<compile_context>
chip_gen: v6e
topology: v6e:2x2x1
jax: 0.10.0
libtpu: 0.0.40
codegen_flags: <defaults>
</compile_context>

<pallas_src>
import functools

import jax
import jax.numpy as jnp
import numpy as np
from jax import lax
from jax.experimental import pallas as pl
from jax.experimental.pallas import tpu as pltpu

_EPS = 1e-5
# MXU operand dtype (activations, weights, stage-1 scratch).  Accumulation and
# all BN statistics are f32.  bf16 operands drive the MXU at native rate on
# v5e/v6e/v7x and halve activation / scratch / HBM bytes.
_MXU_DTYPE = jnp.bfloat16
# Interior row offset of the stage-1 scratch: a multiple of the bf16 sublane
# tile (16) so the big interior store is fully aligned / unmasked.
_PADTOP = 16


def _lane_group_allreduce(v, group, length):
    """v: (1, length).  Sum the lanes sharing the same (lane % group) phase and
    broadcast the per-group total back to every lane.  Pure pltpu.roll (XLU)."""
    reps = length // group
    if reps & (reps - 1) == 0:              # power-of-two group count: log2 rolls
        shift = group
        while shift < length:
            v = v + pltpu.roll(v, shift=shift, axis=1)
            shift *= 2
        return v
    out = v                                 # generic fallback: reps-1 rolls
    for j in range(1, reps):
        out = out + pltpu.roll(v, shift=j * group, axis=1)
    return out


def _double_conv_kernel(y_ref, up_ref, w1y_ref, w1u_ref, w2_ref, bn_ref,
                        o_ref, h1_ref, *, n_batch, h_out, w_out, c_out):
    """Fused Conv3x3 -> BN(train) -> ReLU -> Conv3x3 -> BN(train) -> ReLU.

    y_ref  : (N, H+2, W*Cskip) bf16  skip activation, lane-dense, 1-row zero pad
    up_ref : (N, H+2, W*Cup)   bf16  upsampled activation, same layout
    w1y/w1u: (3, W*Cskip | W*Cup, W*Cout) bf16  block-banded conv1 weights per kh
    w2_ref : (3, W*Cout, W*Cout)          bf16  block-banded conv2 weights per kh
    bn_ref : (4, W*Cout) f32   rows: gamma1, beta1, gamma2, beta2 (lane-tiled)
    o_ref  : (N, H, W*Cout) f32  lane-dense output
    h1_ref : (N, _PADTOP+H+2, W*Cout) bf16  stage-1 scratch: interior at row
             _PADTOP (aligned), zero halo rows at _PADTOP-1 and _PADTOP+H.
    """
    f32 = jnp.float32
    H = h_out
    L = w_out * c_out
    inv_cnt = 1.0 / float(n_batch * h_out * w_out)

    def bn_scale_shift(accs, g_row, b_row):
        # One-pass batch stats: per-channel sum / sum-of-squares.  The W-group
        # reduction and its broadcast stay lane-dense via XLU rolls.
        s = accs[0].sum(axis=0, keepdims=True)
        q = (accs[0] * accs[0]).sum(axis=0, keepdims=True)
        for a in accs[1:]:
            s = s + a.sum(axis=0, keepdims=True)
            q = q + (a * a).sum(axis=0, keepdims=True)
        s = _lane_group_allreduce(s, c_out, L)
        q = _lane_group_allreduce(q, c_out, L)
        mean = s * inv_cnt
        var = q * inv_cnt - mean * mean          # biased variance (PyTorch BN)
        scale = g_row * lax.rsqrt(var + _EPS)
        return scale, b_row - mean * scale

    # ---- stage 1: conv1 on [skip | up]; channel concat folded into weights ----
    acc1 = []
    for n in range(n_batch):
        yv = y_ref[n, :, :]                       # (H+2, W*Cskip)
        uv = up_ref[n, :, :]                      # (H+2, W*Cup)
        a = None
        for kh in range(3):
            t = jnp.dot(yv[kh:kh + H, :], w1y_ref[kh, :, :],
                        preferred_element_type=f32)
            t = t + jnp.dot(uv[kh:kh + H, :], w1u_ref[kh, :, :],
                            preferred_element_type=f32)
            a = t if a is None else a + t
        acc1.append(a)                            # (H, W*Cout) f32

    sc1, sh1 = bn_scale_shift(acc1, bn_ref[0:1, :], bn_ref[1:2, :])

    zero_row = jnp.zeros((1, L), dtype=_MXU_DTYPE)
    for n in range(n_batch):
        h1 = jnp.maximum(acc1[n] * sc1 + sh1, 0.0)            # BN affine + ReLU
        h1_ref[n, _PADTOP:_PADTOP + H, :] = h1.astype(_MXU_DTYPE)  # aligned store
        h1_ref[n, _PADTOP - 1:_PADTOP, :] = zero_row               # 1-row halos only
        h1_ref[n, _PADTOP + H:_PADTOP + H + 1, :] = zero_row

    # ---- stage 2: conv2 on the VMEM-resident stage-1 activation ---------------
    acc2 = []
    for n in range(n_batch):
        hv = h1_ref[n, _PADTOP - 1:_PADTOP + H + 1, :]        # (H+2, W*Cout)
        a = None
        for kh in range(3):
            t = jnp.dot(hv[kh:kh + H, :], w2_ref[kh, :, :],
                        preferred_element_type=f32)
            a = t if a is None else a + t
        acc2.append(a)

    sc2, sh2 = bn_scale_shift(acc2, bn_ref[2:3, :], bn_ref[3:4, :])

    for n in range(n_batch):
        o_ref[n, :, :] = jnp.maximum(acc2[n] * sc2 + sh2, 0.0).astype(f32)


def _band_weights(w_oihw, w_sp):
    """(Cout, Cin, 3, 3) PyTorch conv weight -> (3, w_sp*Cin, w_sp*Cout)
    block-banded matrices (one per kernel row kh) for a padding=1 conv acting on
    a lane-dense (rows, W*Cin) activation.  Column block w of matrix kh holds
    w[:, :, kh, kw] at row block w_in = w + kw - 1; out-of-range blocks are
    zero, i.e. the horizontal zero-padding is encoded in the weights (no im2col).
    Assumes kernel_size=3, padding=1 (the module defaults)."""
    c_out, c_in, k_h, k_w = w_oihw.shape
    wk = jnp.transpose(w_oihw, (2, 3, 1, 0)).astype(jnp.float32)  # (kh, kw, ci, co)
    n, k = w_sp, k_w
    mats = []
    for kh in range(k_h):
        v = jnp.concatenate(
            [wk[kh], jnp.zeros((n, c_in, c_out), jnp.float32)], axis=0)  # (k+n,ci,co)
        flat = jnp.tile(v, (n, 1, 1))[: n * (n + k - 1)]
        s = flat.reshape(n, n + k - 1, c_in, c_out)[:, 1:n + 1]   # [w, w_in, ci, co]
        mats.append(jnp.transpose(s, (1, 2, 0, 3)).reshape(n * c_in, n * c_out))
    return jnp.stack(mats, axis=0)


def uplayer_forward(x_nchw, y_nchw, params):
    """UpLayer.forward(x, y).  params in PyTorch layouts:
       wt (Cin, Cin//2, 2, 2), bt (Cin//2,)            # ConvTranspose2d
       w1 (Cout, Cin, 3, 3),  b1/g1/be1 (Cout,)        # conv1 / BN1
       w2 (Cout, Cout, 3, 3), b2/g2/be2 (Cout,)        # conv2 / BN2
    NOTE: b1/b2 are intentionally not passed to the kernel -- a per-channel
    bias right before train-mode BatchNorm cancels exactly in the mean
    subtraction."""
    (wt, bt, w1, b1, g1, be1, w2, b2, g2, be2) = params
    f32 = jnp.float32
    n, c_in, hx, wx = x_nchw.shape
    _, c_skip, hy, wy = y_nchw.shape
    c_up = wt.shape[1]
    c_cat = c_skip + c_up
    c_out = w1.shape[0]
    l_out = wy * c_out

    xf = jnp.transpose(x_nchw, (0, 2, 3, 1)).astype(f32)   # NHWC
    yf = jnp.transpose(y_nchw, (0, 2, 3, 1)).astype(f32)

    # ConvTranspose2d(k=2, s=2) upsample (XLA-side).
    # TODO(synk): fuse the transposed-conv into the kernel too (fold its taps
    # into per-output-row-parity banded conv1 weights) to drop the last HBM
    # round trip of `up`.
    up = jnp.einsum('nhwi,iopq->nhpwqo', xf, wt.astype(f32))
    up = up.reshape(n, 2 * hx, 2 * wx, c_up) + bt.astype(f32)
    d_y, d_x = hy - 2 * hx, wy - 2 * wx
    if d_y or d_x:
        up = jnp.pad(up, ((0, 0), (d_y // 2, d_y - d_y // 2),
                          (d_x // 2, d_x - d_x // 2), (0, 0)))

    # Lane-dense (H, W*C) layout with +1 zero row top/bottom (the horizontal
    # conv padding is folded into the banded weights).  bf16 MXU operands.
    y2d = jnp.pad(yf.reshape(n, hy, wy * c_skip),
                  ((0, 0), (1, 1), (0, 0))).astype(_MXU_DTYPE)
    up2d = jnp.pad(up.reshape(n, hy, wy * c_up),
                   ((0, 0), (1, 1), (0, 0))).astype(_MXU_DTYPE)

    # Block-banded weights; the skip/up split realizes the channel concat on
    # the weight side (two accumulating matmuls, nothing concatenated in HBM).
    w1y_b = _band_weights(w1[:, :c_skip], wy).astype(_MXU_DTYPE)
    w1u_b = _band_weights(w1[:, c_skip:], wy).astype(_MXU_DTYPE)
    w2_b = _band_weights(w2, wy).astype(_MXU_DTYPE)

    # BN affine params, pre-tiled to the lane-dense layout, packed in one operand.
    bnp = jnp.stack([jnp.tile(g1.astype(f32), wy),
                     jnp.tile(be1.astype(f32), wy),
                     jnp.tile(g2.astype(f32), wy),
                     jnp.tile(be2.astype(f32), wy)], axis=0)

    m = n * hy * wy
    flops = 2 * m * c_out * 9 * (c_cat + c_out)
    bytes_accessed = (2 * (y2d.size + up2d.size + w1y_b.size + w1u_b.size
                           + w2_b.size)
                      + 4 * (bnp.size + n * hy * l_out))

    kernel = functools.partial(_double_conv_kernel, n_batch=n, h_out=hy,
                               w_out=wy, c_out=c_out)
    vmem = pl.BlockSpec(memory_space=pltpu.MemorySpace.VMEM)

    # TODO(synk): for production H/W/C (and v7x's 64 MiB VMEM / 2 TensorCores)
    # add a row-tiled grid with a 1-row halo and two-pass BatchNorm (accumulate
    # per-channel sum/sum-sq across tiles on an 'arbitrary' reduction axis,
    # finalize + normalize in a second pass), and mark the row/batch axis
    # 'parallel'.  At these shapes everything is VMEM-resident in one shot.
    out = pl.pallas_call(
        kernel,
        out_shape=jax.ShapeDtypeStruct((n, hy, l_out), f32),
        in_specs=[vmem] * 6,
        out_specs=vmem,
        scratch_shapes=[
            pltpu.VMEM((n, _PADTOP + hy + 2, l_out), _MXU_DTYPE),  # stage-1 act
        ],
        compiler_params=pltpu.CompilerParams(
            vmem_limit_bytes=32 * 1024 * 1024),
        cost_estimate=pl.CostEstimate(flops=int(flops),
                                      transcendentals=int(2 * l_out),
                                      bytes_accessed=int(bytes_accessed)),
    )(y2d, up2d, w1y_b, w1u_b, w2_b, bnp)

    # (n, hy, wy*c_out) -> NCHW: the reshape is free metadata; only the final
    # transpose is real data movement (required by the NCHW public interface).
    return jnp.transpose(out.reshape(n, hy, wy, c_out), (0, 3, 1, 2))


def _reference(x_nchw, y_nchw, params):
    """Pure-JAX f32 reference mirroring the PyTorch UpLayer forward."""
    (wt, bt, w1, b1, g1, be1, w2, b2, g2, be2) = params

    # ConvTranspose2d(k=2, s=2, p=0) == fractionally-strided conv with the
    # spatially-flipped, in/out-swapped kernel.
    wtc = jnp.flip(jnp.transpose(wt, (1, 0, 2, 3)), axis=(2, 3))
    xu = jax.lax.conv_general_dilated(
        x_nchw, wtc, window_strides=(1, 1), padding=((1, 1), (1, 1)),
        lhs_dilation=(2, 2), dimension_numbers=('NCHW', 'OIHW', 'NCHW'))
    xu = xu + bt[None, :, None, None]

    d_y = y_nchw.shape[2] - xu.shape[2]
    d_x = y_nchw.shape[3] - xu.shape[3]
    xu = jnp.pad(xu, ((0, 0), (0, 0), (d_y // 2, d_y - d_y // 2),
                      (d_x // 2, d_x - d_x // 2)))
    z = jnp.concatenate([y_nchw, xu], axis=1)

    def conv(a, w, b):
        o = jax.lax.conv_general_dilated(
            a, w, window_strides=(1, 1), padding=((1, 1), (1, 1)),
            dimension_numbers=('NCHW', 'OIHW', 'NCHW'))
        return o + b[None, :, None, None]

    def bn(a, g, be):
        mean = jnp.mean(a, axis=(0, 2, 3), keepdims=True)
        var = jnp.mean(jnp.square(a - mean), axis=(0, 2, 3), keepdims=True)
        return (a - mean) * jax.lax.rsqrt(var + _EPS) * g[None, :, None, None] \
            + be[None, :, None, None]

    z = jax.nn.relu(bn(conv(z, w1, b1), g1, be1))
    z = jax.nn.relu(bn(conv(z, w2, b2), g2, be2))
    return z


if __name__ == "__main__":
    N = 2
    Cin = 8            # channels of the decoder feature map x
    Cskip = Cin // 2   # channels of the skip connection y (concat -> Cin)
    Cout = 8
    Hx = Wx = 8
    Hy = Wy = 16

    key = jax.random.PRNGKey(0)
    ks = jax.random.split(key, 12)
    wt = 0.2 * jax.random.normal(ks[0], (Cin, Cin // 2, 2, 2), jnp.float32)
    bt = 0.1 * jax.random.normal(ks[1], (Cin // 2,), jnp.float32)
    w1 = 0.2 * jax.random.normal(ks[2], (Cout, Cin, 3, 3), jnp.float32)
    b1 = 0.1 * jax.random.normal(ks[3], (Cout,), jnp.float32)
    g1 = 1.0 + 0.1 * jax.random.normal(ks[4], (Cout,), jnp.float32)
    be1 = 0.1 * jax.random.normal(ks[5], (Cout,), jnp.float32)
    w2 = 0.2 * jax.random.normal(ks[6], (Cout, Cout, 3, 3), jnp.float32)
    b2 = 0.1 * jax.random.normal(ks[7], (Cout,), jnp.float32)
    g2 = 1.0 + 0.1 * jax.random.normal(ks[8], (Cout,), jnp.float32)
    be2 = 0.1 * jax.random.normal(ks[9], (Cout,), jnp.float32)
    x = jax.random.normal(ks[10], (N, Cin, Hx, Wx), jnp.float32)
    y = jax.random.normal(ks[11], (N, Cskip, Hy, Wy), jnp.float32)

    params = (wt, bt, w1, b1, g1, be1, w2, b2, g2, be2)
    out = jax.block_until_ready(jax.jit(uplayer_forward)(x, y, params))

    ref = _reference(x, y, params)
    assert out.shape == ref.shape == (N, Cout, Hy, Wy)
    # bf16 MXU operands over two chained convs: ~2^-8 relative per operand,
    # well inside 2e-2 after the f32-statistics BatchNorm normalization.
    np.testing.assert_allclose(np.asarray(out), np.asarray(ref),
                               rtol=2e-2, atol=2e-2)
    print("KERNEL_OK")
</pallas_src>

<mosaic_0001>
module attributes {stable_mosaic.version = 11 : i64} {
  func.func @_double_conv_kernel(%arg0: memref<2x18x64xbf16, #tpu.memory_space<vmem>>, %arg1: memref<2x18x64xbf16, #tpu.memory_space<vmem>>, %arg2: memref<3x64x128xbf16, #tpu.memory_space<vmem>>, %arg3: memref<3x64x128xbf16, #tpu.memory_space<vmem>>, %arg4: memref<3x128x128xbf16, #tpu.memory_space<vmem>>, %arg5: memref<4x128xf32, #tpu.memory_space<vmem>>, %arg6: memref<2x16x128xf32, #tpu.memory_space<vmem>>, %arg7: memref<2x34x128xbf16, #tpu.memory_space<vmem>>) attributes {dimension_semantics = [], scalar_prefetch = 0 : i64, scratch_operands = 1 : i64, tpu.core_type = #tpu.core_type<tc>} {
    %c0 = arith.constant 0 : index
    %c0_0 = arith.constant 0 : index
    %c0_1 = arith.constant 0 : index
    %0 = vector.load %arg0[%c0, %c0_0, %c0_1] : memref<2x18x64xbf16, #tpu.memory_space<vmem>>, vector<1x18x64xbf16>
    %1 = vector.shape_cast %0 : vector<1x18x64xbf16> to vector<18x64xbf16>
    %c0_2 = arith.constant 0 : index
    %c0_3 = arith.constant 0 : index
    %c0_4 = arith.constant 0 : index
    %2 = vector.load %arg1[%c0_2, %c0_3, %c0_4] : memref<2x18x64xbf16, #tpu.memory_space<vmem>>, vector<1x18x64xbf16>
    %3 = vector.shape_cast %2 : vector<1x18x64xbf16> to vector<18x64xbf16>
    %4 = vector.extract_strided_slice %1 {offsets = [0, 0], sizes = [16, 64], strides = [1, 1]} : vector<18x64xbf16> to vector<16x64xbf16>
    %c0_5 = arith.constant 0 : index
    %c0_6 = arith.constant 0 : index
    %c0_7 = arith.constant 0 : index
    %5 = vector.load %arg2[%c0_5, %c0_6, %c0_7] : memref<3x64x128xbf16, #tpu.memory_space<vmem>>, vector<1x64x128xbf16>
    %6 = vector.shape_cast %5 : vector<1x64x128xbf16> to vector<64x128xbf16>
    %cst = arith.constant dense<0.000000e+00> : vector<16x128xf32>
    %7 = tpu.matmul %4, %6, %cst {dimension_numbers = #tpu.dot_dimension_numbers<[1], [0], [0], [1], [0, 0, 1, 1], [], []>} : vector<16x64xbf16>, vector<64x128xbf16>, vector<16x128xf32> -> vector<16x128xf32>
    %8 = vector.extract_strided_slice %3 {offsets = [0, 0], sizes = [16, 64], strides = [1, 1]} : vector<18x64xbf16> to vector<16x64xbf16>
    %c0_8 = arith.constant 0 : index
    %c0_9 = arith.constant 0 : index
    %c0_10 = arith.constant 0 : index
    %9 = vector.load %arg3[%c0_8, %c0_9, %c0_10] : memref<3x64x128xbf16, #tpu.memory_space<vmem>>, vector<1x64x128xbf16>
    %10 = vector.shape_cast %9 : vector<1x64x128xbf16> to vector<64x128xbf16>
    %cst_11 = arith.constant dense<0.000000e+00> : vector<16x128xf32>
    %11 = tpu.matmul %8, %10, %cst_11 {dimension_numbers = #tpu.dot_dimension_numbers<[1], [0], [0], [1], [0, 0, 1, 1], [], []>} : vector<16x64xbf16>, vector<64x128xbf16>, vector<16x128xf32> -> vector<16x128xf32>
    %12 = arith.addf %7, %11 : vector<16x128xf32>
    %13 = vector.extract_strided_slice %1 {offsets = [1, 0], sizes = [16, 64], strides = [1, 1]} : vector<18x64xbf16> to vector<16x64xbf16>
    %c1 = arith.constant 1 : index
    %c0_12 = arith.constant 0 : index
    %c0_13 = arith.constant 0 : index
    %14 = vector.load %arg2[%c1, %c0_12, %c0_13] : memref<3x64x128xbf16, #tpu.memory_space<vmem>>, vector<1x64x128xbf16>
    %15 = vector.shape_cast %14 : vector<1x64x128xbf16> to vector<64x128xbf16>
    %cst_14 = arith.constant dense<0.000000e+00> : vector<16x128xf32>
    %16 = tpu.matmul %13, %15, %cst_14 {dimension_numbers = #tpu.dot_dimension_numbers<[1], [0], [0], [1], [0, 0, 1, 1], [], []>} : vector<16x64xbf16>, vector<64x128xbf16>, vector<16x128xf32> -> vector<16x128xf32>
    %17 = vector.extract_strided_slice %3 {offsets = [1, 0], sizes = [16, 64], strides = [1, 1]} : vector<18x64xbf16> to vector<16x64xbf16>
    %c1_15 = arith.constant 1 : index
    %c0_16 = arith.constant 0 : index
    %c0_17 = arith.constant 0 : index
    %18 = vector.load %arg3[%c1_15, %c0_16, %c0_17] : memref<3x64x128xbf16, #tpu.memory_space<vmem>>, vector<1x64x128xbf16>
    %19 = vector.shape_cast %18 : vector<1x64x128xbf16> to vector<64x128xbf16>
    %cst_18 = arith.constant dense<0.000000e+00> : vector<16x128xf32>
    %20 = tpu.matmul %17, %19, %cst_18 {dimension_numbers = #tpu.dot_dimension_numbers<[1], [0], [0], [1], [0, 0, 1, 1], [], []>} : vector<16x64xbf16>, vector<64x128xbf16>, vector<16x128xf32> -> vector<16x128xf32>
    %21 = arith.addf %16, %20 : vector<16x128xf32>
    %22 = arith.addf %12, %21 : vector<16x128xf32>
    %23 = vector.extract_strided_slice %1 {offsets = [2, 0], sizes = [16, 64], strides = [1, 1]} : vector<18x64xbf16> to vector<16x64xbf16>
    %c2 = arith.constant 2 : index
    %c0_19 = arith.constant 0 : index
    %c0_20 = arith.constant 0 : index
    %24 = vector.load %arg2[%c2, %c0_19, %c0_20] : memref<3x64x128xbf16, #tpu.memory_space<vmem>>, vector<1x64x128xbf16>
    %25 = vector.shape_cast %24 : vector<1x64x128xbf16> to vector<64x128xbf16>
    %cst_21 = arith.constant dense<0.000000e+00> : vector<16x128xf32>
    %26 = tpu.matmul %23, %25, %cst_21 {dimension_numbers = #tpu.dot_dimension_numbers<[1], [0], [0], [1], [0, 0, 1, 1], [], []>} : vector<16x64xbf16>, vector<64x128xbf16>, vector<16x128xf32> -> vector<16x128xf32>
    %27 = vector.extract_strided_slice %3 {offsets = [2, 0], sizes = [16, 64], strides = [1, 1]} : vector<18x64xbf16> to vector<16x64xbf16>
    %c2_22 = arith.constant 2 : index
    %c0_23 = arith.constant 0 : index
    %c0_24 = arith.constant 0 : index
    %28 = vector.load %arg3[%c2_22, %c0_23, %c0_24] : memref<3x64x128xbf16, #tpu.memory_space<vmem>>, vector<1x64x128xbf16>
    %29 = vector.shape_cast %28 : vector<1x64x128xbf16> to vector<64x128xbf16>
    %cst_25 = arith.constant dense<0.000000e+00> : vector<16x128xf32>
    %30 = tpu.matmul %27, %29, %cst_25 {dimension_numbers = #tpu.dot_dimension_numbers<[1], [0], [0], [1], [0, 0, 1, 1], [], []>} : vector<16x64xbf16>, vector<64x128xbf16>, vector<16x128xf32> -> vector<16x128xf32>
    %31 = arith.addf %26, %30 : vector<16x128xf32>
    %32 = arith.addf %22, %31 : vector<16x128xf32>
    %c1_26 = arith.constant 1 : index
    %c0_27 = arith.constant 0 : index
    %c0_28 = arith.constant 0 : index
    %33 = vector.load %arg0[%c1_26, %c0_27, %c0_28] : memref<2x18x64xbf16, #tpu.memory_space<vmem>>, vector<1x18x64xbf16>
    %34 = vector.shape_cast %33 : vector<1x18x64xbf16> to vector<18x64xbf16>
    %c1_29 = arith.constant 1 : index
    %c0_30 = arith.constant 0 : index
    %c0_31 = arith.constant 0 : index
    %35 = vector.load %arg1[%c1_29, %c0_30, %c0_31] : memref<2x18x64xbf16, #tpu.memory_space<vmem>>, vector<1x18x64xbf16>
    %36 = vector.shape_cast %35 : vector<1x18x64xbf16> to vector<18x64xbf16>
    %37 = vector.extract_strided_slice %34 {offsets = [0, 0], sizes = [16, 64], strides = [1, 1]} : vector<18x64xbf16> to vector<16x64xbf16>
    %c0_32 = arith.constant 0 : index
    %c0_33 = arith.constant 0 : index
    %c0_34 = arith.constant 0 : index
    %38 = vector.load %arg2[%c0_32, %c0_33, %c0_34] : memref<3x64x128xbf16, #tpu.memory_space<vmem>>, vector<1x64x128xbf16>
    %39 = vector.shape_cast %38 : vector<1x64x128xbf16> to vector<64x128xbf16>
    %cst_35 = arith.constant dense<0.000000e+00> : vector<16x128xf32>
    %40 = tpu.matmul %37, %39, %cst_35 {dimension_numbers = #tpu.dot_dimension_numbers<[1], [0], [0], [1], [0, 0, 1, 1], [], []>} : vector<16x64xbf16>, vector<64x128xbf16>, vector<16x128xf32> -> vector<16x128xf32>
    %41 = vector.extract_strided_slice %36 {offsets = [0, 0], sizes = [16, 64], strides = [1, 1]} : vector<18x64xbf16> to vector<16x64xbf16>
    %c0_36 = arith.constant 0 : index
    %c0_37 = arith.constant 0 : index
    %c0_38 = arith.constant 0 : index
    %42 = vector.load %arg3[%c0_36, %c0_37, %c0_38] : memref<3x64x128xbf16, #tpu.memory_space<vmem>>, vector<1x64x128xbf16>
    %43 = vector.shape_cast %42 : vector<1x64x128xbf16> to vector<64x128xbf16>
    %cst_39 = arith.constant dense<0.000000e+00> : vector<16x128xf32>
    %44 = tpu.matmul %41, %43, %cst_39 {dimension_numbers = #tpu.dot_dimension_numbers<[1], [0], [0], [1], [0, 0, 1, 1], [], []>} : vector<16x64xbf16>, vector<64x128xbf16>, vector<16x128xf32> -> vector<16x128xf32>
    %45 = arith.addf %40, %44 : vector<16x128xf32>
    %46 = vector.extract_strided_slice %34 {offsets = [1, 0], sizes = [16, 64], strides = [1, 1]} : vector<18x64xbf16> to vector<16x64xbf16>
    %c1_40 = arith.constant 1 : index
    %c0_41 = arith.constant 0 : index
    %c0_42 = arith.constant 0 : index
    %47 = vector.load %arg2[%c1_40, %c0_41, %c0_42] : memref<3x64x128xbf16, #tpu.memory_space<vmem>>, vector<1x64x128xbf16>
    %48 = vector.shape_cast %47 : vector<1x64x128xbf16> to vector<64x128xbf16>
    %cst_43 = arith.constant dense<0.000000e+00> : vector<16x128xf32>
    %49 = tpu.matmul %46, %48, %cst_43 {dimension_numbers = #tpu.dot_dimension_numbers<[1], [0], [0], [1], [0, 0, 1, 1], [], []>} : vector<16x64xbf16>, vector<64x128xbf16>, vector<16x128xf32> -> vector<16x128xf32>
    %50 = vector.extract_strided_slice %36 {offsets = [1, 0], sizes = [16, 64], strides = [1, 1]} : vector<18x64xbf16> to vector<16x64xbf16>
    %c1_44 = arith.constant 1 : index
    %c0_45 = arith.constant 0 : index
    %c0_46 = arith.constant 0 : index
    %51 = vector.load %arg3[%c1_44, %c0_45, %c0_46] : memref<3x64x128xbf16, #tpu.memory_space<vmem>>, vector<1x64x128xbf16>
    %52 = vector.shape_cast %51 : vector<1x64x128xbf16> to vector<64x128xbf16>
    %cst_47 = arith.constant dense<0.000000e+00> : vector<16x128xf32>
    %53 = tpu.matmul %50, %52, %cst_47 {dimension_numbers = #tpu.dot_dimension_numbers<[1], [0], [0], [1], [0, 0, 1, 1], [], []>} : vector<16x64xbf16>, vector<64x128xbf16>, vector<16x128xf32> -> vector<16x128xf32>
    %54 = arith.addf %49, %53 : vector<16x128xf32>
    %55 = arith.addf %45, %54 : vector<16x128xf32>
    %56 = vector.extract_strided_slice %34 {offsets = [2, 0], sizes = [16, 64], strides = [1, 1]} : vector<18x64xbf16> to vector<16x64xbf16>
    %c2_48 = arith.constant 2 : index
    %c0_49 = arith.constant 0 : index
    %c0_50 = arith.constant 0 : index
    %57 = vector.load %arg2[%c2_48, %c0_49, %c0_50] : memref<3x64x128xbf16, #tpu.memory_space<vmem>>, vector<1x64x128xbf16>
    %58 = vector.shape_cast %57 : vector<1x64x128xbf16> to vector<64x128xbf16>
    %cst_51 = arith.constant dense<0.000000e+00> : vector<16x128xf32>
    %59 = tpu.matmul %56, %58, %cst_51 {dimension_numbers = #tpu.dot_dimension_numbers<[1], [0], [0], [1], [0, 0, 1, 1], [], []>} : vector<16x64xbf16>, vector<64x128xbf16>, vector<16x128xf32> -> vector<16x128xf32>
    %60 = vector.extract_strided_slice %36 {offsets = [2, 0], sizes = [16, 64], strides = [1, 1]} : vector<18x64xbf16> to vector<16x64xbf16>
    %c2_52 = arith.constant 2 : index
    %c0_53 = arith.constant 0 : index
    %c0_54 = arith.constant 0 : index
    %61 = vector.load %arg3[%c2_52, %c0_53, %c0_54] : memref<3x64x128xbf16, #tpu.memory_space<vmem>>, vector<1x64x128xbf16>
    %62 = vector.shape_cast %61 : vector<1x64x128xbf16> to vector<64x128xbf16>
    %cst_55 = arith.constant dense<0.000000e+00> : vector<16x128xf32>
    %63 = tpu.matmul %60, %62, %cst_55 {dimension_numbers = #tpu.dot_dimension_numbers<[1], [0], [0], [1], [0, 0, 1, 1], [], []>} : vector<16x64xbf16>, vector<64x128xbf16>, vector<16x128xf32> -> vector<16x128xf32>
    %64 = arith.addf %59, %63 : vector<16x128xf32>
    %65 = arith.addf %55, %64 : vector<16x128xf32>
    %c0_56 = arith.constant 0 : index
    %c0_57 = arith.constant 0 : index
    %66 = vector.load %arg5[%c0_56, %c0_57] : memref<4x128xf32, #tpu.memory_space<vmem>>, vector<1x128xf32>
    %c1_58 = arith.constant 1 : index
    %c0_59 = arith.constant 0 : index
    %67 = vector.load %arg5[%c1_58, %c0_59] : memref<4x128xf32, #tpu.memory_space<vmem>>, vector<1x128xf32>
    %cst_60 = arith.constant dense<0.000000e+00> : vector<128xf32>
    %68 = vector.multi_reduction <add>, %32, %cst_60 [0] : vector<16x128xf32> to vector<128xf32>
    %69 = vector.shape_cast %68 : vector<128xf32> to vector<1x128xf32>
    %70 = arith.mulf %32, %32 : vector<16x128xf32>
    %cst_61 = arith.constant dense<0.000000e+00> : vector<128xf32>
    %71 = vector.multi_reduction <add>, %70, %cst_61 [0] : vector<16x128xf32> to vector<128xf32>
    %72 = vector.shape_cast %71 : vector<128xf32> to vector<1x128xf32>
    %cst_62 = arith.constant dense<0.000000e+00> : vector<128xf32>
    %73 = vector.multi_reduction <add>, %65, %cst_62 [0] : vector<16x128xf32> to vector<128xf32>
    %74 = vector.shape_cast %73 : vector<128xf32> to vector<1x128xf32>
    %75 = arith.addf %69, %74 : vector<1x128xf32>
    %76 = arith.mulf %65, %65 : vector<16x128xf32>
    %cst_63 = arith.constant dense<0.000000e+00> : vector<128xf32>
    %77 = vector.multi_reduction <add>, %76, %cst_63 [0] : vector<16x128xf32> to vector<128xf32>
    %78 = vector.shape_cast %77 : vector<128xf32> to vector<1x128xf32>
    %79 = arith.addf %72, %78 : vector<1x128xf32>
    %c8_i32 = arith.constant 8 : i32
    %80 = tpu.dynamic_rotate %75 by %c8_i32 dim 1 : vector<1x128xf32>, i32 -> vector<1x128xf32>
    %81 = arith.addf %75, %80 : vector<1x128xf32>
    %c16_i32 = arith.constant 16 : i32
    %82 = tpu.dynamic_rotate %81 by %c16_i32 dim 1 : vector<1x128xf32>, i32 -> vector<1x128xf32>
    %83 = arith.addf %81, %82 : vector<1x128xf32>
    %c32_i32 = arith.constant 32 : i32
    %84 = tpu.dynamic_rotate %83 by %c32_i32 dim 1 : vector<1x128xf32>, i32 -> vector<1x128xf32>
    %85 = arith.addf %83, %84 : vector<1x128xf32>
    %c64_i32 = arith.constant 64 : i32
    %86 = tpu.dynamic_rotate %85 by %c64_i32 dim 1 : vector<1x128xf32>, i32 -> vector<1x128xf32>
    %87 = arith.addf %85, %86 : vector<1x128xf32>
    %c8_i32_64 = arith.constant 8 : i32
    %88 = tpu.dynamic_rotate %79 by %c8_i32_64 dim 1 : vector<1x128xf32>, i32 -> vector<1x128xf32>
    %89 = arith.addf %79, %88 : vector<1x128xf32>
    %c16_i32_65 = arith.constant 16 : i32
    %90 = tpu.dynamic_rotate %89 by %c16_i32_65 dim 1 : vector<1x128xf32>, i32 -> vector<1x128xf32>
    %91 = arith.addf %89, %90 : vector<1x128xf32>
    %c32_i32_66 = arith.constant 32 : i32
    %92 = tpu.dynamic_rotate %91 by %c32_i32_66 dim 1 : vector<1x128xf32>, i32 -> vector<1x128xf32>
    %93 = arith.addf %91, %92 : vector<1x128xf32>
    %c64_i32_67 = arith.constant 64 : i32
    %94 = tpu.dynamic_rotate %93 by %c64_i32_67 dim 1 : vector<1x128xf32>, i32 -> vector<1x128xf32>
    %95 = arith.addf %93, %94 : vector<1x128xf32>
    %cst_68 = arith.constant 0.001953125 : f32
    %96 = vector.broadcast %cst_68 : f32 to vector<1x128xf32>
    %97 = arith.mulf %87, %96 : vector<1x128xf32>
    %cst_69 = arith.constant 0.001953125 : f32
    %98 = vector.broadcast %cst_69 : f32 to vector<1x128xf32>
    %99 = arith.mulf %95, %98 : vector<1x128xf32>
    %100 = arith.mulf %97, %97 : vector<1x128xf32>
    %101 = arith.subf %99, %100 : vector<1x128xf32>
    %cst_70 = arith.constant 9.99999974E-6 : f32
    %102 = vector.broadcast %cst_70 : f32 to vector<1x128xf32>
    %103 = arith.addf %101, %102 : vector<1x128xf32>
    %104 = math.rsqrt %103 : vector<1x128xf32>
    %105 = arith.mulf %66, %104 : vector<1x128xf32>
    %106 = arith.mulf %97, %105 : vector<1x128xf32>
    %107 = arith.subf %67, %106 : vector<1x128xf32>
    %cst_71 = arith.constant 0.000000e+00 : bf16
    %108 = vector.broadcast %cst_71 : bf16 to vector<1x128xbf16>
    %109 = vector.broadcast %105 : vector<1x128xf32> to vector<16x128xf32>
    %110 = arith.mulf %32, %109 : vector<16x128xf32>
    %111 = vector.broadcast %107 : vector<1x128xf32> to vector<16x128xf32>
    %112 = arith.addf %110, %111 : vector<16x128xf32>
    %cst_72 = arith.constant 0.000000e+00 : f32
    %113 = vector.broadcast %cst_72 : f32 to vector<16x128xf32>
    %114 = arith.maximumf %112, %113 : vector<16x128xf32>
    %115 = arith.truncf %114 : vector<16x128xf32> to vector<16x128xbf16>
    %c0_73 = arith.constant 0 : index
    %c16 = arith.constant 16 : index
    %c0_74 = arith.constant 0 : index
    %116 = vector.load %arg7[%c0_73, %c16, %c0_74] : memref<2x34x128xbf16, #tpu.memory_space<vmem>>, vector<1x16x128xbf16>
    %117 = vector.shape_cast %116 : vector<1x16x128xbf16> to vector<16x128xbf16>
    %118 = vector.shape_cast %115 : vector<16x128xbf16> to vector<1x16x128xbf16>
    tpu.vector_store %arg7[%c0_73, %c16, %c0_74], %118 {strides = array<i32>} : memref<2x34x128xbf16, #tpu.memory_space<vmem>>, vector<1x16x128xbf16>,
    %c0_75 = arith.constant 0 : index
    %c15 = arith.constant 15 : index
    %c0_76 = arith.constant 0 : index
    %119 = vector.load %arg7[%c0_75, %c15, %c0_76] : memref<2x34x128xbf16, #tpu.memory_space<vmem>>, vector<1x1x128xbf16>
    %120 = vector.shape_cast %119 : vector<1x1x128xbf16> to vector<1x128xbf16>
    %121 = vector.shape_cast %108 : vector<1x128xbf16> to vector<1x1x128xbf16>
    tpu.vector_store %arg7[%c0_75, %c15, %c0_76], %121 {strides = array<i32>} : memref<2x34x128xbf16, #tpu.memory_space<vmem>>, vector<1x1x128xbf16>,
    %c0_77 = arith.constant 0 : index
    %c32 = arith.constant 32 : index
    %c0_78 = arith.constant 0 : index
    %122 = vector.load %arg7[%c0_77, %c32, %c0_78] : memref<2x34x128xbf16, #tpu.memory_space<vmem>>, vector<1x1x128xbf16>
    %123 = vector.shape_cast %122 : vector<1x1x128xbf16> to vector<1x128xbf16>
    %124 = vector.shape_cast %108 : vector<1x128xbf16> to vector<1x1x128xbf16>
    tpu.vector_store %arg7[%c0_77, %c32, %c0_78], %124 {strides = array<i32>} : memref<2x34x128xbf16, #tpu.memory_space<vmem>>, vector<1x1x128xbf16>,
    %125 = vector.broadcast %105 : vector<1x128xf32> to vector<16x128xf32>
    %126 = arith.mulf %65, %125 : vector<16x128xf32>
    %127 = vector.broadcast %107 : vector<1x128xf32> to vector<16x128xf32>
    %128 = arith.addf %126, %127 : vector<16x128xf32>
    %cst_79 = arith.constant 0.000000e+00 : f32
    %129 = vector.broadcast %cst_79 : f32 to vector<16x128xf32>
    %130 = arith.maximumf %128, %129 : vector<16x128xf32>
    %131 = arith.truncf %130 : vector<16x128xf32> to vector<16x128xbf16>
    %c1_80 = arith.constant 1 : index
    %c16_81 = arith.constant 16 : index
    %c0_82 = arith.constant 0 : index
    %132 = vector.load %arg7[%c1_80, %c16_81, %c0_82] : memref<2x34x128xbf16, #tpu.memory_space<vmem>>, vector<1x16x128xbf16>
    %133 = vector.shape_cast %132 : vector<1x16x128xbf16> to vector<16x128xbf16>
    %134 = vector.shape_cast %131 : vector<16x128xbf16> to vector<1x16x128xbf16>
    tpu.vector_store %arg7[%c1_80, %c16_81, %c0_82], %134 {strides = array<i32>} : memref<2x34x128xbf16, #tpu.memory_space<vmem>>, vector<1x16x128xbf16>,
    %c1_83 = arith.constant 1 : index
    %c15_84 = arith.constant 15 : index
    %c0_85 = arith.constant 0 : index
    %135 = vector.load %arg7[%c1_83, %c15_84, %c0_85] : memref<2x34x128xbf16, #tpu.memory_space<vmem>>, vector<1x1x128xbf16>
    %136 = vector.shape_cast %135 : vector<1x1x128xbf16> to vector<1x128xbf16>
    %137 = vector.shape_cast %108 : vector<1x128xbf16> to vector<1x1x128xbf16>
    tpu.vector_store %arg7[%c1_83, %c15_84, %c0_85], %137 {strides = array<i32>} : memref<2x34x128xbf16, #tpu.memory_space<vmem>>, vector<1x1x128xbf16>,
    %c1_86 = arith.constant 1 : index
    %c32_87 = arith.constant 32 : index
    %c0_88 = arith.constant 0 : index
    %138 = vector.load %arg7[%c1_86, %c32_87, %c0_88] : memref<2x34x128xbf16, #tpu.memory_space<vmem>>, vector<1x1x128xbf16>
    %139 = vector.shape_cast %138 : vector<1x1x128xbf16> to vector<1x128xbf16>
    %140 = vector.shape_cast %108 : vector<1x128xbf16> to vector<1x1x128xbf16>
    tpu.vector_store %arg7[%c1_86, %c32_87, %c0_88], %140 {strides = array<i32>} : memref<2x34x128xbf16, #tpu.memory_space<vmem>>, vector<1x1x128xbf16>,
    %c0_89 = arith.constant 0 : index
    %c15_90 = arith.constant 15 : index
    %c0_91 = arith.constant 0 : index
    %141 = vector.load %arg7[%c0_89, %c15_90, %c0_91] : memref<2x34x128xbf16, #tpu.memory_space<vmem>>, vector<1x18x128xbf16>
    %142 = vector.shape_cast %141 : vector<1x18x128xbf16> to vector<18x128xbf16>
    %143 = vector.extract_strided_slice %142 {offsets = [0, 0], sizes = [16, 128], strides = [1, 1]} : vector<18x128xbf16> to vector<16x128xbf16>
    %c0_92 = arith.constant 0 : index
    %c0_93 = arith.constant 0 : index
    %c0_94 = arith.constant 0 : index
    %144 = vector.load %arg4[%c0_92, %c0_93, %c0_94] : memref<3x128x128xbf16, #tpu.memory_space<vmem>>, vector<1x128x128xbf16>
    %145 = vector.shape_cast %144 : vector<1x128x128xbf16> to vector<128x128xbf16>
    %cst_95 = arith.constant dense<0.000000e+00> : vector<16x128xf32>
    %146 = tpu.matmul %143, %145, %cst_95 {dimension_numbers = #tpu.dot_dimension_numbers<[1], [0], [0], [1], [0, 0, 1, 1], [], []>} : vector<16x128xbf16>, vector<128x128xbf16>, vector<16x128xf32> -> vector<16x128xf32>
    %147 = vector.extract_strided_slice %142 {offsets = [1, 0], sizes = [16, 128], strides = [1, 1]} : vector<18x128xbf16> to vector<16x128xbf16>
    %c1_96 = arith.constant 1 : index
    %c0_97 = arith.constant 0 : index
    %c0_98 = arith.constant 0 : index
    %148 = vector.load %arg4[%c1_96, %c0_97, %c0_98] : memref<3x128x128xbf16, #tpu.memory_space<vmem>>, vector<1x128x128xbf16>
    %149 = vector.shape_cast %148 : vector<1x128x128xbf16> to vector<128x128xbf16>
    %cst_99 = arith.constant dense<0.000000e+00> : vector<16x128xf32>
    %150 = tpu.matmul %147, %149, %cst_99 {dimension_numbers = #tpu.dot_dimension_numbers<[1], [0], [0], [1], [0, 0, 1, 1], [], []>} : vector<16x128xbf16>, vector<128x128xbf16>, vector<16x128xf32> -> vector<16x128xf32>
    %151 = arith.addf %146, %150 : vector<16x128xf32>
    %152 = vector.extract_strided_slice %142 {offsets = [2, 0], sizes = [16, 128], strides = [1, 1]} : vector<18x128xbf16> to vector<16x128xbf16>
    %c2_100 = arith.constant 2 : index
    %c0_101 = arith.constant 0 : index
    %c0_102 = arith.constant 0 : index
    %153 = vector.load %arg4[%c2_100, %c0_101, %c0_102] : memref<3x128x128xbf16, #tpu.memory_space<vmem>>, vector<1x128x128xbf16>
    %154 = vector.shape_cast %153 : vector<1x128x128xbf16> to vector<128x128xbf16>
    %cst_103 = arith.constant dense<0.000000e+00> : vector<16x128xf32>
    %155 = tpu.matmul %152, %154, %cst_103 {dimension_numbers = #tpu.dot_dimension_numbers<[1], [0], [0], [1], [0, 0, 1, 1], [], []>} : vector<16x128xbf16>, vector<128x128xbf16>, vector<16x128xf32> -> vector<16x128xf32>
    %156 = arith.addf %151, %155 : vector<16x128xf32>
    %c1_104 = arith.constant 1 : index
    %c15_105 = arith.constant 15 : index
    %c0_106 = arith.constant 0 : index
    %157 = vector.load %arg7[%c1_104, %c15_105, %c0_106] : memref<2x34x128xbf16, #tpu.memory_space<vmem>>, vector<1x18x128xbf16>
    %158 = vector.shape_cast %157 : vector<1x18x128xbf16> to vector<18x128xbf16>
    %159 = vector.extract_strided_slice %158 {offsets = [0, 0], sizes = [16, 128], strides = [1, 1]} : vector<18x128xbf16> to vector<16x128xbf16>
    %c0_107 = arith.constant 0 : index
    %c0_108 = arith.constant 0 : index
    %c0_109 = arith.constant 0 : index
    %160 = vector.load %arg4[%c0_107, %c0_108, %c0_109] : memref<3x128x128xbf16, #tpu.memory_space<vmem>>, vector<1x128x128xbf16>
    %161 = vector.shape_cast %160 : vector<1x128x128xbf16> to vector<128x128xbf16>
    %cst_110 = arith.constant dense<0.000000e+00> : vector<16x128xf32>
    %162 = tpu.matmul %159, %161, %cst_110 {dimension_numbers = #tpu.dot_dimension_numbers<[1], [0], [0], [1], [0, 0, 1, 1], [], []>} : vector<16x128xbf16>, vector<128x128xbf16>, vector<16x128xf32> -> vector<16x128xf32>
    %163 = vector.extract_strided_slice %158 {offsets = [1, 0], sizes = [16, 128], strides = [1, 1]} : vector<18x128xbf16> to vector<16x128xbf16>
    %c1_111 = arith.constant 1 : index
    %c0_112 = arith.constant 0 : index
    %c0_113 = arith.constant 0 : index
    %164 = vector.load %arg4[%c1_111, %c0_112, %c0_113] : memref<3x128x128xbf16, #tpu.memory_space<vmem>>, vector<1x128x128xbf16>
    %165 = vector.shape_cast %164 : vector<1x128x128xbf16> to vector<128x128xbf16>
    %cst_114 = arith.constant dense<0.000000e+00> : vector<16x128xf32>
    %166 = tpu.matmul %163, %165, %cst_114 {dimension_numbers = #tpu.dot_dimension_numbers<[1], [0], [0], [1], [0, 0, 1, 1], [], []>} : vector<16x128xbf16>, vector<128x128xbf16>, vector<16x128xf32> -> vector<16x128xf32>
    %167 = arith.addf %162, %166 : vector<16x128xf32>
    %168 = vector.extract_strided_slice %158 {offsets = [2, 0], sizes = [16, 128], strides = [1, 1]} : vector<18x128xbf16> to vector<16x128xbf16>
    %c2_115 = arith.constant 2 : index
    %c0_116 = arith.constant 0 : index
    %c0_117 = arith.constant 0 : index
    %169 = vector.load %arg4[%c2_115, %c0_116, %c0_117] : memref<3x128x128xbf16, #tpu.memory_space<vmem>>, vector<1x128x128xbf16>
    %170 = vector.shape_cast %169 : vector<1x128x128xbf16> to vector<128x128xbf16>
    %cst_118 = arith.constant dense<0.000000e+00> : vector<16x128xf32>
    %171 = tpu.matmul %168, %170, %cst_118 {dimension_numbers = #tpu.dot_dimension_numbers<[1], [0], [0], [1], [0, 0, 1, 1], [], []>} : vector<16x128xbf16>, vector<128x128xbf16>, vector<16x128xf32> -> vector<16x128xf32>
    %172 = arith.addf %167, %171 : vector<16x128xf32>
    %c2_119 = arith.constant 2 : index
    %c0_120 = arith.constant 0 : index
    %173 = vector.load %arg5[%c2_119, %c0_120] : memref<4x128xf32, #tpu.memory_space<vmem>>, vector<1x128xf32>
    %c3 = arith.constant 3 : index
    %c0_121 = arith.constant 0 : index
    %174 = vector.load %arg5[%c3, %c0_121] : memref<4x128xf32, #tpu.memory_space<vmem>>, vector<1x128xf32>
    %cst_122 = arith.constant dense<0.000000e+00> : vector<128xf32>
    %175 = vector.multi_reduction <add>, %156, %cst_122 [0] : vector<16x128xf32> to vector<128xf32>
    %176 = vector.shape_cast %175 : vector<128xf32> to vector<1x128xf32>
    %177 = arith.mulf %156, %156 : vector<16x128xf32>
    %cst_123 = arith.constant dense<0.000000e+00> : vector<128xf32>
    %178 = vector.multi_reduction <add>, %177, %cst_123 [0] : vector<16x128xf32> to vector<128xf32>
    %179 = vector.shape_cast %178 : vector<128xf32> to vector<1x128xf32>
    %cst_124 = arith.constant dense<0.000000e+00> : vector<128xf32>
    %180 = vector.multi_reduction <add>, %172, %cst_124 [0] : vector<16x128xf32> to vector<128xf32>
    %181 = vector.shape_cast %180 : vector<128xf32> to vector<1x128xf32>
    %182 = arith.addf %176, %181 : vector<1x128xf32>
    %183 = arith.mulf %172, %172 : vector<16x128xf32>
    %cst_125 = arith.constant dense<0.000000e+00> : vector<128xf32>
    %184 = vector.multi_reduction <add>, %183, %cst_125 [0] : vector<16x128xf32> to vector<128xf32>
    %185 = vector.shape_cast %184 : vector<128xf32> to vector<1x128xf32>
    %186 = arith.addf %179, %185 : vector<1x128xf32>
    %c8_i32_126 = arith.constant 8 : i32
    %187 = tpu.dynamic_rotate %182 by %c8_i32_126 dim 1 : vector<1x128xf32>, i32 -> vector<1x128xf32>
    %188 = arith.addf %182, %187 : vector<1x128xf32>
    %c16_i32_127 = arith.constant 16 : i32
    %189 = tpu.dynamic_rotate %188 by %c16_i32_127 dim 1 : vector<1x128xf32>, i32 -> vector<1x128xf32>
    %190 = arith.addf %188, %189 : vector<1x128xf32>
    %c32_i32_128 = arith.constant 32 : i32
    %191 = tpu.dynamic_rotate %190 by %c32_i32_128 dim 1 : vector<1x128xf32>, i32 -> vector<1x128xf32>
    %192 = arith.addf %190, %191 : vector<1x128xf32>
    %c64_i32_129 = arith.constant 64 : i32
    %193 = tpu.dynamic_rotate %192 by %c64_i32_129 dim 1 : vector<1x128xf32>, i32 -> vector<1x128xf32>
    %194 = arith.addf %192, %193 : vector<1x128xf32>
    %c8_i32_130 = arith.constant 8 : i32
    %195 = tpu.dynamic_rotate %186 by %c8_i32_130 dim 1 : vector<1x128xf32>, i32 -> vector<1x128xf32>
    %196 = arith.addf %186, %195 : vector<1x128xf32>
    %c16_i32_131 = arith.constant 16 : i32
    %197 = tpu.dynamic_rotate %196 by %c16_i32_131 dim 1 : vector<1x128xf32>, i32 -> vector<1x128xf32>
    %198 = arith.addf %196, %197 : vector<1x128xf32>
    %c32_i32_132 = arith.constant 32 : i32
    %199 = tpu.dynamic_rotate %198 by %c32_i32_132 dim 1 : vector<1x128xf32>, i32 -> vector<1x128xf32>
    %200 = arith.addf %198, %199 : vector<1x128xf32>
    %c64_i32_133 = arith.constant 64 : i32
    %201 = tpu.dynamic_rotate %200 by %c64_i32_133 dim 1 : vector<1x128xf32>, i32 -> vector<1x128xf32>
    %202 = arith.addf %200, %201 : vector<1x128xf32>
    %cst_134 = arith.constant 0.001953125 : f32
    %203 = vector.broadcast %cst_134 : f32 to vector<1x128xf32>
    %204 = arith.mulf %194, %203 : vector<1x128xf32>
    %cst_135 = arith.constant 0.001953125 : f32
    %205 = vector.broadcast %cst_135 : f32 to vector<1x128xf32>
    %206 = arith.mulf %202, %205 : vector<1x128xf32>
    %207 = arith.mulf %204, %204 : vector<1x128xf32>
    %208 = arith.subf %206, %207 : vector<1x128xf32>
    %cst_136 = arith.constant 9.99999974E-6 : f32
    %209 = vector.broadcast %cst_136 : f32 to vector<1x128xf32>
    %210 = arith.addf %208, %209 : vector<1x128xf32>
    %211 = math.rsqrt %210 : vector<1x128xf32>
    %212 = arith.mulf %173, %211 : vector<1x128xf32>
    %213 = arith.mulf %204, %212 : vector<1x128xf32>
    %214 = arith.subf %174, %213 : vector<1x128xf32>
    %215 = vector.broadcast %212 : vector<1x128xf32> to vector<16x128xf32>
    %216 = arith.mulf %156, %215 : vector<16x128xf32>
    %217 = vector.broadcast %214 : vector<1x128xf32> to vector<16x128xf32>
    %218 = arith.addf %216, %217 : vector<16x128xf32>
    %cst_137 = arith.constant 0.000000e+00 : f32
    %219 = vector.broadcast %cst_137 : f32 to vector<16x128xf32>
    %220 = arith.maximumf %218, %219 : vector<16x128xf32>
    %c0_138 = arith.constant 0 : index
    %c0_139 = arith.constant 0 : index
    %c0_140 = arith.constant 0 : index
    %221 = vector.load %arg6[%c0_138, %c0_139, %c0_140] : memref<2x16x128xf32, #tpu.memory_space<vmem>>, vector<1x16x128xf32>
    %222 = vector.shape_cast %221 : vector<1x16x128xf32> to vector<16x128xf32>
    %223 = vector.shape_cast %220 : vector<16x128xf32> to vector<1x16x128xf32>
    tpu.vector_store %arg6[%c0_138, %c0_139, %c0_140], %223 {strides = array<i32>} : memref<2x16x128xf32, #tpu.memory_space<vmem>>, vector<1x16x128xf32>,
    %224 = vector.broadcast %212 : vector<1x128xf32> to vector<16x128xf32>
    %225 = arith.mulf %172, %224 : vector<16x128xf32>
    %226 = vector.broadcast %214 : vector<1x128xf32> to vector<16x128xf32>
    %227 = arith.addf %225, %226 : vector<16x128xf32>
    %cst_141 = arith.constant 0.000000e+00 : f32
    %228 = vector.broadcast %cst_141 : f32 to vector<16x128xf32>
    %229 = arith.maximumf %227, %228 : vector<16x128xf32>
    %c1_142 = arith.constant 1 : index
    %c0_143 = arith.constant 0 : index
    %c0_144 = arith.constant 0 : index
    %230 = vector.load %arg6[%c1_142, %c0_143, %c0_144] : memref<2x16x128xf32, #tpu.memory_space<vmem>>, vector<1x16x128xf32>
    %231 = vector.shape_cast %230 : vector<1x16x128xf32> to vector<16x128xf32>
    %232 = vector.shape_cast %229 : vector<16x128xf32> to vector<1x16x128xf32>
    tpu.vector_store %arg6[%c1_142, %c0_143, %c0_144], %232 {strides = array<i32>} : memref<2x16x128xf32, #tpu.memory_space<vmem>>, vector<1x16x128xf32>,
    return
  }
}

</mosaic_0001>

<bundles_post_ra>
// kernel: tile.6
= control target key start
LH: loop header
LB: loop body
LE: loop exit
PB: predicated region body
PF: predicated region fallthrough
CT: control target
= control target key end

     0   :  { %vm1030_vm0 = vcmask 1043458   ;;  %s3329_s30 = smov 3  ;;  %s3331_s2 = smov 12  ;;  %vm1034_vm1 = vcmask 1045508   ;;  %vm1038_vm2 = vcmask 1047558   ;;  %vm1141_vm3 = vcmask 72704   ;;  %s3780_s0 = inlined_call_operand.vmem [shape: bf16[16,19,4,8], index: 0, kind: input, shape index: {}]   ;;  %s3781_s1 = inlined_call_operand.vmem [shape: bf16[304,4,8], index: 1, kind: output, shape index: {}]  }
   0x1   :  { %v3293_v0 = vld [vmem:[%s3780_s0 + $0x78] sm:$0xff]   ;;  %v3081_v1 = vld [vmem:[%s3780_s0 + $0x70] sm:$0xff]   ;;  %v3082_v2 = vld [vmem:[%s3780_s0 + $0x68] sm:$0xff]   ;;  %s3339_s7 = smov 48  ;;  %s3341_s8 = smov 192  ;;  %vm1325_vm4 = vcmask 113664  }
   0x2   :  { %v2973_v3 = vunpack.c.h.bf16 %v3293_v0  ;;  %v2976_v4 = vunpack.c.l.bf16 %v3081_v1  ;;  %v2977_v5 = vunpack.c.h.bf16 %v3081_v1  ;;  %v2980_v6 = vunpack.c.l.bf16 %v3082_v2  ;;  %v3083_v7 = vld [vmem:[%s3780_s0 + $0x60] sm:$0xff]   ;;  %v3084_v8 = vld [vmem:[%s3780_s0 + $0x58] sm:$0xff]   ;;  %v3085_v9 = vld [vmem:[%s3780_s0 + $0x50] sm:$0xff]   ;;  %s3349_s13 = smov 3  ;;  %s3351_s14 = smov 12 }
   0x3   :  { %v2981_v10 = vunpack.c.h.bf16 %v3082_v2  ;;  %v2984_v11 = vunpack.c.l.bf16 %v3083_v7  ;;  %v2985_v12 = vunpack.c.h.bf16 %v3083_v7  ;;  %v2988_v13 = vunpack.c.l.bf16 %v3084_v8  ;;  %v3086_v14 = vld [vmem:[%s3780_s0 + $0x48] sm:$0xff]   ;;  %v3087_v15 = vld [vmem:[%s3780_s0 + $0x40] sm:$0xff]   ;;  %v3088_v16 = vld [vmem:[%s3780_s0 + $0x38] sm:$0xff]   ;;  %s3353_s15 = smov 48  ;;  %s3363_s20 = smov 192 }
   0x4   :  { %533 = vst [vmem:[#allocation1 + $0xf8] sm:$0xff] %v2973_v3  ;;  %565 = vst [vmem:[#allocation1 + $0xe8] sm:$0xff] %v2977_v5  ;;  %v2989_v17 = vunpack.c.h.bf16 %v3084_v8  ;;  %v2992_v18 = vunpack.c.l.bf16 %v3085_v9  ;;  %v2993_v19 = vunpack.c.h.bf16 %v3085_v9  ;;  %v2996_v20 = vunpack.c.l.bf16 %v3086_v14  ;;  %v3089_v21 = vld [vmem:[%s3780_s0 + $0x30] sm:$0xff]   ;;  %v3090_v22 = vld [vmem:[%s3780_s0 + $0x28] sm:$0xff]   ;;  %s3371_s25 = smov 3  ;;  %s3380_s3 = smov 12 }
   0x5   :  { %v3091_v23 = vld [vmem:[%s3780_s0 + $0x20] sm:$0xff]   ;;  %581 = vst [vmem:[#allocation1 + $0xe0] sm:$0xff] %v2976_v4  ;;  %613 = vst [vmem:[#allocation1 + $0xd0] sm:$0xff] %v2980_v6  ;;  %v2997_v24 = vunpack.c.h.bf16 %v3086_v14  ;;  %v3000_v25 = vunpack.c.l.bf16 %v3087_v15  ;;  %v3001_v26 = vunpack.c.h.bf16 %v3087_v15  ;;  %v3004_v27 = vunpack.c.l.bf16 %v3088_v16  ;;  %v3092_v28 = vld [vmem:[%s3780_s0 + $0x18] sm:$0xff]   ;;  %s3382_s4 = smov 48  ;;  %s3391_s11 = smov 192 }
   0x6   :  { %597 = vst [vmem:[#allocation1 + $0xd8] sm:$0xff] %v2981_v10  ;;  %629 = vst [vmem:[#allocation1 + $0xc8] sm:$0xff] %v2985_v12  ;;  %v3093_v29 = vld [vmem:[%s3780_s0 + $0x10] sm:$0xff]   ;;  %v3005_v30 = vunpack.c.h.bf16 %v3088_v16  ;;  %v3008_v31 = vunpack.c.l.bf16 %v3089_v21  ;;  %v3009_v32 = vunpack.c.h.bf16 %v3089_v21  ;;  %v3012_v33 = vunpack.c.l.bf16 %v3090_v22  ;;  %v3094_v34 = vld [vmem:[%s3780_s0 + $0x8] sm:$0xff]   ;;  %s3393_s12 = smov 3  ;;  %s3401_s21 = smov 12 }
   0x7   :  { %645 = vst [vmem:[#allocation1 + $0xc0] sm:$0xff] %v2984_v11  ;;  %677 = vst [vmem:[#allocation1 + $0xb0] sm:$0xff] %v2988_v13  ;;  %v3031_v35 = vld [vmem:[%s3780_s0] sm:$0xff]   ;;  %v3013_v36 = vunpack.c.h.bf16 %v3090_v22  ;;  %v3016_v37 = vunpack.c.l.bf16 %v3091_v23  ;;  %v3017_v38 = vunpack.c.h.bf16 %v3091_v23  ;;  %v3020_v39 = vunpack.c.l.bf16 %v3092_v28  ;;  %v3358_v40 = vld [vmem:[%s3780_s0 + $0xf8] sm:$0xff]   ;;  %s3403_s22 = smov 48  ;;  %s3411_s28 = smov 192 }
   0x8   :  { %661 = vst [vmem:[#allocation1 + $0xb8] sm:$0xff] %v2989_v17  ;;  %693 = vst [vmem:[#allocation1 + $0xa8] sm:$0xff] %v2993_v19  ;;  %v3065_v41 = vld [vmem:[%s3780_s0 + $0xf0] sm:$0xff]   ;;  %v3021_v42 = vunpack.c.h.bf16 %v3092_v28  ;;  %v3024_v43 = vunpack.c.l.bf16 %v3093_v29  ;;  %v3025_v44 = vunpack.c.h.bf16 %v3093_v29  ;;  %v3028_v45 = vunpack.c.l.bf16 %v3094_v34  ;;  %v3066_v46 = vld [vmem:[%s3780_s0 + $0xe8] sm:$0xff]   ;;  %s3422_s17 = smov 3  ;;  %s3424_s18 = smov 12 }
   0x9   :  { %709 = vst [vmem:[#allocation1 + $0xa0] sm:$0xff] %v2992_v18  ;;  %741 = vst [vmem:[#allocation1 + $0x90] sm:$0xff] %v2996_v20  ;;  %v3067_v47 = vld [vmem:[%s3780_s0 + $0xe0] sm:$0xff]   ;;  %v3029_v48 = vunpack.c.h.bf16 %v3094_v34  ;;  %v3032_v49 = vunpack.c.l.bf16 %v3031_v35  ;;  %v3033_v50 = vunpack.c.h.bf16 %v3031_v35  ;;  %v2972_v51 = vunpack.c.l.bf16 %v3293_v0  ;;  %v3068_v52 = vld [vmem:[%s3780_s0 + $0xd8] sm:$0xff]   ;;  %s3441_s19 = smov 12  ;;  %s1565_s23 = smov 3 }
   0xa   :  { %725 = vst [vmem:[#allocation1 + $0x98] sm:$0xff] %v2997_v24  ;;  %757 = vst [vmem:[#allocation1 + $0x88] sm:$0xff] %v3001_v26  ;;  %v3069_v53 = vld [vmem:[%s3780_s0 + $0xd0] sm:$0xff]   ;;  %v2909_v54 = vunpack.c.h.bf16 %v3358_v40  ;;  %v2912_v55 = vunpack.c.l.bf16 %v3065_v41  ;;  %v2913_v56 = vunpack.c.h.bf16 %v3065_v41  ;;  %v2916_v57 = vunpack.c.l.bf16 %v3066_v46  ;;  %v3070_v58 = vld [vmem:[%s3780_s0 + $0xc8] sm:$0xff]   ;;  %s1568_s24 = smov 12  ;;  %s3466_s26 = smov 48 }
   0xb   :  { %773 = vst [vmem:[#allocation1 + $0x80] sm:$0xff] %v3000_v25  ;;  %805 = vst [vmem:[#allocation1 + $0x70] sm:$0xff] %v3004_v27  ;;  %v3071_v59 = vld [vmem:[%s3780_s0 + $0xc0] sm:$0xff]   ;;  %v2917_v60 = vunpack.c.h.bf16 %v3066_v46  ;;  %v2920_v61 = vunpack.c.l.bf16 %v3067_v47  ;;  %v2921_v62 = vunpack.c.h.bf16 %v3067_v47  ;;  %v2924_v63 = vunpack.c.l.bf16 %v3068_v52  ;;  %v3072_v0 = vld [vmem:[%s3780_s0 + $0xb8] sm:$0xff]   ;;  %s3468_s27 = smov 192  ;;  %s3475_s29 = smov 12 }
   0xc   :  { %789 = vst [vmem:[#allocation1 + $0x78] sm:$0xff] %v3005_v30  ;;  %821 = vst [vmem:[#allocation1 + $0x68] sm:$0xff] %v3009_v32  ;;  %v3073_v1 = vld [vmem:[%s3780_s0 + $0xb0] sm:$0xff]   ;;  %v2925_v2 = vunpack.c.h.bf16 %v3068_v52  ;;  %v2928_v3 = vunpack.c.l.bf16 %v3069_v53  ;;  %v2929_v4 = vunpack.c.h.bf16 %v3069_v53  ;;  %v2932_v5 = vunpack.c.l.bf16 %v3070_v58  ;;  %v3074_v6 = vld [vmem:[%s3780_s0 + $0xa8] sm:$0xff]   ;;  %s1114_s5 = smov 48  ;;  %s3478_s6 = smov 192 }
   0xd   :  { %837 = vst [vmem:[#allocation1 + $0x60] sm:$0xff] %v3008_v31  ;;  %869 = vst [vmem:[#allocation1 + $0x50] sm:$0xff] %v3012_v33  ;;  %v3075_v7 = vld [vmem:[%s3780_s0 + $0xa0] sm:$0xff]   ;;  %v2933_v8 = vunpack.c.h.bf16 %v3070_v58  ;;  %v2936_v9 = vunpack.c.l.bf16 %v3071_v59  ;;  %v2937_v10 = vunpack.c.h.bf16 %v3071_v59  ;;  %v2940_v11 = vunpack.c.l.bf16 %v3072_v0  ;;  %v3076_v12 = vld [vmem:[%s3780_s0 + $0x98] sm:$0xff]   ;;  %s1152_s9 = smov 3  ;;  %s1155_s10 = smov 12 }
   0xe   :  { %853 = vst [vmem:[#allocation1 + $0x58] sm:$0xff] %v3013_v36  ;;  %885 = vst [vmem:[#allocation1 + $0x48] sm:$0xff] %v3017_v38  ;;  %v3077_v13 = vld [vmem:[%s3780_s0 + $0x90] sm:$0xff]   ;;  %v3078_v14 = vld [vmem:[%s3780_s0 + $0x88] sm:$0xff]   ;;  %v2941_v18 = vunpack.c.h.bf16 %v3072_v0  ;;  %v2944_v19 = vunpack.c.l.bf16 %v3073_v1  ;;  %v2945_v20 = vunpack.c.h.bf16 %v3073_v1  ;;  %v2948_v21 = vunpack.c.l.bf16 %v3074_v6  ;;  %s1160_s16 = smov 48 }
   0xf   :  { %901 = vst [vmem:[#allocation1 + $0x40] sm:$0xff] %v3016_v37  ;;  %933 = vst [vmem:[#allocation1 + $0x30] sm:$0xff] %v3020_v39  ;;  %v2949_v23 = vunpack.c.h.bf16 %v3074_v6  ;;  %v2952_v24 = vunpack.c.l.bf16 %v3075_v7  ;;  %v2953_v25 = vunpack.c.h.bf16 %v3075_v7  ;;  %v3079_v26 = vld [vmem:[%s3780_s0 + $0x80] sm:$0xff]   ;;  %s3433_s0 = smov 48  ;;  %v2956_v29 = vunpack.c.l.bf16 %v3076_v12 }
  0x10   :  { %917 = vst [vmem:[#allocation1 + $0x38] sm:$0xff] %v3021_v42  ;;  %949 = vst [vmem:[#allocation1 + $0x28] sm:$0xff] %v3025_v44  ;;  %v2957_v30 = vunpack.c.h.bf16 %v3076_v12  ;;  %v2960_v31 = vunpack.c.l.bf16 %v3077_v13  ;;  %v2961_v32 = vunpack.c.h.bf16 %v3077_v13  ;;  %v2964_v33 = vunpack.c.l.bf16 %v3078_v14 }
  0x11   :  { %965 = vst [vmem:[#allocation1 + $0x20] sm:$0xff] %v3024_v43  ;;  %997 = vst [vmem:[#allocation1 + $0x10] sm:$0xff] %v3028_v45  ;;  %v1474_v15 = vld [vmem:[#allocation1 + $0x8c] ss:$16 sm:%s3329_s30]   ;;  %v2965_v34 = vunpack.c.h.bf16 %v3078_v14  ;;  %v2968_v38 = vunpack.c.l.bf16 %v3079_v26  ;;  %v2969_v39 = vunpack.c.h.bf16 %v3079_v26  ;;  %v2908_v40 = vunpack.c.l.bf16 %v3358_v40  ;;  %s1170_s30 = smov 3 }
  0x12   :  { %981 = vst [vmem:[#allocation1 + $0x18] sm:$0xff] %v3029_v48  ;;  %1012 = vst [vmem:[#allocation1 + $0x8] sm:$0xff] %v3033_v50  ;;  %v1477_v16 = vld [vmem:[#allocation1 + $0x8c] ss:$16 sm:%s3331_s2]   ;;  %s1173_s2 = smov 12  ;;  %vm1145_vm5 = vcmask 80896  }
  0x13   :  { %549 = vst [vmem:[#allocation1 + $0xf0] sm:$0xff] %v2972_v51  ;;  %1025 = vst [vmem:[#allocation1] sm:$0xff] %v3032_v49  ;;  %v1482_v17 = vld [vmem:[#allocation1 + $0x8c] ss:$16 sm:%s3339_s7]   ;;  %v1479_v22 = vsel %vm1030_vm0, %v1477_v16, %v1474_v15  ;;  %s3435_s7 = smov 192  ;;  %vm1148_vm6 = vcmask 1048504  }
  0x14   :  { %21 = vst [vmem:[#allocation1 + $0x1f8] sm:$0xff] %v2909_v54  ;;  %53 = vst [vmem:[#allocation1 + $0x1e8] sm:$0xff] %v2913_v56  ;;  %v1484_v27 = vsel %vm1034_vm1, %v1482_v17, %v1479_v22  ;;  %v1487_v28 = vld [vmem:[#allocation1 + $0x8c] ss:$16 sm:%s3341_s8]   ;;  %s3439_s8 = smov 3  ;;  %vm1040_vm7 = vcmask 154624  }
  0x15   :  { %69 = vst [vmem:[#allocation1 + $0x1e0] sm:$0xff] %v2912_v55  ;;  %101 = vst [vmem:[#allocation1 + $0x1d0] sm:$0xff] %v2916_v57  ;;  %v1489_v41 = vsel %vm1038_vm2, %v1487_v28, %v1484_v27  ;;  %vm1329_vm8 = vcmask 39936   ;;  %vm1332_vm9 = vcmask 1048464   ;;  %vm1492_vm10 = vcmask 974624  }
  0x16   :  { %85 = vst [vmem:[#allocation1 + $0x1d8] sm:$0xff] %v2917_v60  ;;  %117 = vst [vmem:[#allocation1 + $0x1c8] sm:$0xff] %v2921_v62  ;;  %vm1584_vm11 = vcmask 933624   ;;  %vm1675_vm12 = vcmask 818824   ;;  %vm1767_vm13 = vcmask 777824   ;;  %vm1858_vm14 = vcmask 663024  }
  0x17   :  { %133 = vst [vmem:[#allocation1 + $0x1c0] sm:$0xff] %v2920_v61  ;;  %165 = vst [vmem:[#allocation1 + $0x1b0] sm:$0xff] %v2924_v63  ;;  %vm1950_vm15 = vcmask 622024  }
  0x18   :  { %149 = vst [vmem:[#allocation1 + $0x1b8] sm:$0xff] %v2925_v2  ;;  %181 = vst [vmem:[#allocation1 + $0x1a8] sm:$0xff] %v2929_v4 }
  0x19   :  { %197 = vst [vmem:[#allocation1 + $0x1a0] sm:$0xff] %v2928_v3  ;;  %229 = vst [vmem:[#allocation1 + $0x190] sm:$0xff] %v2932_v5  ;;  %v1497_v35 = vld [vmem:[#allocation1 + $0xc] ss:$16 sm:%s3349_s13]   ;;  %s1641_s13 = smov 48 }
  0x1a   :  { %213 = vst [vmem:[#allocation1 + $0x198] sm:$0xff] %v2933_v8  ;;  %245 = vst [vmem:[#allocation1 + $0x188] sm:$0xff] %v2937_v10  ;;  %v1500_v36 = vld [vmem:[#allocation1 + $0xc] ss:$16 sm:%s3351_s14]   ;;  %s3450_s14 = smov 192 }
  0x1b   :  { %261 = vst [vmem:[#allocation1 + $0x180] sm:$0xff] %v2936_v9  ;;  %293 = vst [vmem:[#allocation1 + $0x170] sm:$0xff] %v2940_v11  ;;  %v1505_v37 = vld [vmem:[#allocation1 + $0xc] ss:$16 sm:%s3353_s15]   ;;  %v1502_v42 = vsel %vm1030_vm0, %v1500_v36, %v1497_v35  ;;  %v1634_v45 = vld [vmem:[#allocation1 + $0x85] ss:$16 sm:%s3439_s8]  }
  0x1c   :  { %277 = vst [vmem:[#allocation1 + $0x178] sm:$0xff] %v2941_v18  ;;  %309 = vst [vmem:[#allocation1 + $0x168] sm:$0xff] %v2945_v20  ;;  %v1510_v43 = vld [vmem:[#allocation1 + $0xc] ss:$16 sm:%s3363_s20]   ;;  %v1507_v44 = vsel %vm1034_vm1, %v1505_v37, %v1502_v42  ;;  %s1573_s15 = smov 48  ;;  %s1578_s20 = smov 192 }
  0x1d   :  { %325 = vst [vmem:[#allocation1 + $0x160] sm:$0xff] %v2944_v19  ;;  %357 = vst [vmem:[#allocation1 + $0x150] sm:$0xff] %v2948_v21  ;;  %v1512_v46 = vsel %vm1038_vm2, %v1510_v43, %v1507_v44  ;;  %v1637_v47 = vld [vmem:[#allocation1 + $0x85] ss:$16 sm:%s3441_s19]   ;;  %v1161_v42 = vld [vmem:[#allocation1 + $0x8d] ss:$16 sm:%s1160_s16]  }
  0x1e   :  { %341 = vst [vmem:[#allocation1 + $0x158] sm:$0xff] %v2949_v23  ;;  %373 = vst [vmem:[#allocation1 + $0x148] sm:$0xff] %v2953_v25  ;;  %v1566_v48 = vld [vmem:[#allocation1 + $0x5] ss:$16 sm:%s1565_s23]   ;;  %v3115_v50 = vpack.i.bf16 %v1512_v46, %v1489_v41  ;;  %v1639_v55 = vsel %vm1030_vm0, %v1637_v47, %v1634_v45  ;;  %v1156_v41 = vld [vmem:[#allocation1 + $0x8d] ss:$16 sm:%s1155_s10]  }
  0x1f   :  { %389 = vst [vmem:[#allocation1 + $0x140] sm:$0xff] %v2952_v24  ;;  %405 = vst [vmem:[#allocation1 + $0x138] sm:$0xff] %v2957_v30  ;;  %v1569_v49 = vld [vmem:[#allocation1 + $0x5] ss:$16 sm:%s1568_s24]   ;;  %v1171_v47 = vld [vmem:[#allocation1 + $0xd] ss:$16 sm:%s1170_s30]  }
  0x20   :  { %421 = vst [vmem:[#allocation1 + $0x130] sm:$0xff] %v2956_v29  ;;  %453 = vst [vmem:[#allocation1 + $0x120] sm:$0xff] %v2960_v31  ;;  %v1642_v56 = vld [vmem:[#allocation1 + $0x85] ss:$16 sm:%s1641_s13]   ;;  %v1571_v59 = vsel %vm1030_vm0, %v1569_v49, %v1566_v48  ;;  %v1174_v49 = vld [vmem:[#allocation1 + $0xd] ss:$16 sm:%s1173_s2]  }
  0x21   :  { %437 = vst [vmem:[#allocation1 + $0x128] sm:$0xff] %v2961_v32  ;;  %469 = vst [vmem:[#allocation1 + $0x118] sm:$0xff] %v2965_v34  ;;  %v1520_v51 = vld [vmem:[#allocation1 + $0x18c] ss:$16 sm:%s3371_s25]   ;;  %s3460_s25 = smov 3  ;;  %v1644_v2 = vsel %vm1034_vm1, %v1642_v56, %v1639_v55  ;;  %s1290_s8 = smov 3 }
  0x22   :  { %485 = vst [vmem:[#allocation1 + $0x110] sm:$0xff] %v2964_v33  ;;  %501 = vst [vmem:[#allocation1 + $0x108] sm:$0xff] %v2969_v39  ;;  %v1523_v52 = vld [vmem:[#allocation1 + $0x18c] ss:$16 sm:%s3380_s3]   ;;  %s3462_s3 = smov 12  ;;  %s1293_s19 = smov 12 }
  0x23   :  { %37 = vst [vmem:[#allocation1 + $0x1f0] sm:$0xff] %v2908_v40  ;;  %517 = vst [vmem:[#allocation1 + $0x100] sm:$0xff] %v2968_v38  ;;  %v1528_v53 = vld [vmem:[#allocation1 + $0x18c] ss:$16 sm:%s3382_s4]   ;;  %v1525_v54 = vsel %vm1030_vm0, %v1523_v52, %v1520_v51  ;;  %s3265_s4 = smov 100   ;;  %v1176_v52 = vsel %vm1030_vm0, %v1174_v49, %v1171_v47  ;;  %s1298_s23 = smov 48 }
  0x24   :  { %3116 = vrot.lane.b32.xlu0 %v3115_v50, %s3265_s4  ;;  %v1530_v57 = vsel %vm1034_vm1, %v1528_v53, %v1525_v54  ;;  %v1533_v58 = vld [vmem:[#allocation1 + $0x18c] ss:$16 sm:%s3391_s11]   ;;  %v1574_v60 = vld [vmem:[#allocation1 + $0x5] ss:$16 sm:%s1573_s15]   ;;  %s3473_s11 = smov 3  ;;  %s1303_s24 = smov 192 }
  0x25   :  { %v1647_v61 = vld [vmem:[#allocation1 + $0x85] ss:$16 sm:%s3450_s14]   ;;  %v1535_v3 = vsel %vm1038_vm2, %v1533_v58, %v1530_v57  ;;  %v1576_v8 = vsel %vm1034_vm1, %v1574_v60, %v1571_v59  ;;  %v1153_v40 = vld [vmem:[#allocation1 + $0x8d] ss:$16 sm:%s1152_s9]   ;;  %v1291_v54 = vld [vmem:[#allocation1 + $0x86] ss:$16 sm:%s1290_s8]  }
  0x26   :  { %v1579_v62 = vld [vmem:[#allocation1 + $0x5] ss:$16 sm:%s1578_s20]   ;;  %v1649_v16 = vsel %vm1038_vm2, %v1647_v61, %v1644_v2  ;;  %v1158_v45 = vsel %vm1030_vm0, %v1156_v41, %v1153_v40  ;;  %v1294_v57 = vld [vmem:[#allocation1 + $0x86] ss:$16 sm:%s1293_s19]   ;;  %s1308_s13 = smov 3  ;;  %s1311_s14 = smov 12 }
  0x27   :  { %v1581_v22 = vsel %vm1038_vm2, %v1579_v62, %v1576_v8  ;;  %v1163_v48 = vsel %vm1034_vm1, %v1161_v42, %v1158_v45  ;;  %v1299_v58 = vld [vmem:[#allocation1 + $0x86] ss:$16 sm:%s1298_s23]   ;;  %v1296_v60 = vsel %vm1030_vm0, %v1294_v57, %v1291_v54  ;;  %s1316_s15 = smov 48  ;;  %s1321_s20 = smov 192 }
  0x28   :  { %v1304_v61 = vld [vmem:[#allocation1 + $0x86] ss:$16 sm:%s1303_s24]   ;;  %s1216_s9 = smov 3  ;;  %s1219_s10 = smov 12 }
  0x29   :  { %v1543_v63 = vld [vmem:[#allocation1 + $0x10c] ss:$16 sm:%s3393_s12]   ;;  %v1107_v24 = vld [vmem:[#allocation1 + $0x10d] ss:$16 sm:%s3473_s11]   ;;  %s1124_s12 = smov 3  ;;  %s1353_s11 = smov 3 }
  0x2a   :  { %v1546_v0 = vld [vmem:[#allocation1 + $0x10c] ss:$16 sm:%s3401_s21]   ;;  %v1611_v6 = vld [vmem:[#allocation1 + $0x105] ss:$16 sm:%s3422_s17]   ;;  %v1110_v25 = vld [vmem:[#allocation1 + $0x10d] ss:$16 sm:%s3475_s29]  }
  0x2b   :  { %v1551_v1 = vld [vmem:[#allocation1 + $0x10c] ss:$16 sm:%s3403_s22]   ;;  %v1548_v4 = vsel %vm1030_vm0, %v1546_v0, %v1543_v63  ;;  %v1614_v7 = vld [vmem:[#allocation1 + $0x105] ss:$16 sm:%s3424_s18]   ;;  %v1115_v26 = vld [vmem:[#allocation1 + $0x10d] ss:$16 sm:%s1114_s5]   ;;  %v1112_v28 = vsel %vm1030_vm0, %v1110_v25, %v1107_v24  ;;  %v1301_v0 = vsel %vm1034_vm1, %v1299_v58, %v1296_v60 }
  0x2c   :  { %v1556_v5 = vld [vmem:[#allocation1 + $0x10c] ss:$16 sm:%s3411_s28]   ;;  %v1553_v9 = vsel %vm1034_vm1, %v1551_v1, %v1548_v4  ;;  %v1616_v10 = vsel %vm1030_vm0, %v1614_v7, %v1611_v6  ;;  %v1619_v11 = vld [vmem:[#allocation1 + $0x105] ss:$16 sm:%s3433_s0]   ;;  %v1120_v29 = vld [vmem:[#allocation1 + $0x10d] ss:$16 sm:%s3478_s6]   ;;  %v1117_v35 = vsel %vm1034_vm1, %v1115_v26, %v1112_v28 }
  0x2d   :  { %v1624_v12 = vld [vmem:[#allocation1 + $0x105] ss:$16 sm:%s3435_s7]   ;;  %v1558_v14 = vsel %vm1038_vm2, %v1556_v5, %v1553_v9  ;;  %v1621_v15 = vsel %vm1034_vm1, %v1619_v11, %v1616_v10  ;;  %s1127_s21 = smov 12  ;;  %v1125_v32 = vld [vmem:[#allocation1 + $0x8d] ss:$16 sm:%s1124_s12]   ;;  %s1132_s22 = smov 48  ;;  %v1122_v43 = vsel %vm1038_vm2, %v1120_v29, %v1117_v35  ;;  %v1306_v9 = vsel %vm1038_vm2, %v1304_v61, %v1301_v0 }
  0x2e   :  { %v1588_v13 = vld [vmem:[#allocation1 + $0x185] ss:$16 sm:%s3460_s25]   ;;  %v3120_v20 = vpack.i.bf16 %v1558_v14, %v1535_v3  ;;  %v1626_v21 = vsel %vm1038_vm2, %v1624_v12, %v1621_v15  ;;  %v1128_v33 = vld [vmem:[#allocation1 + $0x8d] ss:$16 sm:%s1127_s21]   ;;  %s1137_s28 = smov 192  ;;  %s3266_s17 = smov 95  }
  0x2f   :  { %v1591_v17 = vld [vmem:[#allocation1 + $0x185] ss:$16 sm:%s3462_s3]   ;;  %v3130_v30 = vpack.i.bf16 %v1649_v16, %v1626_v21  ;;  %v1130_v36 = vsel %vm1030_vm0, %v1128_v33, %v1125_v32  ;;  %v1133_v37 = vld [vmem:[#allocation1 + $0x8d] ss:$16 sm:%s1132_s22]   ;;  %s1165_s18 = smov 192  ;;  %s1178_s0 = smov 48 }
  0x30   :  { %v1596_v18 = vld [vmem:[#allocation1 + $0x185] ss:$16 sm:%s3466_s26]   ;;  %v1593_v23 = vsel %vm1030_vm0, %v1591_v17, %v1588_v13  ;;  %3121 = vrot.lane.b32.xlu1 %v3120_v20, %s3265_s4  ;;  %v1138_v38 = vld [vmem:[#allocation1 + $0x8d] ss:$16 sm:%s1137_s28]   ;;  %v1135_v39 = vsel %vm1034_vm1, %v1133_v37, %v1130_v36  ;;  %s1183_s7 = smov 192  ;;  %s1335_s25 = smov 3 }
  0x31   :  { %v1601_v19 = vld [vmem:[#allocation1 + $0x185] ss:$16 sm:%s3468_s27]   ;;  %v1598_v27 = vsel %vm1034_vm1, %v1596_v18, %v1593_v23  ;;  %v1140_v44 = vsel %vm1038_vm2, %v1138_v38, %v1135_v39  ;;  %v1166_v46 = vld [vmem:[#allocation1 + $0x8d] ss:$16 sm:%s1165_s18]   ;;  %v1309_v62 = vld [vmem:[#allocation1 + $0x6] ss:$16 sm:%s1308_s13]  }
  0x32   :  { %v1603_v31 = vsel %vm1038_vm2, %v1601_v19, %v1598_v27  ;;  %v1179_v50 = vld [vmem:[#allocation1 + $0xd] ss:$16 sm:%s1178_s0]   ;;  %v1168_v51 = vsel %vm1038_vm2, %v1166_v46, %v1163_v48  ;;  %v1142_v55 = vsel %vm1141_vm3, %v1140_v44, %v1122_v43  ;;  %v1312_v1 = vld [vmem:[#allocation1 + $0x6] ss:$16 sm:%s1311_s14]   ;;  %s1338_s3 = smov 12  ;;  %s1343_s4 = smov 48 }
  0x33   :  { %v3125_v34 = vpack.i.bf16 %v1603_v31, %v1581_v22  ;;  %v1184_v53 = vld [vmem:[#allocation1 + $0xd] ss:$16 sm:%s1183_s7]   ;;  %v1181_v56 = vsel %vm1034_vm1, %v1179_v50, %v1176_v52  ;;  %v1317_v2 = vld [vmem:[#allocation1 + $0x6] ss:$16 sm:%s1316_s15]   ;;  %v1314_v4 = vsel %vm1030_vm0, %v1312_v1, %v1309_v62  ;;  %s1348_s26 = smov 192  ;;  %s3267_s27 = smov 119  }
  0x34   :  { %3131 = vrot.lane.b32.xlu1 %v3130_v30, %s3266_s17  ;;  %v1186_v59 = vsel %vm1038_vm2, %v1184_v53, %v1181_v56  ;;  %v1322_v5 = vld [vmem:[#allocation1 + $0x6] ss:$16 sm:%s1321_s20]   ;;  %v1319_v6 = vsel %vm1034_vm1, %v1317_v2, %v1314_v4  ;;  %s1356_s29 = smov 12  ;;  %s1361_s5 = smov 48  ;;  %v1217_v31 = vld [vmem:[#allocation1 + $0x18d] ss:$16 sm:%s1216_s9]  }
  0x35   :  { %3126 = vrot.lane.b32.xlu0 %v3125_v34, %s3266_s17  ;;  %v1188_v63 = vsel %vm1141_vm3, %v1186_v59, %v1168_v51  ;;  %v1336_v7 = vld [vmem:[#allocation1 + $0x6] ss:$16 sm:%s1335_s25]   ;;  %v1324_v10 = vsel %vm1038_vm2, %v1322_v5, %v1319_v6  ;;  %s1366_s6 = smov 192  ;;  %s1198_s12 = smov 3  ;;  %v1220_v32 = vld [vmem:[#allocation1 + $0x18d] ss:$16 sm:%s1219_s10]  }
  0x36   :  { %v3135_v3 = vpack.i.bf16 %v1188_v63, %v1142_v55  ;;  %v1339_v8 = vld [vmem:[#allocation1 + $0x6] ss:$16 sm:%s1338_s3]   ;;  %s1201_s21 = smov 12  ;;  %v1326_v21 = vsel %vm1325_vm4, %v1324_v10, %v1306_v9  ;;  %v1199_v23 = vld [vmem:[#allocation1 + $0xd] ss:$16 sm:%s1198_s12]   ;;  %s1206_s22 = smov 48  ;;  %v1222_v34 = vsel %vm1030_vm0, %v1220_v32, %v1217_v31 }
  0x37   :  { %v1341_v11 = vsel %vm1030_vm0, %v1339_v8, %v1336_v7  ;;  %v1344_v12 = vld [vmem:[#allocation1 + $0x6] ss:$16 sm:%s1343_s4]   ;;  %v1202_v24 = vld [vmem:[#allocation1 + $0xd] ss:$16 sm:%s1201_s21]   ;;  %s1211_s28 = smov 192  ;;  %s1224_s16 = smov 48 }
  0x38   :  { %v1349_v13 = vld [vmem:[#allocation1 + $0x6] ss:$16 sm:%s1348_s26]   ;;  %v1346_v14 = vsel %vm1034_vm1, %v1344_v12, %v1341_v11  ;;  %v1204_v26 = vsel %vm1030_vm0, %v1202_v24, %v1199_v23  ;;  %v1207_v27 = vld [vmem:[#allocation1 + $0xd] ss:$16 sm:%s1206_s22]   ;;  %s1229_s17 = smov 192  ;;  %s1244_s18 = smov 3 }
  0x39   :  { %3136 = vrot.lane.b32.xlu0 %v3135_v3, %s3267_s27  ;;  %v1354_v15 = vld [vmem:[#allocation1 + $0x186] ss:$16 sm:%s1353_s11]   ;;  %v1351_v17 = vsel %vm1038_vm2, %v1349_v13, %v1346_v14  ;;  %v1212_v28 = vld [vmem:[#allocation1 + $0xd] ss:$16 sm:%s1211_s28]   ;;  %v1209_v30 = vsel %vm1034_vm1, %v1207_v27, %v1204_v26  ;;  %s1247_s30 = smov 12  ;;  %s1252_s2 = smov 48 }
  0x3a   :  { %v1357_v16 = vld [vmem:[#allocation1 + $0x186] ss:$16 sm:%s1356_s29]   ;;  %v1225_v35 = vld [vmem:[#allocation1 + $0x18d] ss:$16 sm:%s1224_s16]   ;;  %s1257_s0 = smov 192  ;;  %s3268_s7 = smov 114   ;;  %v1214_v40 = vsel %vm1038_vm2, %v1212_v28, %v1209_v30 }
  0x3b   :  { %v1359_v18 = vsel %vm1030_vm0, %v1357_v16, %v1354_v15  ;;  %v1362_v19 = vld [vmem:[#allocation1 + $0x186] ss:$16 sm:%s1361_s5]   ;;  %v1230_v36 = vld [vmem:[#allocation1 + $0x18d] ss:$16 sm:%s1229_s17]   ;;  %v1227_v37 = vsel %vm1034_vm1, %v1225_v35, %v1222_v34  ;;  %s1262_s8 = smov 3  ;;  %s1265_s19 = smov 12 }
  0x3c   :  { %v1367_v20 = vld [vmem:[#allocation1 + $0x186] ss:$16 sm:%s1366_s6]   ;;  %v1364_v22 = vsel %vm1034_vm1, %v1362_v19, %v1359_v18  ;;  %v1245_v38 = vld [vmem:[#allocation1 + $0x18d] ss:$16 sm:%s1244_s18]   ;;  %v1232_v41 = vsel %vm1038_vm2, %v1230_v36, %v1227_v37  ;;  %s1270_s23 = smov 48  ;;  %s1275_s24 = smov 192 }
  0x3d   :  { %v1369_v25 = vsel %vm1038_vm2, %v1367_v20, %v1364_v22  ;;  %v1248_v39 = vld [vmem:[#allocation1 + $0x18d] ss:$16 sm:%s1247_s30]   ;;  %s1381_s13 = smov 3  ;;  %s1384_s14 = smov 12  ;;  %v1234_v52 = vsel %vm1141_vm3, %v1232_v41, %v1214_v40 }
  0x3e   :  { %v1371_v29 = vsel %vm1325_vm4, %v1369_v25, %v1351_v17  ;;  %v1250_v42 = vsel %vm1030_vm0, %v1248_v39, %v1245_v38  ;;  %v1253_v43 = vld [vmem:[#allocation1 + $0x18d] ss:$16 sm:%s1252_s2]   ;;  %v1382_v54 = vld [vmem:[#allocation1 + $0x186] ss:$16 sm:%s1381_s13]   ;;  %s1389_s15 = smov 48  ;;  %s1394_s20 = smov 192 }
  0x3f   :  { %v3150_v33 = vpack.i.bf16 %v1371_v29, %v1326_v21  ;;  %v1258_v44 = vld [vmem:[#allocation1 + $0x18d] ss:$16 sm:%s1257_s0]   ;;  %v1255_v45 = vsel %vm1034_vm1, %v1253_v43, %v1250_v42  ;;  %v1385_v55 = vld [vmem:[#allocation1 + $0x186] ss:$16 sm:%s1384_s14]   ;;  %s1399_s25 = smov 3  ;;  %s1402_s3 = smov 12 }
  0x40   :  { %v1263_v46 = vld [vmem:[#allocation1 + $0x10d] ss:$16 sm:%s1262_s8]   ;;  %v1260_v48 = vsel %vm1038_vm2, %v1258_v44, %v1255_v45  ;;  %v1387_v57 = vsel %vm1030_vm0, %v1385_v55, %v1382_v54  ;;  %v1390_v58 = vld [vmem:[#allocation1 + $0x186] ss:$16 sm:%s1389_s15]   ;;  %s1407_s4 = smov 48  ;;  %s1412_s26 = smov 192 }
  0x41   :  { %3151 = vrot.lane.b32.xlu1 %v3150_v33, %s3268_s7  ;;  %v1266_v47 = vld [vmem:[#allocation1 + $0x10d] ss:$16 sm:%s1265_s19]   ;;  %v1395_v59 = vld [vmem:[#allocation1 + $0x186] ss:$16 sm:%s1394_s20]   ;;  %v1392_v61 = vsel %vm1034_vm1, %v1390_v58, %v1387_v57  ;;  %s1427_s11 = smov 3  ;;  %s1430_s29 = smov 12 }
  0x42   :  { %v1268_v49 = vsel %vm1030_vm0, %v1266_v47, %v1263_v46  ;;  %v1271_v50 = vld [vmem:[#allocation1 + $0x10d] ss:$16 sm:%s1270_s23]   ;;  %v1400_v62 = vld [vmem:[#allocation1 + $0x106] ss:$16 sm:%s1399_s25]   ;;  %s1435_s5 = smov 48  ;;  %s1440_s6 = smov 192  ;;  %v1397_v7 = vsel %vm1038_vm2, %v1395_v59, %v1392_v61 }
  0x43   :  { %v1276_v51 = vld [vmem:[#allocation1 + $0x10d] ss:$16 sm:%s1275_s24]   ;;  %v1273_v53 = vsel %vm1034_vm1, %v1271_v50, %v1268_v49  ;;  %v1403_v63 = vld [vmem:[#allocation1 + $0x106] ss:$16 sm:%s1402_s3]   ;;  %s1448_s12 = smov 12  ;;  %s1453_s21 = smov 48 }
  0x44   :  { %v1278_v56 = vsel %vm1038_vm2, %v1276_v51, %v1273_v53  ;;  %v1405_v1 = vsel %vm1030_vm0, %v1403_v63, %v1400_v62  ;;  %v1408_v2 = vld [vmem:[#allocation1 + $0x106] ss:$16 sm:%s1407_s4]   ;;  %s1458_s22 = smov 192  ;;  %s1656_s28 = smov 3 }
  0x45   :  { %v1280_v60 = vsel %vm1141_vm3, %v1278_v56, %v1260_v48  ;;  %v1413_v3 = vld [vmem:[#allocation1 + $0x106] ss:$16 sm:%s1412_s26]   ;;  %v1410_v4 = vsel %vm1034_vm1, %v1408_v2, %v1405_v1  ;;  %s1659_s9 = smov 12  ;;  %v1657_v21 = vld [vmem:[#allocation1 + $0x8b] ss:$16 sm:%s1656_s28]   ;;  %s1664_s10 = smov 48 }
  0x46   :  { %v3140_v0 = vpack.i.bf16 %v1280_v60, %v1234_v52  ;;  %v1428_v5 = vld [vmem:[#allocation1 + $0x106] ss:$16 sm:%s1427_s11]   ;;  %v1415_v8 = vsel %vm1038_vm2, %v1413_v3, %v1410_v4  ;;  %v1660_v22 = vld [vmem:[#allocation1 + $0x8b] ss:$16 sm:%s1659_s9]   ;;  %s1669_s16 = smov 192  ;;  %s1679_s17 = smov 3 }
  0x47   :  { %v1431_v6 = vld [vmem:[#allocation1 + $0x106] ss:$16 sm:%s1430_s29]   ;;  %v1417_v19 = vsel %vm1325_vm4, %v1415_v8, %v1397_v7  ;;  %v1662_v24 = vsel %vm1030_vm0, %v1660_v22, %v1657_v21  ;;  %v1665_v25 = vld [vmem:[#allocation1 + $0x8b] ss:$16 sm:%s1664_s10]   ;;  %s1682_s18 = smov 12  ;;  %s1687_s30 = smov 48 }
  0x48   :  { %3141 = vrot.lane.b32.xlu0 %v3140_v0, %s3267_s27  ;;  %v1433_v9 = vsel %vm1030_vm0, %v1431_v6, %v1428_v5  ;;  %v1436_v10 = vld [vmem:[#allocation1 + $0x106] ss:$16 sm:%s1435_s5]   ;;  %s1445_s27 = smov 3  ;;  %v1670_v26 = vld [vmem:[#allocation1 + $0x8b] ss:$16 sm:%s1669_s16]   ;;  %v1667_v28 = vsel %vm1034_vm1, %v1665_v25, %v1662_v24  ;;  %s1692_s2 = smov 192 }
  0x49   :  { %v1441_v11 = vld [vmem:[#allocation1 + $0x106] ss:$16 sm:%s1440_s6]   ;;  %v1438_v12 = vsel %vm1034_vm1, %v1436_v10, %v1433_v9  ;;  %v1680_v29 = vld [vmem:[#allocation1 + $0xb] ss:$16 sm:%s1679_s17]   ;;  %s1702_s0 = smov 3  ;;  %v1672_v33 = vsel %vm1038_vm2, %v1670_v26, %v1667_v28  ;;  %s1705_s8 = smov 12 }
  0x4a   :  { %v1446_v13 = vld [vmem:[#allocation1 + $0x86] ss:$16 sm:%s1445_s27]   ;;  %v1443_v15 = vsel %vm1038_vm2, %v1441_v11, %v1438_v12  ;;  %v1683_v31 = vld [vmem:[#allocation1 + $0xb] ss:$16 sm:%s1682_s18]   ;;  %s1710_s19 = smov 48  ;;  %s1725_s23 = smov 3 }
  0x4b   :  { %v1449_v14 = vld [vmem:[#allocation1 + $0x86] ss:$16 sm:%s1448_s12]   ;;  %v1688_v32 = vld [vmem:[#allocation1 + $0xb] ss:$16 sm:%s1687_s30]   ;;  %v1685_v34 = vsel %vm1030_vm0, %v1683_v31, %v1680_v29  ;;  %s1728_s24 = smov 12  ;;  %s1733_s13 = smov 48 }
  0x4c   :  { %v1451_v16 = vsel %vm1030_vm0, %v1449_v14, %v1446_v13  ;;  %v1454_v17 = vld [vmem:[#allocation1 + $0x86] ss:$16 sm:%s1453_s21]   ;;  %v1693_v35 = vld [vmem:[#allocation1 + $0xb] ss:$16 sm:%s1692_s2]   ;;  %v1690_v37 = vsel %vm1034_vm1, %v1688_v32, %v1685_v34  ;;  %s1738_s14 = smov 192  ;;  %s1748_s15 = smov 3 }
  0x4d   :  { %v1459_v18 = vld [vmem:[#allocation1 + $0x86] ss:$16 sm:%s1458_s22]   ;;  %v1456_v20 = vsel %vm1034_vm1, %v1454_v17, %v1451_v16  ;;  %v1703_v36 = vld [vmem:[#allocation1 + $0x18b] ss:$16 sm:%s1702_s0]   ;;  %v1695_v40 = vsel %vm1038_vm2, %v1693_v35, %v1690_v37  ;;  %v1749_v51 = vld [vmem:[#allocation1 + $0x4] ss:$16 sm:%s1748_s15]  }
  0x4e   :  { %v1461_v23 = vsel %vm1038_vm2, %v1459_v18, %v1456_v20  ;;  %v1706_v38 = vld [vmem:[#allocation1 + $0x18b] ss:$16 sm:%s1705_s8]   ;;  %v3145_v44 = vpack.i.bf16 %v1695_v40, %v1672_v33  ;;  %s1751_s20 = smov 12  ;;  %s1756_s25 = smov 48  ;;  %vm2316_vm3 = vcmask 351424  }
  0x4f   :  { %v1463_v27 = vsel %vm1325_vm4, %v1461_v23, %v1443_v15  ;;  %v1711_v39 = vld [vmem:[#allocation1 + $0x18b] ss:$16 sm:%s1710_s19]   ;;  %v1708_v41 = vsel %vm1030_vm0, %v1706_v38, %v1703_v36  ;;  %s3269_s3 = smov 81   ;;  %v1752_v53 = vld [vmem:[#allocation1 + $0x4] ss:$16 sm:%s1751_s20]   ;;  %s1761_s4 = smov 192 }
  0x50   :  { %v3155_v30 = vpack.i.bf16 %v1463_v27, %v1417_v19  ;;  %v1726_v43 = vld [vmem:[#allocation1 + $0x10b] ss:$16 sm:%s1725_s23]   ;;  %v1713_v45 = vsel %vm1034_vm1, %v1711_v39, %v1708_v41  ;;  %3146 = vrot.lane.b32.xlu0 %v3145_v44, %s3269_s3  ;;  %v1757_v54 = vld [vmem:[#allocation1 + $0x4] ss:$16 sm:%s1756_s25]   ;;  %v1754_v56 = vsel %vm1030_vm0, %v1752_v53, %v1749_v51  ;;  %s1770_s26 = smov 3  ;;  %s1773_s11 = smov 12 }
  0x51   :  { %v1729_v46 = vld [vmem:[#allocation1 + $0x10b] ss:$16 sm:%s1728_s24]   ;;  %v1762_v57 = vld [vmem:[#allocation1 + $0x4] ss:$16 sm:%s1761_s4]   ;;  %v1759_v59 = vsel %vm1034_vm1, %v1757_v54, %v1754_v56  ;;  %s1778_s29 = smov 48  ;;  %s1783_s5 = smov 192 }
  0x52   :  { %3156 = vrot.lane.b32.xlu1 %v3155_v30, %s3268_s7  ;;  %s1715_s7 = smov 192  ;;  %v1734_v47 = vld [vmem:[#allocation1 + $0x10b] ss:$16 sm:%s1733_s13]   ;;  %v1731_v49 = vsel %vm1030_vm0, %v1729_v46, %v1726_v43  ;;  %v1771_v60 = vld [vmem:[#allocation1 + $0x184] ss:$16 sm:%s1770_s26]   ;;  %v1764_v62 = vsel %vm1038_vm2, %v1762_v57, %v1759_v59  ;;  %s1793_s6 = smov 3 }
  0x53   :  { %v1716_v42 = vld [vmem:[#allocation1 + $0x18b] ss:$16 sm:%s1715_s7]   ;;  %v1736_v52 = vsel %vm1034_vm1, %v1734_v47, %v1731_v49  ;;  %v1774_v61 = vld [vmem:[#allocation1 + $0x184] ss:$16 sm:%s1773_s11]   ;;  %s1796_s27 = smov 12  ;;  %s1801_s12 = smov 48 }
  0x54   :  { %v1718_v48 = vsel %vm1038_vm2, %v1716_v42, %v1713_v45  ;;  %v1739_v50 = vld [vmem:[#allocation1 + $0x10b] ss:$16 sm:%s1738_s14]   ;;  %v1776_v63 = vsel %vm1030_vm0, %v1774_v61, %v1771_v60  ;;  %v1779_v0 = vld [vmem:[#allocation1 + $0x184] ss:$16 sm:%s1778_s29]   ;;  %s1806_s21 = smov 192  ;;  %s1816_s22 = smov 3 }
  0x55   :  { %v1741_v55 = vsel %vm1038_vm2, %v1739_v50, %v1736_v52  ;;  %v1784_v1 = vld [vmem:[#allocation1 + $0x184] ss:$16 sm:%s1783_s5]   ;;  %v1781_v2 = vsel %vm1034_vm1, %v1779_v0, %v1776_v63  ;;  %s1819_s28 = smov 12  ;;  %s1824_s9 = smov 48  ;;  %vm2408_vm4 = vcmask 310424  }
  0x56   :  { %v3160_v58 = vpack.i.bf16 %v1741_v55, %v1718_v48  ;;  %v1794_v3 = vld [vmem:[#allocation1 + $0x104] ss:$16 sm:%s1793_s6]   ;;  %v1786_v5 = vsel %vm1038_vm2, %v1784_v1, %v1781_v2  ;;  %s1829_s10 = smov 192  ;;  %s1839_s16 = smov 3 }
  0x57   :  { %v1797_v4 = vld [vmem:[#allocation1 + $0x104] ss:$16 sm:%s1796_s27]   ;;  %v3165_v9 = vpack.i.bf16 %v1786_v5, %v1764_v62  ;;  %s1842_s17 = smov 12  ;;  %s3270_s18 = smov 76   ;;  %v1840_v18 = vld [vmem:[#allocation1 + $0x8a] ss:$16 sm:%s1839_s16]  }
  0x58   :  { %3161 = vrot.lane.b32.xlu1 %v3160_v58, %s3269_s3  ;;  %v1799_v6 = vsel %vm1030_vm0, %v1797_v4, %v1794_v3  ;;  %v1802_v7 = vld [vmem:[#allocation1 + $0x104] ss:$16 sm:%s1801_s12]   ;;  %v1843_v19 = vld [vmem:[#allocation1 + $0x8a] ss:$16 sm:%s1842_s17]   ;;  %s1847_s30 = smov 48  ;;  %s1852_s2 = smov 192 }
  0x59   :  { %v1807_v8 = vld [vmem:[#allocation1 + $0x104] ss:$16 sm:%s1806_s21]   ;;  %v1804_v10 = vsel %vm1034_vm1, %v1802_v7, %v1799_v6  ;;  %3166 = vrot.lane.b32.xlu0 %v3165_v9, %s3270_s18  ;;  %v1845_v21 = vsel %vm1030_vm0, %v1843_v19, %v1840_v18  ;;  %v1848_v22 = vld [vmem:[#allocation1 + $0x8a] ss:$16 sm:%s1847_s30]   ;;  %s1862_s0 = smov 3  ;;  %s1865_s8 = smov 12 }
  0x5a   :  { %v1817_v11 = vld [vmem:[#allocation1 + $0x84] ss:$16 sm:%s1816_s22]   ;;  %v1809_v13 = vsel %vm1038_vm2, %v1807_v8, %v1804_v10  ;;  %v1853_v23 = vld [vmem:[#allocation1 + $0x8a] ss:$16 sm:%s1852_s2]   ;;  %v1850_v25 = vsel %vm1034_vm1, %v1848_v22, %v1845_v21  ;;  %s1870_s19 = smov 48  ;;  %s1875_s7 = smov 192 }
  0x5b   :  { %v1820_v12 = vld [vmem:[#allocation1 + $0x84] ss:$16 sm:%s1819_s28]   ;;  %v1863_v26 = vld [vmem:[#allocation1 + $0xa] ss:$16 sm:%s1862_s0]   ;;  %s1885_s23 = smov 3  ;;  %v1855_v29 = vsel %vm1038_vm2, %v1853_v23, %v1850_v25  ;;  %s1888_s24 = smov 12 }
  0x5c   :  { %v1822_v14 = vsel %vm1030_vm0, %v1820_v12, %v1817_v11  ;;  %v1825_v15 = vld [vmem:[#allocation1 + $0x84] ss:$16 sm:%s1824_s9]   ;;  %v1866_v27 = vld [vmem:[#allocation1 + $0xa] ss:$16 sm:%s1865_s8]   ;;  %s1893_s13 = smov 48  ;;  %s1898_s14 = smov 192 }
  0x5d   :  { %v1830_v16 = vld [vmem:[#allocation1 + $0x84] ss:$16 sm:%s1829_s10]   ;;  %v1827_v17 = vsel %vm1034_vm1, %v1825_v15, %v1822_v14  ;;  %v1871_v28 = vld [vmem:[#allocation1 + $0xa] ss:$16 sm:%s1870_s19]   ;;  %v1868_v30 = vsel %vm1030_vm0, %v1866_v27, %v1863_v26  ;;  %s1908_s15 = smov 3  ;;  %s1911_s20 = smov 12 }
  0x5e   :  { %v1832_v20 = vsel %vm1038_vm2, %v1830_v16, %v1827_v17  ;;  %v1876_v31 = vld [vmem:[#allocation1 + $0xa] ss:$16 sm:%s1875_s7]   ;;  %v1873_v33 = vsel %vm1034_vm1, %v1871_v28, %v1868_v30  ;;  %s1916_s25 = smov 48  ;;  %s1921_s3 = smov 192 }
  0x5f   :  { %v3170_v24 = vpack.i.bf16 %v1832_v20, %v1809_v13  ;;  %v1886_v32 = vld [vmem:[#allocation1 + $0x18a] ss:$16 sm:%s1885_s23]   ;;  %v1878_v36 = vsel %vm1038_vm2, %v1876_v31, %v1873_v33  ;;  %s1931_s4 = smov 3  ;;  %s1934_s26 = smov 12 }
  0x60   :  { %v1889_v34 = vld [vmem:[#allocation1 + $0x18a] ss:$16 sm:%s1888_s24]   ;;  %v3175_v40 = vpack.i.bf16 %v1878_v36, %v1855_v29  ;;  %v1932_v47 = vld [vmem:[#allocation1 + $0x3] ss:$16 sm:%s1931_s4]   ;;  %s1939_s11 = smov 48  ;;  %s3271_s29 = smov 62  }
  0x61   :  { %3171 = vrot.lane.b32.xlu1 %v3170_v24, %s3270_s18  ;;  %v1894_v35 = vld [vmem:[#allocation1 + $0x18a] ss:$16 sm:%s1893_s13]   ;;  %v1891_v37 = vsel %vm1030_vm0, %v1889_v34, %v1886_v32  ;;  %v1935_v49 = vld [vmem:[#allocation1 + $0x3] ss:$16 sm:%s1934_s26]   ;;  %s1944_s5 = smov 192  ;;  %s1953_s6 = smov 3 }
  0x62   :  { %v1899_v38 = vld [vmem:[#allocation1 + $0x18a] ss:$16 sm:%s1898_s14]   ;;  %v1896_v41 = vsel %vm1034_vm1, %v1894_v35, %v1891_v37  ;;  %3176 = vrot.lane.b32.xlu0 %v3175_v40, %s3271_s29  ;;  %v1940_v50 = vld [vmem:[#allocation1 + $0x3] ss:$16 sm:%s1939_s11]   ;;  %v1937_v52 = vsel %vm1030_vm0, %v1935_v49, %v1932_v47  ;;  %s1956_s27 = smov 12  ;;  %s1961_s12 = smov 48 }
  0x63   :  { %v1909_v39 = vld [vmem:[#allocation1 + $0x10a] ss:$16 sm:%s1908_s15]   ;;  %v1901_v44 = vsel %vm1038_vm2, %v1899_v38, %v1896_v41  ;;  %v1945_v53 = vld [vmem:[#allocation1 + $0x3] ss:$16 sm:%s1944_s5]   ;;  %v1942_v55 = vsel %vm1034_vm1, %v1940_v50, %v1937_v52  ;;  %s1966_s21 = smov 192  ;;  %s1976_s22 = smov 3 }
  0x64   :  { %v1912_v42 = vld [vmem:[#allocation1 + $0x10a] ss:$16 sm:%s1911_s20]   ;;  %v1954_v56 = vld [vmem:[#allocation1 + $0x183] ss:$16 sm:%s1953_s6]   ;;  %v1947_v58 = vsel %vm1038_vm2, %v1945_v53, %v1942_v55  ;;  %s1979_s28 = smov 12  ;;  %s1984_s9 = smov 48 }
  0x65   :  { %v1917_v43 = vld [vmem:[#allocation1 + $0x10a] ss:$16 sm:%s1916_s25]   ;;  %v1914_v45 = vsel %vm1030_vm0, %v1912_v42, %v1909_v39  ;;  %v1957_v57 = vld [vmem:[#allocation1 + $0x183] ss:$16 sm:%s1956_s27]   ;;  %s1989_s10 = smov 192  ;;  %s1999_s16 = smov 3 }
  0x66   :  { %v1922_v46 = vld [vmem:[#allocation1 + $0x10a] ss:$16 sm:%s1921_s3]   ;;  %v1919_v48 = vsel %vm1034_vm1, %v1917_v43, %v1914_v45  ;;  %v1959_v59 = vsel %vm1030_vm0, %v1957_v57, %v1954_v56  ;;  %v1962_v60 = vld [vmem:[#allocation1 + $0x183] ss:$16 sm:%s1961_s12]   ;;  %s2002_s17 = smov 12  ;;  %s2007_s18 = smov 48 }
  0x67   :  { %v1924_v51 = vsel %vm1038_vm2, %v1922_v46, %v1919_v48  ;;  %v1967_v61 = vld [vmem:[#allocation1 + $0x183] ss:$16 sm:%s1966_s21]   ;;  %v1964_v62 = vsel %vm1034_vm1, %v1962_v60, %v1959_v59  ;;  %s2012_s30 = smov 192  ;;  %s2022_s2 = smov 3 }
  0x68   :  { %v3180_v54 = vpack.i.bf16 %v1924_v51, %v1901_v44  ;;  %v1977_v63 = vld [vmem:[#allocation1 + $0x103] ss:$16 sm:%s1976_s22]   ;;  %v1969_v1 = vsel %vm1038_vm2, %v1967_v61, %v1964_v62  ;;  %s2025_s0 = smov 12  ;;  %s3272_s8 = smov 57   ;;  %v2023_v14 = vld [vmem:[#allocation1 + $0x89] ss:$16 sm:%s2022_s2]  }
  0x69   :  { %v1980_v0 = vld [vmem:[#allocation1 + $0x103] ss:$16 sm:%s1979_s28]   ;;  %v3185_v5 = vpack.i.bf16 %v1969_v1, %v1947_v58  ;;  %v2026_v15 = vld [vmem:[#allocation1 + $0x89] ss:$16 sm:%s2025_s0]   ;;  %s2030_s19 = smov 48  ;;  %s2035_s7 = smov 192 }
  0x6a   :  { %3181 = vrot.lane.b32.xlu1 %v3180_v54, %s3271_s29  ;;  %v1982_v2 = vsel %vm1030_vm0, %v1980_v0, %v1977_v63  ;;  %v1985_v3 = vld [vmem:[#allocation1 + $0x103] ss:$16 sm:%s1984_s9]   ;;  %v2028_v17 = vsel %vm1030_vm0, %v2026_v15, %v2023_v14  ;;  %v2031_v18 = vld [vmem:[#allocation1 + $0x89] ss:$16 sm:%s2030_s19]   ;;  %s2045_s23 = smov 3  ;;  %s2048_s24 = smov 12 }
  0x6b   :  { %v1990_v4 = vld [vmem:[#allocation1 + $0x103] ss:$16 sm:%s1989_s10]   ;;  %v1987_v6 = vsel %vm1034_vm1, %v1985_v3, %v1982_v2  ;;  %3186 = vrot.lane.b32.xlu0 %v3185_v5, %s3272_s8  ;;  %v2036_v19 = vld [vmem:[#allocation1 + $0x89] ss:$16 sm:%s2035_s7]   ;;  %v2033_v21 = vsel %vm1034_vm1, %v2031_v18, %v2028_v17  ;;  %s2053_s13 = smov 48  ;;  %s2058_s14 = smov 192 }
  0x6c   :  { %v2000_v7 = vld [vmem:[#allocation1 + $0x83] ss:$16 sm:%s1999_s16]   ;;  %v1992_v9 = vsel %vm1038_vm2, %v1990_v4, %v1987_v6  ;;  %v2046_v22 = vld [vmem:[#allocation1 + $0x9] ss:$16 sm:%s2045_s23]   ;;  %s2068_s15 = smov 3  ;;  %v2038_v25 = vsel %vm1038_vm2, %v2036_v19, %v2033_v21  ;;  %s2071_s20 = smov 12 }
  0x6d   :  { %v2003_v8 = vld [vmem:[#allocation1 + $0x83] ss:$16 sm:%s2002_s17]   ;;  %v2049_v23 = vld [vmem:[#allocation1 + $0x9] ss:$16 sm:%s2048_s24]   ;;  %s2076_s25 = smov 48  ;;  %s2081_s3 = smov 192 }
  0x6e   :  { %v2005_v10 = vsel %vm1030_vm0, %v2003_v8, %v2000_v7  ;;  %v2008_v11 = vld [vmem:[#allocation1 + $0x83] ss:$16 sm:%s2007_s18]   ;;  %v2054_v24 = vld [vmem:[#allocation1 + $0x9] ss:$16 sm:%s2053_s13]   ;;  %v2051_v26 = vsel %vm1030_vm0, %v2049_v23, %v2046_v22  ;;  %s2091_s4 = smov 3  ;;  %s2094_s26 = smov 12 }
  0x6f   :  { %v2013_v12 = vld [vmem:[#allocation1 + $0x83] ss:$16 sm:%s2012_s30]   ;;  %v2010_v13 = vsel %vm1034_vm1, %v2008_v11, %v2005_v10  ;;  %v2059_v27 = vld [vmem:[#allocation1 + $0x9] ss:$16 sm:%s2058_s14]   ;;  %v2056_v29 = vsel %vm1034_vm1, %v2054_v24, %v2051_v26  ;;  %s2099_s11 = smov 48  ;;  %s2104_s29 = smov 192 }
  0x70   :  { %v2015_v16 = vsel %vm1038_vm2, %v2013_v12, %v2010_v13  ;;  %v2069_v28 = vld [vmem:[#allocation1 + $0x189] ss:$16 sm:%s2068_s15]   ;;  %v2061_v32 = vsel %vm1038_vm2, %v2059_v27, %v2056_v29  ;;  %s2114_s5 = smov 3  ;;  %s2117_s6 = smov 12 }
  0x71   :  { %v3190_v20 = vpack.i.bf16 %v2015_v16, %v1992_v9  ;;  %v2072_v30 = vld [vmem:[#allocation1 + $0x189] ss:$16 sm:%s2071_s20]   ;;  %v3195_v36 = vpack.i.bf16 %v2061_v32, %v2038_v25  ;;  %v2115_v43 = vld [vmem:[#allocation1 + $0x2] ss:$16 sm:%s2114_s5]   ;;  %s2122_s27 = smov 48  ;;  %s3273_s12 = smov 43  }
  0x72   :  { %v2077_v31 = vld [vmem:[#allocation1 + $0x189] ss:$16 sm:%s2076_s25]   ;;  %v2074_v33 = vsel %vm1030_vm0, %v2072_v30, %v2069_v28  ;;  %v2118_v45 = vld [vmem:[#allocation1 + $0x2] ss:$16 sm:%s2117_s6]   ;;  %s2127_s21 = smov 192  ;;  %s2136_s22 = smov 3 }
  0x73   :  { %3191 = vrot.lane.b32.xlu1 %v3190_v20, %s3272_s8  ;;  %v2082_v34 = vld [vmem:[#allocation1 + $0x189] ss:$16 sm:%s2081_s3]   ;;  %v2079_v37 = vsel %vm1034_vm1, %v2077_v31, %v2074_v33  ;;  %3196 = vrot.lane.b32.xlu0 %v3195_v36, %s3273_s12  ;;  %v2123_v46 = vld [vmem:[#allocation1 + $0x2] ss:$16 sm:%s2122_s27]   ;;  %v2120_v48 = vsel %vm1030_vm0, %v2118_v45, %v2115_v43  ;;  %s2139_s28 = smov 12  ;;  %s2144_s9 = smov 48 }
  0x74   :  { %v2092_v35 = vld [vmem:[#allocation1 + $0x109] ss:$16 sm:%s2091_s4]   ;;  %v2084_v40 = vsel %vm1038_vm2, %v2082_v34, %v2079_v37  ;;  %v2128_v49 = vld [vmem:[#allocation1 + $0x2] ss:$16 sm:%s2127_s21]   ;;  %v2125_v51 = vsel %vm1034_vm1, %v2123_v46, %v2120_v48  ;;  %s2149_s10 = smov 192  ;;  %s2159_s16 = smov 3 }
  0x75   :  { %v2095_v38 = vld [vmem:[#allocation1 + $0x109] ss:$16 sm:%s2094_s26]   ;;  %v2137_v52 = vld [vmem:[#allocation1 + $0x182] ss:$16 sm:%s2136_s22]   ;;  %v2130_v54 = vsel %vm1038_vm2, %v2128_v49, %v2125_v51  ;;  %s2162_s17 = smov 12  ;;  %s2167_s18 = smov 48 }
  0x76   :  { %v2100_v39 = vld [vmem:[#allocation1 + $0x109] ss:$16 sm:%s2099_s11]   ;;  %v2097_v41 = vsel %vm1030_vm0, %v2095_v38, %v2092_v35  ;;  %v2140_v53 = vld [vmem:[#allocation1 + $0x182] ss:$16 sm:%s2139_s28]   ;;  %s2172_s30 = smov 192  ;;  %s2182_s2 = smov 3 }
  0x77   :  { %v2105_v42 = vld [vmem:[#allocation1 + $0x109] ss:$16 sm:%s2104_s29]   ;;  %v2102_v44 = vsel %vm1034_vm1, %v2100_v39, %v2097_v41  ;;  %v2142_v55 = vsel %vm1030_vm0, %v2140_v53, %v2137_v52  ;;  %v2145_v56 = vld [vmem:[#allocation1 + $0x182] ss:$16 sm:%s2144_s9]   ;;  %s2185_s0 = smov 12  ;;  %s2190_s8 = smov 48 }
  0x78   :  { %v2107_v47 = vsel %vm1038_vm2, %v2105_v42, %v2102_v44  ;;  %v2150_v57 = vld [vmem:[#allocation1 + $0x182] ss:$16 sm:%s2149_s10]   ;;  %v2147_v58 = vsel %vm1034_vm1, %v2145_v56, %v2142_v55  ;;  %s2195_s19 = smov 192  ;;  %s2205_s7 = smov 3 }
  0x79   :  { %v3200_v50 = vpack.i.bf16 %v2107_v47, %v2084_v40  ;;  %v2160_v59 = vld [vmem:[#allocation1 + $0x102] ss:$16 sm:%s2159_s16]   ;;  %v2152_v61 = vsel %vm1038_vm2, %v2150_v57, %v2147_v58  ;;  %s2208_s23 = smov 12  ;;  %s3274_s24 = smov 38   ;;  %v2206_v10 = vld [vmem:[#allocation1 + $0x10f] ss:$16 sm:%s2205_s7]  }
  0x7a   :  { %v2163_v60 = vld [vmem:[#allocation1 + $0x102] ss:$16 sm:%s2162_s17]   ;;  %v3205_v1 = vpack.i.bf16 %v2152_v61, %v2130_v54  ;;  %v2209_v11 = vld [vmem:[#allocation1 + $0x10f] ss:$16 sm:%s2208_s23]   ;;  %s2213_s13 = smov 48  ;;  %s2218_s14 = smov 192 }
  0x7b   :  { %3201 = vrot.lane.b32.xlu1 %v3200_v50, %s3273_s12  ;;  %v2165_v62 = vsel %vm1030_vm0, %v2163_v60, %v2160_v59  ;;  %v2168_v63 = vld [vmem:[#allocation1 + $0x102] ss:$16 sm:%s2167_s18]   ;;  %v2211_v13 = vsel %vm1030_vm0, %v2209_v11, %v2206_v10  ;;  %v2214_v14 = vld [vmem:[#allocation1 + $0x10f] ss:$16 sm:%s2213_s13]   ;;  %s2228_s15 = smov 3  ;;  %s2231_s20 = smov 12 }
  0x7c   :  { %v2173_v0 = vld [vmem:[#allocation1 + $0x102] ss:$16 sm:%s2172_s30]   ;;  %v2170_v2 = vsel %vm1034_vm1, %v2168_v63, %v2165_v62  ;;  %3206 = vrot.lane.b32.xlu0 %v3205_v1, %s3274_s24  ;;  %v2219_v15 = vld [vmem:[#allocation1 + $0x10f] ss:$16 sm:%s2218_s14]   ;;  %v2216_v17 = vsel %vm1034_vm1, %v2214_v14, %v2211_v13  ;;  %s2236_s25 = smov 48  ;;  %s2241_s3 = smov 192 }
  0x7d   :  { %v2183_v3 = vld [vmem:[#allocation1 + $0x82] ss:$16 sm:%s2182_s2]   ;;  %v2175_v5 = vsel %vm1038_vm2, %v2173_v0, %v2170_v2  ;;  %v2229_v18 = vld [vmem:[#allocation1 + $0x8f] ss:$16 sm:%s2228_s15]   ;;  %s2251_s4 = smov 3  ;;  %v2221_v21 = vsel %vm1038_vm2, %v2219_v15, %v2216_v17  ;;  %s2254_s26 = smov 12 }
  0x7e   :  { %v2186_v4 = vld [vmem:[#allocation1 + $0x82] ss:$16 sm:%s2185_s0]   ;;  %v2232_v19 = vld [vmem:[#allocation1 + $0x8f] ss:$16 sm:%s2231_s20]   ;;  %s2259_s11 = smov 48  ;;  %s2264_s29 = smov 192 }
  0x7f   :  { %v2188_v6 = vsel %vm1030_vm0, %v2186_v4, %v2183_v3  ;;  %v2191_v7 = vld [vmem:[#allocation1 + $0x82] ss:$16 sm:%s2190_s8]   ;;  %v2237_v20 = vld [vmem:[#allocation1 + $0x8f] ss:$16 sm:%s2236_s25]   ;;  %v2234_v22 = vsel %vm1030_vm0, %v2232_v19, %v2229_v18  ;;  %s2274_s5 = smov 3  ;;  %s2277_s6 = smov 12 }
  0x80   :  { %v2196_v8 = vld [vmem:[#allocation1 + $0x82] ss:$16 sm:%s2195_s19]   ;;  %v2193_v9 = vsel %vm1034_vm1, %v2191_v7, %v2188_v6  ;;  %v2242_v23 = vld [vmem:[#allocation1 + $0x8f] ss:$16 sm:%s2241_s3]   ;;  %v2239_v25 = vsel %vm1034_vm1, %v2237_v20, %v2234_v22  ;;  %s2282_s27 = smov 48  ;;  %s2287_s12 = smov 192 }
  0x81   :  { %v2198_v12 = vsel %vm1038_vm2, %v2196_v8, %v2193_v9  ;;  %v2252_v24 = vld [vmem:[#allocation1 + $0xf] ss:$16 sm:%s2251_s4]   ;;  %v2244_v28 = vsel %vm1038_vm2, %v2242_v23, %v2239_v25  ;;  %s2297_s21 = smov 3  ;;  %s2300_s22 = smov 12 }
  0x82   :  { %v3210_v16 = vpack.i.bf16 %v2198_v12, %v2175_v5  ;;  %v2255_v26 = vld [vmem:[#allocation1 + $0xf] ss:$16 sm:%s2254_s26]   ;;  %v3215_v32 = vpack.i.bf16 %v2244_v28, %v2221_v21  ;;  %v2298_v39 = vld [vmem:[#allocation1 + $0x88] ss:$16 sm:%s2297_s21]   ;;  %s2305_s28 = smov 48  ;;  %s3275_s9 = smov 29  }
  0x83   :  { %v2260_v27 = vld [vmem:[#allocation1 + $0xf] ss:$16 sm:%s2259_s11]   ;;  %v2257_v29 = vsel %vm1030_vm0, %v2255_v26, %v2252_v24  ;;  %v2301_v41 = vld [vmem:[#allocation1 + $0x88] ss:$16 sm:%s2300_s22]   ;;  %s2310_s10 = smov 192  ;;  %s2320_s16 = smov 3 }
  0x84   :  { %3211 = vrot.lane.b32.xlu1 %v3210_v16, %s3274_s24  ;;  %v2265_v30 = vld [vmem:[#allocation1 + $0xf] ss:$16 sm:%s2264_s29]   ;;  %v2262_v33 = vsel %vm1034_vm1, %v2260_v27, %v2257_v29  ;;  %3216 = vrot.lane.b32.xlu0 %v3215_v32, %s3275_s9  ;;  %v2306_v42 = vld [vmem:[#allocation1 + $0x88] ss:$16 sm:%s2305_s28]   ;;  %v2303_v44 = vsel %vm1030_vm0, %v2301_v41, %v2298_v39  ;;  %s2323_s17 = smov 12  ;;  %s2328_s18 = smov 48 }
  0x85   :  { %v2275_v31 = vld [vmem:[#allocation1 + $0x18f] ss:$16 sm:%s2274_s5]   ;;  %v2267_v36 = vsel %vm1038_vm2, %v2265_v30, %v2262_v33  ;;  %v2311_v45 = vld [vmem:[#allocation1 + $0x88] ss:$16 sm:%s2310_s10]   ;;  %v2308_v47 = vsel %vm1034_vm1, %v2306_v42, %v2303_v44  ;;  %s2333_s30 = smov 192  ;;  %s2343_s2 = smov 3 }
  0x86   :  { %v2278_v34 = vld [vmem:[#allocation1 + $0x18f] ss:$16 sm:%s2277_s6]   ;;  %v2321_v48 = vld [vmem:[#allocation1 + $0x8] ss:$16 sm:%s2320_s16]   ;;  %v2313_v50 = vsel %vm1038_vm2, %v2311_v45, %v2308_v47  ;;  %s2346_s0 = smov 12  ;;  %s2351_s8 = smov 48 }
  0x87   :  { %v2283_v35 = vld [vmem:[#allocation1 + $0x18f] ss:$16 sm:%s2282_s27]   ;;  %v2280_v37 = vsel %vm1030_vm0, %v2278_v34, %v2275_v31  ;;  %v2324_v49 = vld [vmem:[#allocation1 + $0x8] ss:$16 sm:%s2323_s17]   ;;  %s2356_s19 = smov 192  ;;  %s2366_s7 = smov 3 }
  0x88   :  { %v2288_v38 = vld [vmem:[#allocation1 + $0x18f] ss:$16 sm:%s2287_s12]   ;;  %v2285_v40 = vsel %vm1034_vm1, %v2283_v35, %v2280_v37  ;;  %v2326_v51 = vsel %vm1030_vm0, %v2324_v49, %v2321_v48  ;;  %v2329_v52 = vld [vmem:[#allocation1 + $0x8] ss:$16 sm:%s2328_s18]   ;;  %s2369_s23 = smov 12  ;;  %s2374_s24 = smov 48 }
  0x89   :  { %v2290_v43 = vsel %vm1038_vm2, %v2288_v38, %v2285_v40  ;;  %v2334_v53 = vld [vmem:[#allocation1 + $0x8] ss:$16 sm:%s2333_s30]   ;;  %v2331_v54 = vsel %vm1034_vm1, %v2329_v52, %v2326_v51  ;;  %s2379_s13 = smov 192  ;;  %s2389_s14 = smov 3 }
  0x8a   :  { %v3220_v46 = vpack.i.bf16 %v2290_v43, %v2267_v36  ;;  %v2344_v55 = vld [vmem:[#allocation1 + $0x188] ss:$16 sm:%s2343_s2]   ;;  %v2336_v57 = vsel %vm1038_vm2, %v2334_v53, %v2331_v54  ;;  %s2392_s15 = smov 12  ;;  %s3276_s20 = smov 24   ;;  %v2390_v6 = vld [vmem:[#allocation1 + $0x1] ss:$16 sm:%s2389_s14]  }
  0x8b   :  { %v2347_v56 = vld [vmem:[#allocation1 + $0x188] ss:$16 sm:%s2346_s0]   ;;  %v3225_v61 = vpack.i.bf16 %v2336_v57, %v2313_v50  ;;  %v2393_v7 = vld [vmem:[#allocation1 + $0x1] ss:$16 sm:%s2392_s15]   ;;  %s2397_s25 = smov 48  ;;  %s2402_s3 = smov 192 }
  0x8c   :  { %3221 = vrot.lane.b32.xlu1 %v3220_v46, %s3275_s9  ;;  %v2349_v58 = vsel %vm1030_vm0, %v2347_v56, %v2344_v55  ;;  %v2352_v59 = vld [vmem:[#allocation1 + $0x188] ss:$16 sm:%s2351_s8]   ;;  %v2395_v9 = vsel %vm1030_vm0, %v2393_v7, %v2390_v6  ;;  %v2398_v10 = vld [vmem:[#allocation1 + $0x1] ss:$16 sm:%s2397_s25]   ;;  %s2411_s4 = smov 3  ;;  %s2414_s26 = smov 12 }
  0x8d   :  { %v2357_v60 = vld [vmem:[#allocation1 + $0x188] ss:$16 sm:%s2356_s19]   ;;  %v2354_v62 = vsel %vm1034_vm1, %v2352_v59, %v2349_v58  ;;  %3226 = vrot.lane.b32.xlu0 %v3225_v61, %s3276_s20  ;;  %v2403_v11 = vld [vmem:[#allocation1 + $0x1] ss:$16 sm:%s2402_s3]   ;;  %v2400_v13 = vsel %vm1034_vm1, %v2398_v10, %v2395_v9  ;;  %s2419_s11 = smov 48  ;;  %s2424_s29 = smov 192 }
  0x8e   :  { %v2367_v63 = vld [vmem:[#allocation1 + $0x108] ss:$16 sm:%s2366_s7]   ;;  %v2359_v1 = vsel %vm1038_vm2, %v2357_v60, %v2354_v62  ;;  %v2412_v14 = vld [vmem:[#allocation1 + $0x181] ss:$16 sm:%s2411_s4]   ;;  %s2434_s5 = smov 3  ;;  %v2405_v17 = vsel %vm1038_vm2, %v2403_v11, %v2400_v13  ;;  %s2437_s6 = smov 12 }
  0x8f   :  { %v2370_v0 = vld [vmem:[#allocation1 + $0x108] ss:$16 sm:%s2369_s23]   ;;  %v2415_v15 = vld [vmem:[#allocation1 + $0x181] ss:$16 sm:%s2414_s26]   ;;  %s2442_s27 = smov 48  ;;  %s2447_s12 = smov 192 }
  0x90   :  { %v2372_v2 = vsel %vm1030_vm0, %v2370_v0, %v2367_v63  ;;  %v2375_v3 = vld [vmem:[#allocation1 + $0x108] ss:$16 sm:%s2374_s24]   ;;  %v2420_v16 = vld [vmem:[#allocation1 + $0x181] ss:$16 sm:%s2419_s11]   ;;  %v2417_v18 = vsel %vm1030_vm0, %v2415_v15, %v2412_v14  ;;  %s2457_s21 = smov 3  ;;  %s2460_s22 = smov 12 }
  0x91   :  { %v2380_v4 = vld [vmem:[#allocation1 + $0x108] ss:$16 sm:%s2379_s13]   ;;  %v2377_v5 = vsel %vm1034_vm1, %v2375_v3, %v2372_v2  ;;  %v2425_v19 = vld [vmem:[#allocation1 + $0x181] ss:$16 sm:%s2424_s29]   ;;  %v2422_v21 = vsel %vm1034_vm1, %v2420_v16, %v2417_v18  ;;  %s2465_s28 = smov 48  ;;  %s2470_s9 = smov 192 }
  0x92   :  { %v2382_v8 = vsel %vm1038_vm2, %v2380_v4, %v2377_v5  ;;  %v2435_v20 = vld [vmem:[#allocation1 + $0x101] ss:$16 sm:%s2434_s5]   ;;  %v2427_v24 = vsel %vm1038_vm2, %v2425_v19, %v2422_v21  ;;  %s2480_s10 = smov 3  ;;  %s2483_s16 = smov 12 }
  0x93   :  { %v3230_v12 = vpack.i.bf16 %v2382_v8, %v2359_v1  ;;  %v2438_v22 = vld [vmem:[#allocation1 + $0x101] ss:$16 sm:%s2437_s6]   ;;  %v3235_v29 = vpack.i.bf16 %v2427_v24, %v2405_v17  ;;  %v2481_v36 = vld [vmem:[#allocation1 + $0x10e] ss:$16 sm:%s2480_s10]   ;;  %s2488_s17 = smov 48  ;;  %s3277_s18 = smov 19  }
  0x94   :  { %v2443_v23 = vld [vmem:[#allocation1 + $0x101] ss:$16 sm:%s2442_s27]   ;;  %v2440_v25 = vsel %vm1030_vm0, %v2438_v22, %v2435_v20  ;;  %v2484_v38 = vld [vmem:[#allocation1 + $0x10e] ss:$16 sm:%s2483_s16]   ;;  %s2493_s30 = smov 192  ;;  %s2503_s2 = smov 3 }
  0x95   :  { %3231 = vrot.lane.b32.xlu1 %v3230_v12, %s3276_s20  ;;  %v2448_v26 = vld [vmem:[#allocation1 + $0x101] ss:$16 sm:%s2447_s12]   ;;  %v2445_v30 = vsel %vm1034_vm1, %v2443_v23, %v2440_v25  ;;  %3236 = vrot.lane.b32.xlu0 %v3235_v29, %s3277_s18  ;;  %v2489_v39 = vld [vmem:[#allocation1 + $0x10e] ss:$16 sm:%s2488_s17]   ;;  %v2486_v41 = vsel %vm1030_vm0, %v2484_v38, %v2481_v36  ;;  %s2506_s0 = smov 12  ;;  %s2511_s8 = smov 48 }
  0x96   :  { %v2458_v27 = vld [vmem:[#allocation1 + $0x81] ss:$16 sm:%s2457_s21]   ;;  %v3673_v28 = vpop.permute.xlu0 %3116  ;;  %v2450_v33 = vsel %vm1038_vm2, %v2448_v26, %v2445_v30  ;;  %v2494_v42 = vld [vmem:[#allocation1 + $0x10e] ss:$16 sm:%s2493_s30]   ;;  %v2491_v44 = vsel %vm1034_vm1, %v2489_v39, %v2486_v41  ;;  %s2516_s19 = smov 192  ;;  %s2526_s7 = smov 3 }
  0x97   :  { %v2461_v31 = vld [vmem:[#allocation1 + $0x81] ss:$16 sm:%s2460_s22]   ;;  %v2504_v45 = vld [vmem:[#allocation1 + $0x8e] ss:$16 sm:%s2503_s2]   ;;  %v2496_v47 = vsel %vm1038_vm2, %v2494_v42, %v2491_v44  ;;  %s2529_s23 = smov 12  ;;  %s2534_s24 = smov 48 }
  0x98   :  { %v2466_v32 = vld [vmem:[#allocation1 + $0x81] ss:$16 sm:%s2465_s28]   ;;  %v2463_v34 = vsel %vm1030_vm0, %v2461_v31, %v2458_v27  ;;  %v2507_v46 = vld [vmem:[#allocation1 + $0x8e] ss:$16 sm:%s2506_s0]   ;;  %s2539_s13 = smov 192  ;;  %s2549_s14 = smov 3 }
  0x99   :  { %v2471_v35 = vld [vmem:[#allocation1 + $0x81] ss:$16 sm:%s2470_s9]   ;;  %v2468_v37 = vsel %vm1034_vm1, %v2466_v32, %v2463_v34  ;;  %v2509_v48 = vsel %vm1030_vm0, %v2507_v46, %v2504_v45  ;;  %v2512_v49 = vld [vmem:[#allocation1 + $0x8e] ss:$16 sm:%s2511_s8]   ;;  %s2552_s15 = smov 12  ;;  %s2557_s20 = smov 48 }
  0x9a   :  { %v2473_v40 = vsel %vm1038_vm2, %v2471_v35, %v2468_v37  ;;  %v2517_v50 = vld [vmem:[#allocation1 + $0x8e] ss:$16 sm:%s2516_s19]   ;;  %v2514_v51 = vsel %vm1034_vm1, %v2512_v49, %v2509_v48  ;;  %s2562_s25 = smov 192  ;;  %s2572_s3 = smov 3 }
  0x9b   :  { %v3240_v43 = vpack.i.bf16 %v2473_v40, %v2450_v33  ;;  %v2527_v52 = vld [vmem:[#allocation1 + $0xe] ss:$16 sm:%s2526_s7]   ;;  %v2519_v54 = vsel %vm1038_vm2, %v2517_v50, %v2514_v51  ;;  %s2575_s4 = smov 12  ;;  %s3278_s26 = smov 10   ;;  %v2573_v4 = vld [vmem:[#allocation1 + $0x87] ss:$16 sm:%s2572_s3]  }
  0x9c   :  { %v2530_v53 = vld [vmem:[#allocation1 + $0xe] ss:$16 sm:%s2529_s23]   ;;  %v3245_v58 = vpack.i.bf16 %v2519_v54, %v2496_v47  ;;  %v2576_v5 = vld [vmem:[#allocation1 + $0x87] ss:$16 sm:%s2575_s4]   ;;  %s2580_s11 = smov 48  ;;  %s2585_s29 = smov 192 }
  0x9d   :  { %3241 = vrot.lane.b32.xlu1 %v3240_v43, %s3277_s18  ;;  %v2532_v55 = vsel %vm1030_vm0, %v2530_v53, %v2527_v52  ;;  %v2535_v56 = vld [vmem:[#allocation1 + $0xe] ss:$16 sm:%s2534_s24]   ;;  %v2578_v7 = vsel %vm1030_vm0, %v2576_v5, %v2573_v4  ;;  %v2581_v8 = vld [vmem:[#allocation1 + $0x87] ss:$16 sm:%s2580_s11]   ;;  %s2595_s5 = smov 3  ;;  %s2598_s6 = smov 12 }
  0x9e   :  { %v2540_v57 = vld [vmem:[#allocation1 + $0xe] ss:$16 sm:%s2539_s13]   ;;  %v2537_v59 = vsel %vm1034_vm1, %v2535_v56, %v2532_v55  ;;  %3246 = vrot.lane.b32.xlu0 %v3245_v58, %s3278_s26  ;;  %v2586_v9 = vld [vmem:[#allocation1 + $0x87] ss:$16 sm:%s2585_s29]   ;;  %v2583_v12 = vsel %vm1034_vm1, %v2581_v8, %v2578_v7  ;;  %s2603_s27 = smov 48  ;;  %s2608_s12 = smov 192 }
  0x9f   :  { %v2550_v60 = vld [vmem:[#allocation1 + $0x18e] ss:$16 sm:%s2549_s14]   ;;  %v2542_v63 = vsel %vm1038_vm2, %v2540_v57, %v2537_v59  ;;  %v2596_v13 = vld [vmem:[#allocation1 + $0x7] ss:$16 sm:%s2595_s5]   ;;  %s2618_s21 = smov 3  ;;  %v2588_v17 = vsel %vm1038_vm2, %v2586_v9, %v2583_v12  ;;  %s2621_s22 = smov 12 }
  0xa0   :  { %v2553_v61 = vld [vmem:[#allocation1 + $0x18e] ss:$16 sm:%s2552_s15]   ;;  %v2599_v15 = vld [vmem:[#allocation1 + $0x7] ss:$16 sm:%s2598_s6]   ;;  %s2626_s28 = smov 48  ;;  %s2631_s9 = smov 192 }
  0xa1   :  { %v2555_v0 = vsel %vm1030_vm0, %v2553_v61, %v2550_v60  ;;  %v2558_v1 = vld [vmem:[#allocation1 + $0x18e] ss:$16 sm:%s2557_s20]   ;;  %v2604_v16 = vld [vmem:[#allocation1 + $0x7] ss:$16 sm:%s2603_s27]   ;;  %v2601_v18 = vsel %vm1030_vm0, %v2599_v15, %v2596_v13  ;;  %s2641_s10 = smov 3  ;;  %s2644_s16 = smov 12 }
  0xa2   :  { %v3688_v62 = vpop.permute.xlu1 %3121  ;;  %v2563_v2 = vld [vmem:[#allocation1 + $0x18e] ss:$16 sm:%s2562_s25]   ;;  %v2560_v3 = vsel %vm1034_vm1, %v2558_v1, %v2555_v0  ;;  %v2609_v19 = vld [vmem:[#allocation1 + $0x7] ss:$16 sm:%s2608_s12]   ;;  %v2606_v21 = vsel %vm1034_vm1, %v2604_v16, %v2601_v18  ;;  %s2649_s17 = smov 48  ;;  %s2654_s18 = smov 192 }
  0xa3   :  { %v2565_v6 = vsel %vm1038_vm2, %v2563_v2, %v2560_v3  ;;  %v2619_v20 = vld [vmem:[#allocation1 + $0x187] ss:$16 sm:%s2618_s21]   ;;  %v2611_v24 = vsel %vm1038_vm2, %v2609_v19, %v2606_v21  ;;  %s1026_s30 = smov 3  ;;  %s1028_s2 = smov 12 }
  0xa4   :  { %v3250_v11 = vpack.i.bf16 %v2565_v6, %v2542_v63  ;;  %v2622_v22 = vld [vmem:[#allocation1 + $0x187] ss:$16 sm:%s2621_s22]   ;;  %v3255_v29 = vpack.i.bf16 %v2611_v24, %v2588_v17  ;;  %v1027_v36 = vld [vmem:[#allocation1] ss:$16 sm:%s1026_s30]   ;;  %s1032_s0 = smov 48  ;;  %s3279_s8 = smov 5  }
  0xa5   :  { %v2627_v23 = vld [vmem:[#allocation1 + $0x187] ss:$16 sm:%s2626_s28]   ;;  %v2624_v25 = vsel %vm1030_vm0, %v2622_v22, %v2619_v20  ;;  %v1029_v38 = vld [vmem:[#allocation1] ss:$16 sm:%s1028_s2]   ;;  %s1036_s19 = smov 192  ;;  %s1085_s7 = smov 3  ;;  %v3124_v20 = vunpack.i.h.bf16 %v3688_v62  ;;  %v3123_v62 = vunpack.i.l.bf16 %v3688_v62 }
  0xa6   :  { %v3698_v14 = vpop.permute.xlu1 %3131  ;;  %3251 = vrot.lane.b32.xlu1 %v3250_v11, %s3278_s26  ;;  %v2632_v26 = vld [vmem:[#allocation1 + $0x187] ss:$16 sm:%s2631_s9]   ;;  %v2629_v30 = vsel %vm1034_vm1, %v2627_v23, %v2624_v25  ;;  %3256 = vrot.lane.b32.xlu0 %v3255_v29, %s3279_s8  ;;  %v1033_v39 = vld [vmem:[#allocation1] ss:$16 sm:%s1032_s0]   ;;  %v1031_v42 = vsel %vm1030_vm0, %v1029_v38, %v1027_v36  ;;  %s1088_s23 = smov 12  ;;  %s1093_s24 = smov 48  ;;  %v3119_v11 = vunpack.i.h.bf16 %v3673_v28  ;;  %v3118_v28 = vunpack.i.l.bf16 %v3673_v28 }
  0xa7   :  { %v3695_v10 = vpop.permute.xlu0 %3126  ;;  %v2642_v27 = vld [vmem:[#allocation1 + $0x107] ss:$16 sm:%s2641_s10]   ;;  %v2634_v33 = vsel %vm1038_vm2, %v2632_v26, %v2629_v30  ;;  %v1037_v43 = vld [vmem:[#allocation1] ss:$16 sm:%s1036_s19]   ;;  %v1035_v48 = vsel %vm1034_vm1, %v1033_v39, %v1031_v42  ;;  %s1098_s13 = smov 192  ;;  %s1043_s14 = smov 3  ;;  %v3134_v21 = vunpack.i.h.bf16 %v3698_v14  ;;  %v3133_v14 = vunpack.i.l.bf16 %v3698_v14 }
  0xa8   :  { %v2645_v31 = vld [vmem:[#allocation1 + $0x107] ss:$16 sm:%s2644_s16]   ;;  %v1086_v44 = vld [vmem:[#allocation1 + $0x180] ss:$16 sm:%s1085_s7]   ;;  %v1039_v51 = vsel %vm1038_vm2, %v1037_v43, %v1035_v48  ;;  %s1046_s15 = smov 12  ;;  %s1051_s20 = smov 48  ;;  %v3129_v12 = vunpack.i.h.bf16 %v3695_v10  ;;  %v3128_v10 = vunpack.i.l.bf16 %v3695_v10 }
  0xa9   :  { %v2650_v32 = vld [vmem:[#allocation1 + $0x107] ss:$16 sm:%s2649_s17]   ;;  %v2647_v34 = vsel %vm1030_vm0, %v2645_v31, %v2642_v27  ;;  %v1089_v49 = vld [vmem:[#allocation1 + $0x180] ss:$16 sm:%s1088_s23]   ;;  %1041 = vst.msk [vmem:[#allocation0] sm:$0xff] %vm1040_vm7, %v1039_v51   ;;  %s1056_s25 = smov 192 }
  0xaa   :  { %v2655_v35 = vld [vmem:[#allocation1 + $0x107] ss:$16 sm:%s2654_s18]   ;;  %v2652_v37 = vsel %vm1034_vm1, %v2650_v32, %v2647_v34  ;;  %v1094_v50 = vld [vmem:[#allocation1 + $0x180] ss:$16 sm:%s1093_s24]   ;;  %v1091_v52 = vsel %vm1030_vm0, %v1089_v49, %v1086_v44  ;;  %s1064_s3 = smov 3  ;;  %s1067_s4 = smov 12 }
  0xab   :  { %v2657_v40 = vsel %vm1038_vm2, %v2655_v35, %v2652_v37  ;;  %v3137_v41 = vpop.permute.xlu0 %3136  ;;  %v1099_v53 = vld [vmem:[#allocation1 + $0x180] ss:$16 sm:%s1098_s13]   ;;  %v1096_v55 = vsel %vm1034_vm1, %v1094_v50, %v1091_v52  ;;  %s1072_s26 = smov 48  ;;  %s1077_s11 = smov 192 }
  0xac   :  { %v3260_v45 = vpack.i.bf16 %v2657_v40, %v2634_v33  ;;  %v3139_v46 = vunpack.i.h.bf16 %v3137_v41  ;;  %v3138_v47 = vunpack.i.l.bf16 %v3137_v41  ;;  %v1044_v54 = vld [vmem:[#allocation1 + $0x80] ss:$16 sm:%s1043_s14]   ;;  %v1101_v58 = vsel %vm1038_vm2, %v1099_v53, %v1096_v55 }
  0xad   :  { %v1047_v56 = vld [vmem:[#allocation1 + $0x80] ss:$16 sm:%s1046_s15]   ;;  %1104 = vst.msk [vmem:[#allocation0 + $0x48] sm:$0xff] %vm1040_vm7, %v1101_v58  }
  0xae   :  { %3261 = vrot.lane.b32.xlu1 %v3260_v45, %s3279_s8  ;;  %1193 = vst.msk [vmem:[#allocation0 + $0x28] sm:$0xff] %vm1145_vm5, %v3139_v46   ;;  %1147 = vst.msk [vmem:[#allocation0 + $0x40] sm:$0xff] %vm1145_vm5, %v3138_v47   ;;  %v1052_v57 = vld [vmem:[#allocation1 + $0x80] ss:$16 sm:%s1051_s20]   ;;  %v1049_v59 = vsel %vm1030_vm0, %v1047_v56, %v1044_v54 }
  0xaf   :  { %1196 = vst.msk [vmem:[#allocation0 + $0x8] sm:$0xff] %vm1148_vm6, %v3139_v46   ;;  %1150 = vst.msk [vmem:[#allocation0 + $0x20] sm:$0xff] %vm1148_vm6, %v3138_v47   ;;  %v1057_v60 = vld [vmem:[#allocation1 + $0x80] ss:$16 sm:%s1056_s25]   ;;  %v1054_v63 = vsel %vm1034_vm1, %v1052_v57, %v1049_v59 }
  0xb0   :  { %v1065_v61 = vld [vmem:[#allocation1 + $0x100] ss:$16 sm:%s1064_s3]   ;;  %v1059_v2 = vsel %vm1038_vm2, %v1057_v60, %v1054_v63 }
  0xb1   :  { %v1068_v0 = vld [vmem:[#allocation1 + $0x100] ss:$16 sm:%s1067_s4]   ;;  %1062 = vst.msk [vmem:[#allocation0 + $0x18] sm:$0xff] %vm1040_vm7, %v1059_v2  }
  0xb2   :  { %v1073_v1 = vld [vmem:[#allocation1 + $0x100] ss:$16 sm:%s1072_s26]   ;;  %v1070_v3 = vsel %vm1030_vm0, %v1068_v0, %v1065_v61  ;;  %vm2041_vm0 = vcmask 507224  }
  0xb3   :  { %v1078_v4 = vld [vmem:[#allocation1 + $0x100] ss:$16 sm:%s1077_s11]   ;;  %v1075_v5 = vsel %vm1034_vm1, %v1073_v1, %v1070_v3  ;;  %v3152_v6 = vpop.permute.xlu1 %3151  ;;  %vm2133_vm1 = vcmask 466224  }
  0xb4   :  { %v1080_v7 = vsel %vm1038_vm2, %v1078_v4, %v1075_v5  ;;  %v3154_v8 = vunpack.i.h.bf16 %v3152_v6  ;;  %v3153_v9 = vunpack.i.l.bf16 %v3152_v6  ;;  %vm2224_vm2 = vcmask 392424  }
  0xb5   :  { %1083 = vst.msk [vmem:[#allocation0 + $0x30] sm:$0xff] %vm1040_vm7, %v1080_v7  }
  0xb6   :  { %1333 = vst.msk [vmem:[#allocation0] sm:$0xff] %vm1332_vm9, %v3153_v9   ;;  %1379 = vst.msk [vmem:[#allocation0 + $0x48] sm:$0xff] %vm1332_vm9, %v3154_v8  }
  0xb7   :  { %1331 = vst.msk [vmem:[#allocation0 + $0x20] sm:$0xff] %vm1329_vm8, %v3153_v9   ;;  %1376 = vst.msk [vmem:[#allocation0 + $0x8] sm:$0xff] %vm1329_vm8, %v3154_v8  }
  0xb8   :  { %1585 = vst.msk [vmem:[#allocation0] sm:$0xff] %vm1584_vm11, %v3128_v10   ;;  %1608 = vst.msk [vmem:[#allocation0 + $0x48] sm:$0xff] %vm1584_vm11, %v3129_v12  }
  0xb9   :  { %1494 = vst.msk [vmem:[#allocation0 + $0x20] sm:$0xff] %vm1492_vm10, %v3118_v28   ;;  %1517 = vst.msk [vmem:[#allocation0 + $0x8] sm:$0xff] %vm1492_vm10, %v3119_v11  }
  0xba   :  { %v3142_v13 = vpop.permute.xlu0 %3141 }
  0xbb   :  { %v3144_v15 = vunpack.i.h.bf16 %v3142_v13  ;;  %v3143_v16 = vunpack.i.l.bf16 %v3142_v13 }
  0xbd   :  { %1285 = vst.msk [vmem:[#allocation0 + $0x58] sm:$0xff] %vm1145_vm5, %v3144_v15   ;;  %1239 = vst.msk [vmem:[#allocation0 + $0x10] sm:$0xff] %vm1145_vm5, %v3143_v16   ;;  %vm2499_vm5 = vcmask 236624  }
  0xbe   :  { %1288 = vst.msk [vmem:[#allocation0 + $0x38] sm:$0xff] %vm1148_vm6, %v3144_v15   ;;  %1242 = vst.msk [vmem:[#allocation0 + $0x50] sm:$0xff] %vm1148_vm6, %v3143_v16   ;;  %vm2591_vm6 = vcmask 195624  }
  0xc2   :  { %v3147_v22 = vpop.permute.xlu0 %3146 }
  0xc3   :  { %v3149_v23 = vunpack.i.h.bf16 %v3147_v22  ;;  %v3148_v24 = vunpack.i.l.bf16 %v3147_v22 }
  0xc4   :  { %v3157_v17 = vpop.permute.xlu1 %3156 }
  0xc5   :  { %v3159_v18 = vunpack.i.h.bf16 %v3157_v17  ;;  %v3158_v19 = vunpack.i.l.bf16 %v3157_v17  ;;  %1677 = vst.msk [vmem:[#allocation0 + $0x20] sm:$0xff] %vm1675_vm12, %v3148_v24   ;;  %1700 = vst.msk [vmem:[#allocation0 + $0x8] sm:$0xff] %vm1675_vm12, %v3149_v23  }
  0xc7   :  { %1471 = vst.msk [vmem:[#allocation0 + $0x18] sm:$0xff] %vm1332_vm9, %v3159_v18   ;;  %1425 = vst.msk [vmem:[#allocation0 + $0x30] sm:$0xff] %vm1332_vm9, %v3158_v19  }
  0xc8   :  { %1422 = vst.msk [vmem:[#allocation0 + $0x50] sm:$0xff] %vm1329_vm8, %v3158_v19   ;;  %1468 = vst.msk [vmem:[#allocation0 + $0x38] sm:$0xff] %vm1329_vm8, %v3159_v18  }
  0xc9   :  { %1631 = vst.msk [vmem:[#allocation0 + $0x30] sm:$0xff] %vm1584_vm11, %v3133_v14   ;;  %1654 = vst.msk [vmem:[#allocation0 + $0x18] sm:$0xff] %vm1584_vm11, %v3134_v21  }
  0xca   :  { %1540 = vst.msk [vmem:[#allocation0 + $0x50] sm:$0xff] %vm1492_vm10, %v3123_v62   ;;  %1563 = vst.msk [vmem:[#allocation0 + $0x38] sm:$0xff] %vm1492_vm10, %v3124_v20   ;;  %v3162_v25 = vpop.permute.xlu1 %3161 }
  0xcb   :  { %v3164_v26 = vunpack.i.h.bf16 %v3162_v25  ;;  %v3163_v27 = vunpack.i.l.bf16 %v3162_v25  ;;  %v3167_v29 = vpop.permute.xlu0 %3166 }
  0xcc   :  { %v3169_v30 = vunpack.i.h.bf16 %v3167_v29  ;;  %v3168_v31 = vunpack.i.l.bf16 %v3167_v29 }
  0xcd   :  { %1723 = vst.msk [vmem:[#allocation0 + $0x50] sm:$0xff] %vm1675_vm12, %v3163_v27   ;;  %1746 = vst.msk [vmem:[#allocation0 + $0x38] sm:$0xff] %vm1675_vm12, %v3164_v26  }
  0xce   :  { %1768 = vst.msk [vmem:[#allocation0] sm:$0xff] %vm1767_vm13, %v3168_v31   ;;  %1791 = vst.msk [vmem:[#allocation0 + $0x48] sm:$0xff] %vm1767_vm13, %v3169_v30  }
  0xd3   :  { %v3172_v32 = vpop.permute.xlu1 %3171 }
  0xd4   :  { %v3174_v33 = vunpack.i.h.bf16 %v3172_v32  ;;  %v3173_v34 = vunpack.i.l.bf16 %v3172_v32  ;;  %v3177_v35 = vpop.permute.xlu0 %3176 }
  0xd5   :  { %v3179_v36 = vunpack.i.h.bf16 %v3177_v35  ;;  %v3178_v37 = vunpack.i.l.bf16 %v3177_v35 }
  0xd6   :  { %1814 = vst.msk [vmem:[#allocation0 + $0x30] sm:$0xff] %vm1767_vm13, %v3173_v34   ;;  %1837 = vst.msk [vmem:[#allocation0 + $0x18] sm:$0xff] %vm1767_vm13, %v3174_v33  }
  0xd7   :  { %1860 = vst.msk [vmem:[#allocation0 + $0x20] sm:$0xff] %vm1858_vm14, %v3178_v37   ;;  %1883 = vst.msk [vmem:[#allocation0 + $0x8] sm:$0xff] %vm1858_vm14, %v3179_v36  }
  0xdc   :  { %v3182_v38 = vpop.permute.xlu1 %3181 }
  0xdd   :  { %v3184_v39 = vunpack.i.h.bf16 %v3182_v38  ;;  %v3183_v40 = vunpack.i.l.bf16 %v3182_v38  ;;  %v3187_v41 = vpop.permute.xlu0 %3186 }
  0xde   :  { %v3189_v42 = vunpack.i.h.bf16 %v3187_v41  ;;  %v3188_v43 = vunpack.i.l.bf16 %v3187_v41 }
  0xdf   :  { %1906 = vst.msk [vmem:[#allocation0 + $0x50] sm:$0xff] %vm1858_vm14, %v3183_v40   ;;  %1929 = vst.msk [vmem:[#allocation0 + $0x38] sm:$0xff] %vm1858_vm14, %v3184_v39  }
  0xe0   :  { %1951 = vst.msk [vmem:[#allocation0] sm:$0xff] %vm1950_vm15, %v3188_v43   ;;  %1974 = vst.msk [vmem:[#allocation0 + $0x48] sm:$0xff] %vm1950_vm15, %v3189_v42  }
  0xe5   :  { %v3192_v44 = vpop.permute.xlu1 %3191  ;;  %v3197_v47 = vpop.permute.xlu0 %3196 }
  0xe6   :  { %v3194_v45 = vunpack.i.h.bf16 %v3192_v44  ;;  %v3193_v46 = vunpack.i.l.bf16 %v3192_v44  ;;  %v3199_v48 = vunpack.i.h.bf16 %v3197_v47  ;;  %v3198_v49 = vunpack.i.l.bf16 %v3197_v47 }
  0xe8   :  { %1997 = vst.msk [vmem:[#allocation0 + $0x30] sm:$0xff] %vm1950_vm15, %v3193_v46   ;;  %2020 = vst.msk [vmem:[#allocation0 + $0x18] sm:$0xff] %vm1950_vm15, %v3194_v45  }
  0xe9   :  { %2043 = vst.msk [vmem:[#allocation0 + $0x20] sm:$0xff] %vm2041_vm0, %v3198_v49   ;;  %2066 = vst.msk [vmem:[#allocation0 + $0x8] sm:$0xff] %vm2041_vm0, %v3199_v48  }
  0xed   :  { %v3202_v50 = vpop.permute.xlu1 %3201 }
  0xee   :  { %v3204_v51 = vunpack.i.h.bf16 %v3202_v50  ;;  %v3203_v52 = vunpack.i.l.bf16 %v3202_v50  ;;  %v3207_v53 = vpop.permute.xlu0 %3206 }
  0xef   :  { %v3209_v54 = vunpack.i.h.bf16 %v3207_v53  ;;  %v3208_v55 = vunpack.i.l.bf16 %v3207_v53 }
  0xf0   :  { %2089 = vst.msk [vmem:[#allocation0 + $0x50] sm:$0xff] %vm2041_vm0, %v3203_v52   ;;  %2112 = vst.msk [vmem:[#allocation0 + $0x38] sm:$0xff] %vm2041_vm0, %v3204_v51  }
  0xf1   :  { %2134 = vst.msk [vmem:[#allocation0] sm:$0xff] %vm2133_vm1, %v3208_v55   ;;  %2157 = vst.msk [vmem:[#allocation0 + $0x48] sm:$0xff] %vm2133_vm1, %v3209_v54  }
  0xf6   :  { %v3212_v56 = vpop.permute.xlu1 %3211  ;;  %v3217_v59 = vpop.permute.xlu0 %3216 }
  0xf7   :  { %v3214_v57 = vunpack.i.h.bf16 %v3212_v56  ;;  %v3213_v58 = vunpack.i.l.bf16 %v3212_v56  ;;  %v3219_v60 = vunpack.i.h.bf16 %v3217_v59  ;;  %v3218_v61 = vunpack.i.l.bf16 %v3217_v59 }
  0xf9   :  { %2180 = vst.msk [vmem:[#allocation0 + $0x30] sm:$0xff] %vm2133_vm1, %v3213_v58   ;;  %2203 = vst.msk [vmem:[#allocation0 + $0x18] sm:$0xff] %vm2133_vm1, %v3214_v57  }
  0xfa   :  { %2226 = vst.msk [vmem:[#allocation0 + $0x40] sm:$0xff] %vm2224_vm2, %v3218_v61   ;;  %2249 = vst.msk [vmem:[#allocation0 + $0x28] sm:$0xff] %vm2224_vm2, %v3219_v60  }
  0xfe   :  { %v3222_v63 = vpop.permute.xlu1 %3221 }
  0xff   :  { %v3224_v0 = vunpack.i.h.bf16 %v3222_v63  ;;  %v3223_v1 = vunpack.i.l.bf16 %v3222_v63  ;;  %v3227_v2 = vpop.permute.xlu0 %3226 }
 0x100   :  { %v3229_v3 = vunpack.i.h.bf16 %v3227_v2  ;;  %v3228_v4 = vunpack.i.l.bf16 %v3227_v2 }
 0x101   :  { %2272 = vst.msk [vmem:[#allocation0 + $0x10] sm:$0xff] %vm2224_vm2, %v3223_v1   ;;  %2295 = vst.msk [vmem:[#allocation0 + $0x58] sm:$0xff] %vm2224_vm2, %v3224_v0  }
 0x102   :  { %2318 = vst.msk [vmem:[#allocation0 + $0x20] sm:$0xff] %vm2316_vm3, %v3228_v4   ;;  %2341 = vst.msk [vmem:[#allocation0 + $0x8] sm:$0xff] %vm2316_vm3, %v3229_v3  }
 0x107   :  { %v3232_v5 = vpop.permute.xlu1 %3231  ;;  %v3237_v8 = vpop.permute.xlu0 %3236 }
 0x108   :  { %v3234_v6 = vunpack.i.h.bf16 %v3232_v5  ;;  %v3233_v7 = vunpack.i.l.bf16 %v3232_v5  ;;  %v3239_v9 = vunpack.i.h.bf16 %v3237_v8  ;;  %v3238_v11 = vunpack.i.l.bf16 %v3237_v8 }
 0x10a   :  { %2364 = vst.msk [vmem:[#allocation0 + $0x50] sm:$0xff] %vm2316_vm3, %v3233_v7   ;;  %2387 = vst.msk [vmem:[#allocation0 + $0x38] sm:$0xff] %vm2316_vm3, %v3234_v6  }
 0x10b   :  { %2409 = vst.msk [vmem:[#allocation0] sm:$0xff] %vm2408_vm4, %v3238_v11   ;;  %2432 = vst.msk [vmem:[#allocation0 + $0x48] sm:$0xff] %vm2408_vm4, %v3239_v9  }
 0x10f   :  { %v3242_v28 = vpop.permute.xlu1 %3241 }
 0x110   :  { %v3244_v12 = vunpack.i.h.bf16 %v3242_v28  ;;  %v3243_v10 = vunpack.i.l.bf16 %v3242_v28  ;;  %v3247_v13 = vpop.permute.xlu0 %3246 }
 0x111   :  { %v3249_v15 = vunpack.i.h.bf16 %v3247_v13  ;;  %v3248_v16 = vunpack.i.l.bf16 %v3247_v13 }
 0x112   :  { %2455 = vst.msk [vmem:[#allocation0 + $0x30] sm:$0xff] %vm2408_vm4, %v3243_v10   ;;  %2478 = vst.msk [vmem:[#allocation0 + $0x18] sm:$0xff] %vm2408_vm4, %v3244_v12   ;;  %v2737_v62 = vld [vmem:[#allocation0 + $0x48] sm:$0xff]  ;;  %v2668_v31 = vld [vmem:[#allocation0] sm:$0xff] }
 0x113   :  { %2501 = vst.msk [vmem:[#allocation0 + $0x40] sm:$0xff] %vm2499_vm5, %v3248_v16   ;;  %2524 = vst.msk [vmem:[#allocation0 + $0x28] sm:$0xff] %vm2499_vm5, %v3249_v15  }
 0x118   :  { %v3252_v17 = vpop.permute.xlu1 %3251  ;;  %v3257_v20 = vpop.permute.xlu0 %3256 }
 0x119   :  { %v3254_v18 = vunpack.i.h.bf16 %v3252_v17  ;;  %v3253_v19 = vunpack.i.l.bf16 %v3252_v17  ;;  %v3259_v14 = vunpack.i.h.bf16 %v3257_v20  ;;  %v3258_v22 = vunpack.i.l.bf16 %v3257_v20  ;;  %v2689_v25 = vld [vmem:[#allocation0 + $0x18] sm:$0xff]  ;;  %v2713_v37 = vld [vmem:[#allocation0 + $0x30] sm:$0xff] }
 0x11a   :  { %v2729_v21 = vld [vmem:[#allocation0 + $0x40] sm:$0xff]  ;;  %v2705_v32 = vld [vmem:[#allocation0 + $0x28] sm:$0xff] }
 0x11b   :  { %2547 = vst.msk [vmem:[#allocation0 + $0x10] sm:$0xff] %vm2499_vm5, %v3253_v19   ;;  %2570 = vst.msk [vmem:[#allocation0 + $0x58] sm:$0xff] %vm2499_vm5, %v3254_v18   ;;  %v3057_v23 = vpack.c.bf16 %v2737_v62, %v2729_v21 }
 0x11c   :  { %2593 = vst.msk [vmem:[#allocation0 + $0x20] sm:$0xff] %vm2591_vm6, %v3258_v22   ;;  %2616 = vst.msk [vmem:[#allocation0 + $0x8] sm:$0xff] %vm2591_vm6, %v3259_v14  }
 0x11d   :  { %3098 = vst [vmem:[%s3781_s1 + $0x20] sm:$0xff] %v3057_v23  }
 0x120   :  { %v3262_v24 = vpop.permute.xlu1 %3261 }
 0x121   :  { %v3264_v27 = vunpack.i.h.bf16 %v3262_v24  ;;  %v3263_v29 = vunpack.i.l.bf16 %v3262_v24 }
 0x122   :  { %v2681_v26 = vld [vmem:[#allocation0 + $0x10] sm:$0xff]  ;;  %v2753_v38 = vld [vmem:[#allocation0 + $0x58] sm:$0xff] }
 0x123   :  { %v3042_v30 = vpack.c.bf16 %v2689_v25, %v2681_v26  ;;  %2639 = vst.msk [vmem:[#allocation0 + $0x50] sm:$0xff] %vm2591_vm6, %v3263_v29   ;;  %2662 = vst.msk [vmem:[#allocation0 + $0x38] sm:$0xff] %vm2591_vm6, %v3264_v27   ;;  %v2674_v33 = vld [vmem:[#allocation0 + $0x8] sm:$0xff]  ;;  %v2697_v34 = vld [vmem:[#allocation0 + $0x20] sm:$0xff] }
 0x124   :  { %v3037_v35 = vpack.c.bf16 %v2674_v33, %v2668_v31  ;;  %v3047_v36 = vpack.c.bf16 %v2705_v32, %v2697_v34 }
 0x125   :  { %3095 = vst [vmem:[%s3781_s1 + $0x8] sm:$0xff] %v3042_v30  }
 0x126   :  { %3038 = vst [vmem:[%s3781_s1] sm:$0xff] %v3037_v35   ;;  %3096 = vst [vmem:[%s3781_s1 + $0x10] sm:$0xff] %v3047_v36  }
 0x12a   :  { %v2721_v39 = vld [vmem:[#allocation0 + $0x38] sm:$0xff]  ;;  %v2745_v40 = vld [vmem:[#allocation0 + $0x50] sm:$0xff] }
 0x12b   :  { %v3052_v41 = vpack.c.bf16 %v2721_v39, %v2713_v37  ;;  %v3062_v42 = vpack.c.bf16 %v2753_v38, %v2745_v40 }
 0x12d   :  { %3097 = vst [vmem:[%s3781_s1 + $0x18] sm:$0xff] %v3052_v41   ;;  %3099 = vst [vmem:[%s3781_s1 + $0x28] sm:$0xff] %v3062_v42  }

// kernel: tile.0
= control target key start
LH: loop header
LB: loop body
LE: loop exit
PB: predicated region body
PF: predicated region fallthrough
CT: control target
= control target key end

     0   :  { %s6589_s18 = smov 3  ;;  %s6591_s19 = smov 12  ;;  %vm2054_vm0 = vcmask 1043458   ;;  %vm2058_vm1 = vcmask 1045508   ;;  %vm2062_vm2 = vcmask 1047558   ;;  %vm2249_vm3 = vcmask 72704   ;;  %s7873_s0 = inlined_call_operand.vmem [shape: bf16[16,19,8,8], index: 0, kind: input, shape index: {}]   ;;  %s7874_s1 = inlined_call_operand.vmem [shape: bf16[304,8,8], index: 1, kind: output, shape index: {}]  }
   0x1   :  { %v6559_v0 = vld [vmem:[%s7873_s0 + $0x1b8] sm:$0xff]   ;;  %v6564_v1 = vld [vmem:[%s7873_s0 + $0x1b0] sm:$0xff]   ;;  %v6569_v2 = vld [vmem:[%s7873_s0 + $0x1a8] sm:$0xff]   ;;  %s6609_s26 = smov 48  ;;  %s6611_s27 = smov 192  ;;  %vm2617_vm4 = vcmask 113664  }
   0x2   :  { %v5861_v3 = vunpack.c.h.bf16 %v6559_v0  ;;  %v5865_v4 = vunpack.c.h.bf16 %v6564_v1  ;;  %v5869_v5 = vunpack.c.h.bf16 %v6569_v2  ;;  %v6577_v6 = vld [vmem:[%s7873_s0 + $0x1a0] sm:$0xff]   ;;  %v6582_v7 = vld [vmem:[%s7873_s0 + $0x198] sm:$0xff]   ;;  %v6587_v8 = vld [vmem:[%s7873_s0 + $0x190] sm:$0xff]   ;;  %s6626_s5 = smov 3  ;;  %s6628_s6 = smov 12  ;;  %v5860_v0 = vunpack.c.l.bf16 %v6559_v0 }
   0x3   :  { %v5873_v9 = vunpack.c.h.bf16 %v6577_v6  ;;  %v5877_v10 = vunpack.c.h.bf16 %v6582_v7  ;;  %v5881_v11 = vunpack.c.h.bf16 %v6587_v8  ;;  %v6599_v12 = vld [vmem:[%s7873_s0 + $0x188] sm:$0xff]   ;;  %v6604_v13 = vld [vmem:[%s7873_s0 + $0x180] sm:$0xff]   ;;  %v6158_v14 = vld [vmem:[%s7873_s0 + $0x178] sm:$0xff]   ;;  %s6646_s13 = smov 48  ;;  %s6648_s14 = smov 192  ;;  %v5864_v1 = vunpack.c.l.bf16 %v6564_v1 }
   0x4   :  { %277 = vst [vmem:[#allocation1 + $0x378] sm:$0xff] %v5861_v3  ;;  %309 = vst [vmem:[#allocation1 + $0x368] sm:$0xff] %v5865_v4  ;;  %v5885_v15 = vunpack.c.h.bf16 %v6599_v12  ;;  %v5889_v16 = vunpack.c.h.bf16 %v6604_v13  ;;  %v5893_v17 = vunpack.c.h.bf16 %v6158_v14  ;;  %v6159_v18 = vld [vmem:[%s7873_s0 + $0x170] sm:$0xff]   ;;  %v6160_v19 = vld [vmem:[%s7873_s0 + $0x168] sm:$0xff]   ;;  %v5892_v21 = vunpack.c.l.bf16 %v6158_v14  ;;  %s6668_s23 = smov 3  ;;  %s6688_s3 = smov 12 }
   0x5   :  { %341 = vst [vmem:[#allocation1 + $0x358] sm:$0xff] %v5869_v5  ;;  %v6624_v20 = vld [vmem:[%s7873_s0 + $0x160] sm:$0xff]   ;;  %373 = vst [vmem:[#allocation1 + $0x348] sm:$0xff] %v5873_v9  ;;  %v5897_v22 = vunpack.c.h.bf16 %v6159_v18  ;;  %v5901_v23 = vunpack.c.h.bf16 %v6160_v19  ;;  %v6634_v25 = vld [vmem:[%s7873_s0 + $0x158] sm:$0xff]   ;;  %v5896_v28 = vunpack.c.l.bf16 %v6159_v18  ;;  %v5900_v35 = vunpack.c.l.bf16 %v6160_v19  ;;  %s6690_s4 = smov 48  ;;  %s6711_s15 = smov 192 }
   0x6   :  { %405 = vst [vmem:[#allocation1 + $0x338] sm:$0xff] %v5877_v10  ;;  %437 = vst [vmem:[#allocation1 + $0x328] sm:$0xff] %v5881_v11  ;;  %v5905_v24 = vunpack.c.h.bf16 %v6624_v20  ;;  %v6639_v26 = vld [vmem:[%s7873_s0 + $0x150] sm:$0xff]   ;;  %v6644_v27 = vld [vmem:[%s7873_s0 + $0x148] sm:$0xff]   ;;  %v5909_v29 = vunpack.c.h.bf16 %v6634_v25  ;;  %v5904_v42 = vunpack.c.l.bf16 %v6624_v20  ;;  %s6713_s16 = smov 3  ;;  %v5908_v49 = vunpack.c.l.bf16 %v6634_v25  ;;  %s6734_s28 = smov 12 }
   0x7   :  { %469 = vst [vmem:[#allocation1 + $0x318] sm:$0xff] %v5885_v15  ;;  %501 = vst [vmem:[#allocation1 + $0x308] sm:$0xff] %v5889_v16  ;;  %v5913_v30 = vunpack.c.h.bf16 %v6639_v26  ;;  %v5917_v31 = vunpack.c.h.bf16 %v6644_v27  ;;  %v6656_v32 = vld [vmem:[%s7873_s0 + $0x140] sm:$0xff]   ;;  %v6661_v33 = vld [vmem:[%s7873_s0 + $0xb8] sm:$0xff]   ;;  %s6736_s29 = smov 48  ;;  %v5912_v56 = vunpack.c.l.bf16 %v6639_v26  ;;  %s6757_s11 = smov 192  ;;  %v5916_v63 = vunpack.c.l.bf16 %v6644_v27 }
   0x8   :  { %533 = vst [vmem:[#allocation1 + $0x2f8] sm:$0xff] %v5893_v17  ;;  %v6666_v34 = vld [vmem:[%s7873_s0 + $0xb0] sm:$0xff]   ;;  %549 = vst [vmem:[#allocation1 + $0x2f0] sm:$0xff] %v5892_v21  ;;  %v5921_v36 = vunpack.c.h.bf16 %v6656_v32  ;;  %v5989_v37 = vunpack.c.h.bf16 %v6661_v33  ;;  %v6676_v39 = vld [vmem:[%s7873_s0 + $0xa8] sm:$0xff]   ;;  %s6759_s12 = smov 3  ;;  %s6780_s30 = smov 12  ;;  %v5920_v14 = vunpack.c.l.bf16 %v6656_v32  ;;  %v5868_v2 = vunpack.c.l.bf16 %v6569_v2 }
   0x9   :  { %565 = vst [vmem:[#allocation1 + $0x2e8] sm:$0xff] %v5897_v22  ;;  %597 = vst [vmem:[#allocation1 + $0x2d8] sm:$0xff] %v5901_v23  ;;  %v5993_v38 = vunpack.c.h.bf16 %v6666_v34  ;;  %v6681_v40 = vld [vmem:[%s7873_s0 + $0xa0] sm:$0xff]   ;;  %v6686_v41 = vld [vmem:[%s7873_s0 + $0x98] sm:$0xff]   ;;  %v5997_v43 = vunpack.c.h.bf16 %v6676_v39  ;;  %s6782_s2 = smov 48  ;;  %s6803_s21 = smov 192  ;;  %v5872_v6 = vunpack.c.l.bf16 %v6577_v6  ;;  %v5876_v7 = vunpack.c.l.bf16 %v6582_v7 }
   0xa   :  { %629 = vst [vmem:[#allocation1 + $0x2c8] sm:$0xff] %v5905_v24  ;;  %581 = vst [vmem:[#allocation1 + $0x2e0] sm:$0xff] %v5896_v28  ;;  %v6001_v44 = vunpack.c.h.bf16 %v6681_v40  ;;  %v6005_v45 = vunpack.c.h.bf16 %v6686_v41  ;;  %v6699_v46 = vld [vmem:[%s7873_s0 + $0x90] sm:$0xff]   ;;  %v6704_v47 = vld [vmem:[%s7873_s0 + $0x88] sm:$0xff]   ;;  %s6805_s22 = smov 3  ;;  %s6827_s24 = smov 12  ;;  %v5880_v8 = vunpack.c.l.bf16 %v6587_v8  ;;  %v5884_v12 = vunpack.c.l.bf16 %v6599_v12 }
   0xb   :  { %661 = vst [vmem:[#allocation1 + $0x2b8] sm:$0xff] %v5909_v29  ;;  %693 = vst [vmem:[#allocation1 + $0x2a8] sm:$0xff] %v5913_v30  ;;  %v6709_v48 = vld [vmem:[%s7873_s0 + $0x80] sm:$0xff]   ;;  %v6009_v50 = vunpack.c.h.bf16 %v6699_v46  ;;  %v6013_v51 = vunpack.c.h.bf16 %v6704_v47  ;;  %v6722_v53 = vld [vmem:[%s7873_s0 + $0x78] sm:$0xff]   ;;  %s6829_s25 = smov 48  ;;  %s6888_s7 = smov 192  ;;  %v5888_v13 = vunpack.c.l.bf16 %v6604_v13  ;;  %v5988_v33 = vunpack.c.l.bf16 %v6661_v33 }
   0xc   :  { %725 = vst [vmem:[#allocation1 + $0x298] sm:$0xff] %v5917_v31  ;;  %613 = vst [vmem:[#allocation1 + $0x2d0] sm:$0xff] %v5900_v35  ;;  %v6017_v52 = vunpack.c.h.bf16 %v6709_v48  ;;  %v6727_v54 = vld [vmem:[%s7873_s0 + $0x70] sm:$0xff]   ;;  %v6732_v55 = vld [vmem:[%s7873_s0 + $0x68] sm:$0xff]   ;;  %v6021_v57 = vunpack.c.h.bf16 %v6722_v53  ;;  %v6020_v21 = vunpack.c.l.bf16 %v6722_v53  ;;  %s6890_s8 = smov 3  ;;  %s6974_s9 = smov 192  ;;  %v5992_v34 = vunpack.c.l.bf16 %v6666_v34 }
   0xd   :  { %757 = vst [vmem:[#allocation1 + $0x288] sm:$0xff] %v5921_v36  ;;  %1301 = vst [vmem:[#allocation1 + $0x178] sm:$0xff] %v5989_v37  ;;  %v6025_v58 = vunpack.c.h.bf16 %v6727_v54  ;;  %v6029_v59 = vunpack.c.h.bf16 %v6732_v55  ;;  %v6745_v60 = vld [vmem:[%s7873_s0 + $0x60] sm:$0xff]   ;;  %v6750_v61 = vld [vmem:[%s7873_s0 + $0x58] sm:$0xff]   ;;  %v6024_v28 = vunpack.c.l.bf16 %v6727_v54  ;;  %v6028_v35 = vunpack.c.l.bf16 %v6732_v55  ;;  %s6976_s10 = smov 3  ;;  %s7010_s17 = smov 192 }
   0xe   :  { %1333 = vst [vmem:[#allocation1 + $0x168] sm:$0xff] %v5993_v38  ;;  %645 = vst [vmem:[#allocation1 + $0x2c0] sm:$0xff] %v5904_v42  ;;  %v6755_v62 = vld [vmem:[%s7873_s0 + $0x50] sm:$0xff]   ;;  %v6033_v3 = vunpack.c.h.bf16 %v6745_v60  ;;  %v6037_v4 = vunpack.c.h.bf16 %v6750_v61  ;;  %v6768_v9 = vld [vmem:[%s7873_s0 + $0x48] sm:$0xff]   ;;  %v6032_v36 = vunpack.c.l.bf16 %v6745_v60  ;;  %v6036_v37 = vunpack.c.l.bf16 %v6750_v61  ;;  %s7012_s20 = smov 3 }
   0xf   :  { %1365 = vst [vmem:[#allocation1 + $0x158] sm:$0xff] %v5997_v43  ;;  %1397 = vst [vmem:[#allocation1 + $0x148] sm:$0xff] %v6001_v44  ;;  %v6041_v5 = vunpack.c.h.bf16 %v6755_v62  ;;  %v6773_v10 = vld [vmem:[%s7873_s0 + $0x40] sm:$0xff]   ;;  %v6778_v11 = vld [vmem:[%s7873_s0 + $0x1f8] sm:$0xff]   ;;  %v6045_v15 = vunpack.c.h.bf16 %v6768_v9  ;;  %v5996_v39 = vunpack.c.l.bf16 %v6676_v39  ;;  %v6000_v40 = vunpack.c.l.bf16 %v6681_v40 }
  0x10   :  { %1429 = vst [vmem:[#allocation1 + $0x138] sm:$0xff] %v6005_v45  ;;  %677 = vst [vmem:[#allocation1 + $0x2b0] sm:$0xff] %v5908_v49  ;;  %v6049_v16 = vunpack.c.h.bf16 %v6773_v10  ;;  %v5829_v17 = vunpack.c.h.bf16 %v6778_v11  ;;  %v6791_v18 = vld [vmem:[%s7873_s0 + $0x1f0] sm:$0xff]   ;;  %v6796_v19 = vld [vmem:[%s7873_s0 + $0x1e8] sm:$0xff]   ;;  %v5828_v11 = vunpack.c.l.bf16 %v6778_v11  ;;  %v6004_v41 = vunpack.c.l.bf16 %v6686_v41 }
  0x11   :  { %1461 = vst [vmem:[#allocation1 + $0x128] sm:$0xff] %v6009_v50  ;;  %1493 = vst [vmem:[#allocation1 + $0x118] sm:$0xff] %v6013_v51  ;;  %v6801_v20 = vld [vmem:[%s7873_s0 + $0x1e0] sm:$0xff]   ;;  %v2261_v22 = vld [vmem:[#allocation1 + $0x30d] ss:$16 sm:%s6668_s23]   ;;  %v5833_v25 = vunpack.c.h.bf16 %v6791_v18  ;;  %v5837_v26 = vunpack.c.h.bf16 %v6796_v19  ;;  %s6850_s23 = smov 192  ;;  %v6040_v50 = vunpack.c.l.bf16 %v6755_v62  ;;  %v5832_v18 = vunpack.c.l.bf16 %v6791_v18 }
  0x12   :  { %1525 = vst [vmem:[#allocation1 + $0x108] sm:$0xff] %v6017_v52  ;;  %709 = vst [vmem:[#allocation1 + $0x2a0] sm:$0xff] %v5912_v56  ;;  %v2264_v23 = vld [vmem:[#allocation1 + $0x30d] ss:$16 sm:%s6688_s3]   ;;  %v5841_v27 = vunpack.c.h.bf16 %v6801_v20  ;;  %v6825_v32 = vld [vmem:[%s7873_s0 + $0x1d0] sm:$0xff]   ;;  %s6852_s3 = smov 3  ;;  %v5836_v19 = vunpack.c.l.bf16 %v6796_v19  ;;  %v5840_v20 = vunpack.c.l.bf16 %v6801_v20  ;;  %v6008_v46 = vunpack.c.l.bf16 %v6699_v46 }
  0x13   :  { %1557 = vst [vmem:[#allocation1 + $0xf8] sm:$0xff] %v6021_v57  ;;  %1589 = vst [vmem:[#allocation1 + $0xe8] sm:$0xff] %v6025_v58  ;;  %v2269_v24 = vld [vmem:[#allocation1 + $0x30d] ss:$16 sm:%s6690_s4]   ;;  %v2266_v29 = vsel %vm2054_vm0, %v2264_v23, %v2261_v22  ;;  %v5849_v43 = vunpack.c.h.bf16 %v6825_v32  ;;  %v6845_v45 = vld [vmem:[%s7873_s0 + $0x1c0] sm:$0xff]   ;;  %s6869_s4 = smov 12  ;;  %v5848_v32 = vunpack.c.l.bf16 %v6825_v32  ;;  %v6012_v47 = vunpack.c.l.bf16 %v6704_v47 }
  0x14   :  { %1621 = vst [vmem:[#allocation1 + $0xd8] sm:$0xff] %v6029_v59  ;;  %741 = vst [vmem:[#allocation1 + $0x290] sm:$0xff] %v5916_v63  ;;  %v2274_v30 = vld [vmem:[#allocation1 + $0x30d] ss:$16 sm:%s6711_s15]   ;;  %v2271_v38 = vsel %vm2058_vm1, %v2269_v24, %v2266_v29  ;;  %v5857_v56 = vunpack.c.h.bf16 %v6845_v45  ;;  %v6167_v60 = vld [vmem:[%s7873_s0 + $0x130] sm:$0xff]   ;;  %s6871_s15 = smov 48  ;;  %v6044_v63 = vunpack.c.l.bf16 %v6768_v9  ;;  %v5856_v45 = vunpack.c.l.bf16 %v6845_v45 }
  0x15   :  { %1653 = vst [vmem:[#allocation1 + $0xc8] sm:$0xff] %v6033_v3  ;;  %1685 = vst [vmem:[#allocation1 + $0xb8] sm:$0xff] %v6037_v4  ;;  %v6820_v31 = vld [vmem:[%s7873_s0 + $0x1d8] sm:$0xff]   ;;  %v6840_v44 = vld [vmem:[%s7873_s0 + $0x1c8] sm:$0xff]   ;;  %v2276_v51 = vsel %vm2062_vm2, %v2274_v30, %v2271_v38  ;;  %v6048_v3 = vunpack.c.l.bf16 %v6773_v10  ;;  %v6016_v48 = vunpack.c.l.bf16 %v6709_v48  ;;  %vm2253_vm5 = vcmask 80896  }
  0x16   :  { %1717 = vst [vmem:[#allocation1 + $0xa8] sm:$0xff] %v6041_v5  ;;  %773 = vst [vmem:[#allocation1 + $0x280] sm:$0xff] %v5920_v14  ;;  %v5845_v42 = vunpack.c.h.bf16 %v6820_v31  ;;  %v6166_v49 = vld [vmem:[%s7873_s0 + $0x138] sm:$0xff]   ;;  %v5853_v55 = vunpack.c.h.bf16 %v6840_v44  ;;  %v6168_v61 = vld [vmem:[%s7873_s0 + $0x128] sm:$0xff]   ;;  %v5929_v14 = vunpack.c.h.bf16 %v6167_v60  ;;  %v5844_v31 = vunpack.c.l.bf16 %v6820_v31 }
  0x17   :  { %1749 = vst [vmem:[#allocation1 + $0x98] sm:$0xff] %v6045_v15  ;;  %1781 = vst [vmem:[#allocation1 + $0x88] sm:$0xff] %v6049_v16  ;;  %v2279_v52 = vld [vmem:[#allocation1 + $0x28d] ss:$16 sm:%s6713_s16]   ;;  %v5925_v57 = vunpack.c.h.bf16 %v6166_v49  ;;  %v5924_v62 = vunpack.c.l.bf16 %v6166_v49  ;;  %v5933_v15 = vunpack.c.h.bf16 %v6168_v61  ;;  %v5928_v16 = vunpack.c.l.bf16 %v6167_v60  ;;  %v6169_v23 = vld [vmem:[%s7873_s0 + $0x120] sm:$0xff]   ;;  %s6951_s16 = smov 12 }
  0x18   :  { %21 = vst [vmem:[#allocation1 + $0x3f8] sm:$0xff] %v5829_v17  ;;  %1573 = vst [vmem:[#allocation1 + $0xf0] sm:$0xff] %v6020_v21  ;;  %v2282_v53 = vld [vmem:[#allocation1 + $0x28d] ss:$16 sm:%s6734_s28]   ;;  %v6171_v30 = vld [vmem:[%s7873_s0 + $0x110] sm:$0xff]   ;;  %s6953_s28 = smov 48  ;;  %v5852_v44 = vunpack.c.l.bf16 %v6840_v44 }
  0x19   :  { %53 = vst [vmem:[#allocation1 + $0x3e8] sm:$0xff] %v5833_v25  ;;  %85 = vst [vmem:[#allocation1 + $0x3d8] sm:$0xff] %v5837_v26  ;;  %v2287_v54 = vld [vmem:[#allocation1 + $0x28d] ss:$16 sm:%s6736_s29]   ;;  %v2284_v58 = vsel %vm2054_vm0, %v2282_v53, %v2279_v52  ;;  %v5932_v25 = vunpack.c.l.bf16 %v6168_v61  ;;  %s6908_s29 = smov 12  ;;  %v5945_v49 = vunpack.c.h.bf16 %v6171_v30  ;;  %vm2256_vm6 = vcmask 1048504  }
  0x1a   :  { %117 = vst [vmem:[#allocation1 + $0x3c8] sm:$0xff] %v5841_v27  ;;  %1605 = vst [vmem:[#allocation1 + $0xe0] sm:$0xff] %v6024_v28  ;;  %v2292_v59 = vld [vmem:[#allocation1 + $0x28d] ss:$16 sm:%s6757_s11]   ;;  %v2289_v10 = vsel %vm2058_vm1, %v2287_v54, %v2284_v58  ;;  %v5937_v28 = vunpack.c.h.bf16 %v6169_v23  ;;  %s6910_s11 = smov 48  ;;  %v5944_v58 = vunpack.c.l.bf16 %v6171_v30  ;;  %vm2621_vm7 = vcmask 39936  }
  0x1b   :  { %1637 = vst [vmem:[#allocation1 + $0xd0] sm:$0xff] %v6028_v35  ;;  %1669 = vst [vmem:[#allocation1 + $0xc0] sm:$0xff] %v6032_v36  ;;  %v2215_v4 = vld [vmem:[#allocation1 + $0x10d] ss:$16 sm:%s6589_s18]   ;;  %v2294_v22 = vsel %vm2062_vm2, %v2292_v59, %v2289_v10  ;;  %v6906_v36 = vld [vmem:[%s7873_s0 + $0x100] sm:$0xff]   ;;  %s6929_s18 = smov 192 }
  0x1c   :  { %1701 = vst [vmem:[#allocation1 + $0xb0] sm:$0xff] %v6036_v37  ;;  %149 = vst [vmem:[#allocation1 + $0x3b8] sm:$0xff] %v5845_v42  ;;  %v2218_v5 = vld [vmem:[#allocation1 + $0x10d] ss:$16 sm:%s6591_s19]   ;;  %v6895_v27 = vsel %vm2249_vm3, %v2294_v22, %v2276_v51  ;;  %v5953_v51 = vunpack.c.h.bf16 %v6906_v36  ;;  %s6931_s19 = smov 3  ;;  %v5952_v36 = vunpack.c.l.bf16 %v6906_v36  ;;  %vm2968_vm8 = vcmask 974624  }
  0x1d   :  { %181 = vst [vmem:[#allocation1 + $0x3a8] sm:$0xff] %v5849_v43  ;;  %1733 = vst [vmem:[#allocation1 + $0xa0] sm:$0xff] %v6040_v50  ;;  %v2223_v9 = vld [vmem:[#allocation1 + $0x10d] ss:$16 sm:%s6609_s26]   ;;  %v2220_v17 = vsel %vm2054_vm0, %v2218_v5, %v2215_v4  ;;  %s6993_s26 = smov 12  ;;  %vm3335_vm9 = vcmask 818824  }
  0x1e   :  { %213 = vst [vmem:[#allocation1 + $0x398] sm:$0xff] %v5853_v55  ;;  %245 = vst [vmem:[#allocation1 + $0x388] sm:$0xff] %v5857_v56  ;;  %v2228_v21 = vld [vmem:[#allocation1 + $0x10d] ss:$16 sm:%s6611_s27]   ;;  %v2225_v26 = vsel %vm2058_vm1, %v2223_v9, %v2220_v17  ;;  %v6927_v55 = vld [vmem:[%s7873_s0 + $0xf0] sm:$0xff]   ;;  %v5936_v56 = vunpack.c.l.bf16 %v6169_v23  ;;  %s6995_s27 = smov 48 }
  0x1f   :  { %789 = vst [vmem:[#allocation1 + $0x278] sm:$0xff] %v5925_v57  ;;  %v6170_v24 = vld [vmem:[%s7873_s0 + $0x118] sm:$0xff]   ;;  %805 = vst [vmem:[#allocation1 + $0x270] sm:$0xff] %v5924_v62  ;;  %v6172_v35 = vld [vmem:[%s7873_s0 + $0x108] sm:$0xff]   ;;  %v2230_v37 = vsel %vm2062_vm2, %v2228_v21, %v2225_v26  ;;  %v5961_v61 = vunpack.c.h.bf16 %v6927_v55  ;;  %v5960_v55 = vunpack.c.l.bf16 %v6927_v55  ;;  %vm3702_vm10 = vcmask 663024  }
  0x20   :  { %1765 = vst [vmem:[#allocation1 + $0x90] sm:$0xff] %v6044_v63  ;;  %1797 = vst [vmem:[#allocation1 + $0x80] sm:$0xff] %v6048_v3  ;;  %v5941_v29 = vunpack.c.h.bf16 %v6170_v24  ;;  %v2233_v38 = vld [vmem:[#allocation1 + $0x8d] ss:$16 sm:%s6626_s5]   ;;  %v5949_v50 = vunpack.c.h.bf16 %v6172_v35  ;;  %v5940_v57 = vunpack.c.l.bf16 %v6170_v24  ;;  %v6944_v63 = vld [vmem:[%s7873_s0 + $0xe0] sm:$0xff]   ;;  %v5948_v4 = vunpack.c.l.bf16 %v6172_v35  ;;  %s6531_s5 = smov 119  }
  0x21   :  { %821 = vst [vmem:[#allocation1 + $0x268] sm:$0xff] %v5929_v14  ;;  %853 = vst [vmem:[#allocation1 + $0x258] sm:$0xff] %v5933_v15  ;;  %v2236_v42 = vld [vmem:[#allocation1 + $0x8d] ss:$16 sm:%s6628_s6]   ;;  %v5969_v10 = vunpack.c.h.bf16 %v6944_v63  ;;  %v6962_v15 = vld [vmem:[%s7873_s0 + $0xd0] sm:$0xff]   ;;  %v5968_v63 = vunpack.c.l.bf16 %v6944_v63  ;;  %s2595_s6 = smov 192 }
  0x22   :  { %837 = vst [vmem:[#allocation1 + $0x260] sm:$0xff] %v5928_v16  ;;  %v2241_v43 = vld [vmem:[#allocation1 + $0x8d] ss:$16 sm:%s6646_s13]   ;;  %869 = vst [vmem:[#allocation1 + $0x250] sm:$0xff] %v5932_v25  ;;  %v2238_v52 = vsel %vm2054_vm0, %v2236_v42, %v2233_v38  ;;  %v6972_v17 = vld [vmem:[%s7873_s0 + $0xc0] sm:$0xff]   ;;  %v5977_v22 = vunpack.c.h.bf16 %v6962_v15  ;;  %v5976_v15 = vunpack.c.l.bf16 %v6962_v15  ;;  %s2600_s13 = smov 3 }
  0x23   :  { %37 = vst [vmem:[#allocation1 + $0x3f0] sm:$0xff] %v5828_v11  ;;  %v2246_v53 = vld [vmem:[#allocation1 + $0x8d] ss:$16 sm:%s6648_s14]   ;;  %885 = vst [vmem:[#allocation1 + $0x248] sm:$0xff] %v5937_v28  ;;  %v2243_v59 = vsel %vm2058_vm1, %v2241_v43, %v2238_v52  ;;  %v5985_v24 = vunpack.c.h.bf16 %v6972_v17  ;;  %v6199_v11 = vld [vmem:[%s7873_s0 + $0x30] sm:$0xff]   ;;  %v5984_v17 = vunpack.c.l.bf16 %v6972_v17  ;;  %s2603_s14 = smov 12 }
  0x24   :  { %917 = vst [vmem:[#allocation1 + $0x238] sm:$0xff] %v5941_v29  ;;  %v6922_v54 = vld [vmem:[%s7873_s0 + $0xf8] sm:$0xff]   ;;  %949 = vst [vmem:[#allocation1 + $0x228] sm:$0xff] %v5945_v49  ;;  %v6939_v62 = vld [vmem:[%s7873_s0 + $0xe8] sm:$0xff]   ;;  %v2248_v5 = vsel %vm2062_vm2, %v2246_v53, %v2243_v59  ;;  %v6057_v29 = vunpack.c.h.bf16 %v6199_v11  ;;  %vm2064_vm11 = vcmask 154624   ;;  %vm2624_vm12 = vcmask 1048464  }
  0x25   :  { %981 = vst [vmem:[#allocation1 + $0x218] sm:$0xff] %v5949_v50  ;;  %1013 = vst [vmem:[#allocation1 + $0x208] sm:$0xff] %v5953_v51  ;;  %v5957_v60 = vunpack.c.h.bf16 %v6922_v54  ;;  %v6949_v3 = vld [vmem:[%s7873_s0 + $0xd8] sm:$0xff]   ;;  %v5965_v9 = vunpack.c.h.bf16 %v6939_v62  ;;  %v6967_v16 = vld [vmem:[%s7873_s0 + $0xc8] sm:$0xff]   ;;  %v2250_v21 = vsel %vm2249_vm3, %v2248_v5, %v2230_v37  ;;  %v5956_v54 = vunpack.c.l.bf16 %v6922_v54 }
  0x26   :  { %v5973_v14 = vunpack.c.h.bf16 %v6949_v3  ;;  %901 = vst [vmem:[#allocation1 + $0x240] sm:$0xff] %v5936_v56  ;;  %933 = vst [vmem:[#allocation1 + $0x230] sm:$0xff] %v5940_v57  ;;  %v5981_v23 = vunpack.c.h.bf16 %v6967_v16  ;;  %v6198_v25 = vld [vmem:[%s7873_s0 + $0x38] sm:$0xff]   ;;  %v6991_v26 = vld [vmem:[%s7873_s0 + $0x28] sm:$0xff]   ;;  %v6231_v27 = vpack.i.bf16 %v6895_v27, %v2250_v21  ;;  %v5964_v62 = vunpack.c.l.bf16 %v6939_v62 }
  0x27   :  { %965 = vst [vmem:[#allocation1 + $0x220] sm:$0xff] %v5944_v58  ;;  %1045 = vst [vmem:[#allocation1 + $0x1f8] sm:$0xff] %v5957_v60  ;;  %v6053_v28 = vunpack.c.h.bf16 %v6198_v25  ;;  %v6061_v30 = vunpack.c.h.bf16 %v6991_v26  ;;  %v6201_v35 = vld [vmem:[%s7873_s0 + $0x20] sm:$0xff]   ;;  %v6202_v37 = vld [vmem:[%s7873_s0 + $0x18] sm:$0xff]   ;;  %v6052_v60 = vunpack.c.l.bf16 %v6198_v25  ;;  %v5972_v3 = vunpack.c.l.bf16 %v6949_v3 }
  0x28   :  { %1077 = vst [vmem:[#allocation1 + $0x1e8] sm:$0xff] %v5961_v61  ;;  %997 = vst [vmem:[#allocation1 + $0x210] sm:$0xff] %v5948_v4  ;;  %v7008_v38 = vld [vmem:[%s7873_s0 + $0x10] sm:$0xff]   ;;  %v6065_v42 = vunpack.c.h.bf16 %v6201_v35  ;;  %v6069_v43 = vunpack.c.h.bf16 %v6202_v37  ;;  %v6204_v50 = vld [vmem:[%s7873_s0 + $0x8] sm:$0xff]   ;;  %6232 = vrot.lane.b32.xlu0 %v6231_v27, %s6531_s5  ;;  %v6056_v61 = vunpack.c.l.bf16 %v6199_v11  ;;  %v6064_v21 = vunpack.c.l.bf16 %v6201_v35 }
  0x29   :  { %1109 = vst [vmem:[#allocation1 + $0x1d8] sm:$0xff] %v5965_v9  ;;  %1141 = vst [vmem:[#allocation1 + $0x1c8] sm:$0xff] %v5969_v10  ;;  %v6073_v49 = vunpack.c.h.bf16 %v7008_v38  ;;  %v7021_v51 = vld [vmem:[%s7873_s0] sm:$0xff]   ;;  %v2463_v52 = vld [vmem:[#allocation1 + $0x38d] ss:$16 sm:%s6890_s8]   ;;  %s7024_s0 = smov 12  ;;  %v6077_v53 = vunpack.c.h.bf16 %v6204_v50  ;;  %v6072_v27 = vunpack.c.l.bf16 %v7008_v38  ;;  %v5980_v16 = vunpack.c.l.bf16 %v6967_v16 }
  0x2a   :  { %1173 = vst [vmem:[#allocation1 + $0x1b8] sm:$0xff] %v5973_v14  ;;  %1205 = vst [vmem:[#allocation1 + $0x1a8] sm:$0xff] %v5977_v22  ;;  %s7026_s8 = smov 48  ;;  %v6081_v56 = vunpack.c.h.bf16 %v7021_v51  ;;  %v2466_v57 = vld [vmem:[#allocation1 + $0x38d] ss:$16 sm:%s6908_s29]   ;;  %v6060_v14 = vunpack.c.l.bf16 %v6991_v26  ;;  %v6068_v22 = vunpack.c.l.bf16 %v6202_v37  ;;  %s2521_s29 = smov 192 }
  0x2b   :  { %1237 = vst [vmem:[#allocation1 + $0x198] sm:$0xff] %v5981_v23  ;;  %1269 = vst [vmem:[#allocation1 + $0x188] sm:$0xff] %v5985_v24  ;;  %v2471_v58 = vld [vmem:[#allocation1 + $0x38d] ss:$16 sm:%s6910_s11]   ;;  %v2468_v4 = vsel %vm2054_vm0, %v2466_v57, %v2463_v52  ;;  %s2536_s11 = smov 3  ;;  %vm3152_vm13 = vcmask 933624  }
  0x2c   :  { %1813 = vst [vmem:[#allocation1 + $0x78] sm:$0xff] %v6053_v28  ;;  %1845 = vst [vmem:[#allocation1 + $0x68] sm:$0xff] %v6057_v29  ;;  %v2476_v59 = vld [vmem:[#allocation1 + $0x38d] ss:$16 sm:%s6929_s18]   ;;  %v2473_v11 = vsel %vm2058_vm1, %v2471_v58, %v2468_v4  ;;  %v6076_v28 = vunpack.c.l.bf16 %v6204_v50  ;;  %s2539_s18 = smov 12  ;;  %vm3519_vm14 = vcmask 777824  }
  0x2d   :  { %1877 = vst [vmem:[#allocation1 + $0x58] sm:$0xff] %v6061_v30  ;;  %1909 = vst [vmem:[#allocation1 + $0x48] sm:$0xff] %v6065_v42  ;;  %v2307_v5 = vld [vmem:[#allocation1 + $0x8d] ss:$16 sm:%s6931_s19]   ;;  %v2478_v35 = vsel %vm2062_vm2, %v2476_v59, %v2473_v11  ;;  %s2544_s19 = smov 48  ;;  %vm3886_vm15 = vcmask 622024  }
  0x2e   :  { %1941 = vst [vmem:[#allocation1 + $0x38] sm:$0xff] %v6069_v43  ;;  %1973 = vst [vmem:[#allocation1 + $0x28] sm:$0xff] %v6073_v49  ;;  %v2310_v9 = vld [vmem:[#allocation1 + $0x8d] ss:$16 sm:%s6951_s16]   ;;  %v6080_v43 = vunpack.c.l.bf16 %v7021_v51  ;;  %s2549_s16 = smov 192 }
  0x2f   :  { %v2315_v10 = vld [vmem:[#allocation1 + $0x8d] ss:$16 sm:%s6953_s28]   ;;  %1029 = vst [vmem:[#allocation1 + $0x200] sm:$0xff] %v5952_v36  ;;  %2005 = vst [vmem:[#allocation1 + $0x18] sm:$0xff] %v6077_v53  ;;  %v2312_v26 = vsel %vm2054_vm0, %v2310_v9, %v2307_v5  ;;  %s2554_s28 = smov 3 }
  0x30   :  { %2036 = vst [vmem:[#allocation1 + $0x8] sm:$0xff] %v6081_v56  ;;  %v2445_v23 = vld [vmem:[#allocation1 + $0x20d] ss:$16 sm:%s6852_s3]   ;;  %1829 = vst [vmem:[#allocation1 + $0x70] sm:$0xff] %v6052_v60  ;;  %v2317_v37 = vsel %vm2058_vm1, %v2315_v10, %v2312_v26  ;;  %s2365_s3 = smov 192 }
  0x31   :  { %v2448_v24 = vld [vmem:[#allocation1 + $0x20d] ss:$16 sm:%s6869_s4]   ;;  %1861 = vst [vmem:[#allocation1 + $0x60] sm:$0xff] %v6056_v61  ;;  %1893 = vst [vmem:[#allocation1 + $0x50] sm:$0xff] %v6060_v14  ;;  %s2370_s4 = smov 3 }
  0x32   :  { %v2453_v25 = vld [vmem:[#allocation1 + $0x20d] ss:$16 sm:%s6871_s15]   ;;  %v2450_v29 = vsel %vm2054_vm0, %v2448_v24, %v2445_v23  ;;  %1925 = vst [vmem:[#allocation1 + $0x40] sm:$0xff] %v6064_v21  ;;  %1957 = vst [vmem:[#allocation1 + $0x30] sm:$0xff] %v6068_v22  ;;  %s2373_s15 = smov 12 }
  0x33   :  { %v2458_v30 = vld [vmem:[#allocation1 + $0x20d] ss:$16 sm:%s6888_s7]   ;;  %v2455_v49 = vsel %vm2058_vm1, %v2453_v25, %v2450_v29  ;;  %1989 = vst [vmem:[#allocation1 + $0x20] sm:$0xff] %v6072_v27  ;;  %2021 = vst [vmem:[#allocation1 + $0x10] sm:$0xff] %v6076_v28  ;;  %s2378_s7 = smov 48 }
  0x34   :  { %v2320_v38 = vld [vmem:[#allocation1 + $0x8d] ss:$16 sm:%s6974_s9]   ;;  %v2460_v36 = vsel %vm2062_vm2, %v2458_v30, %v2455_v49  ;;  %2049 = vst [vmem:[#allocation1] sm:$0xff] %v6080_v43  ;;  %69 = vst [vmem:[#allocation1 + $0x3e0] sm:$0xff] %v5832_v18  ;;  %s2557_s9 = smov 12 }
  0x35   :  { %v2353_v42 = vld [vmem:[#allocation1 + $0x28d] ss:$16 sm:%s7012_s20]   ;;  %v7054_v50 = vsel %vm2062_vm2, %v2320_v38, %v2317_v37  ;;  %v7068_v61 = vsel %vm2249_vm3, %v2478_v35, %v2460_v36  ;;  %101 = vst [vmem:[#allocation1 + $0x3d0] sm:$0xff] %v5836_v19  ;;  %133 = vst [vmem:[#allocation1 + $0x3c0] sm:$0xff] %v5840_v20  ;;  %s2590_s20 = smov 48 }
  0x36   :  { %v2356_v51 = vld [vmem:[#allocation1 + $0x28d] ss:$16 sm:%s7024_s0]   ;;  %165 = vst [vmem:[#allocation1 + $0x3b0] sm:$0xff] %v5844_v31  ;;  %197 = vst [vmem:[#allocation1 + $0x3a0] sm:$0xff] %v5848_v32  ;;  %s2608_s0 = smov 48 }
  0x37   :  { %v2361_v52 = vld [vmem:[#allocation1 + $0x28d] ss:$16 sm:%s7026_s8]   ;;  %v2358_v53 = vsel %vm2054_vm0, %v2356_v51, %v2353_v42  ;;  %229 = vst [vmem:[#allocation1 + $0x390] sm:$0xff] %v5852_v44  ;;  %261 = vst [vmem:[#allocation1 + $0x380] sm:$0xff] %v5856_v45  ;;  %s2613_s8 = smov 192 }
  0x38   :  { %v2366_v56 = vld [vmem:[#allocation1 + $0x28d] ss:$16 sm:%s2365_s3]   ;;  %v2363_v4 = vsel %vm2058_vm1, %v2361_v52, %v2358_v53  ;;  %1061 = vst [vmem:[#allocation1 + $0x1f0] sm:$0xff] %v5956_v54  ;;  %1093 = vst [vmem:[#allocation1 + $0x1e0] sm:$0xff] %v5960_v55  ;;  %s2627_s3 = smov 3 }
  0x39   :  { %v2371_v57 = vld [vmem:[#allocation1 + $0x20d] ss:$16 sm:%s2370_s4]   ;;  %v2368_v10 = vsel %vm2062_vm2, %v2366_v56, %v2363_v4  ;;  %1125 = vst [vmem:[#allocation1 + $0x1d0] sm:$0xff] %v5964_v62  ;;  %1157 = vst [vmem:[#allocation1 + $0x1c0] sm:$0xff] %v5968_v63  ;;  %s2630_s4 = smov 12 }
  0x3a   :  { %v2417_v58 = vld [vmem:[#allocation1 + $0x18d] ss:$16 sm:%s6805_s22]   ;;  %s2383_s22 = smov 192  ;;  %1189 = vst [vmem:[#allocation1 + $0x1b0] sm:$0xff] %v5972_v3  ;;  %1221 = vst [vmem:[#allocation1 + $0x1a0] sm:$0xff] %v5976_v15 }
  0x3b   :  { %v2420_v59 = vld [vmem:[#allocation1 + $0x18d] ss:$16 sm:%s6827_s24]   ;;  %s7080_s24 = smov 3  ;;  %1253 = vst [vmem:[#allocation1 + $0x190] sm:$0xff] %v5980_v16  ;;  %1285 = vst [vmem:[#allocation1 + $0x180] sm:$0xff] %v5984_v17 }
  0x3c   :  { %v2425_v60 = vld [vmem:[#allocation1 + $0x18d] ss:$16 sm:%s6829_s25]   ;;  %v2422_v5 = vsel %vm2054_vm0, %v2420_v59, %v2417_v58  ;;  %293 = vst [vmem:[#allocation1 + $0x370] sm:$0xff] %v5860_v0  ;;  %325 = vst [vmem:[#allocation1 + $0x360] sm:$0xff] %v5864_v1  ;;  %s2511_s25 = smov 12 }
  0x3d   :  { %v2430_v9 = vld [vmem:[#allocation1 + $0x18d] ss:$16 sm:%s6850_s23]   ;;  %v2427_v22 = vsel %vm2058_vm1, %v2425_v60, %v2422_v5  ;;  %s2516_s23 = smov 48  ;;  %357 = vst [vmem:[#allocation1 + $0x350] sm:$0xff] %v5868_v2  ;;  %389 = vst [vmem:[#allocation1 + $0x340] sm:$0xff] %v5872_v6 }
  0x3e   :  { %v2374_v14 = vld [vmem:[#allocation1 + $0x20d] ss:$16 sm:%s2373_s15]   ;;  %v2432_v26 = vsel %vm2062_vm2, %v2430_v9, %v2427_v22  ;;  %421 = vst [vmem:[#allocation1 + $0x330] sm:$0xff] %v5876_v7  ;;  %453 = vst [vmem:[#allocation1 + $0x320] sm:$0xff] %v5880_v8  ;;  %v2596_v17 = vld [vmem:[#allocation1 + $0x86] ss:$16 sm:%s2595_s6]  }
  0x3f   :  { %v2379_v21 = vld [vmem:[#allocation1 + $0x20d] ss:$16 sm:%s2378_s7]   ;;  %v2376_v23 = vsel %vm2054_vm0, %v2374_v14, %v2371_v57  ;;  %485 = vst [vmem:[#allocation1 + $0x310] sm:$0xff] %v5884_v12  ;;  %517 = vst [vmem:[#allocation1 + $0x300] sm:$0xff] %v5888_v13  ;;  %s2635_s15 = smov 48  ;;  %s2640_s7 = smov 192 }
  0x40   :  { %v2399_v24 = vld [vmem:[#allocation1 + $0xd] ss:$16 sm:%s6759_s12]   ;;  %v2381_v27 = vsel %vm2058_vm1, %v2379_v21, %v2376_v23  ;;  %s2493_s12 = smov 12  ;;  %1317 = vst [vmem:[#allocation1 + $0x170] sm:$0xff] %v5988_v33  ;;  %1349 = vst [vmem:[#allocation1 + $0x160] sm:$0xff] %v5992_v34  ;;  %s2765_s6 = smov 3 }
  0x41   :  { %v2402_v25 = vld [vmem:[#allocation1 + $0xd] ss:$16 sm:%s6780_s30]   ;;  %s2498_s30 = smov 48  ;;  %1381 = vst [vmem:[#allocation1 + $0x150] sm:$0xff] %v5996_v39  ;;  %1413 = vst [vmem:[#allocation1 + $0x140] sm:$0xff] %v6000_v40 }
  0x42   :  { %v2407_v11 = vld [vmem:[#allocation1 + $0xd] ss:$16 sm:%s6782_s2]   ;;  %v2404_v28 = vsel %vm2054_vm0, %v2402_v25, %v2399_v24  ;;  %s2503_s2 = smov 192  ;;  %1445 = vst [vmem:[#allocation1 + $0x130] sm:$0xff] %v6004_v41  ;;  %1477 = vst [vmem:[#allocation1 + $0x120] sm:$0xff] %v6008_v46 }
  0x43   :  { %v2412_v29 = vld [vmem:[#allocation1 + $0xd] ss:$16 sm:%s6803_s21]   ;;  %v2409_v37 = vsel %vm2058_vm1, %v2407_v11, %v2404_v28  ;;  %s2508_s21 = smov 3  ;;  %1509 = vst [vmem:[#allocation1 + $0x110] sm:$0xff] %v6012_v47  ;;  %1541 = vst [vmem:[#allocation1 + $0x100] sm:$0xff] %v6016_v48 }
  0x44   :  { %v2325_v30 = vld [vmem:[#allocation1 + $0xd] ss:$16 sm:%s6976_s10]   ;;  %v2414_v51 = vsel %vm2062_vm2, %v2412_v29, %v2409_v37  ;;  %s2562_s10 = smov 48  ;;  %v2601_v37 = vld [vmem:[#allocation1 + $0x6] ss:$16 sm:%s2600_s13]   ;;  %s2768_s13 = smov 12 }
  0x45   :  { %v2328_v35 = vld [vmem:[#allocation1 + $0xd] ss:$16 sm:%s6993_s26]   ;;  %v2434_v36 = vsel %vm2249_vm3, %v2432_v26, %v2414_v51  ;;  %s2567_s26 = smov 192  ;;  %v2614_v51 = vld [vmem:[#allocation1 + $0x6] ss:$16 sm:%s2613_s8]   ;;  %s2783_s8 = smov 3 }
  0x46   :  { %v2330_v38 = vsel %vm2054_vm0, %v2328_v35, %v2325_v30  ;;  %v2333_v42 = vld [vmem:[#allocation1 + $0xd] ss:$16 sm:%s6995_s27]   ;;  %v6241_v31 = vpack.i.bf16 %v7068_v61, %v2434_v36  ;;  %s2582_s27 = smov 3  ;;  %v2591_v35 = vld [vmem:[#allocation1 + $0x86] ss:$16 sm:%s2590_s20]   ;;  %s2750_s20 = smov 192 }
  0x47   :  { %v2338_v43 = vld [vmem:[#allocation1 + $0xd] ss:$16 sm:%s7010_s17]   ;;  %v2335_v52 = vsel %vm2058_vm1, %v2333_v42, %v2330_v38  ;;  %v2583_v3 = vld [vmem:[#allocation1 + $0x86] ss:$16 sm:%s2582_s27]   ;;  %s2585_s17 = smov 12  ;;  %s2740_s27 = smov 12 }
  0x48   :  { %v2384_v49 = vld [vmem:[#allocation1 + $0x20d] ss:$16 sm:%s2383_s22]   ;;  %v2340_v53 = vsel %vm2062_vm2, %v2338_v43, %v2335_v52  ;;  %6242 = vrot.lane.b32.xlu1 %v6241_v31, %s6531_s5  ;;  %v2586_v30 = vld [vmem:[#allocation1 + $0x86] ss:$16 sm:%s2585_s17]   ;;  %s2648_s22 = smov 12  ;;  %s2745_s17 = smov 48 }
  0x49   :  { %v2386_v18 = vsel %vm2062_vm2, %v2384_v49, %v2381_v27  ;;  %v2491_v19 = vld [vmem:[#allocation1 + $0x18d] ss:$16 sm:%s7080_s24]   ;;  %v2342_v50 = vsel %vm2249_vm3, %v2340_v53, %v7054_v50  ;;  %v2588_v16 = vsel %vm2054_vm0, %v2586_v30, %v2583_v3  ;;  %v2604_v43 = vld [vmem:[#allocation1 + $0x6] ss:$16 sm:%s2603_s14]   ;;  %s2653_s24 = smov 48  ;;  %s2773_s14 = smov 48 }
  0x4a   :  { %v2388_v56 = vsel %vm2249_vm3, %v2386_v18, %v2368_v10  ;;  %v2494_v57 = vld [vmem:[#allocation1 + $0x18d] ss:$16 sm:%s2493_s12]   ;;  %v2593_v42 = vsel %vm2058_vm1, %v2591_v35, %v2588_v16  ;;  %v2609_v49 = vld [vmem:[#allocation1 + $0x6] ss:$16 sm:%s2608_s0]   ;;  %v2606_v1 = vsel %vm2054_vm0, %v2604_v43, %v2601_v37  ;;  %s2658_s12 = smov 192  ;;  %s2778_s0 = smov 192 }
  0x4b   :  { %v2499_v20 = vld [vmem:[#allocation1 + $0x18d] ss:$16 sm:%s2498_s30]   ;;  %v2496_v58 = vsel %vm2054_vm0, %v2494_v57, %v2491_v19  ;;  %v6236_v61 = vpack.i.bf16 %v2388_v56, %v2342_v50  ;;  %v2611_v52 = vsel %vm2058_vm1, %v2609_v49, %v2606_v1  ;;  %v2628_v18 = vld [vmem:[#allocation1 + $0x286] ss:$16 sm:%s2627_s3]   ;;  %v2598_v2 = vsel %vm2062_vm2, %v2596_v17, %v2593_v42  ;;  %s2673_s30 = smov 3  ;;  %s2786_s3 = smov 12 }
  0x4c   :  { %v2504_v59 = vld [vmem:[#allocation1 + $0x18d] ss:$16 sm:%s2503_s2]   ;;  %v2501_v4 = vsel %vm2058_vm1, %v2499_v20, %v2496_v58  ;;  %v2631_v19 = vld [vmem:[#allocation1 + $0x286] ss:$16 sm:%s2630_s4]   ;;  %v2616_v36 = vsel %vm2062_vm2, %v2614_v51, %v2611_v52  ;;  %s2676_s2 = smov 12  ;;  %s2791_s4 = smov 48 }
  0x4d   :  { %v2509_v60 = vld [vmem:[#allocation1 + $0x10d] ss:$16 sm:%s2508_s21]   ;;  %v2506_v5 = vsel %vm2062_vm2, %v2504_v59, %v2501_v4  ;;  %6237 = vrot.lane.b32.xlu0 %v6236_v61, %s6531_s5  ;;  %v2633_v53 = vsel %vm2054_vm0, %v2631_v19, %v2628_v18  ;;  %v2636_v56 = vld [vmem:[#allocation1 + $0x286] ss:$16 sm:%s2635_s15]   ;;  %v2618_v7 = vsel %vm2617_vm4, %v2616_v36, %v2598_v2  ;;  %s2681_s21 = smov 48  ;;  %s2796_s15 = smov 192 }
  0x4e   :  { %v2512_v32 = vld [vmem:[#allocation1 + $0x10d] ss:$16 sm:%s2511_s25]   ;;  %v2641_v57 = vld [vmem:[#allocation1 + $0x286] ss:$16 sm:%s2640_s7]   ;;  %v2638_v20 = vsel %vm2058_vm1, %v2636_v56, %v2633_v53  ;;  %s2686_s25 = smov 192  ;;  %s2811_s7 = smov 3 }
  0x4f   :  { %v2517_v44 = vld [vmem:[#allocation1 + $0x10d] ss:$16 sm:%s2516_s23]   ;;  %v2514_v9 = vsel %vm2054_vm0, %v2512_v32, %v2509_v60  ;;  %v2649_v31 = vld [vmem:[#allocation1 + $0x206] ss:$16 sm:%s2648_s22]   ;;  %v2643_v50 = vsel %vm2062_vm2, %v2641_v57, %v2638_v20  ;;  %s2691_s23 = smov 3  ;;  %s2819_s22 = smov 48 }
  0x50   :  { %v2522_v10 = vld [vmem:[#allocation1 + $0x10d] ss:$16 sm:%s2521_s29]   ;;  %v2519_v21 = vsel %vm2058_vm1, %v2517_v44, %v2514_v9  ;;  %v2654_v59 = vld [vmem:[#allocation1 + $0x206] ss:$16 sm:%s2653_s24]   ;;  %s2694_s29 = smov 12  ;;  %s2824_s24 = smov 192 }
  0x51   :  { %v2537_v14 = vld [vmem:[#allocation1 + $0x38d] ss:$16 sm:%s2536_s11]   ;;  %v2524_v22 = vsel %vm2062_vm2, %v2522_v10, %v2519_v21  ;;  %v2659_v60 = vld [vmem:[#allocation1 + $0x206] ss:$16 sm:%s2658_s12]   ;;  %s2699_s11 = smov 48  ;;  %s2829_s12 = smov 3 }
  0x52   :  { %v2540_v45 = vld [vmem:[#allocation1 + $0x38d] ss:$16 sm:%s2539_s18]   ;;  %v2526_v28 = vsel %vm2249_vm3, %v2524_v22, %v2506_v5  ;;  %v2674_v4 = vld [vmem:[#allocation1 + $0x6] ss:$16 sm:%s2673_s30]   ;;  %s2704_s18 = smov 192  ;;  %s2832_s30 = smov 12 }
  0x53   :  { %v2545_v54 = vld [vmem:[#allocation1 + $0x38d] ss:$16 sm:%s2544_s19]   ;;  %v2542_v23 = vsel %vm2054_vm0, %v2540_v45, %v2537_v14  ;;  %v2677_v32 = vld [vmem:[#allocation1 + $0x6] ss:$16 sm:%s2676_s2]   ;;  %s2719_s19 = smov 3  ;;  %s2837_s2 = smov 48 }
  0x54   :  { %v2550_v55 = vld [vmem:[#allocation1 + $0x38d] ss:$16 sm:%s2549_s16]   ;;  %v2547_v24 = vsel %vm2058_vm1, %v2545_v54, %v2542_v23  ;;  %v2679_v8 = vsel %vm2054_vm0, %v2677_v32, %v2674_v4  ;;  %v2682_v12 = vld [vmem:[#allocation1 + $0x6] ss:$16 sm:%s2681_s21]   ;;  %s2722_s16 = smov 12  ;;  %s2842_s21 = smov 192 }
  0x55   :  { %v2555_v62 = vld [vmem:[#allocation1 + $0x30d] ss:$16 sm:%s2554_s28]   ;;  %v2552_v26 = vsel %vm2062_vm2, %v2550_v55, %v2547_v24  ;;  %v2687_v5 = vld [vmem:[#allocation1 + $0x6] ss:$16 sm:%s2686_s25]   ;;  %v2684_v10 = vsel %vm2058_vm1, %v2682_v12, %v2679_v8  ;;  %s2727_s28 = smov 48  ;;  %s2857_s25 = smov 3 }
  0x56   :  { %v2558_v25 = vld [vmem:[#allocation1 + $0x30d] ss:$16 sm:%s2557_s9]   ;;  %v2692_v14 = vld [vmem:[#allocation1 + $0x186] ss:$16 sm:%s2691_s23]   ;;  %s2732_s9 = smov 192  ;;  %v2689_v22 = vsel %vm2062_vm2, %v2687_v5, %v2684_v10  ;;  %s2860_s23 = smov 12 }
  0x57   :  { %v2563_v11 = vld [vmem:[#allocation1 + $0x30d] ss:$16 sm:%s2562_s10]   ;;  %v2560_v27 = vsel %vm2054_vm0, %v2558_v25, %v2555_v62  ;;  %v2695_v13 = vld [vmem:[#allocation1 + $0x186] ss:$16 sm:%s2694_s29]   ;;  %s6532_s10 = smov 114   ;;  %s2865_s29 = smov 48 }
  0x58   :  { %v2568_v63 = vld [vmem:[#allocation1 + $0x30d] ss:$16 sm:%s2567_s26]   ;;  %v2565_v29 = vsel %vm2058_vm1, %v2563_v11, %v2560_v27  ;;  %v2697_v21 = vsel %vm2054_vm0, %v2695_v13, %v2692_v14  ;;  %v2700_v45 = vld [vmem:[#allocation1 + $0x186] ss:$16 sm:%s2699_s11]   ;;  %s2737_s26 = smov 3  ;;  %s2870_s11 = smov 192 }
  0x59   :  { %v2570_v15 = vsel %vm2062_vm2, %v2568_v63, %v2565_v29  ;;  %v2705_v54 = vld [vmem:[#allocation1 + $0x186] ss:$16 sm:%s2704_s18]   ;;  %v2702_v34 = vsel %vm2058_vm1, %v2700_v45, %v2697_v21  ;;  %s2875_s18 = smov 3 }
  0x5a   :  { %v2572_v38 = vsel %vm2249_vm3, %v2570_v15, %v2552_v26  ;;  %v2720_v39 = vld [vmem:[#allocation1 + $0x206] ss:$16 sm:%s2719_s19]   ;;  %v2707_v23 = vsel %vm2062_vm2, %v2705_v54, %v2702_v34  ;;  %s2878_s19 = smov 12  ;;  %vm4069_vm3 = vcmask 507224  }
  0x5b   :  { %v6246_v0 = vpack.i.bf16 %v2572_v38, %v2526_v28  ;;  %v2723_v40 = vld [vmem:[#allocation1 + $0x206] ss:$16 sm:%s2722_s16]   ;;  %v2709_v27 = vsel %vm2617_vm4, %v2707_v23, %v2689_v22  ;;  %s2883_s16 = smov 48 }
  0x5c   :  { %v2725_v55 = vsel %vm2054_vm0, %v2723_v40, %v2720_v39  ;;  %v2728_v62 = vld [vmem:[#allocation1 + $0x206] ss:$16 sm:%s2727_s28]   ;;  %s2888_s28 = smov 192 }
  0x5d   :  { %6247 = vrot.lane.b32.xlu1 %v6246_v0, %s6531_s5  ;;  %s2645_s5 = smov 3  ;;  %v2733_v41 = vld [vmem:[#allocation1 + $0x206] ss:$16 sm:%s2732_s9]   ;;  %v2730_v46 = vsel %vm2058_vm1, %v2728_v62, %v2725_v55  ;;  %s2903_s9 = smov 3 }
  0x5e   :  { %v2646_v6 = vld [vmem:[#allocation1 + $0x206] ss:$16 sm:%s2645_s5]   ;;  %v2735_v11 = vsel %vm2062_vm2, %v2733_v41, %v2730_v46  ;;  %s2814_s5 = smov 12 }
  0x5f   :  { %v2651_v58 = vsel %vm2054_vm0, %v2649_v31, %v2646_v6  ;;  %v2738_v24 = vld [vmem:[#allocation1 + $0x386] ss:$16 sm:%s2737_s26]   ;;  %s2906_s26 = smov 12 }
  0x60   :  { %v2656_v61 = vsel %vm2058_vm1, %v2654_v59, %v2651_v58  ;;  %v2741_v25 = vld [vmem:[#allocation1 + $0x386] ss:$16 sm:%s2740_s27]   ;;  %s2911_s27 = smov 48 }
  0x61   :  { %v2661_v44 = vsel %vm2062_vm2, %v2659_v60, %v2656_v61  ;;  %v2743_v47 = vsel %vm2054_vm0, %v2741_v25, %v2738_v24  ;;  %v2746_v48 = vld [vmem:[#allocation1 + $0x386] ss:$16 sm:%s2745_s17]   ;;  %s2916_s17 = smov 192 }
  0x62   :  { %v2663_v9 = vsel %vm2617_vm4, %v2661_v44, %v2643_v50  ;;  %v2751_v26 = vld [vmem:[#allocation1 + $0x386] ss:$16 sm:%s2750_s20]   ;;  %v2748_v63 = vsel %vm2058_vm1, %v2746_v48, %v2743_v47  ;;  %s2921_s20 = smov 3 }
  0x63   :  { %v6251_v33 = vpack.i.bf16 %v2663_v9, %v2618_v7  ;;  %v2766_v3 = vld [vmem:[#allocation1 + $0x186] ss:$16 sm:%s2765_s6]   ;;  %v2753_v29 = vsel %vm2062_vm2, %v2751_v26, %v2748_v63  ;;  %s2924_s6 = smov 12 }
  0x64   :  { %v2769_v28 = vld [vmem:[#allocation1 + $0x186] ss:$16 sm:%s2768_s13]   ;;  %v2755_v16 = vsel %vm2617_vm4, %v2753_v29, %v2735_v11  ;;  %s2929_s13 = smov 48 }
  0x65   :  { %6252 = vrot.lane.b32.xlu0 %v6251_v33, %s6532_s10  ;;  %v2771_v30 = vsel %vm2054_vm0, %v2769_v28, %v2766_v3  ;;  %v2774_v35 = vld [vmem:[#allocation1 + $0x186] ss:$16 sm:%s2773_s14]   ;;  %v6256_v42 = vpack.i.bf16 %v2755_v16, %v2709_v27  ;;  %s2934_s14 = smov 192 }
  0x66   :  { %v2779_v15 = vld [vmem:[#allocation1 + $0x186] ss:$16 sm:%s2778_s0]   ;;  %v2776_v17 = vsel %vm2058_vm1, %v2774_v35, %v2771_v30  ;;  %s2949_s0 = smov 3 }
  0x67   :  { %v2784_v37 = vld [vmem:[#allocation1 + $0x106] ss:$16 sm:%s2783_s8]   ;;  %6257 = vrot.lane.b32.xlu1 %v6256_v42, %s6532_s10  ;;  %v2781_v18 = vsel %vm2062_vm2, %v2779_v15, %v2776_v17  ;;  %s2952_s8 = smov 12  ;;  %v2950_v27 = vld [vmem:[#allocation1 + $0x8c] ss:$16 sm:%s2949_s0]   ;;  %s3113_s0 = smov 12 }
  0x68   :  { %v2787_v38 = vld [vmem:[#allocation1 + $0x106] ss:$16 sm:%s2786_s3]   ;;  %v2953_v63 = vld [vmem:[#allocation1 + $0x8c] ss:$16 sm:%s2952_s8]   ;;  %s2957_s3 = smov 48  ;;  %s3118_s8 = smov 48 }
  0x69   :  { %v2789_v43 = vsel %vm2054_vm0, %v2787_v38, %v2784_v37  ;;  %v2792_v49 = vld [vmem:[#allocation1 + $0x106] ss:$16 sm:%s2791_s4]   ;;  %s2962_s4 = smov 192  ;;  %v2955_v28 = vsel %vm2054_vm0, %v2953_v63, %v2950_v27  ;;  %v2958_v29 = vld [vmem:[#allocation1 + $0x8c] ss:$16 sm:%s2957_s3]   ;;  %s3123_s3 = smov 192 }
  0x6a   :  { %v2797_v0 = vld [vmem:[#allocation1 + $0x106] ss:$16 sm:%s2796_s15]   ;;  %v2794_v1 = vsel %vm2058_vm1, %v2792_v49, %v2789_v43  ;;  %v2963_v30 = vld [vmem:[#allocation1 + $0x8c] ss:$16 sm:%s2962_s4]   ;;  %s2972_s15 = smov 3  ;;  %v2960_v15 = vsel %vm2058_vm1, %v2958_v29, %v2955_v28  ;;  %s3133_s4 = smov 3 }
  0x6b   :  { %v2812_v51 = vld [vmem:[#allocation1 + $0x386] ss:$16 sm:%s2811_s7]   ;;  %v2799_v19 = vsel %vm2062_vm2, %v2797_v0, %v2794_v1  ;;  %v2973_v16 = vld [vmem:[#allocation1 + $0x28c] ss:$16 sm:%s2972_s15]   ;;  %s2975_s7 = smov 12  ;;  %v2965_v42 = vsel %vm2062_vm2, %v2963_v30, %v2960_v15  ;;  %s3136_s15 = smov 12 }
  0x6c   :  { %v2815_v52 = vld [vmem:[#allocation1 + $0x386] ss:$16 sm:%s2814_s5]   ;;  %v2801_v59 = vsel %vm2617_vm4, %v2799_v19, %v2781_v18  ;;  %s2980_s5 = smov 48  ;;  %v2976_v37 = vld [vmem:[#allocation1 + $0x28c] ss:$16 sm:%s2975_s7]   ;;  %s3141_s7 = smov 48 }
  0x6d   :  { %v2817_v2 = vsel %vm2054_vm0, %v2815_v52, %v2812_v51  ;;  %v2820_v36 = vld [vmem:[#allocation1 + $0x386] ss:$16 sm:%s2819_s22]   ;;  %v2981_v38 = vld [vmem:[#allocation1 + $0x28c] ss:$16 sm:%s2980_s5]   ;;  %s2985_s22 = smov 192  ;;  %v2978_v43 = vsel %vm2054_vm0, %v2976_v37, %v2973_v16  ;;  %s3146_s5 = smov 192 }
  0x6e   :  { %v2825_v53 = vld [vmem:[#allocation1 + $0x386] ss:$16 sm:%s2824_s24]   ;;  %v2822_v56 = vsel %vm2058_vm1, %v2820_v36, %v2817_v2  ;;  %s2995_s24 = smov 3  ;;  %v2986_v49 = vld [vmem:[#allocation1 + $0x28c] ss:$16 sm:%s2985_s22]   ;;  %v2983_v1 = vsel %vm2058_vm1, %v2981_v38, %v2978_v43  ;;  %s3155_s22 = smov 3 }
  0x6f   :  { %v2830_v57 = vld [vmem:[#allocation1 + $0x306] ss:$16 sm:%s2829_s12]   ;;  %v2827_v6 = vsel %vm2062_vm2, %v2825_v53, %v2822_v56  ;;  %v2996_v0 = vld [vmem:[#allocation1 + $0xc] ss:$16 sm:%s2995_s24]   ;;  %s2998_s12 = smov 12  ;;  %v2988_v18 = vsel %vm2062_vm2, %v2986_v49, %v2983_v1  ;;  %s3158_s24 = smov 12 }
  0x70   :  { %v2833_v20 = vld [vmem:[#allocation1 + $0x306] ss:$16 sm:%s2832_s30]   ;;  %s3003_s30 = smov 48  ;;  %v2999_v51 = vld [vmem:[#allocation1 + $0xc] ss:$16 sm:%s2998_s12]   ;;  %v6266_v53 = vpack.i.bf16 %v2988_v18, %v2965_v42  ;;  %s3163_s12 = smov 48 }
  0x71   :  { %v2835_v31 = vsel %vm2054_vm0, %v2833_v20, %v2830_v57  ;;  %v2838_v50 = vld [vmem:[#allocation1 + $0x306] ss:$16 sm:%s2837_s2]   ;;  %v3004_v52 = vld [vmem:[#allocation1 + $0xc] ss:$16 sm:%s3003_s30]   ;;  %s3018_s2 = smov 3  ;;  %v3001_v19 = vsel %vm2054_vm0, %v2999_v51, %v2996_v0  ;;  %s3168_s30 = smov 192 }
  0x72   :  { %v2843_v58 = vld [vmem:[#allocation1 + $0x306] ss:$16 sm:%s2842_s21]   ;;  %v2840_v60 = vsel %vm2058_vm1, %v2838_v50, %v2835_v31  ;;  %v3019_v36 = vld [vmem:[#allocation1 + $0x20c] ss:$16 sm:%s3018_s2]   ;;  %s3021_s21 = smov 12  ;;  %v3006_v56 = vsel %vm2058_vm1, %v3004_v52, %v3001_v19  ;;  %s3181_s2 = smov 12 }
  0x73   :  { %v2858_v7 = vld [vmem:[#allocation1 + $0x106] ss:$16 sm:%s2857_s25]   ;;  %v2845_v4 = vsel %vm2062_vm2, %v2843_v58, %v2840_v60  ;;  %s3026_s25 = smov 48  ;;  %v3022_v57 = vld [vmem:[#allocation1 + $0x20c] ss:$16 sm:%s3021_s21]   ;;  %s3186_s21 = smov 48 }
  0x74   :  { %v2861_v61 = vld [vmem:[#allocation1 + $0x106] ss:$16 sm:%s2860_s23]   ;;  %v2847_v12 = vsel %vm2617_vm4, %v2845_v4, %v2827_v6  ;;  %v3027_v20 = vld [vmem:[#allocation1 + $0x20c] ss:$16 sm:%s3026_s25]   ;;  %s3031_s23 = smov 192  ;;  %v3024_v31 = vsel %vm2054_vm0, %v3022_v57, %v3019_v36  ;;  %s3191_s25 = smov 192 }
  0x75   :  { %v2863_v32 = vsel %vm2054_vm0, %v2861_v61, %v2858_v7  ;;  %v2866_v44 = vld [vmem:[#allocation1 + $0x106] ss:$16 sm:%s2865_s29]   ;;  %v6261_v14 = vpack.i.bf16 %v2847_v12, %v2801_v59  ;;  %s3041_s29 = smov 3  ;;  %v3032_v50 = vld [vmem:[#allocation1 + $0x20c] ss:$16 sm:%s3031_s23]   ;;  %v3029_v59 = vsel %vm2058_vm1, %v3027_v20, %v3024_v31  ;;  %s3201_s23 = smov 3 }
  0x76   :  { %v2871_v8 = vld [vmem:[#allocation1 + $0x106] ss:$16 sm:%s2870_s11]   ;;  %v2868_v5 = vsel %vm2058_vm1, %v2866_v44, %v2863_v32  ;;  %v3042_v58 = vld [vmem:[#allocation1 + $0x18c] ss:$16 sm:%s3041_s29]   ;;  %s3044_s11 = smov 12  ;;  %v3034_v61 = vsel %vm2062_vm2, %v3032_v50, %v3029_v59  ;;  %s3204_s29 = smov 12 }
  0x77   :  { %v2876_v9 = vld [vmem:[#allocation1 + $0x86] ss:$16 sm:%s2875_s18]   ;;  %6262 = vrot.lane.b32.xlu0 %v6261_v14, %s6532_s10  ;;  %v2873_v39 = vsel %vm2062_vm2, %v2871_v8, %v2868_v5  ;;  %s3049_s18 = smov 48  ;;  %v3045_v60 = vld [vmem:[#allocation1 + $0x18c] ss:$16 sm:%s3044_s11]   ;;  %s3209_s11 = smov 48 }
  0x78   :  { %v2879_v10 = vld [vmem:[#allocation1 + $0x86] ss:$16 sm:%s2878_s19]   ;;  %s6533_s19 = smov 100   ;;  %v3050_v7 = vld [vmem:[#allocation1 + $0x18c] ss:$16 sm:%s3049_s18]   ;;  %v3047_v4 = vsel %vm2054_vm0, %v3045_v60, %v3042_v58  ;;  %s3214_s18 = smov 192 }
  0x79   :  { %v2881_v13 = vsel %vm2054_vm0, %v2879_v10, %v2876_v9  ;;  %v2884_v33 = vld [vmem:[#allocation1 + $0x86] ss:$16 sm:%s2883_s16]   ;;  %s3054_s16 = smov 192  ;;  %v3052_v12 = vsel %vm2058_vm1, %v3050_v7, %v3047_v4  ;;  %v3156_v30 = vld [vmem:[#allocation1 + $0x205] ss:$16 sm:%s3155_s22]   ;;  %s3319_s22 = smov 12 }
  0x7a   :  { %v2889_v21 = vld [vmem:[#allocation1 + $0x86] ss:$16 sm:%s2888_s28]   ;;  %v2886_v45 = vsel %vm2058_vm1, %v2884_v33, %v2881_v13  ;;  %s3064_s28 = smov 3  ;;  %v3055_v32 = vld [vmem:[#allocation1 + $0x18c] ss:$16 sm:%s3054_s16]   ;;  %s3227_s16 = smov 12 }
  0x7b   :  { %v2904_v54 = vld [vmem:[#allocation1 + $0x306] ss:$16 sm:%s2903_s9]   ;;  %v2891_v40 = vsel %vm2062_vm2, %v2889_v21, %v2886_v45  ;;  %6267 = vrot.lane.b32.xlu0 %v6266_v53, %s6533_s19  ;;  %v3065_v44 = vld [vmem:[#allocation1 + $0x38c] ss:$16 sm:%s3064_s28]   ;;  %s3067_s9 = smov 12  ;;  %v3057_v10 = vsel %vm2062_vm2, %v3055_v32, %v3052_v12  ;;  %s6534_s28 = smov 95  }
  0x7c   :  { %v2907_v34 = vld [vmem:[#allocation1 + $0x306] ss:$16 sm:%s2906_s26]   ;;  %v2893_v48 = vsel %vm2617_vm4, %v2891_v40, %v2873_v39  ;;  %s3072_s26 = smov 48  ;;  %v3068_v5 = vld [vmem:[#allocation1 + $0x38c] ss:$16 sm:%s3067_s9]   ;;  %s3232_s9 = smov 48 }
  0x7d   :  { %v2909_v22 = vsel %vm2054_vm0, %v2907_v34, %v2904_v54  ;;  %v2912_v23 = vld [vmem:[#allocation1 + $0x306] ss:$16 sm:%s2911_s27]   ;;  %v3073_v9 = vld [vmem:[#allocation1 + $0x38c] ss:$16 sm:%s3072_s26]   ;;  %s3077_s27 = smov 192  ;;  %v3070_v14 = vsel %vm2054_vm0, %v3068_v5, %v3065_v44  ;;  %s3237_s26 = smov 192 }
  0x7e   :  { %v2917_v55 = vld [vmem:[#allocation1 + $0x306] ss:$16 sm:%s2916_s17]   ;;  %v2914_v62 = vsel %vm2058_vm1, %v2912_v23, %v2909_v22  ;;  %s3087_s17 = smov 3  ;;  %v3078_v13 = vld [vmem:[#allocation1 + $0x38c] ss:$16 sm:%s3077_s27]   ;;  %v3075_v21 = vsel %vm2058_vm1, %v3073_v9, %v3070_v14  ;;  %s3247_s27 = smov 3 }
  0x7f   :  { %v2922_v41 = vld [vmem:[#allocation1 + $0x286] ss:$16 sm:%s2921_s20]   ;;  %v2919_v24 = vsel %vm2062_vm2, %v2917_v55, %v2914_v62  ;;  %v3088_v33 = vld [vmem:[#allocation1 + $0x10c] ss:$16 sm:%s3087_s17]   ;;  %s3090_s20 = smov 12  ;;  %v3080_v34 = vsel %vm2062_vm2, %v3078_v13, %v3075_v21  ;;  %s3250_s17 = smov 12 }
  0x80   :  { %v2925_v46 = vld [vmem:[#allocation1 + $0x286] ss:$16 sm:%s2924_s6]   ;;  %s3095_s6 = smov 48  ;;  %v3091_v45 = vld [vmem:[#allocation1 + $0x10c] ss:$16 sm:%s3090_s20]   ;;  %v6281_v23 = vpack.i.bf16 %v3080_v34, %v3057_v10  ;;  %s3255_s20 = smov 48 }
  0x81   :  { %v2927_v25 = vsel %vm2054_vm0, %v2925_v46, %v2922_v41  ;;  %v2930_v11 = vld [vmem:[#allocation1 + $0x286] ss:$16 sm:%s2929_s13]   ;;  %v3096_v54 = vld [vmem:[#allocation1 + $0x10c] ss:$16 sm:%s3095_s6]   ;;  %s3100_s13 = smov 192  ;;  %v3093_v39 = vsel %vm2054_vm0, %v3091_v45, %v3088_v33  ;;  %s3260_s6 = smov 192 }
  0x82   :  { %v2935_v47 = vld [vmem:[#allocation1 + $0x286] ss:$16 sm:%s2934_s14]   ;;  %v2932_v26 = vsel %vm2058_vm1, %v2930_v11, %v2927_v25  ;;  %s3110_s14 = smov 3  ;;  %v3101_v40 = vld [vmem:[#allocation1 + $0x10c] ss:$16 sm:%s3100_s13]   ;;  %v3098_v55 = vsel %vm2058_vm1, %v3096_v54, %v3093_v39  ;;  %6282 = vrot.lane.b32.xlu0 %v6281_v23, %s6533_s19  ;;  %s3270_s13 = smov 3 }
  0x83   :  { %v2937_v3 = vsel %vm2062_vm2, %v2935_v47, %v2932_v26  ;;  %v3111_v22 = vld [vmem:[#allocation1 + $0x30c] ss:$16 sm:%s3110_s14]   ;;  %v3103_v46 = vsel %vm2062_vm2, %v3101_v40, %v3098_v55  ;;  %v3134_v11 = vld [vmem:[#allocation1 + $0x5] ss:$16 sm:%s3133_s4]   ;;  %s3273_s14 = smov 12  ;;  %s3296_s4 = smov 12 }
  0x84   :  { %v2939_v35 = vsel %vm2617_vm4, %v2937_v3, %v2919_v24  ;;  %v3114_v62 = vld [vmem:[#allocation1 + $0x30c] ss:$16 sm:%s3113_s0]   ;;  %v3142_v26 = vld [vmem:[#allocation1 + $0x5] ss:$16 sm:%s3141_s7]   ;;  %s3278_s0 = smov 48  ;;  %s3306_s7 = smov 192 }
  0x85   :  { %v6271_v17 = vpack.i.bf16 %v2939_v35, %v2893_v48  ;;  %v3119_v41 = vld [vmem:[#allocation1 + $0x30c] ss:$16 sm:%s3118_s8]   ;;  %v3116_v24 = vsel %vm2054_vm0, %v3114_v62, %v3111_v22  ;;  %v3137_v48 = vld [vmem:[#allocation1 + $0x5] ss:$16 sm:%s3136_s15]   ;;  %s3283_s8 = smov 192  ;;  %s3301_s15 = smov 48 }
  0x86   :  { %v3124_v25 = vld [vmem:[#allocation1 + $0x30c] ss:$16 sm:%s3123_s3]   ;;  %v3121_v47 = vsel %vm2058_vm1, %v3119_v41, %v3116_v24  ;;  %v3139_v63 = vsel %vm2054_vm0, %v3137_v48, %v3134_v11  ;;  %v3147_v3 = vld [vmem:[#allocation1 + $0x5] ss:$16 sm:%s3146_s5]   ;;  %s3293_s3 = smov 3  ;;  %s3316_s5 = smov 3 }
  0x87   :  { %6272 = vrot.lane.b32.xlu1 %v6271_v17, %s6532_s10  ;;  %s3008_s10 = smov 192  ;;  %v3126_v27 = vsel %vm2062_vm2, %v3124_v25, %v3121_v47  ;;  %v3144_v29 = vsel %vm2058_vm1, %v3142_v26, %v3139_v63  ;;  %v3159_v35 = vld [vmem:[#allocation1 + $0x205] ss:$16 sm:%s3158_s24]   ;;  %v3320_v24 = vld [vmem:[#allocation1 + $0x8b] ss:$16 sm:%s3319_s22]   ;;  %s3324_s24 = smov 48 }
  0x88   :  { %v3009_v2 = vld [vmem:[#allocation1 + $0xc] ss:$16 sm:%s3008_s10]   ;;  %v6286_v28 = vpack.i.bf16 %v3126_v27, %v3103_v46  ;;  %v3149_v15 = vsel %vm2062_vm2, %v3147_v3, %v3144_v29  ;;  %v3161_v16 = vsel %vm2054_vm0, %v3159_v35, %v3156_v30  ;;  %v3164_v17 = vld [vmem:[#allocation1 + $0x205] ss:$16 sm:%s3163_s12]   ;;  %s3178_s10 = smov 3  ;;  %s3329_s12 = smov 192 }
  0x89   :  { %v3011_v6 = vsel %vm2062_vm2, %v3009_v2, %v3006_v56  ;;  %v3169_v37 = vld [vmem:[#allocation1 + $0x205] ss:$16 sm:%s3168_s30]   ;;  %v3166_v38 = vsel %vm2058_vm1, %v3164_v17, %v3161_v16  ;;  %v3317_v46 = vld [vmem:[#allocation1 + $0x8b] ss:$16 sm:%s3316_s5]   ;;  %s3339_s30 = smov 3  ;;  %s3480_s5 = smov 12 }
  0x8a   :  { %v6276_v8 = vpack.i.bf16 %v3034_v61, %v3011_v6  ;;  %v3179_v42 = vld [vmem:[#allocation1 + $0x185] ss:$16 sm:%s3178_s10]   ;;  %v3171_v49 = vsel %vm2062_vm2, %v3169_v37, %v3166_v38  ;;  %v3322_v11 = vsel %vm2054_vm0, %v3320_v24, %v3317_v46  ;;  %v3325_v47 = vld [vmem:[#allocation1 + $0x8b] ss:$16 sm:%s3324_s24]   ;;  %s3342_s10 = smov 12  ;;  %s3485_s22 = smov 48 }
  0x8b   :  { %v3182_v43 = vld [vmem:[#allocation1 + $0x185] ss:$16 sm:%s3181_s2]   ;;  %v6291_v52 = vpack.i.bf16 %v3171_v49, %v3149_v15  ;;  %v3330_v48 = vld [vmem:[#allocation1 + $0x8b] ss:$16 sm:%s3329_s12]   ;;  %v3327_v27 = vsel %vm2058_vm1, %v3325_v47, %v3322_v11  ;;  %s3347_s2 = smov 48  ;;  %s3490_s24 = smov 192 }
  0x8c   :  { %6277 = vrot.lane.b32.xlu1 %v6276_v8, %s6533_s19  ;;  %v3184_v0 = vsel %vm2054_vm0, %v3182_v43, %v3179_v42  ;;  %v3187_v1 = vld [vmem:[#allocation1 + $0x185] ss:$16 sm:%s3186_s21]   ;;  %v3340_v63 = vld [vmem:[#allocation1 + $0x28b] ss:$16 sm:%s3339_s30]   ;;  %s3352_s21 = smov 192  ;;  %v3332_v29 = vsel %vm2062_vm2, %v3330_v48, %v3327_v27  ;;  %s3500_s12 = smov 3 }
  0x8d   :  { %v3192_v51 = vld [vmem:[#allocation1 + $0x185] ss:$16 sm:%s3191_s25]   ;;  %v3189_v18 = vsel %vm2058_vm1, %v3187_v1, %v3184_v0  ;;  %6292 = vrot.lane.b32.xlu0 %v6291_v52, %s6534_s28  ;;  %v3343_v3 = vld [vmem:[#allocation1 + $0x28b] ss:$16 sm:%s3342_s10]   ;;  %s3362_s25 = smov 3  ;;  %s3503_s30 = smov 12 }
  0x8e   :  { %v3202_v19 = vld [vmem:[#allocation1 + $0x385] ss:$16 sm:%s3201_s23]   ;;  %v3194_v36 = vsel %vm2062_vm2, %v3192_v51, %v3189_v18  ;;  %v3345_v30 = vsel %vm2054_vm0, %v3343_v3, %v3340_v63  ;;  %v3353_v35 = vld [vmem:[#allocation1 + $0x28b] ss:$16 sm:%s3352_s21]   ;;  %s3365_s23 = smov 12  ;;  %s3508_s10 = smov 48 }
  0x8f   :  { %v3205_v2 = vld [vmem:[#allocation1 + $0x385] ss:$16 sm:%s3204_s29]   ;;  %v3363_v15 = vld [vmem:[#allocation1 + $0xb] ss:$16 sm:%s3362_s25]   ;;  %s3370_s29 = smov 48  ;;  %s3522_s21 = smov 3 }
  0x90   :  { %6287 = vrot.lane.b32.xlu1 %v6286_v28, %s6533_s19  ;;  %v3207_v53 = vsel %vm2054_vm0, %v3205_v2, %v3202_v19  ;;  %v3210_v56 = vld [vmem:[#allocation1 + $0x385] ss:$16 sm:%s3209_s11]   ;;  %s3224_s19 = smov 3  ;;  %v3348_v28 = vld [vmem:[#allocation1 + $0x28b] ss:$16 sm:%s3347_s2]   ;;  %s3375_s11 = smov 192 }
  0x91   :  { %v3215_v57 = vld [vmem:[#allocation1 + $0x385] ss:$16 sm:%s3214_s18]   ;;  %v3212_v20 = vsel %vm2058_vm1, %v3210_v56, %v3207_v53  ;;  %v3350_v16 = vsel %vm2058_vm1, %v3348_v28, %v3345_v30  ;;  %v3366_v17 = vld [vmem:[#allocation1 + $0xb] ss:$16 sm:%s3365_s23]   ;;  %s3385_s18 = smov 3  ;;  %s3513_s2 = smov 192 }
  0x92   :  { %v3225_v6 = vld [vmem:[#allocation1 + $0x105] ss:$16 sm:%s3224_s19]   ;;  %v3217_v50 = vsel %vm2062_vm2, %v3215_v57, %v3212_v20  ;;  %v3371_v37 = vld [vmem:[#allocation1 + $0xb] ss:$16 sm:%s3370_s29]   ;;  %v3355_v38 = vsel %vm2062_vm2, %v3353_v35, %v3350_v16  ;;  %v3368_v42 = vsel %vm2054_vm0, %v3366_v17, %v3363_v15  ;;  %s3388_s19 = smov 12  ;;  %s3525_s25 = smov 12 }
  0x93   :  { %v3228_v31 = vld [vmem:[#allocation1 + $0x105] ss:$16 sm:%s3227_s16]   ;;  %v6296_v7 = vpack.i.bf16 %v3217_v50, %v3194_v36  ;;  %v3376_v43 = vld [vmem:[#allocation1 + $0xb] ss:$16 sm:%s3375_s11]   ;;  %s3393_s16 = smov 48  ;;  %v6311_v0 = vpack.i.bf16 %v3355_v38, %v3332_v29  ;;  %v3373_v1 = vsel %vm2058_vm1, %v3371_v37, %v3368_v42  ;;  %s3530_s23 = smov 48 }
  0x94   :  { %v3230_v58 = vsel %vm2054_vm0, %v3228_v31, %v3225_v6  ;;  %v3233_v59 = vld [vmem:[#allocation1 + $0x105] ss:$16 sm:%s3232_s9]   ;;  %v3386_v49 = vld [vmem:[#allocation1 + $0x20b] ss:$16 sm:%s3385_s18]   ;;  %s3408_s9 = smov 3  ;;  %v3378_v18 = vsel %vm2062_vm2, %v3376_v43, %v3373_v1  ;;  %s3535_s29 = smov 192 }
  0x95   :  { %v3238_v60 = vld [vmem:[#allocation1 + $0x105] ss:$16 sm:%s3237_s26]   ;;  %v3235_v61 = vsel %vm2058_vm1, %v3233_v59, %v3230_v58  ;;  %6297 = vrot.lane.b32.xlu1 %v6296_v7, %s6534_s28  ;;  %v3389_v51 = vld [vmem:[#allocation1 + $0x20b] ss:$16 sm:%s3388_s19]   ;;  %s3411_s26 = smov 12  ;;  %s3545_s11 = smov 3 }
  0x96   :  { %v3248_v4 = vld [vmem:[#allocation1 + $0x305] ss:$16 sm:%s3247_s27]   ;;  %v3240_v44 = vsel %vm2062_vm2, %v3238_v60, %v3235_v61  ;;  %v3394_v52 = vld [vmem:[#allocation1 + $0x20b] ss:$16 sm:%s3393_s16]   ;;  %v3391_v19 = vsel %vm2054_vm0, %v3389_v51, %v3386_v49  ;;  %s3416_s27 = smov 48  ;;  %s3548_s18 = smov 12 }
  0x97   :  { %v3251_v32 = vld [vmem:[#allocation1 + $0x305] ss:$16 sm:%s3250_s17]   ;;  %v3409_v36 = vld [vmem:[#allocation1 + $0x18b] ss:$16 sm:%s3408_s9]   ;;  %s6535_s17 = smov 81   ;;  %v3396_v53 = vsel %vm2058_vm1, %v3394_v52, %v3391_v19  ;;  %s3553_s19 = smov 48 }
  0x98   :  { %v3253_v8 = vsel %vm2054_vm0, %v3251_v32, %v3248_v4  ;;  %v3256_v12 = vld [vmem:[#allocation1 + $0x305] ss:$16 sm:%s3255_s20]   ;;  %v3412_v56 = vld [vmem:[#allocation1 + $0x18b] ss:$16 sm:%s3411_s26]   ;;  %s3421_s20 = smov 192  ;;  %s3558_s16 = smov 192 }
  0x99   :  { %v3261_v5 = vld [vmem:[#allocation1 + $0x305] ss:$16 sm:%s3260_s6]   ;;  %v3258_v9 = vsel %vm2058_vm1, %v3256_v12, %v3253_v8  ;;  %v3417_v57 = vld [vmem:[#allocation1 + $0x18b] ss:$16 sm:%s3416_s27]   ;;  %s3431_s6 = smov 3  ;;  %v3414_v6 = vsel %vm2054_vm0, %v3412_v56, %v3409_v36  ;;  %s3571_s9 = smov 12 }
  0x9a   :  { %v3271_v10 = vld [vmem:[#allocation1 + $0x85] ss:$16 sm:%s3270_s13]   ;;  %v3263_v13 = vsel %vm2062_vm2, %v3261_v5, %v3258_v9  ;;  %v3422_v31 = vld [vmem:[#allocation1 + $0x18b] ss:$16 sm:%s3421_s20]   ;;  %s3434_s13 = smov 12  ;;  %v3419_v59 = vsel %vm2058_vm1, %v3417_v57, %v3414_v6  ;;  %s3576_s26 = smov 48 }
  0x9b   :  { %v3274_v14 = vld [vmem:[#allocation1 + $0x85] ss:$16 sm:%s3273_s14]   ;;  %v6301_v54 = vpack.i.bf16 %v3263_v13, %v3240_v44  ;;  %v3432_v50 = vld [vmem:[#allocation1 + $0x38b] ss:$16 sm:%s3431_s6]   ;;  %s3439_s14 = smov 48  ;;  %v3424_v61 = vsel %vm2062_vm2, %v3422_v31, %v3419_v59  ;;  %s3581_s27 = smov 192 }
  0x9c   :  { %v3276_v33 = vsel %vm2054_vm0, %v3274_v14, %v3271_v10  ;;  %v3279_v21 = vld [vmem:[#allocation1 + $0x85] ss:$16 sm:%s3278_s0]   ;;  %v3435_v60 = vld [vmem:[#allocation1 + $0x38b] ss:$16 sm:%s3434_s13]   ;;  %s3444_s0 = smov 192  ;;  %s3594_s20 = smov 12 }
  0x9d   :  { %v3284_v45 = vld [vmem:[#allocation1 + $0x85] ss:$16 sm:%s3283_s8]   ;;  %v3281_v34 = vsel %vm2058_vm1, %v3279_v21, %v3276_v33  ;;  %6302 = vrot.lane.b32.xlu0 %v6301_v54, %s6534_s28  ;;  %v3440_v7 = vld [vmem:[#allocation1 + $0x38b] ss:$16 sm:%s3439_s14]   ;;  %s3454_s8 = smov 3  ;;  %v3437_v4 = vsel %vm2054_vm0, %v3435_v60, %v3432_v50  ;;  %s6536_s6 = smov 76  }
  0x9e   :  { %v3294_v39 = vld [vmem:[#allocation1 + $0x285] ss:$16 sm:%s3293_s3]   ;;  %v3286_v22 = vsel %vm2062_vm2, %v3284_v45, %v3281_v34  ;;  %v3445_v32 = vld [vmem:[#allocation1 + $0x38b] ss:$16 sm:%s3444_s0]   ;;  %s3457_s3 = smov 12  ;;  %v3442_v8 = vsel %vm2058_vm1, %v3440_v7, %v3437_v4  ;;  %s3599_s13 = smov 48 }
  0x9f   :  { %v3297_v40 = vld [vmem:[#allocation1 + $0x285] ss:$16 sm:%s3296_s4]   ;;  %v3455_v44 = vld [vmem:[#allocation1 + $0x10b] ss:$16 sm:%s3454_s8]   ;;  %s3462_s4 = smov 48  ;;  %v3447_v9 = vsel %vm2062_vm2, %v3445_v32, %v3442_v8  ;;  %s3604_s14 = smov 192 }
  0xa0   :  { %v3299_v23 = vsel %vm2054_vm0, %v3297_v40, %v3294_v39  ;;  %v3302_v55 = vld [vmem:[#allocation1 + $0x285] ss:$16 sm:%s3301_s15]   ;;  %v3458_v12 = vld [vmem:[#allocation1 + $0x10b] ss:$16 sm:%s3457_s3]   ;;  %s3467_s15 = smov 192  ;;  %v6321_v33 = vpack.i.bf16 %v3447_v9, %v3424_v61  ;;  %s3614_s0 = smov 3 }
  0xa1   :  { %v3307_v62 = vld [vmem:[#allocation1 + $0x285] ss:$16 sm:%s3306_s7]   ;;  %v3304_v41 = vsel %vm2058_vm1, %v3302_v55, %v3299_v23  ;;  %6312 = vrot.lane.b32.xlu0 %v6311_v0, %s6535_s17  ;;  %v3463_v5 = vld [vmem:[#allocation1 + $0x10b] ss:$16 sm:%s3462_s4]   ;;  %s3477_s7 = smov 3  ;;  %v3460_v10 = vsel %vm2054_vm0, %v3458_v12, %v3455_v44  ;;  %s3617_s8 = smov 12 }
  0xa2   :  { %v3309_v25 = vsel %vm2062_vm2, %v3307_v62, %v3304_v41  ;;  %v3468_v14 = vld [vmem:[#allocation1 + $0x10b] ss:$16 sm:%s3467_s15]   ;;  %v3465_v21 = vsel %vm2058_vm1, %v3463_v5, %v3460_v10  ;;  %v3504_v55 = vld [vmem:[#allocation1 + $0x4] ss:$16 sm:%s3503_s30]   ;;  %s3622_s3 = smov 48  ;;  %s3627_s4 = smov 192 }
  0xa3   :  { %v6306_v26 = vpack.i.bf16 %v3309_v25, %v3286_v22  ;;  %v3478_v13 = vld [vmem:[#allocation1 + $0x30b] ss:$16 sm:%s3477_s7]   ;;  %v3470_v34 = vsel %vm2062_vm2, %v3468_v14, %v3465_v21  ;;  %v3501_v22 = vld [vmem:[#allocation1 + $0x4] ss:$16 sm:%s3500_s12]   ;;  %s3637_s15 = smov 3  ;;  %s3640_s7 = smov 12 }
  0xa4   :  { %v3481_v45 = vld [vmem:[#allocation1 + $0x30b] ss:$16 sm:%s3480_s5]   ;;  %v3509_v62 = vld [vmem:[#allocation1 + $0x4] ss:$16 sm:%s3508_s10]   ;;  %v3506_v46 = vsel %vm2054_vm0, %v3504_v55, %v3501_v22  ;;  %s3645_s5 = smov 48  ;;  %s3663_s12 = smov 12 }
  0xa5   :  { %6307 = vrot.lane.b32.xlu1 %v6306_v26, %s6534_s28  ;;  %s3398_s28 = smov 192  ;;  %v3486_v54 = vld [vmem:[#allocation1 + $0x30b] ss:$16 sm:%s3485_s22]   ;;  %v3483_v39 = vsel %vm2054_vm0, %v3481_v45, %v3478_v13  ;;  %6322 = vrot.lane.b32.xlu0 %v6321_v33, %s6535_s17  ;;  %v3514_v24 = vld [vmem:[#allocation1 + $0x4] ss:$16 sm:%s3513_s2]   ;;  %v3511_v11 = vsel %vm2058_vm1, %v3509_v62, %v3506_v46  ;;  %s3650_s22 = smov 192 }
  0xa6   :  { %v3399_v2 = vld [vmem:[#allocation1 + $0x20b] ss:$16 sm:%s3398_s28]   ;;  %v3488_v23 = vsel %vm2058_vm1, %v3486_v54, %v3483_v39  ;;  %v3523_v47 = vld [vmem:[#allocation1 + $0x204] ss:$16 sm:%s3522_s21]   ;;  %v3516_v26 = vsel %vm2062_vm2, %v3514_v24, %v3511_v11  ;;  %s3568_s28 = smov 3  ;;  %s3668_s30 = smov 48 }
  0xa7   :  { %v3401_v20 = vsel %vm2062_vm2, %v3399_v2, %v3396_v53  ;;  %v3491_v40 = vld [vmem:[#allocation1 + $0x30b] ss:$16 sm:%s3490_s24]   ;;  %v3526_v48 = vld [vmem:[#allocation1 + $0x204] ss:$16 sm:%s3525_s25]   ;;  %s3660_s24 = smov 3  ;;  %s3673_s10 = smov 192 }
  0xa8   :  { %v6316_v58 = vpack.i.bf16 %v3401_v20, %v3378_v18  ;;  %v3493_v41 = vsel %vm2062_vm2, %v3491_v40, %v3488_v23  ;;  %v3528_v27 = vsel %vm2054_vm0, %v3526_v48, %v3523_v47  ;;  %v3531_v63 = vld [vmem:[#allocation1 + $0x204] ss:$16 sm:%s3530_s23]   ;;  %s3683_s2 = smov 3  ;;  %s3686_s21 = smov 12  ;;  %vm4804_vm4 = vcmask 310424  }
  0xa9   :  { %v6326_v25 = vpack.i.bf16 %v3493_v41, %v3470_v34  ;;  %v3536_v3 = vld [vmem:[#allocation1 + $0x204] ss:$16 sm:%s3535_s29]   ;;  %v3533_v28 = vsel %vm2058_vm1, %v3531_v63, %v3528_v27  ;;  %v3684_v34 = vld [vmem:[#allocation1 + $0x8a] ss:$16 sm:%s3683_s2]   ;;  %s3691_s25 = smov 48  ;;  %s3696_s23 = smov 192 }
  0xaa   :  { %6317 = vrot.lane.b32.xlu1 %v6316_v58, %s6535_s17  ;;  %v3546_v29 = vld [vmem:[#allocation1 + $0x184] ss:$16 sm:%s3545_s11]   ;;  %v3538_v35 = vsel %vm2062_vm2, %v3536_v3, %v3533_v28  ;;  %v3687_v39 = vld [vmem:[#allocation1 + $0x8a] ss:$16 sm:%s3686_s21]   ;;  %s3706_s29 = smov 3  ;;  %s3709_s11 = smov 12 }
  0xab   :  { %v3549_v30 = vld [vmem:[#allocation1 + $0x184] ss:$16 sm:%s3548_s18]   ;;  %v6331_v37 = vpack.i.bf16 %v3538_v35, %v3516_v26  ;;  %v3689_v22 = vsel %vm2054_vm0, %v3687_v39, %v3684_v34  ;;  %v3692_v23 = vld [vmem:[#allocation1 + $0x8a] ss:$16 sm:%s3691_s25]   ;;  %s3714_s18 = smov 48  ;;  %s3847_s2 = smov 12 }
  0xac   :  { %v3551_v15 = vsel %vm2054_vm0, %v3549_v30, %v3546_v29  ;;  %v3554_v16 = vld [vmem:[#allocation1 + $0x184] ss:$16 sm:%s3553_s19]   ;;  %v3697_v55 = vld [vmem:[#allocation1 + $0x8a] ss:$16 sm:%s3696_s23]   ;;  %v3694_v41 = vsel %vm2058_vm1, %v3692_v23, %v3689_v22  ;;  %s3719_s19 = smov 192  ;;  %s3852_s21 = smov 48 }
  0xad   :  { %v3559_v17 = vld [vmem:[#allocation1 + $0x184] ss:$16 sm:%s3558_s16]   ;;  %v3556_v38 = vsel %vm2058_vm1, %v3554_v16, %v3551_v15  ;;  %6332 = vrot.lane.b32.xlu0 %v6331_v37, %s6536_s6  ;;  %v3707_v46 = vld [vmem:[#allocation1 + $0x28a] ss:$16 sm:%s3706_s29]   ;;  %s3729_s16 = smov 3  ;;  %v3699_v11 = vsel %vm2062_vm2, %v3697_v55, %v3694_v41  ;;  %s3857_s25 = smov 192 }
  0xae   :  { %6327 = vrot.lane.b32.xlu1 %v6326_v25, %s6535_s17  ;;  %v3569_v42 = vld [vmem:[#allocation1 + $0x384] ss:$16 sm:%s3568_s28]   ;;  %v3561_v49 = vsel %vm2062_vm2, %v3559_v17, %v3556_v38  ;;  %s3591_s17 = smov 3  ;;  %v3710_v24 = vld [vmem:[#allocation1 + $0x28a] ss:$16 sm:%s3709_s11]   ;;  %s3732_s28 = smov 12 }
  0xaf   :  { %v3572_v43 = vld [vmem:[#allocation1 + $0x384] ss:$16 sm:%s3571_s9]   ;;  %v3715_v25 = vld [vmem:[#allocation1 + $0x28a] ss:$16 sm:%s3714_s18]   ;;  %v3712_v47 = vsel %vm2054_vm0, %v3710_v24, %v3707_v46  ;;  %s3737_s9 = smov 48  ;;  %s3867_s23 = smov 3 }
  0xb0   :  { %v3574_v0 = vsel %vm2054_vm0, %v3572_v43, %v3569_v42  ;;  %v3577_v1 = vld [vmem:[#allocation1 + $0x384] ss:$16 sm:%s3576_s26]   ;;  %v3720_v48 = vld [vmem:[#allocation1 + $0x28a] ss:$16 sm:%s3719_s19]   ;;  %v3717_v27 = vsel %vm2058_vm1, %v3715_v25, %v3712_v47  ;;  %s3742_s26 = smov 192  ;;  %s3870_s29 = smov 12 }
  0xb1   :  { %v3582_v51 = vld [vmem:[#allocation1 + $0x384] ss:$16 sm:%s3581_s27]   ;;  %v3579_v52 = vsel %vm2058_vm1, %v3577_v1, %v3574_v0  ;;  %v3730_v26 = vld [vmem:[#allocation1 + $0xa] ss:$16 sm:%s3729_s16]   ;;  %s3752_s27 = smov 3  ;;  %v3722_v28 = vsel %vm2062_vm2, %v3720_v48, %v3717_v27  ;;  %s3875_s11 = smov 48 }
  0xb2   :  { %v3592_v18 = vld [vmem:[#allocation1 + $0x104] ss:$16 sm:%s3591_s17]   ;;  %v3584_v2 = vsel %vm2062_vm2, %v3582_v51, %v3579_v52  ;;  %v3733_v63 = vld [vmem:[#allocation1 + $0xa] ss:$16 sm:%s3732_s28]   ;;  %s3755_s17 = smov 12  ;;  %v6351_v15 = vpack.i.bf16 %v3722_v28, %v3699_v11  ;;  %s3880_s18 = smov 192 }
  0xb3   :  { %v3595_v19 = vld [vmem:[#allocation1 + $0x104] ss:$16 sm:%s3594_s20]   ;;  %v6336_v57 = vpack.i.bf16 %v3584_v2, %v3561_v49  ;;  %v3738_v3 = vld [vmem:[#allocation1 + $0xa] ss:$16 sm:%s3737_s9]   ;;  %v3735_v29 = vsel %vm2054_vm0, %v3733_v63, %v3730_v26  ;;  %s3760_s20 = smov 48  ;;  %s3889_s19 = smov 3 }
  0xb4   :  { %v3597_v36 = vsel %vm2054_vm0, %v3595_v19, %v3592_v18  ;;  %v3600_v53 = vld [vmem:[#allocation1 + $0x104] ss:$16 sm:%s3599_s13]   ;;  %v3743_v30 = vld [vmem:[#allocation1 + $0xa] ss:$16 sm:%s3742_s26]   ;;  %v3740_v16 = vsel %vm2058_vm1, %v3738_v3, %v3735_v29  ;;  %s3775_s13 = smov 3  ;;  %s3892_s16 = smov 12 }
  0xb5   :  { %v3605_v56 = vld [vmem:[#allocation1 + $0x104] ss:$16 sm:%s3604_s14]   ;;  %v3602_v20 = vsel %vm2058_vm1, %v3600_v53, %v3597_v36  ;;  %6337 = vrot.lane.b32.xlu1 %v6336_v57, %s6536_s6  ;;  %v3753_v35 = vld [vmem:[#allocation1 + $0x20a] ss:$16 sm:%s3752_s27]   ;;  %v3745_v38 = vsel %vm2062_vm2, %v3743_v30, %v3740_v16  ;;  %s3778_s14 = smov 12  ;;  %s3897_s28 = smov 48 }
  0xb6   :  { %v3615_v6 = vld [vmem:[#allocation1 + $0x304] ss:$16 sm:%s3614_s0]   ;;  %v3607_v50 = vsel %vm2062_vm2, %v3605_v56, %v3602_v20  ;;  %v3756_v17 = vld [vmem:[#allocation1 + $0x20a] ss:$16 sm:%s3755_s17]   ;;  %s3783_s0 = smov 48  ;;  %s3902_s9 = smov 192 }
  0xb7   :  { %v3618_v31 = vld [vmem:[#allocation1 + $0x304] ss:$16 sm:%s3617_s8]   ;;  %v3761_v37 = vld [vmem:[#allocation1 + $0x20a] ss:$16 sm:%s3760_s20]   ;;  %v3758_v42 = vsel %vm2054_vm0, %v3756_v17, %v3753_v35  ;;  %s6537_s8 = smov 62   ;;  %s3912_s26 = smov 3 }
  0xb8   :  { %v3620_v58 = vsel %vm2054_vm0, %v3618_v31, %v3615_v6  ;;  %v3623_v59 = vld [vmem:[#allocation1 + $0x304] ss:$16 sm:%s3622_s3]   ;;  %v3776_v49 = vld [vmem:[#allocation1 + $0x18a] ss:$16 sm:%s3775_s13]   ;;  %v3763_v0 = vsel %vm2058_vm1, %v3761_v37, %v3758_v42  ;;  %s3788_s3 = smov 192  ;;  %s3915_s27 = smov 12 }
  0xb9   :  { %v3628_v60 = vld [vmem:[#allocation1 + $0x304] ss:$16 sm:%s3627_s4]   ;;  %v3625_v7 = vsel %vm2058_vm1, %v3623_v59, %v3620_v58  ;;  %v3779_v1 = vld [vmem:[#allocation1 + $0x18a] ss:$16 sm:%s3778_s14]   ;;  %s3798_s4 = smov 3  ;;  %s3920_s17 = smov 48 }
  0xba   :  { %v3638_v61 = vld [vmem:[#allocation1 + $0x84] ss:$16 sm:%s3637_s15]   ;;  %v3630_v32 = vsel %vm2062_vm2, %v3628_v60, %v3625_v7  ;;  %v3784_v51 = vld [vmem:[#allocation1 + $0x18a] ss:$16 sm:%s3783_s0]   ;;  %v3781_v18 = vsel %vm2054_vm0, %v3779_v1, %v3776_v49  ;;  %s3801_s15 = smov 12  ;;  %v6243_v34 = vpop.permute.xlu1 %6242  ;;  %s3925_s20 = smov 192 }
  0xbb   :  { %v3641_v4 = vld [vmem:[#allocation1 + $0x84] ss:$16 sm:%s3640_s7]   ;;  %v6341_v5 = vpack.i.bf16 %v3630_v32, %v3607_v50  ;;  %v3789_v19 = vld [vmem:[#allocation1 + $0x18a] ss:$16 sm:%s3788_s3]   ;;  %s3806_s7 = smov 48  ;;  %v3786_v53 = vsel %vm2058_vm1, %v3784_v51, %v3781_v18  ;;  %v6245_v26 = vunpack.i.h.bf16 %v6243_v34  ;;  %v6244_v27 = vunpack.i.l.bf16 %v6243_v34  ;;  %s3938_s13 = smov 12 }
  0xbc   :  { %v3643_v44 = vsel %vm2054_vm0, %v3641_v4, %v3638_v61  ;;  %v3646_v8 = vld [vmem:[#allocation1 + $0x84] ss:$16 sm:%s3645_s5]   ;;  %v3799_v2 = vld [vmem:[#allocation1 + $0x38a] ss:$16 sm:%s3798_s4]   ;;  %s3811_s5 = smov 192  ;;  %v3791_v20 = vsel %vm2062_vm2, %v3789_v19, %v3786_v53  ;;  %s3943_s14 = smov 48 }
  0xbd   :  { %v3651_v12 = vld [vmem:[#allocation1 + $0x84] ss:$16 sm:%s3650_s22]   ;;  %v3648_v9 = vsel %vm2058_vm1, %v3646_v8, %v3643_v44  ;;  %6342 = vrot.lane.b32.xlu0 %v6341_v5, %s6536_s6  ;;  %v3802_v56 = vld [vmem:[#allocation1 + $0x38a] ss:$16 sm:%s3801_s15]   ;;  %s3821_s22 = smov 3  ;;  %2485 = vst.msk [vmem:[#allocation0 + $0x70] sm:$0xff] %vm2253_vm5, %v6245_v26  }
  0xbe   :  { %v3661_v10 = vld [vmem:[#allocation1 + $0x284] ss:$16 sm:%s3660_s24]   ;;  %v3653_v13 = vsel %vm2062_vm2, %v3651_v12, %v3648_v9  ;;  %v3807_v57 = vld [vmem:[#allocation1 + $0x38a] ss:$16 sm:%s3806_s7]   ;;  %v3804_v6 = vsel %vm2054_vm0, %v3802_v56, %v3799_v2  ;;  %s3824_s24 = smov 12  ;;  %2488 = vst.msk [vmem:[#allocation0 + $0xb0] sm:$0xff] %vm2256_vm6, %v6245_v26  }
  0xbf   :  { %v3664_v14 = vld [vmem:[#allocation1 + $0x284] ss:$16 sm:%s3663_s12]   ;;  %v3812_v31 = vld [vmem:[#allocation1 + $0x38a] ss:$16 sm:%s3811_s5]   ;;  %s3829_s12 = smov 48  ;;  %v3809_v58 = vsel %vm2058_vm1, %v3807_v57, %v3804_v6  ;;  %2439 = vst.msk [vmem:[#allocation0 + $0x10] sm:$0xff] %vm2253_vm5, %v6244_v27  }
  0xc0   :  { %v3666_v33 = vsel %vm2054_vm0, %v3664_v14, %v3661_v10  ;;  %v3669_v21 = vld [vmem:[#allocation1 + $0x284] ss:$16 sm:%s3668_s30]   ;;  %v3822_v50 = vld [vmem:[#allocation1 + $0x10a] ss:$16 sm:%s3821_s22]   ;;  %s3834_s30 = smov 192  ;;  %v3814_v7 = vsel %vm2062_vm2, %v3812_v31, %v3809_v58  ;;  %2442 = vst.msk [vmem:[#allocation0 + $0x50] sm:$0xff] %vm2256_vm6, %v6244_v27  }
  0xc1   :  { %v3674_v45 = vld [vmem:[#allocation1 + $0x284] ss:$16 sm:%s3673_s10]   ;;  %v3671_v54 = vsel %vm2058_vm1, %v3669_v21, %v3666_v33  ;;  %6352 = vrot.lane.b32.xlu0 %v6351_v15, %s6537_s8  ;;  %v3825_v59 = vld [vmem:[#allocation1 + $0x10a] ss:$16 sm:%s3824_s24]   ;;  %s3844_s10 = smov 3  ;;  %v6361_v44 = vpack.i.bf16 %v3814_v7, %v3791_v20  ;;  %s3948_s0 = smov 192 }
  0xc2   :  { %v3676_v40 = vsel %vm2062_vm2, %v3674_v45, %v3671_v54  ;;  %v3830_v60 = vld [vmem:[#allocation1 + $0x10a] ss:$16 sm:%s3829_s12]   ;;  %v3827_v61 = vsel %vm2054_vm0, %v3825_v59, %v3822_v50  ;;  %v3871_v21 = vld [vmem:[#allocation1 + $0x3] ss:$16 sm:%s3870_s29]   ;;  %v6233_v54 = vpop.permute.xlu0 %6232  ;;  %s3961_s3 = smov 12  ;;  %s6538_s4 = smov 57  }
  0xc3   :  { %v6346_v62 = vpack.i.bf16 %v3676_v40, %v3653_v13  ;;  %v3835_v4 = vld [vmem:[#allocation1 + $0x10a] ss:$16 sm:%s3834_s30]   ;;  %v3832_v8 = vsel %vm2058_vm1, %v3830_v60, %v3827_v61  ;;  %v3868_v13 = vld [vmem:[#allocation1 + $0x3] ss:$16 sm:%s3867_s23]   ;;  %v6235_v46 = vunpack.i.h.bf16 %v6233_v54  ;;  %v6234_v24 = vunpack.i.l.bf16 %v6233_v54  ;;  %s3966_s15 = smov 48  ;;  %s3971_s7 = smov 192 }
  0xc4   :  { %v3845_v32 = vld [vmem:[#allocation1 + $0x30a] ss:$16 sm:%s3844_s10]   ;;  %v3837_v9 = vsel %vm2062_vm2, %v3835_v4, %v3832_v8  ;;  %v3876_v45 = vld [vmem:[#allocation1 + $0x3] ss:$16 sm:%s3875_s11]   ;;  %v3873_v40 = vsel %vm2054_vm0, %v3871_v21, %v3868_v13  ;;  %s3981_s5 = smov 3  ;;  %s3984_s22 = smov 12 }
  0xc5   :  { %6347 = vrot.lane.b32.xlu1 %v6346_v62, %s6536_s6  ;;  %s3765_s6 = smov 192  ;;  %v3848_v12 = vld [vmem:[#allocation1 + $0x30a] ss:$16 sm:%s3847_s2]   ;;  %6362 = vrot.lane.b32.xlu0 %v6361_v44, %s6537_s8  ;;  %v3881_v22 = vld [vmem:[#allocation1 + $0x3] ss:$16 sm:%s3880_s18]   ;;  %v3878_v55 = vsel %vm2058_vm1, %v3876_v45, %v3873_v40  ;;  %2301 = vst.msk [vmem:[#allocation0 + $0xa0] sm:$0xff] %vm2253_vm5, %v6235_v46  }
  0xc6   :  { %v3766_v43 = vld [vmem:[#allocation1 + $0x20a] ss:$16 sm:%s3765_s6]   ;;  %v3850_v10 = vsel %vm2054_vm0, %v3848_v12, %v3845_v32  ;;  %v3890_v62 = vld [vmem:[#allocation1 + $0x203] ss:$16 sm:%s3889_s19]   ;;  %v3883_v25 = vsel %vm2062_vm2, %v3881_v22, %v3878_v55  ;;  %2304 = vst.msk [vmem:[#allocation0 + $0x80] sm:$0xff] %vm2256_vm6, %v6235_v46   ;;  %2258 = vst.msk [vmem:[#allocation0 + $0x20] sm:$0xff] %vm2256_vm6, %v6234_v24   ;;  %v6238_v18 = vpop.permute.xlu0 %6237 }
  0xc7   :  { %v3768_v52 = vsel %vm2062_vm2, %v3766_v43, %v3763_v0  ;;  %v3853_v5 = vld [vmem:[#allocation1 + $0x30a] ss:$16 sm:%s3852_s21]   ;;  %v3893_v41 = vld [vmem:[#allocation1 + $0x203] ss:$16 sm:%s3892_s16]   ;;  %2255 = vst.msk [vmem:[#allocation0 + $0x40] sm:$0xff] %vm2253_vm5, %v6234_v24   ;;  %s3935_s6 = smov 3  ;;  %v6240_v57 = vunpack.i.h.bf16 %v6238_v18  ;;  %v6239_v20 = vunpack.i.l.bf16 %v6238_v18 }
  0xc8   :  { %v6356_v36 = vpack.i.bf16 %v3768_v52, %v3745_v38  ;;  %v3858_v14 = vld [vmem:[#allocation1 + $0x30a] ss:$16 sm:%s3857_s25]   ;;  %v3855_v33 = vsel %vm2058_vm1, %v3853_v5, %v3850_v10  ;;  %v3895_v11 = vsel %vm2054_vm0, %v3893_v41, %v3890_v62  ;;  %v3898_v47 = vld [vmem:[#allocation1 + $0x203] ss:$16 sm:%s3897_s28]   ;;  %s3989_s24 = smov 48  ;;  %s3994_s12 = smov 192 }
  0xc9   :  { %v3860_v39 = vsel %vm2062_vm2, %v3858_v14, %v3855_v33  ;;  %v3903_v48 = vld [vmem:[#allocation1 + $0x203] ss:$16 sm:%s3902_s9]   ;;  %v3900_v63 = vsel %vm2058_vm1, %v3898_v47, %v3895_v11  ;;  %s4004_s30 = smov 3  ;;  %s4007_s10 = smov 12  ;;  %2393 = vst.msk [vmem:[#allocation0 + $0x88] sm:$0xff] %vm2253_vm5, %v6240_v57   ;;  %2347 = vst.msk [vmem:[#allocation0 + $0x28] sm:$0xff] %vm2253_vm5, %v6239_v20  }
  0xca   :  { %6357 = vrot.lane.b32.xlu1 %v6356_v36, %s6537_s8  ;;  %v6366_v23 = vpack.i.bf16 %v3860_v39, %v3837_v9  ;;  %v3913_v3 = vld [vmem:[#allocation1 + $0x183] ss:$16 sm:%s3912_s26]   ;;  %v3905_v29 = vsel %vm2062_vm2, %v3903_v48, %v3900_v63  ;;  %2396 = vst.msk [vmem:[#allocation0 + $0x68] sm:$0xff] %vm2256_vm6, %v6240_v57   ;;  %2350 = vst.msk [vmem:[#allocation0 + $0x8] sm:$0xff] %vm2256_vm6, %v6239_v20   ;;  %s4012_s2 = smov 48  ;;  %s4017_s21 = smov 192 }
  0xcb   :  { %v3916_v28 = vld [vmem:[#allocation1 + $0x183] ss:$16 sm:%s3915_s27]   ;;  %v6371_v16 = vpack.i.bf16 %v3905_v29, %v3883_v25  ;;  %s4027_s25 = smov 3  ;;  %s4030_s23 = smov 12 }
  0xcc   :  { %v3918_v30 = vsel %vm2054_vm0, %v3916_v28, %v3913_v3  ;;  %v3921_v35 = vld [vmem:[#allocation1 + $0x183] ss:$16 sm:%s3920_s17]   ;;  %s4035_s29 = smov 48  ;;  %s4040_s11 = smov 192 }
  0xcd   :  { %v3926_v15 = vld [vmem:[#allocation1 + $0x183] ss:$16 sm:%s3925_s20]   ;;  %v3923_v17 = vsel %vm2058_vm1, %v3921_v35, %v3918_v30  ;;  %6372 = vrot.lane.b32.xlu0 %v6371_v16, %s6538_s4  ;;  %s4050_s18 = smov 3  ;;  %s4053_s19 = smov 12 }
  0xce   :  { %6367 = vrot.lane.b32.xlu1 %v6366_v23, %s6537_s8  ;;  %v3936_v37 = vld [vmem:[#allocation1 + $0x383] ss:$16 sm:%s3935_s6]   ;;  %v3928_v42 = vsel %vm2062_vm2, %v3926_v15, %v3923_v17  ;;  %s3958_s8 = smov 3  ;;  %v4051_v41 = vld [vmem:[#allocation1 + $0x89] ss:$16 sm:%s4050_s18]   ;;  %s4058_s16 = smov 48 }
  0xcf   :  { %v3939_v38 = vld [vmem:[#allocation1 + $0x383] ss:$16 sm:%s3938_s13]   ;;  %v6248_v19 = vpop.permute.xlu1 %6247  ;;  %v4054_v46 = vld [vmem:[#allocation1 + $0x89] ss:$16 sm:%s4053_s19]   ;;  %s4063_s28 = smov 192  ;;  %s4073_s9 = smov 3 }
  0xd0   :  { %v3941_v43 = vsel %vm2054_vm0, %v3939_v38, %v3936_v37  ;;  %v3944_v49 = vld [vmem:[#allocation1 + $0x383] ss:$16 sm:%s3943_s14]   ;;  %v6250_v59 = vunpack.i.h.bf16 %v6248_v19  ;;  %v6249_v60 = vunpack.i.l.bf16 %v6248_v19  ;;  %v4056_v25 = vsel %vm2054_vm0, %v4054_v46, %v4051_v41  ;;  %v4059_v11 = vld [vmem:[#allocation1 + $0x89] ss:$16 sm:%s4058_s16]   ;;  %s4076_s26 = smov 12  ;;  %s4081_s27 = smov 48 }
  0xd1   :  { %v3949_v0 = vld [vmem:[#allocation1 + $0x383] ss:$16 sm:%s3948_s0]   ;;  %v3946_v1 = vsel %vm2058_vm1, %v3944_v49, %v3941_v43  ;;  %v4064_v47 = vld [vmem:[#allocation1 + $0x89] ss:$16 sm:%s4063_s28]   ;;  %v4061_v26 = vsel %vm2058_vm1, %v4059_v11, %v4056_v25  ;;  %s4086_s17 = smov 192  ;;  %s4096_s20 = smov 3 }
  0xd2   :  { %v3959_v51 = vld [vmem:[#allocation1 + $0x103] ss:$16 sm:%s3958_s8]   ;;  %v3951_v2 = vsel %vm2062_vm2, %v3949_v0, %v3946_v1  ;;  %2577 = vst.msk [vmem:[#allocation0 + $0xb8] sm:$0xff] %vm2253_vm5, %v6250_v59   ;;  %2531 = vst.msk [vmem:[#allocation0 + $0x58] sm:$0xff] %vm2253_vm5, %v6249_v60   ;;  %v4074_v27 = vld [vmem:[#allocation1 + $0x289] ss:$16 sm:%s4073_s9]   ;;  %v4066_v28 = vsel %vm2062_vm2, %v4064_v47, %v4061_v26 }
  0xd3   :  { %v3962_v52 = vld [vmem:[#allocation1 + $0x103] ss:$16 sm:%s3961_s3]   ;;  %v6376_v6 = vpack.i.bf16 %v3951_v2, %v3928_v42  ;;  %2580 = vst.msk [vmem:[#allocation0 + $0x98] sm:$0xff] %vm2256_vm6, %v6250_v59   ;;  %2534 = vst.msk [vmem:[#allocation0 + $0x38] sm:$0xff] %vm2256_vm6, %v6249_v60   ;;  %v4077_v63 = vld [vmem:[#allocation1 + $0x289] ss:$16 sm:%s4076_s26]  }
  0xd4   :  { %v3964_v36 = vsel %vm2054_vm0, %v3962_v52, %v3959_v51  ;;  %v3967_v53 = vld [vmem:[#allocation1 + $0x103] ss:$16 sm:%s3966_s15]   ;;  %v4082_v3 = vld [vmem:[#allocation1 + $0x289] ss:$16 sm:%s4081_s27]   ;;  %v4079_v29 = vsel %vm2054_vm0, %v4077_v63, %v4074_v27  ;;  %s4099_s6 = smov 12  ;;  %s4104_s13 = smov 48 }
  0xd5   :  { %v3972_v56 = vld [vmem:[#allocation1 + $0x103] ss:$16 sm:%s3971_s7]   ;;  %v3969_v31 = vsel %vm2058_vm1, %v3967_v53, %v3964_v36  ;;  %6377 = vrot.lane.b32.xlu1 %v6376_v6, %s6538_s4  ;;  %v4087_v30 = vld [vmem:[#allocation1 + $0x289] ss:$16 sm:%s4086_s17]   ;;  %v4084_v16 = vsel %vm2058_vm1, %v4082_v3, %v4079_v29  ;;  %s4109_s14 = smov 192  ;;  %s4119_s0 = smov 3 }
  0xd6   :  { %v3982_v50 = vld [vmem:[#allocation1 + $0x303] ss:$16 sm:%s3981_s5]   ;;  %v3974_v7 = vsel %vm2062_vm2, %v3972_v56, %v3969_v31  ;;  %v4097_v35 = vld [vmem:[#allocation1 + $0x9] ss:$16 sm:%s4096_s20]   ;;  %v4089_v43 = vsel %vm2062_vm2, %v4087_v30, %v4084_v16  ;;  %s4122_s8 = smov 12  ;;  %s4127_s3 = smov 48 }
  0xd7   :  { %v3985_v58 = vld [vmem:[#allocation1 + $0x303] ss:$16 sm:%s3984_s22]   ;;  %v7380_v5 = vpop.permute.xlu0 %6252  ;;  %v4100_v17 = vld [vmem:[#allocation1 + $0x9] ss:$16 sm:%s4099_s6]   ;;  %v6391_v51 = vpack.i.bf16 %v4089_v43, %v4066_v28  ;;  %s4142_s15 = smov 3  ;;  %s4145_s7 = smov 12 }
  0xd8   :  { %v3987_v61 = vsel %vm2054_vm0, %v3985_v58, %v3982_v50  ;;  %v3990_v4 = vld [vmem:[#allocation1 + $0x303] ss:$16 sm:%s3989_s24]   ;;  %v6255_v23 = vunpack.i.h.bf16 %v7380_v5  ;;  %v6254_v55 = vunpack.i.l.bf16 %v7380_v5  ;;  %v4105_v37 = vld [vmem:[#allocation1 + $0x9] ss:$16 sm:%s4104_s13]   ;;  %v4102_v49 = vsel %vm2054_vm0, %v4100_v17, %v4097_v35  ;;  %s4150_s5 = smov 48  ;;  %s6539_s22 = smov 43  }
  0xd9   :  { %v3995_v32 = vld [vmem:[#allocation1 + $0x303] ss:$16 sm:%s3994_s12]   ;;  %v3992_v44 = vsel %vm2058_vm1, %v3990_v4, %v3987_v61  ;;  %v7403_v15 = vpop.permute.xlu1 %6257  ;;  %v4110_v0 = vld [vmem:[#allocation1 + $0x9] ss:$16 sm:%s4109_s14]   ;;  %v4107_v52 = vsel %vm2058_vm1, %v4105_v37, %v4102_v49  ;;  %s4155_s24 = smov 192  ;;  %s4165_s12 = smov 3 }
  0xda   :  { %v4005_v8 = vld [vmem:[#allocation1 + $0x83] ss:$16 sm:%s4004_s30]   ;;  %v3997_v9 = vsel %vm2062_vm2, %v3995_v32, %v3992_v44  ;;  %2623 = vst.msk [vmem:[#allocation0 + $0x20] sm:$0xff] %vm2621_vm7, %v6254_v55   ;;  %2668 = vst.msk [vmem:[#allocation0 + $0x80] sm:$0xff] %vm2621_vm7, %v6255_v23   ;;  %v6260_v38 = vunpack.i.h.bf16 %v7403_v15  ;;  %v6259_v42 = vunpack.i.l.bf16 %v7403_v15  ;;  %v4120_v1 = vld [vmem:[#allocation1 + $0x209] ss:$16 sm:%s4119_s0]   ;;  %v4112_v2 = vsel %vm2062_vm2, %v4110_v0, %v4107_v52 }
  0xdb   :  { %v4008_v12 = vld [vmem:[#allocation1 + $0x83] ss:$16 sm:%s4007_s10]   ;;  %v6381_v33 = vpack.i.bf16 %v3997_v9, %v3974_v7  ;;  %v4123_v18 = vld [vmem:[#allocation1 + $0x209] ss:$16 sm:%s4122_s8]   ;;  %s4168_s30 = smov 12  ;;  %s4173_s10 = smov 48 }
  0xdc   :  { %v4010_v10 = vsel %vm2054_vm0, %v4008_v12, %v4005_v8  ;;  %v4013_v14 = vld [vmem:[#allocation1 + $0x83] ss:$16 sm:%s4012_s2]   ;;  %v4128_v19 = vld [vmem:[#allocation1 + $0x209] ss:$16 sm:%s4127_s3]   ;;  %2714 = vst.msk [vmem:[#allocation0 + $0x8] sm:$0xff] %vm2621_vm7, %v6259_v42   ;;  %2760 = vst.msk [vmem:[#allocation0 + $0x68] sm:$0xff] %vm2621_vm7, %v6260_v38   ;;  %v4125_v36 = vsel %vm2054_vm0, %v4123_v18, %v4120_v1 }
  0xdd   :  { %v4018_v13 = vld [vmem:[#allocation1 + $0x83] ss:$16 sm:%s4017_s21]   ;;  %v4015_v21 = vsel %vm2058_vm1, %v4013_v14, %v4010_v10  ;;  %6382 = vrot.lane.b32.xlu0 %v6381_v33, %s6538_s4  ;;  %v4143_v56 = vld [vmem:[#allocation1 + $0x189] ss:$16 sm:%s4142_s15]   ;;  %v4130_v57 = vsel %vm2058_vm1, %v4128_v19, %v4125_v36  ;;  %s4178_s2 = smov 192  ;;  %s4188_s21 = smov 3 }
  0xde   :  { %v4028_v45 = vld [vmem:[#allocation1 + $0x283] ss:$16 sm:%s4027_s25]   ;;  %v4020_v34 = vsel %vm2062_vm2, %v4018_v13, %v4015_v21  ;;  %v4146_v20 = vld [vmem:[#allocation1 + $0x189] ss:$16 sm:%s4145_s7]   ;;  %s4191_s25 = smov 12  ;;  %s4214_s18 = smov 12 }
  0xdf   :  { %v4031_v54 = vld [vmem:[#allocation1 + $0x283] ss:$16 sm:%s4030_s23]   ;;  %v4151_v6 = vld [vmem:[#allocation1 + $0x189] ss:$16 sm:%s4150_s5]   ;;  %v4148_v50 = vsel %vm2054_vm0, %v4146_v20, %v4143_v56  ;;  %s4196_s23 = smov 48  ;;  %s4219_s19 = smov 48 }
  0xe0   :  { %v4033_v39 = vsel %vm2054_vm0, %v4031_v54, %v4028_v45  ;;  %v4036_v40 = vld [vmem:[#allocation1 + $0x283] ss:$16 sm:%s4035_s29]   ;;  %v4156_v58 = vld [vmem:[#allocation1 + $0x189] ss:$16 sm:%s4155_s24]   ;;  %v4153_v7 = vsel %vm2058_vm1, %v4151_v6, %v4148_v50  ;;  %s4201_s29 = smov 192  ;;  %s4224_s16 = smov 192 }
  0xe1   :  { %v4041_v22 = vld [vmem:[#allocation1 + $0x283] ss:$16 sm:%s4040_s11]   ;;  %v4038_v62 = vsel %vm2058_vm1, %v4036_v40, %v4033_v39  ;;  %6392 = vrot.lane.b32.xlu0 %v6391_v51, %s6539_s22  ;;  %v4166_v59 = vld [vmem:[#allocation1 + $0x389] ss:$16 sm:%s4165_s12]   ;;  %v4158_v32 = vsel %vm2062_vm2, %v4156_v58, %v4153_v7  ;;  %s4211_s11 = smov 3  ;;  %s4234_s28 = smov 3 }
  0xe2   :  { %v4043_v24 = vsel %vm2062_vm2, %v4041_v22, %v4038_v62  ;;  %v4169_v61 = vld [vmem:[#allocation1 + $0x389] ss:$16 sm:%s4168_s30]   ;;  %v4235_v11 = vld [vmem:[#allocation1 + $0x2] ss:$16 sm:%s4234_s28]   ;;  %s4237_s9 = smov 12  ;;  %s4242_s26 = smov 48 }
  0xe3   :  { %v6386_v48 = vpack.i.bf16 %v4043_v24, %v4020_v34  ;;  %v4174_v4 = vld [vmem:[#allocation1 + $0x389] ss:$16 sm:%s4173_s10]   ;;  %v4171_v44 = vsel %vm2054_vm0, %v4169_v61, %v4166_v59  ;;  %v4243_v26 = vld [vmem:[#allocation1 + $0x2] ss:$16 sm:%s4242_s26]   ;;  %s4247_s27 = smov 192  ;;  %s4256_s17 = smov 3 }
  0xe4   :  { %v4179_v8 = vld [vmem:[#allocation1 + $0x389] ss:$16 sm:%s4178_s2]   ;;  %v4176_v10 = vsel %vm2058_vm1, %v4174_v4, %v4171_v44  ;;  %v4248_v3 = vld [vmem:[#allocation1 + $0x2] ss:$16 sm:%s4247_s27]   ;;  %s4259_s20 = smov 12  ;;  %s4264_s6 = smov 48 }
  0xe5   :  { %6387 = vrot.lane.b32.xlu1 %v6386_v48, %s6538_s4  ;;  %s4132_s4 = smov 192  ;;  %v4189_v12 = vld [vmem:[#allocation1 + $0x109] ss:$16 sm:%s4188_s21]   ;;  %v4181_v45 = vsel %vm2062_vm2, %v4179_v8, %v4176_v10  ;;  %v4238_v48 = vld [vmem:[#allocation1 + $0x2] ss:$16 sm:%s4237_s9]   ;;  %s4269_s13 = smov 192 }
  0xe6   :  { %v4133_v53 = vld [vmem:[#allocation1 + $0x209] ss:$16 sm:%s4132_s4]   ;;  %v6401_v40 = vpack.i.bf16 %v4181_v45, %v4158_v32  ;;  %v4240_v63 = vsel %vm2054_vm0, %v4238_v48, %v4235_v11  ;;  %v4257_v30 = vld [vmem:[#allocation1 + $0x202] ss:$16 sm:%s4256_s17]   ;;  %s4279_s14 = smov 3  ;;  %s4282_s0 = smov 12 }
  0xe7   :  { %v4135_v31 = vsel %vm2062_vm2, %v4133_v53, %v4130_v57  ;;  %v4192_v14 = vld [vmem:[#allocation1 + $0x109] ss:$16 sm:%s4191_s25]   ;;  %v4245_v29 = vsel %vm2058_vm1, %v4243_v26, %v4240_v63  ;;  %v4260_v35 = vld [vmem:[#allocation1 + $0x202] ss:$16 sm:%s4259_s20]   ;;  %s4287_s8 = smov 48  ;;  %s4292_s3 = smov 192 }
  0xe8   :  { %v6396_v60 = vpack.i.bf16 %v4135_v31, %v4112_v2  ;;  %v4197_v13 = vld [vmem:[#allocation1 + $0x109] ss:$16 sm:%s4196_s23]   ;;  %v4194_v54 = vsel %vm2054_vm0, %v4192_v14, %v4189_v12  ;;  %6402 = vrot.lane.b32.xlu0 %v6401_v40, %s6539_s22  ;;  %v4250_v16 = vsel %vm2062_vm2, %v4248_v3, %v4245_v29  ;;  %v4262_v17 = vsel %vm2054_vm0, %v4260_v35, %v4257_v30  ;;  %v4265_v37 = vld [vmem:[#allocation1 + $0x202] ss:$16 sm:%s4264_s6]   ;;  %s4302_s4 = smov 3  ;;  %s4305_s15 = smov 12 }
  0xe9   :  { %v7426_v9 = vpop.permute.xlu0 %6262  ;;  %v4202_v34 = vld [vmem:[#allocation1 + $0x109] ss:$16 sm:%s4201_s29]   ;;  %v4199_v22 = vsel %vm2058_vm1, %v4197_v13, %v4194_v54  ;;  %v4270_v43 = vld [vmem:[#allocation1 + $0x202] ss:$16 sm:%s4269_s13]   ;;  %v4267_v0 = vsel %vm2058_vm1, %v4265_v37, %v4262_v17  ;;  %s4310_s7 = smov 48  ;;  %s4315_s5 = smov 192 }
  0xea   :  { %6397 = vrot.lane.b32.xlu1 %v6396_v60, %s6539_s22  ;;  %v6265_v33 = vunpack.i.h.bf16 %v7426_v9  ;;  %v6264_v21 = vunpack.i.l.bf16 %v7426_v9  ;;  %v4212_v39 = vld [vmem:[#allocation1 + $0x309] ss:$16 sm:%s4211_s11]   ;;  %v4204_v46 = vsel %vm2062_vm2, %v4202_v34, %v4199_v22  ;;  %v4280_v1 = vld [vmem:[#allocation1 + $0x182] ss:$16 sm:%s4279_s14]   ;;  %v4272_v19 = vsel %vm2062_vm2, %v4270_v43, %v4267_v0  ;;  %s4328_s24 = smov 12  ;;  %s6540_s12 = smov 38  }
  0xeb   :  { %v4215_v62 = vld [vmem:[#allocation1 + $0x309] ss:$16 sm:%s4214_s18]   ;;  %v4283_v51 = vld [vmem:[#allocation1 + $0x182] ss:$16 sm:%s4282_s0]   ;;  %v6411_v56 = vpack.i.bf16 %v4272_v19, %v4250_v16  ;;  %s4333_s30 = smov 48  ;;  %s4338_s10 = smov 192 }
  0xec   :  { %v4220_v41 = vld [vmem:[#allocation1 + $0x309] ss:$16 sm:%s4219_s19]   ;;  %2806 = vst.msk [vmem:[#allocation0 + $0x50] sm:$0xff] %vm2621_vm7, %v6264_v21   ;;  %2852 = vst.msk [vmem:[#allocation0 + $0xb0] sm:$0xff] %vm2621_vm7, %v6265_v33   ;;  %v4217_v24 = vsel %vm2054_vm0, %v4215_v62, %v4212_v39  ;;  %v4285_v2 = vsel %vm2054_vm0, %v4283_v51, %v4280_v1  ;;  %v4288_v36 = vld [vmem:[#allocation1 + $0x182] ss:$16 sm:%s4287_s8]  }
  0xed   :  { %v4225_v25 = vld [vmem:[#allocation1 + $0x309] ss:$16 sm:%s4224_s16]   ;;  %v4222_v47 = vsel %vm2058_vm1, %v4220_v41, %v4217_v24  ;;  %v4293_v53 = vld [vmem:[#allocation1 + $0x182] ss:$16 sm:%s4292_s3]   ;;  %v4290_v57 = vsel %vm2058_vm1, %v4288_v36, %v4285_v2  ;;  %v7467_v60 = vpop.permute.xlu0 %6267  ;;  %6412 = vrot.lane.b32.xlu0 %v6411_v56, %s6540_s12  ;;  %s4348_s2 = smov 3  ;;  %s4351_s21 = smov 12 }
  0xee   :  { %v4227_v27 = vsel %vm2062_vm2, %v4225_v25, %v4222_v47  ;;  %v4303_v20 = vld [vmem:[#allocation1 + $0x382] ss:$16 sm:%s4302_s4]   ;;  %v4295_v31 = vsel %vm2062_vm2, %v4293_v53, %v4290_v57  ;;  %s4356_s25 = smov 48  ;;  %s4361_s23 = smov 192  ;;  %v6270_v3 = vunpack.i.h.bf16 %v7467_v60  ;;  %vm4987_vm5 = vcmask 236624  }
  0xef   :  { %v6406_v28 = vpack.i.bf16 %v4227_v27, %v4204_v46  ;;  %v4306_v6 = vld [vmem:[#allocation1 + $0x382] ss:$16 sm:%s4305_s15]   ;;  %s4371_s29 = smov 3  ;;  %s4374_s11 = smov 12  ;;  %vm5171_vm6 = vcmask 195624  }
  0xf0   :  { %v4308_v50 = vsel %vm2054_vm0, %v4306_v6, %v4303_v20  ;;  %v4311_v58 = vld [vmem:[#allocation1 + $0x382] ss:$16 sm:%s4310_s7]   ;;  %s4379_s18 = smov 48  ;;  %s4384_s19 = smov 192  ;;  %2993 = vst.msk [vmem:[#allocation0 + $0x80] sm:$0xff] %vm2968_vm8, %v6270_v3  }
  0xf1   :  { %6407 = vrot.lane.b32.xlu1 %v6406_v28, %s6539_s22  ;;  %v4316_v59 = vld [vmem:[#allocation1 + $0x382] ss:$16 sm:%s4315_s5]   ;;  %s4325_s22 = smov 3  ;;  %v4313_v7 = vsel %vm2058_vm1, %v4311_v58, %v4308_v50  ;;  %s4394_s16 = smov 3  ;;  %v6269_v28 = vunpack.i.l.bf16 %v7467_v60 }
  0xf2   :  { %v4326_v61 = vld [vmem:[#allocation1 + $0x102] ss:$16 sm:%s4325_s22]   ;;  %v4318_v32 = vsel %vm2062_vm2, %v4316_v59, %v4313_v7  ;;  %s4397_s28 = smov 12  ;;  %s4402_s9 = smov 48 }
  0xf3   :  { %v4329_v4 = vld [vmem:[#allocation1 + $0x102] ss:$16 sm:%s4328_s24]   ;;  %v6416_v10 = vpack.i.bf16 %v4318_v32, %v4295_v31  ;;  %s4407_s26 = smov 192  ;;  %s4417_s27 = smov 3  ;;  %2970 = vst.msk [vmem:[#allocation0 + $0x20] sm:$0xff] %vm2968_vm8, %v6269_v28  }
  0xf4   :  { %v4331_v44 = vsel %vm2054_vm0, %v4329_v4, %v4326_v61  ;;  %v4334_v8 = vld [vmem:[#allocation1 + $0x102] ss:$16 sm:%s4333_s30]   ;;  %s4420_s17 = smov 12  ;;  %v6283_v43 = vpop.permute.xlu0 %6282  ;;  %v4418_v1 = vld [vmem:[#allocation1 + $0x10f] ss:$16 sm:%s4417_s27]   ;;  %s4425_s20 = smov 48 }
  0xf5   :  { %v4339_v12 = vld [vmem:[#allocation1 + $0x102] ss:$16 sm:%s4338_s10]   ;;  %v4336_v14 = vsel %vm2058_vm1, %v4334_v8, %v4331_v44  ;;  %6417 = vrot.lane.b32.xlu1 %v6416_v10, %s6540_s12  ;;  %v4421_v51 = vld [vmem:[#allocation1 + $0x10f] ss:$16 sm:%s4420_s17]   ;;  %s4430_s6 = smov 192  ;;  %v6285_v19 = vunpack.i.h.bf16 %v6283_v43  ;;  %v6284_v2 = vunpack.i.l.bf16 %v6283_v43  ;;  %s4440_s13 = smov 3 }
  0xf6   :  { %v4349_v13 = vld [vmem:[#allocation1 + $0x302] ss:$16 sm:%s4348_s2]   ;;  %v4341_v54 = vsel %vm2062_vm2, %v4339_v12, %v4336_v14  ;;  %v4423_v53 = vsel %vm2054_vm0, %v4421_v51, %v4418_v1  ;;  %v4426_v56 = vld [vmem:[#allocation1 + $0x10f] ss:$16 sm:%s4425_s20]   ;;  %s4443_s14 = smov 12  ;;  %s4448_s0 = smov 48 }
  0xf7   :  { %v4352_v45 = vld [vmem:[#allocation1 + $0x302] ss:$16 sm:%s4351_s21]   ;;  %v4431_v57 = vld [vmem:[#allocation1 + $0x10f] ss:$16 sm:%s4430_s6]   ;;  %v4428_v6 = vsel %vm2058_vm1, %v4426_v56, %v4423_v53  ;;  %s4453_s8 = smov 192  ;;  %s4463_s3 = smov 3 }
  0xf8   :  { %v4354_v34 = vsel %vm2054_vm0, %v4352_v45, %v4349_v13  ;;  %v4357_v39 = vld [vmem:[#allocation1 + $0x302] ss:$16 sm:%s4356_s25]   ;;  %v4441_v31 = vld [vmem:[#allocation1 + $0x30f] ss:$16 sm:%s4440_s13]   ;;  %3062 = vst.msk [vmem:[#allocation0 + $0x50] sm:$0xff] %vm2968_vm8, %v6284_v2   ;;  %3085 = vst.msk [vmem:[#allocation0 + $0xb0] sm:$0xff] %vm2968_vm8, %v6285_v19   ;;  %v4433_v60 = vsel %vm2062_vm2, %v4431_v57, %v4428_v6 }
  0xf9   :  { %v7450_v49 = vpop.permute.xlu1 %6272  ;;  %v4362_v40 = vld [vmem:[#allocation1 + $0x302] ss:$16 sm:%s4361_s23]   ;;  %v4359_v62 = vsel %vm2058_vm1, %v4357_v39, %v4354_v34  ;;  %v4444_v50 = vld [vmem:[#allocation1 + $0x30f] ss:$16 sm:%s4443_s14]   ;;  %s4466_s4 = smov 12  ;;  %s4471_s15 = smov 48 }
  0xfa   :  { %v6275_v52 = vunpack.i.h.bf16 %v7450_v49  ;;  %v6274_v18 = vunpack.i.l.bf16 %v7450_v49  ;;  %v4372_v41 = vld [vmem:[#allocation1 + $0x82] ss:$16 sm:%s4371_s29]   ;;  %v4364_v24 = vsel %vm2062_vm2, %v4362_v40, %v4359_v62  ;;  %v4449_v58 = vld [vmem:[#allocation1 + $0x30f] ss:$16 sm:%s4448_s0]   ;;  %v4446_v7 = vsel %vm2054_vm0, %v4444_v50, %v4441_v31  ;;  %s4476_s7 = smov 192  ;;  %s4486_s5 = smov 3 }
  0xfb   :  { %v4375_v46 = vld [vmem:[#allocation1 + $0x82] ss:$16 sm:%s4374_s11]   ;;  %v6421_v48 = vpack.i.bf16 %v4364_v24, %v4341_v54  ;;  %v4454_v61 = vld [vmem:[#allocation1 + $0x30f] ss:$16 sm:%s4453_s8]   ;;  %v4451_v8 = vsel %vm2058_vm1, %v4449_v58, %v4446_v7  ;;  %s4489_s22 = smov 12  ;;  %s4494_s24 = smov 48 }
  0xfc   :  { %2898 = vst.msk [vmem:[#allocation0 + $0x38] sm:$0xff] %vm2621_vm7, %v6274_v18   ;;  %2944 = vst.msk [vmem:[#allocation0 + $0x98] sm:$0xff] %vm2621_vm7, %v6275_v52   ;;  %v4377_v25 = vsel %vm2054_vm0, %v4375_v46, %v4372_v41  ;;  %v4380_v11 = vld [vmem:[#allocation1 + $0x82] ss:$16 sm:%s4379_s18]   ;;  %v4464_v4 = vld [vmem:[#allocation1 + $0x8f] ss:$16 sm:%s4463_s3]   ;;  %v4456_v14 = vsel %vm2062_vm2, %v4454_v61, %v4451_v8 }
  0xfd   :  { %v4385_v47 = vld [vmem:[#allocation1 + $0x82] ss:$16 sm:%s4384_s19]   ;;  %v4382_v26 = vsel %vm2058_vm1, %v4380_v11, %v4377_v25  ;;  %6422 = vrot.lane.b32.xlu0 %v6421_v48, %s6540_s12  ;;  %v4467_v12 = vld [vmem:[#allocation1 + $0x8f] ss:$16 sm:%s4466_s4]   ;;  %v6431_v34 = vpack.i.bf16 %v4456_v14, %v4433_v60  ;;  %s4509_s30 = smov 3  ;;  %s4512_s10 = smov 12 }
  0xfe   :  { %v6278_v22 = vpop.permute.xlu1 %6277  ;;  %v4395_v27 = vld [vmem:[#allocation1 + $0x282] ss:$16 sm:%s4394_s16]   ;;  %v4387_v29 = vsel %vm2062_vm2, %v4385_v47, %v4382_v26  ;;  %v4472_v10 = vld [vmem:[#allocation1 + $0x8f] ss:$16 sm:%s4471_s15]   ;;  %v4469_v13 = vsel %vm2054_vm0, %v4467_v12, %v4464_v4  ;;  %s4517_s2 = smov 48  ;;  %s6541_s21 = smov 29  }
  0xff   :  { %v4398_v63 = vld [vmem:[#allocation1 + $0x282] ss:$16 sm:%s4397_s28]   ;;  %v6280_v17 = vunpack.i.h.bf16 %v6278_v22  ;;  %v6279_v37 = vunpack.i.l.bf16 %v6278_v22  ;;  %v4477_v45 = vld [vmem:[#allocation1 + $0x8f] ss:$16 sm:%s4476_s7]   ;;  %v4474_v39 = vsel %vm2058_vm1, %v4472_v10, %v4469_v13  ;;  %v7505_v62 = vpop.permute.xlu0 %6292  ;;  %s4522_s25 = smov 192  ;;  %s4532_s23 = smov 3 }
 0x100   :  { %v4400_v30 = vsel %vm2054_vm0, %v4398_v63, %v4395_v27  ;;  %v4403_v35 = vld [vmem:[#allocation1 + $0x282] ss:$16 sm:%s4402_s9]   ;;  %v4487_v54 = vld [vmem:[#allocation1 + $0x28f] ss:$16 sm:%s4486_s5]   ;;  %v4479_v41 = vsel %vm2062_vm2, %v4477_v45, %v4474_v39  ;;  %s4535_s29 = smov 12  ;;  %s4540_s11 = smov 48 }
 0x101   :  { %v4408_v16 = vld [vmem:[#allocation1 + $0x282] ss:$16 sm:%s4407_s26]   ;;  %v4405_v0 = vsel %vm2058_vm1, %v4403_v35, %v4400_v30  ;;  %3016 = vst.msk [vmem:[#allocation0 + $0x8] sm:$0xff] %vm2968_vm8, %v6279_v37   ;;  %3039 = vst.msk [vmem:[#allocation0 + $0x68] sm:$0xff] %vm2968_vm8, %v6280_v17   ;;  %v4490_v40 = vld [vmem:[#allocation1 + $0x28f] ss:$16 sm:%s4489_s22]   ;;  %6432 = vrot.lane.b32.xlu0 %v6431_v34, %s6541_s21 }
 0x102   :  { %v4410_v36 = vsel %vm2062_vm2, %v4408_v16, %v4405_v0  ;;  %v6288_v59 = vpop.permute.xlu1 %6287  ;;  %v4495_v22 = vld [vmem:[#allocation1 + $0x28f] ss:$16 sm:%s4494_s24]   ;;  %v4492_v46 = vsel %vm2054_vm0, %v4490_v40, %v4487_v54  ;;  %s4545_s18 = smov 192  ;;  %s4555_s19 = smov 3 }
 0x103   :  { %v6426_v20 = vpack.i.bf16 %v4410_v36, %v4387_v29  ;;  %v6290_v32 = vunpack.i.h.bf16 %v6288_v59  ;;  %v6289_v44 = vunpack.i.l.bf16 %v6288_v59  ;;  %v4510_v25 = vld [vmem:[#allocation1 + $0xf] ss:$16 sm:%s4509_s30]   ;;  %v4497_v11 = vsel %vm2058_vm1, %v4495_v22, %v4492_v46  ;;  %s4558_s16 = smov 12  ;;  %s4563_s28 = smov 48 }
 0x104   :  { %v4513_v47 = vld [vmem:[#allocation1 + $0xf] ss:$16 sm:%s4512_s10]   ;;  %s4568_s9 = smov 192  ;;  %s4578_s26 = smov 3 }
 0x105   :  { %6427 = vrot.lane.b32.xlu1 %v6426_v20, %s6540_s12  ;;  %3108 = vst.msk [vmem:[#allocation0 + $0x38] sm:$0xff] %vm2968_vm8, %v6289_v44   ;;  %3131 = vst.msk [vmem:[#allocation0 + $0x98] sm:$0xff] %vm2968_vm8, %v6290_v32   ;;  %s4499_s12 = smov 192  ;;  %v4518_v48 = vld [vmem:[#allocation1 + $0xf] ss:$16 sm:%s4517_s2]   ;;  %v4515_v27 = vsel %vm2054_vm0, %v4513_v47, %v4510_v25  ;;  %s4581_s27 = smov 12 }
 0x106   :  { %v4500_v24 = vld [vmem:[#allocation1 + $0x28f] ss:$16 sm:%s4499_s12]   ;;  %v4520_v29 = vsel %vm2058_vm1, %v4518_v48, %v4515_v27  ;;  %s4586_s17 = smov 48  ;;  %s4591_s20 = smov 192 }
 0x107   :  { %v4502_v26 = vsel %vm2062_vm2, %v4500_v24, %v4497_v11  ;;  %v4523_v63 = vld [vmem:[#allocation1 + $0xf] ss:$16 sm:%s4522_s25]   ;;  %v7514_v16 = vpop.permute.xlu1 %6297  ;;  %s4601_s6 = smov 3  ;;  %s4604_s13 = smov 12 }
 0x108   :  { %v4533_v3 = vld [vmem:[#allocation1 + $0x20f] ss:$16 sm:%s4532_s23]   ;;  %v6436_v28 = vpack.i.bf16 %v4502_v26, %v4479_v41  ;;  %v4525_v17 = vsel %vm2062_vm2, %v4523_v63, %v4520_v29  ;;  %v4602_v7 = vld [vmem:[#allocation1 + $0x88] ss:$16 sm:%s4601_s6]   ;;  %s4609_s14 = smov 48  ;;  %s4614_s0 = smov 192 }
 0x109   :  { %v4536_v30 = vld [vmem:[#allocation1 + $0x20f] ss:$16 sm:%s4535_s29]   ;;  %v4605_v4 = vld [vmem:[#allocation1 + $0x88] ss:$16 sm:%s4604_s13]   ;;  %s4624_s8 = smov 3  ;;  %s4627_s3 = smov 12 }
 0x10a   :  { %v4541_v35 = vld [vmem:[#allocation1 + $0x20f] ss:$16 sm:%s4540_s11]   ;;  %v4538_v37 = vsel %vm2054_vm0, %v4536_v30, %v4533_v3  ;;  %6437 = vrot.lane.b32.xlu1 %v6436_v28, %s6541_s21  ;;  %v4610_v32 = vld [vmem:[#allocation1 + $0x88] ss:$16 sm:%s4609_s14]   ;;  %v4607_v8 = vsel %vm2054_vm0, %v4605_v4, %v4602_v7  ;;  %s4632_s4 = smov 48  ;;  %s4637_s15 = smov 192 }
 0x10b   :  { %v4546_v43 = vld [vmem:[#allocation1 + $0x20f] ss:$16 sm:%s4545_s18]   ;;  %v4543_v1 = vsel %vm2058_vm1, %v4541_v35, %v4538_v37  ;;  %v4615_v12 = vld [vmem:[#allocation1 + $0x88] ss:$16 sm:%s4614_s0]   ;;  %v4612_v14 = vsel %vm2058_vm1, %v4610_v32, %v4607_v8  ;;  %s4647_s7 = smov 3  ;;  %s4650_s5 = smov 12 }
 0x10c   :  { %v4556_v0 = vld [vmem:[#allocation1 + $0x18f] ss:$16 sm:%s4555_s19]   ;;  %v4548_v2 = vsel %vm2062_vm2, %v4546_v43, %v4543_v1  ;;  %v4625_v13 = vld [vmem:[#allocation1 + $0x288] ss:$16 sm:%s4624_s8]   ;;  %v4617_v34 = vsel %vm2062_vm2, %v4615_v12, %v4612_v14  ;;  %s4655_s22 = smov 48  ;;  %s4660_s24 = smov 192 }
 0x10d   :  { %v4559_v51 = vld [vmem:[#allocation1 + $0x18f] ss:$16 sm:%s4558_s16]   ;;  %v6441_v57 = vpack.i.bf16 %v4548_v2, %v4525_v17  ;;  %v4628_v45 = vld [vmem:[#allocation1 + $0x288] ss:$16 sm:%s4627_s3]   ;;  %s4670_s12 = smov 3  ;;  %s4673_s30 = smov 12 }
 0x10e   :  { %v4564_v19 = vld [vmem:[#allocation1 + $0x18f] ss:$16 sm:%s4563_s28]   ;;  %v4561_v36 = vsel %vm2054_vm0, %v4559_v51, %v4556_v0  ;;  %v4630_v39 = vsel %vm2054_vm0, %v4628_v45, %v4625_v13  ;;  %v4633_v40 = vld [vmem:[#allocation1 + $0x288] ss:$16 sm:%s4632_s4]   ;;  %s4678_s10 = smov 48  ;;  %s4683_s2 = smov 192 }
 0x10f   :  { %v4569_v53 = vld [vmem:[#allocation1 + $0x18f] ss:$16 sm:%s4568_s9]   ;;  %v4566_v20 = vsel %vm2058_vm1, %v4564_v19, %v4561_v36  ;;  %v7523_v50 = vpop.permute.xlu0 %6302  ;;  %6442 = vrot.lane.b32.xlu0 %v6441_v57, %s6541_s21  ;;  %v4638_v22 = vld [vmem:[#allocation1 + $0x288] ss:$16 sm:%s4637_s15]   ;;  %v4635_v41 = vsel %vm2058_vm1, %v4633_v40, %v4630_v39  ;;  %s4696_s25 = smov 12  ;;  %s6542_s23 = smov 24  }
 0x110   :  { %v4579_v56 = vld [vmem:[#allocation1 + $0x38f] ss:$16 sm:%s4578_s26]   ;;  %v4571_v58 = vsel %vm2062_vm2, %v4569_v53, %v4566_v20  ;;  %v4648_v46 = vld [vmem:[#allocation1 + $0x8] ss:$16 sm:%s4647_s7]   ;;  %v4640_v25 = vsel %vm2062_vm2, %v4638_v22, %v4635_v41  ;;  %s4701_s29 = smov 48  ;;  %s4706_s11 = smov 192 }
 0x111   :  { %v4582_v6 = vld [vmem:[#allocation1 + $0x38f] ss:$16 sm:%s4581_s27]   ;;  %v4651_v24 = vld [vmem:[#allocation1 + $0x8] ss:$16 sm:%s4650_s5]   ;;  %v6451_v26 = vpack.i.bf16 %v4640_v25, %v4617_v34  ;;  %s4716_s18 = smov 3  ;;  %s4719_s19 = smov 12 }
 0x112   :  { %v4587_v31 = vld [vmem:[#allocation1 + $0x38f] ss:$16 sm:%s4586_s17]   ;;  %v4584_v59 = vsel %vm2054_vm0, %v4582_v6, %v4579_v56  ;;  %v4653_v11 = vsel %vm2054_vm0, %v4651_v24, %v4648_v46  ;;  %v4656_v47 = vld [vmem:[#allocation1 + $0x8] ss:$16 sm:%s4655_s22]   ;;  %s4724_s16 = smov 48  ;;  %s4729_s28 = smov 192 }
 0x113   :  { %v4592_v60 = vld [vmem:[#allocation1 + $0x38f] ss:$16 sm:%s4591_s20]   ;;  %v4589_v61 = vsel %vm2058_vm1, %v4587_v31, %v4584_v59  ;;  %v4661_v48 = vld [vmem:[#allocation1 + $0x8] ss:$16 sm:%s4660_s24]   ;;  %v4658_v27 = vsel %vm2058_vm1, %v4656_v47, %v4653_v11  ;;  %v6313_v17 = vpop.permute.xlu0 %6312  ;;  %6452 = vrot.lane.b32.xlu0 %v6451_v26, %s6542_s23  ;;  %s4739_s9 = smov 3  ;;  %s4742_s26 = smov 12 }
 0x114   :  { %v4594_v44 = vsel %vm2062_vm2, %v4592_v60, %v4589_v61  ;;  %v4671_v63 = vld [vmem:[#allocation1 + $0x208] ss:$16 sm:%s4670_s12]   ;;  %v4663_v28 = vsel %vm2062_vm2, %v4661_v48, %v4658_v27  ;;  %v6315_v1 = vunpack.i.h.bf16 %v6313_v17  ;;  %v6314_v51 = vunpack.i.l.bf16 %v6313_v17  ;;  %s4747_s27 = smov 48  ;;  %s4752_s17 = smov 192 }
 0x115   :  { %v6446_v10 = vpack.i.bf16 %v4594_v44, %v4571_v58  ;;  %v4674_v3 = vld [vmem:[#allocation1 + $0x208] ss:$16 sm:%s4673_s30]   ;;  %s4762_s20 = smov 3  ;;  %s4765_s6 = smov 12 }
 0x116   :  { %v4676_v29 = vsel %vm2054_vm0, %v4674_v3, %v4671_v63  ;;  %v4679_v30 = vld [vmem:[#allocation1 + $0x208] ss:$16 sm:%s4678_s10]   ;;  %3337 = vst.msk [vmem:[#allocation0 + $0x20] sm:$0xff] %vm3335_vm9, %v6314_v51   ;;  %3360 = vst.msk [vmem:[#allocation0 + $0x80] sm:$0xff] %vm3335_vm9, %v6315_v1   ;;  %s4770_s13 = smov 48  ;;  %s4775_s14 = smov 192 }
 0x117   :  { %v7532_v54 = vpop.permute.xlu1 %6307  ;;  %6447 = vrot.lane.b32.xlu1 %v6446_v10, %s6541_s21  ;;  %v4684_v35 = vld [vmem:[#allocation1 + $0x208] ss:$16 sm:%s4683_s2]   ;;  %s4693_s21 = smov 3  ;;  %v4681_v37 = vsel %vm2058_vm1, %v4679_v30, %v4676_v29  ;;  %s4785_s0 = smov 3  ;;  %v6323_v25 = vpop.permute.xlu0 %6322 }
 0x118   :  { %v4694_v43 = vld [vmem:[#allocation1 + $0x188] ss:$16 sm:%s4693_s21]   ;;  %v4686_v19 = vsel %vm2062_vm2, %v4684_v35, %v4681_v37  ;;  %s4788_s8 = smov 12  ;;  %v4786_v47 = vld [vmem:[#allocation1 + $0x1] ss:$16 sm:%s4785_s0]   ;;  %s4793_s3 = smov 48  ;;  %v6325_v26 = vunpack.i.h.bf16 %v6323_v25  ;;  %v6324_v27 = vunpack.i.l.bf16 %v6323_v25 }
 0x119   :  { %v4697_v0 = vld [vmem:[#allocation1 + $0x188] ss:$16 sm:%s4696_s25]   ;;  %v6456_v56 = vpack.i.bf16 %v4686_v19, %v4663_v28  ;;  %v4789_v48 = vld [vmem:[#allocation1 + $0x1] ss:$16 sm:%s4788_s8]   ;;  %s4798_s4 = smov 192  ;;  %s4807_s15 = smov 3 }
 0x11a   :  { %v4699_v2 = vsel %vm2054_vm0, %v4697_v0, %v4694_v43  ;;  %v4702_v36 = vld [vmem:[#allocation1 + $0x188] ss:$16 sm:%s4701_s29]   ;;  %v4791_v3 = vsel %vm2054_vm0, %v4789_v48, %v4786_v47  ;;  %v4794_v28 = vld [vmem:[#allocation1 + $0x1] ss:$16 sm:%s4793_s3]   ;;  %s4810_s7 = smov 12  ;;  %s4815_s5 = smov 48 }
 0x11b   :  { %v4707_v53 = vld [vmem:[#allocation1 + $0x188] ss:$16 sm:%s4706_s11]   ;;  %v4704_v57 = vsel %vm2058_vm1, %v4702_v36, %v4699_v2  ;;  %6457 = vrot.lane.b32.xlu1 %v6456_v56, %s6542_s23  ;;  %v4799_v29 = vld [vmem:[#allocation1 + $0x1] ss:$16 sm:%s4798_s4]   ;;  %v4796_v35 = vsel %vm2058_vm1, %v4794_v28, %v4791_v3  ;;  %3429 = vst.msk [vmem:[#allocation0 + $0x50] sm:$0xff] %vm3335_vm9, %v6324_v27   ;;  %3452 = vst.msk [vmem:[#allocation0 + $0xb0] sm:$0xff] %vm3335_vm9, %v6325_v26  }
 0x11c   :  { %v4717_v20 = vld [vmem:[#allocation1 + $0x388] ss:$16 sm:%s4716_s18]   ;;  %v4709_v31 = vsel %vm2062_vm2, %v4707_v53, %v4704_v57  ;;  %v6318_v7 = vpop.permute.xlu1 %6317  ;;  %v4808_v17 = vld [vmem:[#allocation1 + $0x201] ss:$16 sm:%s4807_s15]   ;;  %s4820_s22 = smov 192  ;;  %s4830_s24 = smov 3  ;;  %v4801_v1 = vsel %vm2062_vm2, %v4799_v29, %v4796_v35 }
 0x11d   :  { %v4720_v6 = vld [vmem:[#allocation1 + $0x388] ss:$16 sm:%s4719_s19]   ;;  %v6320_v44 = vunpack.i.h.bf16 %v6318_v7  ;;  %v6319_v8 = vunpack.i.l.bf16 %v6318_v7  ;;  %v4811_v37 = vld [vmem:[#allocation1 + $0x201] ss:$16 sm:%s4810_s7]   ;;  %s4833_s12 = smov 12  ;;  %s4838_s30 = smov 48 }
 0x11e   :  { %v4722_v58 = vsel %vm2054_vm0, %v4720_v6, %v4717_v20  ;;  %v4725_v59 = vld [vmem:[#allocation1 + $0x388] ss:$16 sm:%s4724_s16]   ;;  %v4816_v43 = vld [vmem:[#allocation1 + $0x201] ss:$16 sm:%s4815_s5]   ;;  %v4813_v51 = vsel %vm2054_vm0, %v4811_v37, %v4808_v17  ;;  %s4843_s10 = smov 192  ;;  %s4853_s2 = smov 3 }
 0x11f   :  { %v4730_v60 = vld [vmem:[#allocation1 + $0x388] ss:$16 sm:%s4729_s28]   ;;  %v4727_v61 = vsel %vm2058_vm1, %v4725_v59, %v4722_v58  ;;  %3383 = vst.msk [vmem:[#allocation0 + $0x8] sm:$0xff] %vm3335_vm9, %v6319_v8   ;;  %3406 = vst.msk [vmem:[#allocation0 + $0x68] sm:$0xff] %vm3335_vm9, %v6320_v44   ;;  %v4821_v19 = vld [vmem:[#allocation1 + $0x201] ss:$16 sm:%s4820_s22]   ;;  %v4818_v56 = vsel %vm2058_vm1, %v4816_v43, %v4813_v51 }
 0x120   :  { %v4740_v4 = vld [vmem:[#allocation1 + $0x108] ss:$16 sm:%s4739_s9]   ;;  %v4732_v12 = vsel %vm2062_vm2, %v4730_v60, %v4727_v61  ;;  %v6328_v0 = vpop.permute.xlu1 %6327  ;;  %v4831_v2 = vld [vmem:[#allocation1 + $0x181] ss:$16 sm:%s4830_s24]   ;;  %v4823_v6 = vsel %vm2062_vm2, %v4821_v19, %v4818_v56  ;;  %s4856_s21 = smov 12  ;;  %s4861_s25 = smov 48 }
 0x121   :  { %v4743_v32 = vld [vmem:[#allocation1 + $0x108] ss:$16 sm:%s4742_s26]   ;;  %v6461_v45 = vpack.i.bf16 %v4732_v12, %v4709_v31  ;;  %v6330_v36 = vunpack.i.h.bf16 %v6328_v0  ;;  %v6329_v53 = vunpack.i.l.bf16 %v6328_v0  ;;  %v4834_v57 = vld [vmem:[#allocation1 + $0x181] ss:$16 sm:%s4833_s12]   ;;  %v6471_v60 = vpack.i.bf16 %v4823_v6, %v4801_v1  ;;  %s4876_s29 = smov 3  ;;  %s4879_s11 = smov 12 }
 0x122   :  { %v4745_v10 = vsel %vm2054_vm0, %v4743_v32, %v4740_v4  ;;  %v4748_v14 = vld [vmem:[#allocation1 + $0x108] ss:$16 sm:%s4747_s27]   ;;  %v4839_v20 = vld [vmem:[#allocation1 + $0x181] ss:$16 sm:%s4838_s30]   ;;  %v4836_v31 = vsel %vm2054_vm0, %v4834_v57, %v4831_v2  ;;  %v7577_v32 = vpop.permute.xlu0 %6332  ;;  %s4884_s18 = smov 48  ;;  %s6543_s19 = smov 19  }
 0x123   :  { %v4753_v13 = vld [vmem:[#allocation1 + $0x108] ss:$16 sm:%s4752_s17]   ;;  %v4750_v34 = vsel %vm2058_vm1, %v4748_v14, %v4745_v10  ;;  %6462 = vrot.lane.b32.xlu0 %v6461_v45, %s6542_s23  ;;  %v4844_v58 = vld [vmem:[#allocation1 + $0x181] ss:$16 sm:%s4843_s10]   ;;  %3475 = vst.msk [vmem:[#allocation0 + $0x38] sm:$0xff] %vm3335_vm9, %v6329_v53   ;;  %3498 = vst.msk [vmem:[#allocation0 + $0x98] sm:$0xff] %vm3335_vm9, %v6330_v36   ;;  %v4841_v7 = vsel %vm2058_vm1, %v4839_v20, %v4836_v31 }
 0x124   :  { %v4763_v39 = vld [vmem:[#allocation1 + $0x308] ss:$16 sm:%s4762_s20]   ;;  %v4755_v22 = vsel %vm2062_vm2, %v4753_v13, %v4750_v34  ;;  %v4854_v59 = vld [vmem:[#allocation1 + $0x381] ss:$16 sm:%s4853_s2]   ;;  %v4846_v44 = vsel %vm2062_vm2, %v4844_v58, %v4841_v7  ;;  %s4889_s16 = smov 192  ;;  %s4899_s28 = smov 3 }
 0x125   :  { %v4766_v40 = vld [vmem:[#allocation1 + $0x308] ss:$16 sm:%s4765_s6]   ;;  %v4857_v61 = vld [vmem:[#allocation1 + $0x381] ss:$16 sm:%s4856_s21]   ;;  %s4902_s9 = smov 12  ;;  %s4907_s26 = smov 48 }
 0x126   :  { %v4768_v41 = vsel %vm2054_vm0, %v4766_v40, %v4763_v39  ;;  %v4771_v46 = vld [vmem:[#allocation1 + $0x308] ss:$16 sm:%s4770_s13]   ;;  %v4862_v4 = vld [vmem:[#allocation1 + $0x381] ss:$16 sm:%s4861_s25]   ;;  %v4859_v8 = vsel %vm2054_vm0, %v4857_v61, %v4854_v59  ;;  %s4912_s27 = smov 192  ;;  %s4922_s17 = smov 3 }
 0x127   :  { %v4776_v24 = vld [vmem:[#allocation1 + $0x308] ss:$16 sm:%s4775_s14]   ;;  %v4773_v11 = vsel %vm2058_vm1, %v4771_v46, %v4768_v41  ;;  %v4877_v10 = vld [vmem:[#allocation1 + $0x101] ss:$16 sm:%s4876_s29]   ;;  %6472 = vrot.lane.b32.xlu0 %v6471_v60, %s6543_s19  ;;  %v4864_v14 = vsel %vm2058_vm1, %v4862_v4, %v4859_v8  ;;  %s4925_s20 = smov 12  ;;  %s4930_s6 = smov 48 }
 0x128   :  { %v4778_v63 = vsel %vm2062_vm2, %v4776_v24, %v4773_v11  ;;  %v4880_v13 = vld [vmem:[#allocation1 + $0x101] ss:$16 sm:%s4879_s11]   ;;  %v7586_v11 = vpop.permute.xlu1 %6337  ;;  %s4935_s13 = smov 192  ;;  %s4945_s14 = smov 3 }
 0x129   :  { %v6466_v30 = vpack.i.bf16 %v4778_v63, %v4755_v22  ;;  %v4885_v45 = vld [vmem:[#allocation1 + $0x101] ss:$16 sm:%s4884_s18]   ;;  %v4882_v39 = vsel %vm2054_vm0, %v4880_v13, %v4877_v10  ;;  %s4948_s0 = smov 12  ;;  %s4953_s8 = smov 48 }
 0x12a   :  { %v4890_v40 = vld [vmem:[#allocation1 + $0x101] ss:$16 sm:%s4889_s16]   ;;  %v4887_v46 = vsel %vm2058_vm1, %v4885_v45, %v4882_v39  ;;  %s4958_s3 = smov 192  ;;  %s4968_s4 = smov 3 }
 0x12b   :  { %6467 = vrot.lane.b32.xlu1 %v6466_v30, %s6542_s23  ;;  %s4866_s23 = smov 192  ;;  %v4900_v22 = vld [vmem:[#allocation1 + $0x301] ss:$16 sm:%s4899_s28]   ;;  %v4892_v47 = vsel %vm2062_vm2, %v4890_v40, %v4887_v46  ;;  %v4969_v53 = vld [vmem:[#allocation1 + $0x10e] ss:$16 sm:%s4968_s4]   ;;  %s4971_s15 = smov 12 }
 0x12c   :  { %v4867_v12 = vld [vmem:[#allocation1 + $0x381] ss:$16 sm:%s4866_s23]   ;;  %s4976_s7 = smov 48  ;;  %v4972_v57 = vld [vmem:[#allocation1 + $0x10e] ss:$16 sm:%s4971_s15]   ;;  %s4981_s5 = smov 192 }
 0x12d   :  { %v4869_v34 = vsel %vm2062_vm2, %v4867_v12, %v4864_v14  ;;  %v4903_v24 = vld [vmem:[#allocation1 + $0x301] ss:$16 sm:%s4902_s9]   ;;  %v4977_v20 = vld [vmem:[#allocation1 + $0x10e] ss:$16 sm:%s4976_s7]   ;;  %v4974_v31 = vsel %vm2054_vm0, %v4972_v57, %v4969_v53  ;;  %s4991_s22 = smov 3  ;;  %s4994_s24 = smov 12 }
 0x12e   :  { %v6476_v41 = vpack.i.bf16 %v4869_v34, %v4846_v44  ;;  %v4908_v25 = vld [vmem:[#allocation1 + $0x301] ss:$16 sm:%s4907_s26]   ;;  %v4905_v48 = vsel %vm2054_vm0, %v4903_v24, %v4900_v22  ;;  %v4982_v58 = vld [vmem:[#allocation1 + $0x10e] ss:$16 sm:%s4981_s5]   ;;  %v4979_v60 = vsel %vm2058_vm1, %v4977_v20, %v4974_v31  ;;  %s4999_s12 = smov 48  ;;  %s5004_s30 = smov 192 }
 0x12f   :  { %v4913_v26 = vld [vmem:[#allocation1 + $0x301] ss:$16 sm:%s4912_s27]   ;;  %v4910_v63 = vsel %vm2058_vm1, %v4908_v25, %v4905_v48  ;;  %v7595_v51 = vpop.permute.xlu0 %6342  ;;  %v4992_v7 = vld [vmem:[#allocation1 + $0x30e] ss:$16 sm:%s4991_s22]   ;;  %v4984_v44 = vsel %vm2062_vm2, %v4982_v58, %v4979_v60  ;;  %s5014_s10 = smov 3  ;;  %s5017_s2 = smov 12 }
 0x130   :  { %v4923_v27 = vld [vmem:[#allocation1 + $0x81] ss:$16 sm:%s4922_s17]   ;;  %6477 = vrot.lane.b32.xlu1 %v6476_v41, %s6543_s19  ;;  %v4915_v29 = vsel %vm2062_vm2, %v4913_v26, %v4910_v63  ;;  %v4995_v61 = vld [vmem:[#allocation1 + $0x30e] ss:$16 sm:%s4994_s24]   ;;  %s5022_s21 = smov 48  ;;  %s5027_s25 = smov 192 }
 0x131   :  { %v4926_v3 = vld [vmem:[#allocation1 + $0x81] ss:$16 sm:%s4925_s20]   ;;  %v6481_v37 = vpack.i.bf16 %v4915_v29, %v4892_v47  ;;  %v4997_v8 = vsel %vm2054_vm0, %v4995_v61, %v4992_v7  ;;  %v5000_v12 = vld [vmem:[#allocation1 + $0x30e] ss:$16 sm:%s4999_s12]   ;;  %s5037_s23 = smov 3  ;;  %s5040_s29 = smov 12 }
 0x132   :  { %v4931_v28 = vld [vmem:[#allocation1 + $0x81] ss:$16 sm:%s4930_s6]   ;;  %v4928_v30 = vsel %vm2054_vm0, %v4926_v3, %v4923_v27  ;;  %v5005_v10 = vld [vmem:[#allocation1 + $0x30e] ss:$16 sm:%s5004_s30]   ;;  %v5002_v14 = vsel %vm2058_vm1, %v5000_v12, %v4997_v8  ;;  %s5045_s11 = smov 48  ;;  %s5050_s18 = smov 192 }
 0x133   :  { %v4936_v35 = vld [vmem:[#allocation1 + $0x81] ss:$16 sm:%s4935_s13]   ;;  %v4933_v43 = vsel %vm2058_vm1, %v4931_v28, %v4928_v30  ;;  %6482 = vrot.lane.b32.xlu0 %v6481_v37, %s6543_s19  ;;  %v5015_v13 = vld [vmem:[#allocation1 + $0x8e] ss:$16 sm:%s5014_s10]   ;;  %v5007_v34 = vsel %vm2062_vm2, %v5005_v10, %v5002_v14  ;;  %s5063_s16 = smov 12  ;;  %v6353_v63 = vpop.permute.xlu0 %6352  ;;  %s6544_s28 = smov 10  }
 0x134   :  { %v4946_v17 = vld [vmem:[#allocation1 + $0x281] ss:$16 sm:%s4945_s14]   ;;  %v4938_v19 = vsel %vm2062_vm2, %v4936_v35, %v4933_v43  ;;  %v5018_v45 = vld [vmem:[#allocation1 + $0x8e] ss:$16 sm:%s5017_s2]   ;;  %v6491_v41 = vpack.i.bf16 %v5007_v34, %v4984_v44  ;;  %s5068_s9 = smov 48  ;;  %s5073_s26 = smov 192  ;;  %v6355_v30 = vunpack.i.h.bf16 %v6353_v63  ;;  %v6354_v35 = vunpack.i.l.bf16 %v6353_v63 }
 0x135   :  { %v4949_v0 = vld [vmem:[#allocation1 + $0x281] ss:$16 sm:%s4948_s0]   ;;  %v5020_v39 = vsel %vm2054_vm0, %v5018_v45, %v5015_v13  ;;  %v5023_v40 = vld [vmem:[#allocation1 + $0x8e] ss:$16 sm:%s5022_s21]   ;;  %s5083_s27 = smov 3  ;;  %s5086_s17 = smov 12 }
 0x136   :  { %v4954_v1 = vld [vmem:[#allocation1 + $0x281] ss:$16 sm:%s4953_s8]   ;;  %v4951_v2 = vsel %vm2054_vm0, %v4949_v0, %v4946_v17  ;;  %v5028_v22 = vld [vmem:[#allocation1 + $0x8e] ss:$16 sm:%s5027_s25]   ;;  %v5025_v46 = vsel %vm2058_vm1, %v5023_v40, %v5020_v39  ;;  %s5091_s20 = smov 48  ;;  %s5096_s6 = smov 192 }
 0x137   :  { %v4959_v36 = vld [vmem:[#allocation1 + $0x281] ss:$16 sm:%s4958_s3]   ;;  %v4956_v56 = vsel %vm2058_vm1, %v4954_v1, %v4951_v2  ;;  %v7604_v4 = vpop.permute.xlu1 %6347  ;;  %v5038_v24 = vld [vmem:[#allocation1 + $0x28e] ss:$16 sm:%s5037_s23]   ;;  %v5030_v47 = vsel %vm2062_vm2, %v5028_v22, %v5025_v46  ;;  %6492 = vrot.lane.b32.xlu0 %v6491_v41, %s6544_s28  ;;  %3704 = vst.msk [vmem:[#allocation0 + $0x20] sm:$0xff] %vm3702_vm10, %v6354_v35   ;;  %3727 = vst.msk [vmem:[#allocation0 + $0x80] sm:$0xff] %vm3702_vm10, %v6355_v30   ;;  %v6363_v41 = vpop.permute.xlu0 %6362 }
 0x138   :  { %v4961_v6 = vsel %vm2062_vm2, %v4959_v36, %v4956_v56  ;;  %v5041_v25 = vld [vmem:[#allocation1 + $0x28e] ss:$16 sm:%s5040_s29]   ;;  %s5106_s13 = smov 3  ;;  %s5109_s14 = smov 12 }
 0x139   :  { %v6486_v59 = vpack.i.bf16 %v4961_v6, %v4938_v19  ;;  %v5043_v48 = vsel %vm2054_vm0, %v5041_v25, %v5038_v24  ;;  %v5046_v26 = vld [vmem:[#allocation1 + $0x28e] ss:$16 sm:%s5045_s11]   ;;  %s5114_s0 = smov 48  ;;  %s5119_s8 = smov 192 }
 0x13a   :  { %v5051_v27 = vld [vmem:[#allocation1 + $0x28e] ss:$16 sm:%s5050_s18]   ;;  %v5048_v3 = vsel %vm2058_vm1, %v5046_v26, %v5043_v48  ;;  %s5129_s3 = smov 3  ;;  %s5132_s4 = smov 12  ;;  %v6364_v48 = vunpack.i.l.bf16 %v6363_v41 }
 0x13b   :  { %6487 = vrot.lane.b32.xlu1 %v6486_v59, %s6543_s19  ;;  %s5060_s19 = smov 3  ;;  %v5064_v29 = vld [vmem:[#allocation1 + $0xe] ss:$16 sm:%s5063_s16]   ;;  %v5053_v17 = vsel %vm2062_vm2, %v5051_v27, %v5048_v3  ;;  %s5137_s15 = smov 48 }
 0x13c   :  { %v5061_v28 = vld [vmem:[#allocation1 + $0xe] ss:$16 sm:%s5060_s19]   ;;  %v6496_v1 = vpack.i.bf16 %v5053_v17, %v5030_v47  ;;  %v6358_v6 = vpop.permute.xlu1 %6357  ;;  %s5142_s7 = smov 192  ;;  %s5152_s5 = smov 3  ;;  %v6365_v47 = vunpack.i.h.bf16 %v6363_v41  ;;  %3796 = vst.msk [vmem:[#allocation0 + $0x50] sm:$0xff] %vm3702_vm10, %v6364_v48  }
 0x13d   :  { %v5066_v37 = vsel %vm2054_vm0, %v5064_v29, %v5061_v28  ;;  %v5069_v43 = vld [vmem:[#allocation1 + $0xe] ss:$16 sm:%s5068_s9]   ;;  %v6360_v60 = vunpack.i.h.bf16 %v6358_v6  ;;  %v6359_v7 = vunpack.i.l.bf16 %v6358_v6  ;;  %s5155_s22 = smov 12  ;;  %v5153_v24 = vld [vmem:[#allocation1 + $0x87] ss:$16 sm:%s5152_s5]   ;;  %s5160_s24 = smov 48 }
 0x13e   :  { %v5074_v0 = vld [vmem:[#allocation1 + $0xe] ss:$16 sm:%s5073_s26]   ;;  %v5071_v19 = vsel %vm2058_vm1, %v5069_v43, %v5066_v37  ;;  %v5156_v25 = vld [vmem:[#allocation1 + $0x87] ss:$16 sm:%s5155_s22]   ;;  %s5165_s12 = smov 192  ;;  %s5175_s30 = smov 3 }
 0x13f   :  { %v5084_v2 = vld [vmem:[#allocation1 + $0x20e] ss:$16 sm:%s5083_s27]   ;;  %v5076_v53 = vsel %vm2062_vm2, %v5074_v0, %v5071_v19  ;;  %6497 = vrot.lane.b32.xlu1 %v6496_v1, %s6544_s28  ;;  %3750 = vst.msk [vmem:[#allocation0 + $0x8] sm:$0xff] %vm3702_vm10, %v6359_v7   ;;  %3773 = vst.msk [vmem:[#allocation0 + $0x68] sm:$0xff] %vm3702_vm10, %v6360_v60   ;;  %v5158_v27 = vsel %vm2054_vm0, %v5156_v25, %v5153_v24  ;;  %v5161_v63 = vld [vmem:[#allocation1 + $0x87] ss:$16 sm:%s5160_s24]  }
 0x140   :  { %v5087_v36 = vld [vmem:[#allocation1 + $0x20e] ss:$16 sm:%s5086_s17]   ;;  %v5166_v3 = vld [vmem:[#allocation1 + $0x87] ss:$16 sm:%s5165_s12]   ;;  %v5163_v29 = vsel %vm2058_vm1, %v5161_v63, %v5158_v27  ;;  %s5178_s10 = smov 12  ;;  %s5183_s2 = smov 48  ;;  %v6368_v37 = vpop.permute.xlu1 %6367 }
 0x141   :  { %v5089_v56 = vsel %vm2054_vm0, %v5087_v36, %v5084_v2  ;;  %v5092_v57 = vld [vmem:[#allocation1 + $0x20e] ss:$16 sm:%s5091_s20]   ;;  %v5176_v30 = vld [vmem:[#allocation1 + $0x287] ss:$16 sm:%s5175_s30]   ;;  %3819 = vst.msk [vmem:[#allocation0 + $0xb0] sm:$0xff] %vm3702_vm10, %v6365_v47   ;;  %s5188_s21 = smov 192  ;;  %v5168_v43 = vsel %vm2062_vm2, %v5166_v3, %v5163_v29  ;;  %v6370_v2 = vunpack.i.h.bf16 %v6368_v37  ;;  %v6369_v36 = vunpack.i.l.bf16 %v6368_v37 }
 0x142   :  { %v5097_v20 = vld [vmem:[#allocation1 + $0x20e] ss:$16 sm:%s5096_s6]   ;;  %v5094_v31 = vsel %vm2058_vm1, %v5092_v57, %v5089_v56  ;;  %v5179_v35 = vld [vmem:[#allocation1 + $0x287] ss:$16 sm:%s5178_s10]   ;;  %s5198_s25 = smov 3  ;;  %s5201_s23 = smov 12 }
 0x143   :  { %v5107_v58 = vld [vmem:[#allocation1 + $0x18e] ss:$16 sm:%s5106_s13]   ;;  %v5099_v61 = vsel %vm2062_vm2, %v5097_v20, %v5094_v31  ;;  %v5184_v17 = vld [vmem:[#allocation1 + $0x287] ss:$16 sm:%s5183_s2]   ;;  %v5181_v0 = vsel %vm2054_vm0, %v5179_v35, %v5176_v30  ;;  %s5206_s29 = smov 48  ;;  %s5211_s11 = smov 192 }
 0x144   :  { %v5110_v59 = vld [vmem:[#allocation1 + $0x18e] ss:$16 sm:%s5109_s14]   ;;  %v6501_v10 = vpack.i.bf16 %v5099_v61, %v5076_v53  ;;  %v5189_v1 = vld [vmem:[#allocation1 + $0x287] ss:$16 sm:%s5188_s21]   ;;  %v5186_v53 = vsel %vm2058_vm1, %v5184_v17, %v5181_v0  ;;  %s5221_s18 = smov 3  ;;  %s5224_s19 = smov 12 }
 0x145   :  { %v5112_v44 = vsel %vm2054_vm0, %v5110_v59, %v5107_v58  ;;  %v5115_v8 = vld [vmem:[#allocation1 + $0x18e] ss:$16 sm:%s5114_s0]   ;;  %v5199_v19 = vld [vmem:[#allocation1 + $0x7] ss:$16 sm:%s5198_s25]   ;;  %v5191_v20 = vsel %vm2062_vm2, %v5189_v1, %v5186_v53  ;;  %s5229_s16 = smov 48  ;;  %3842 = vst.msk [vmem:[#allocation0 + $0x38] sm:$0xff] %vm3702_vm10, %v6369_v36  }
 0x146   :  { %v5120_v12 = vld [vmem:[#allocation1 + $0x18e] ss:$16 sm:%s5119_s8]   ;;  %v5117_v14 = vsel %vm2058_vm1, %v5115_v8, %v5112_v44  ;;  %6502 = vrot.lane.b32.xlu0 %v6501_v10, %s6544_s28  ;;  %v5202_v56 = vld [vmem:[#allocation1 + $0x7] ss:$16 sm:%s5201_s23]   ;;  %3865 = vst.msk [vmem:[#allocation0 + $0x98] sm:$0xff] %vm3702_vm10, %v6370_v2   ;;  %v6511_v59 = vpack.i.bf16 %v5191_v20, %v5168_v43  ;;  %s5244_s9 = smov 3  ;;  %v7649_v44 = vpop.permute.xlu0 %6372 }
 0x147   :  { %v5130_v13 = vld [vmem:[#allocation1 + $0x38e] ss:$16 sm:%s5129_s3]   ;;  %v5122_v34 = vsel %vm2062_vm2, %v5120_v12, %v5117_v14  ;;  %v5207_v57 = vld [vmem:[#allocation1 + $0x7] ss:$16 sm:%s5206_s29]   ;;  %v5204_v6 = vsel %vm2054_vm0, %v5202_v56, %v5199_v19  ;;  %s5247_s26 = smov 12  ;;  %s5252_s27 = smov 48  ;;  %v7658_v48 = vpop.permute.xlu1 %6377 }
 0x148   :  { %v5133_v45 = vld [vmem:[#allocation1 + $0x38e] ss:$16 sm:%s5132_s4]   ;;  %v5212_v31 = vld [vmem:[#allocation1 + $0x7] ss:$16 sm:%s5211_s11]   ;;  %v5209_v60 = vsel %vm2058_vm1, %v5207_v57, %v5204_v6  ;;  %s6545_s17 = smov 5   ;;  %s5257_s20 = smov 192 }
 0x149   :  { %v5135_v39 = vsel %vm2054_vm0, %v5133_v45, %v5130_v13  ;;  %v5138_v40 = vld [vmem:[#allocation1 + $0x38e] ss:$16 sm:%s5137_s15]   ;;  %v5222_v58 = vld [vmem:[#allocation1 + $0x207] ss:$16 sm:%s5221_s18]   ;;  %v5214_v8 = vsel %vm2062_vm2, %v5212_v31, %v5209_v60  ;;  %s5267_s6 = smov 3  ;;  %s5270_s13 = smov 12 }
 0x14a   :  { %v5143_v22 = vld [vmem:[#allocation1 + $0x38e] ss:$16 sm:%s5142_s7]   ;;  %v5140_v46 = vsel %vm2058_vm1, %v5138_v40, %v5135_v39  ;;  %v5225_v7 = vld [vmem:[#allocation1 + $0x207] ss:$16 sm:%s5224_s19]   ;;  %6512 = vrot.lane.b32.xlu0 %v6511_v59, %s6545_s17  ;;  %s5275_s14 = smov 48  ;;  %s5280_s0 = smov 192 }
 0x14b   :  { %v5145_v26 = vsel %vm2062_vm2, %v5143_v22, %v5140_v46  ;;  %v5230_v61 = vld [vmem:[#allocation1 + $0x207] ss:$16 sm:%s5229_s16]   ;;  %v5227_v12 = vsel %vm2054_vm0, %v5225_v7, %v5222_v58  ;;  %s5290_s8 = smov 3  ;;  %s5293_s3 = smov 12 }
 0x14c   :  { %v6506_v28 = vpack.i.bf16 %v5145_v26, %v5122_v34  ;;  %v5245_v14 = vld [vmem:[#allocation1 + $0x187] ss:$16 sm:%s5244_s9]   ;;  %v5232_v13 = vsel %vm2058_vm1, %v5230_v61, %v5227_v12  ;;  %s5298_s4 = smov 48  ;;  %s5303_s15 = smov 192 }
 0x14d   :  { %v5248_v45 = vld [vmem:[#allocation1 + $0x187] ss:$16 sm:%s5247_s26]   ;;  %s5313_s7 = smov 3  ;;  %s5316_s5 = smov 12 }
 0x14e   :  { %6507 = vrot.lane.b32.xlu1 %v6506_v28, %s6544_s28  ;;  %s5234_s28 = smov 192  ;;  %v5253_v34 = vld [vmem:[#allocation1 + $0x187] ss:$16 sm:%s5252_s27]   ;;  %v5250_v40 = vsel %vm2054_vm0, %v5248_v45, %v5245_v14  ;;  %s5321_s22 = smov 48 }
 0x14f   :  { %v5235_v10 = vld [vmem:[#allocation1 + $0x207] ss:$16 sm:%s5234_s28]   ;;  %v5255_v24 = vsel %vm2058_vm1, %v5253_v34, %v5250_v40  ;;  %s5326_s24 = smov 192  ;;  %s2050_s12 = smov 3  ;;  %v7667_v36 = vpop.permute.xlu0 %6382 }
 0x150   :  { %v5237_v39 = vsel %vm2062_vm2, %v5235_v10, %v5232_v13  ;;  %v5258_v22 = vld [vmem:[#allocation1 + $0x187] ss:$16 sm:%s5257_s20]   ;;  %v2051_v20 = vld [vmem:[#allocation1] ss:$16 sm:%s2050_s12]   ;;  %s2052_s30 = smov 12  ;;  %s2056_s10 = smov 48  ;;  %v6294_v13 = vunpack.i.l.bf16 %v7505_v62  ;;  %v6295_v62 = vunpack.i.h.bf16 %v7505_v62 }
 0x151   :  { %v5268_v41 = vld [vmem:[#allocation1 + $0x387] ss:$16 sm:%s5267_s6]   ;;  %v6516_v46 = vpack.i.bf16 %v5237_v39, %v5214_v8  ;;  %v5260_v26 = vsel %vm2062_vm2, %v5258_v22, %v5255_v24  ;;  %v2053_v31 = vld [vmem:[#allocation1] ss:$16 sm:%s2052_s30]   ;;  %s2060_s2 = smov 192  ;;  %s2130_s21 = smov 3 }
 0x152   :  { %v5271_v25 = vld [vmem:[#allocation1 + $0x387] ss:$16 sm:%s5270_s13]   ;;  %v2057_v58 = vld [vmem:[#allocation1] ss:$16 sm:%s2056_s10]   ;;  %v2055_v60 = vsel %vm2054_vm0, %v2053_v31, %v2051_v20  ;;  %s2133_s25 = smov 12  ;;  %s2138_s23 = smov 48 }
 0x153   :  { %v5276_v47 = vld [vmem:[#allocation1 + $0x387] ss:$16 sm:%s5275_s14]   ;;  %v5273_v27 = vsel %vm2054_vm0, %v5271_v25, %v5268_v41  ;;  %6517 = vrot.lane.b32.xlu1 %v6516_v46, %s6545_s17  ;;  %v2061_v7 = vld [vmem:[#allocation1] ss:$16 sm:%s2060_s2]   ;;  %v2059_v12 = vsel %vm2058_vm1, %v2057_v58, %v2055_v60  ;;  %s2143_s29 = smov 192  ;;  %s2109_s11 = smov 3  ;;  %v6334_v41 = vunpack.i.l.bf16 %v7577_v32  ;;  %v6335_v32 = vunpack.i.h.bf16 %v7577_v32 }
 0x154   :  { %v5281_v63 = vld [vmem:[#allocation1 + $0x387] ss:$16 sm:%s5280_s0]   ;;  %v5278_v28 = vsel %vm2058_vm1, %v5276_v47, %v5273_v27  ;;  %v2131_v61 = vld [vmem:[#allocation1 + $0x200] ss:$16 sm:%s2130_s21]   ;;  %v2063_v34 = vsel %vm2062_vm2, %v2061_v7, %v2059_v12  ;;  %s2112_s18 = smov 12  ;;  %s2117_s19 = smov 48  ;;  %v6374_v47 = vunpack.i.l.bf16 %v7649_v44  ;;  %v6375_v44 = vunpack.i.h.bf16 %v7649_v44 }
 0x155   :  { %v5291_v3 = vld [vmem:[#allocation1 + $0x107] ss:$16 sm:%s5290_s8]   ;;  %v5283_v35 = vsel %vm2062_vm2, %v5281_v63, %v5278_v28  ;;  %v2134_v10 = vld [vmem:[#allocation1 + $0x200] ss:$16 sm:%s2133_s25]   ;;  %2065 = vst.msk [vmem:[#allocation0] sm:$0xff] %vm2064_vm11, %v2063_v34   ;;  %s2122_s16 = smov 192  ;;  %v6304_v60 = vunpack.i.l.bf16 %v7523_v50  ;;  %v6305_v50 = vunpack.i.h.bf16 %v7523_v50  ;;  %v6384_v34 = vunpack.i.l.bf16 %v7667_v36 }
 0x156   :  { %v5294_v29 = vld [vmem:[#allocation1 + $0x107] ss:$16 sm:%s5293_s3]   ;;  %v6521_v0 = vpack.i.bf16 %v5283_v35, %v5260_v26  ;;  %v2139_v14 = vld [vmem:[#allocation1 + $0x200] ss:$16 sm:%s2138_s23]   ;;  %v2136_v39 = vsel %vm2054_vm0, %v2134_v10, %v2131_v61  ;;  %s2193_s28 = smov 3  ;;  %2625 = vst.msk [vmem:[#allocation0] sm:$0xff] %vm2624_vm12, %v6254_v55   ;;  %v6385_v36 = vunpack.i.h.bf16 %v7667_v36 }
 0x157   :  { %v5299_v30 = vld [vmem:[#allocation1 + $0x107] ss:$16 sm:%s5298_s4]   ;;  %v5296_v17 = vsel %vm2054_vm0, %v5294_v29, %v5291_v3  ;;  %v7677_v45 = vpop.permute.xlu1 %6387  ;;  %v2144_v40 = vld [vmem:[#allocation1 + $0x200] ss:$16 sm:%s2143_s29]   ;;  %v2141_v46 = vsel %vm2058_vm1, %v2139_v14, %v2136_v39  ;;  %s2196_s9 = smov 12  ;;  %s2201_s26 = smov 48 }
 0x158   :  { %v5304_v37 = vld [vmem:[#allocation1 + $0x107] ss:$16 sm:%s5303_s15]   ;;  %v5301_v1 = vsel %vm2058_vm1, %v5299_v30, %v5296_v17  ;;  %6522 = vrot.lane.b32.xlu0 %v6521_v0, %s6545_s17  ;;  %v2110_v22 = vld [vmem:[#allocation1 + $0x180] ss:$16 sm:%s2109_s11]   ;;  %v2146_v26 = vsel %vm2062_vm2, %v2144_v40, %v2141_v46  ;;  %s2206_s27 = smov 192  ;;  %3153 = vst.msk [vmem:[#allocation0] sm:$0xff] %vm3152_vm13, %v6294_v13   ;;  %v6299_v30 = vunpack.i.l.bf16 %v7514_v16  ;;  %v6300_v16 = vunpack.i.h.bf16 %v7514_v16 }
 0x159   :  { %v5314_v43 = vld [vmem:[#allocation1 + $0x307] ss:$16 sm:%s5313_s7]   ;;  %v5306_v53 = vsel %vm2062_vm2, %v5304_v37, %v5301_v1  ;;  %v2113_v24 = vld [vmem:[#allocation1 + $0x180] ss:$16 sm:%s2112_s18]   ;;  %2149 = vst.msk [vmem:[#allocation0 + $0x60] sm:$0xff] %vm2064_vm11, %v2146_v26   ;;  %s2091_s20 = smov 12  ;;  %v6339_v37 = vunpack.i.l.bf16 %v7586_v11  ;;  %v6340_v11 = vunpack.i.h.bf16 %v7586_v11 }
 0x15a   :  { %v5317_v19 = vld [vmem:[#allocation1 + $0x307] ss:$16 sm:%s5316_s5]   ;;  %v2118_v25 = vld [vmem:[#allocation1 + $0x180] ss:$16 sm:%s2117_s19]   ;;  %v2115_v55 = vsel %vm2054_vm0, %v2113_v24, %v2110_v22  ;;  %2671 = vst.msk [vmem:[#allocation0 + $0x60] sm:$0xff] %vm2624_vm12, %v6255_v23   ;;  %s2096_s6 = smov 48 }
 0x15b   :  { %v5322_v2 = vld [vmem:[#allocation1 + $0x307] ss:$16 sm:%s5321_s22]   ;;  %v5319_v56 = vsel %vm2054_vm0, %v5317_v19, %v5314_v43  ;;  %v2123_v27 = vld [vmem:[#allocation1 + $0x180] ss:$16 sm:%s2122_s16]   ;;  %v2120_v3 = vsel %vm2058_vm1, %v2118_v25, %v2115_v55  ;;  %3520 = vst.msk [vmem:[#allocation0] sm:$0xff] %vm3519_vm14, %v6334_v41   ;;  %v6393_v43 = vpop.permute.xlu0 %6392  ;;  %s2101_s13 = smov 192  ;;  %v6349_v55 = vunpack.i.l.bf16 %v7604_v4 }
 0x15c   :  { %v5327_v57 = vld [vmem:[#allocation1 + $0x307] ss:$16 sm:%s5326_s24]   ;;  %v5324_v6 = vsel %vm2058_vm1, %v5322_v2, %v5319_v56  ;;  %v2194_v63 = vld [vmem:[#allocation1 + $0x380] ss:$16 sm:%s2193_s28]   ;;  %v2125_v5 = vsel %vm2062_vm2, %v2123_v27, %v2120_v3  ;;  %s2172_s14 = smov 3  ;;  %3176 = vst.msk [vmem:[#allocation0 + $0x60] sm:$0xff] %vm3152_vm13, %v6295_v62   ;;  %v6379_v2 = vunpack.i.l.bf16 %v7658_v48  ;;  %v6394_v56 = vunpack.i.l.bf16 %v6393_v43  ;;  %v6398_v12 = vpop.permute.xlu1 %6397 }
 0x15d   :  { %v5329_v59 = vsel %vm2062_vm2, %v5327_v57, %v5324_v6  ;;  %v2197_v28 = vld [vmem:[#allocation1 + $0x380] ss:$16 sm:%s2196_s9]   ;;  %2128 = vst.msk [vmem:[#allocation0 + $0x48] sm:$0xff] %vm2064_vm11, %v2125_v5   ;;  %s2175_s0 = smov 12  ;;  %s2180_s8 = smov 48  ;;  %v6380_v48 = vunpack.i.h.bf16 %v7658_v48  ;;  %v6400_v39 = vunpack.i.h.bf16 %v6398_v12  ;;  %v6399_v40 = vunpack.i.l.bf16 %v6398_v12 }
 0x15e   :  { %v6526_v8 = vpack.i.bf16 %v5329_v59, %v5306_v53  ;;  %v2202_v29 = vld [vmem:[#allocation1 + $0x380] ss:$16 sm:%s2201_s26]   ;;  %v2199_v23 = vsel %vm2054_vm0, %v2197_v28, %v2194_v63  ;;  %3887 = vst.msk [vmem:[#allocation0] sm:$0xff] %vm3886_vm15, %v6374_v47   ;;  %v6395_v53 = vunpack.i.h.bf16 %v6393_v43  ;;  %s2185_s3 = smov 192  ;;  %s2067_s4 = smov 3  ;;  %v6309_v47 = vunpack.i.l.bf16 %v7532_v54 }
 0x15f   :  { %v2207_v35 = vld [vmem:[#allocation1 + $0x380] ss:$16 sm:%s2206_s27]   ;;  %v2204_v0 = vsel %vm2058_vm1, %v2202_v29, %v2199_v23  ;;  %2717 = vst.msk [vmem:[#allocation0 + $0x48] sm:$0xff] %vm2624_vm12, %v6259_v42   ;;  %s2070_s15 = smov 12  ;;  %s2075_s7 = smov 48  ;;  %v6310_v54 = vunpack.i.h.bf16 %v7532_v54  ;;  %v6403_v27 = vpop.permute.xlu0 %6402 }
 0x160   :  { %6527 = vrot.lane.b32.xlu1 %v6526_v8, %s6545_s17  ;;  %s2088_s17 = smov 3  ;;  %v2092_v1 = vld [vmem:[#allocation1 + $0x100] ss:$16 sm:%s2091_s20]   ;;  %v2209_v57 = vsel %vm2062_vm2, %v2207_v35, %v2204_v0  ;;  %3543 = vst.msk [vmem:[#allocation0 + $0x60] sm:$0xff] %vm3519_vm14, %v6335_v32   ;;  %v6344_v8 = vunpack.i.l.bf16 %v7595_v51  ;;  %s2080_s5 = smov 192  ;;  %v6345_v51 = vunpack.i.h.bf16 %v7595_v51  ;;  %v6389_v32 = vunpack.i.l.bf16 %v7677_v45 }
 0x161   :  { %v2089_v17 = vld [vmem:[#allocation1 + $0x100] ss:$16 sm:%s2088_s17]   ;;  %2212 = vst.msk [vmem:[#allocation0 + $0xa8] sm:$0xff] %vm2064_vm11, %v2209_v57   ;;  %s2151_s22 = smov 3  ;;  %s2154_s24 = smov 12  ;;  %v6405_v3 = vunpack.i.h.bf16 %v6403_v27  ;;  %v6404_v28 = vunpack.i.l.bf16 %v6403_v27 }
 0x162   :  { %v2097_v19 = vld [vmem:[#allocation1 + $0x100] ss:$16 sm:%s2096_s6]   ;;  %v2094_v42 = vsel %vm2054_vm0, %v2092_v1, %v2089_v17  ;;  %3199 = vst.msk [vmem:[#allocation0 + $0x48] sm:$0xff] %vm3152_vm13, %v6299_v30   ;;  %s2159_s12 = smov 48  ;;  %s2164_s30 = smov 192 }
 0x163   :  { %v2102_v20 = vld [vmem:[#allocation1 + $0x100] ss:$16 sm:%s2101_s13]   ;;  %v2099_v31 = vsel %vm2058_vm1, %v2097_v19, %v2094_v42  ;;  %3910 = vst.msk [vmem:[#allocation0 + $0x60] sm:$0xff] %vm3886_vm15, %v6375_v44   ;;  %v6408_v49 = vpop.permute.xlu1 %6407  ;;  %v6413_v30 = vpop.permute.xlu0 %6412 }
 0x164   :  { %v2173_v6 = vld [vmem:[#allocation1 + $0x300] ss:$16 sm:%s2172_s14]   ;;  %4071 = vst.msk [vmem:[#allocation0 + $0x20] sm:$0xff] %vm4069_vm3, %v6394_v56   ;;  %4094 = vst.msk [vmem:[#allocation0 + $0x80] sm:$0xff] %vm4069_vm3, %v6395_v53   ;;  %v2104_v15 = vsel %vm2062_vm2, %v2102_v20, %v2099_v31  ;;  %v6415_v44 = vunpack.i.h.bf16 %v6413_v30  ;;  %v6414_v5 = vunpack.i.l.bf16 %v6413_v30 }
 0x165   :  { %v2176_v58 = vld [vmem:[#allocation1 + $0x300] ss:$16 sm:%s2175_s0]   ;;  %2763 = vst.msk [vmem:[#allocation0 + $0xa8] sm:$0xff] %vm2624_vm12, %v6260_v38  }
 0x166   :  { %v2181_v59 = vld [vmem:[#allocation1 + $0x300] ss:$16 sm:%s2180_s8]   ;;  %v2178_v38 = vsel %vm2054_vm0, %v2176_v58, %v2173_v6  ;;  %3566 = vst.msk [vmem:[#allocation0 + $0x48] sm:$0xff] %vm3519_vm14, %v6339_v37  }
 0x167   :  { %v2186_v7 = vld [vmem:[#allocation1 + $0x300] ss:$16 sm:%s2185_s3]   ;;  %2107 = vst.msk [vmem:[#allocation0 + $0x30] sm:$0xff] %vm2064_vm11, %v2104_v15   ;;  %v2183_v10 = vsel %vm2058_vm1, %v2181_v59, %v2178_v38  ;;  %v6418_v23 = vpop.permute.xlu1 %6417 }
 0x168   :  { %v2068_v61 = vld [vmem:[#allocation1 + $0x80] ss:$16 sm:%s2067_s4]   ;;  %3222 = vst.msk [vmem:[#allocation0 + $0xa8] sm:$0xff] %vm3152_vm13, %v6300_v16   ;;  %v2188_v22 = vsel %vm2062_vm2, %v2186_v7, %v2183_v10  ;;  %v6420_v35 = vunpack.i.h.bf16 %v6418_v23  ;;  %v6419_v17 = vunpack.i.l.bf16 %v6418_v23 }
 0x169   :  { %v2071_v14 = vld [vmem:[#allocation1 + $0x80] ss:$16 sm:%s2070_s15]   ;;  %3933 = vst.msk [vmem:[#allocation0 + $0x48] sm:$0xff] %vm3886_vm15, %v6379_v2  }
 0x16a   :  { %v2076_v13 = vld [vmem:[#allocation1 + $0x80] ss:$16 sm:%s2075_s7]   ;;  %2809 = vst.msk [vmem:[#allocation0 + $0x30] sm:$0xff] %vm2624_vm12, %v6264_v21   ;;  %v2073_v21 = vsel %vm2054_vm0, %v2071_v14, %v2068_v61 }
 0x16b   :  { %v2081_v41 = vld [vmem:[#allocation1 + $0x80] ss:$16 sm:%s2080_s5]   ;;  %3589 = vst.msk [vmem:[#allocation0 + $0xa8] sm:$0xff] %vm3519_vm14, %v6340_v11   ;;  %v2078_v24 = vsel %vm2058_vm1, %v2076_v13, %v2073_v21 }
 0x16c   :  { %v2152_v46 = vld [vmem:[#allocation1 + $0x280] ss:$16 sm:%s2151_s22]   ;;  %2191 = vst.msk [vmem:[#allocation0 + $0x90] sm:$0xff] %vm2064_vm11, %v2188_v22   ;;  %v2083_v9 = vsel %vm2062_vm2, %v2081_v41, %v2078_v24 }
 0x16d   :  { %v2155_v25 = vld [vmem:[#allocation1 + $0x280] ss:$16 sm:%s2154_s24]   ;;  %3245 = vst.msk [vmem:[#allocation0 + $0x30] sm:$0xff] %vm3152_vm13, %v6304_v60  }
 0x16e   :  { %v2160_v62 = vld [vmem:[#allocation1 + $0x280] ss:$16 sm:%s2159_s12]   ;;  %3956 = vst.msk [vmem:[#allocation0 + $0xa8] sm:$0xff] %vm3886_vm15, %v6380_v48  }
 0x16f   :  { %4117 = vst.msk [vmem:[#allocation0 + $0x8] sm:$0xff] %vm4069_vm3, %v6399_v40   ;;  %4140 = vst.msk [vmem:[#allocation0 + $0x68] sm:$0xff] %vm4069_vm3, %v6400_v39   ;;  %v2165_v26 = vld [vmem:[#allocation1 + $0x280] ss:$16 sm:%s2164_s30]   ;;  %v6423_v16 = vpop.permute.xlu0 %6422 }
 0x170   :  { %2855 = vst.msk [vmem:[#allocation0 + $0x90] sm:$0xff] %vm2624_vm12, %v6265_v33   ;;  %v2157_v33 = vsel %vm2054_vm0, %v2155_v25, %v2152_v46  ;;  %vm4253_vm0 = vcmask 466224   ;;  %v6425_v37 = vunpack.i.h.bf16 %v6423_v16  ;;  %v6424_v43 = vunpack.i.l.bf16 %v6423_v16 }
 0x171   :  { %3612 = vst.msk [vmem:[#allocation0 + $0x30] sm:$0xff] %vm3519_vm14, %v6344_v8   ;;  %v2162_v63 = vsel %vm2058_vm1, %v2160_v62, %v2157_v33  ;;  %vm4436_vm1 = vcmask 392424  }
 0x172   :  { %2086 = vst.msk [vmem:[#allocation0 + $0x18] sm:$0xff] %vm2064_vm11, %v2083_v9   ;;  %v2167_v29 = vsel %vm2062_vm2, %v2165_v26, %v2162_v63  ;;  %vm4620_vm2 = vcmask 351424  }
 0x173   :  { %3268 = vst.msk [vmem:[#allocation0 + $0x90] sm:$0xff] %vm3152_vm13, %v6305_v50   ;;  %v6433_v2 = vpop.permute.xlu0 %6432 }
 0x174   :  { %3979 = vst.msk [vmem:[#allocation0 + $0x30] sm:$0xff] %vm3886_vm15, %v6384_v34   ;;  %v6435_v53 = vunpack.i.h.bf16 %v6433_v2  ;;  %v6434_v56 = vunpack.i.l.bf16 %v6433_v2 }
 0x175   :  { %2901 = vst.msk [vmem:[#allocation0 + $0x18] sm:$0xff] %vm2624_vm12, %v6274_v18   ;;  %v6350_v18 = vunpack.i.h.bf16 %v7604_v4  ;;  %v6390_v4 = vunpack.i.h.bf16 %v7677_v45  ;;  %v6409_v45 = vunpack.i.l.bf16 %v6408_v49 }
 0x176   :  { %3635 = vst.msk [vmem:[#allocation0 + $0x90] sm:$0xff] %vm3519_vm14, %v6345_v51  }
 0x177   :  { %2170 = vst.msk [vmem:[#allocation0 + $0x78] sm:$0xff] %vm2064_vm11, %v2167_v29   ;;  %v6428_v0 = vpop.permute.xlu1 %6427 }
 0x178   :  { %3291 = vst.msk [vmem:[#allocation0 + $0x18] sm:$0xff] %vm3152_vm13, %v6309_v47   ;;  %v6430_v1 = vunpack.i.h.bf16 %v6428_v0  ;;  %v6429_v19 = vunpack.i.l.bf16 %v6428_v0 }
 0x179   :  { %4002 = vst.msk [vmem:[#allocation0 + $0x90] sm:$0xff] %vm3886_vm15, %v6385_v36  }
 0x17a   :  { %4163 = vst.msk [vmem:[#allocation0 + $0x50] sm:$0xff] %vm4069_vm3, %v6404_v28   ;;  %4186 = vst.msk [vmem:[#allocation0 + $0xb0] sm:$0xff] %vm4069_vm3, %v6405_v3  }
 0x17b   :  { %2947 = vst.msk [vmem:[#allocation0 + $0x78] sm:$0xff] %vm2624_vm12, %v6275_v52   ;;  %v6410_v52 = vunpack.i.h.bf16 %v6408_v49 }
 0x17c   :  { %3658 = vst.msk [vmem:[#allocation0 + $0x18] sm:$0xff] %vm3519_vm14, %v6349_v55   ;;  %v6438_v57 = vpop.permute.xlu1 %6437 }
 0x17d   :  { %3314 = vst.msk [vmem:[#allocation0 + $0x78] sm:$0xff] %vm3152_vm13, %v6310_v54   ;;  %v6440_v42 = vunpack.i.h.bf16 %v6438_v57  ;;  %v6439_v20 = vunpack.i.l.bf16 %v6438_v57 }
 0x17e   :  { %4025 = vst.msk [vmem:[#allocation0 + $0x18] sm:$0xff] %vm3886_vm15, %v6389_v32  }
 0x17f   :  { %3681 = vst.msk [vmem:[#allocation0 + $0x78] sm:$0xff] %vm3519_vm14, %v6350_v18  }
 0x180   :  { %4048 = vst.msk [vmem:[#allocation0 + $0x78] sm:$0xff] %vm3886_vm15, %v6390_v4  }
 0x181   :  { %4209 = vst.msk [vmem:[#allocation0 + $0x38] sm:$0xff] %vm4069_vm3, %v6409_v45   ;;  %4232 = vst.msk [vmem:[#allocation0 + $0x98] sm:$0xff] %vm4069_vm3, %v6410_v52   ;;  %v6443_v6 = vpop.permute.xlu0 %6442 }
 0x182   :  { %4254 = vst.msk [vmem:[#allocation0] sm:$0xff] %vm4253_vm0, %v6414_v5   ;;  %4277 = vst.msk [vmem:[#allocation0 + $0x60] sm:$0xff] %vm4253_vm0, %v6415_v44   ;;  %v6445_v11 = vunpack.i.h.bf16 %v6443_v6  ;;  %v6444_v31 = vunpack.i.l.bf16 %v6443_v6 }
 0x183   :  { %4300 = vst.msk [vmem:[#allocation0 + $0x48] sm:$0xff] %vm4253_vm0, %v6419_v17   ;;  %4323 = vst.msk [vmem:[#allocation0 + $0xa8] sm:$0xff] %vm4253_vm0, %v6420_v35  }
 0x184   :  { %4346 = vst.msk [vmem:[#allocation0 + $0x30] sm:$0xff] %vm4253_vm0, %v6424_v43   ;;  %4369 = vst.msk [vmem:[#allocation0 + $0x90] sm:$0xff] %vm4253_vm0, %v6425_v37  }
 0x185   :  { %4392 = vst.msk [vmem:[#allocation0 + $0x18] sm:$0xff] %vm4253_vm0, %v6429_v19   ;;  %4415 = vst.msk [vmem:[#allocation0 + $0x78] sm:$0xff] %vm4253_vm0, %v6430_v1   ;;  %v6453_v48 = vpop.permute.xlu0 %6452 }
 0x186   :  { %4438 = vst.msk [vmem:[#allocation0 + $0x40] sm:$0xff] %vm4436_vm1, %v6434_v56   ;;  %4461 = vst.msk [vmem:[#allocation0 + $0xa0] sm:$0xff] %vm4436_vm1, %v6435_v53   ;;  %v6455_v15 = vunpack.i.h.bf16 %v6453_v48  ;;  %v6454_v38 = vunpack.i.l.bf16 %v6453_v48 }
 0x187   :  { %4484 = vst.msk [vmem:[#allocation0 + $0x28] sm:$0xff] %vm4436_vm1, %v6439_v20   ;;  %4507 = vst.msk [vmem:[#allocation0 + $0x88] sm:$0xff] %vm4436_vm1, %v6440_v42  }
 0x188   :  { %4530 = vst.msk [vmem:[#allocation0 + $0x10] sm:$0xff] %vm4436_vm1, %v6444_v31   ;;  %4553 = vst.msk [vmem:[#allocation0 + $0x70] sm:$0xff] %vm4436_vm1, %v6445_v11  }
 0x189   :  { %v6448_v58 = vpop.permute.xlu1 %6447  ;;  %4622 = vst.msk [vmem:[#allocation0 + $0x20] sm:$0xff] %vm4620_vm2, %v6454_v38   ;;  %4645 = vst.msk [vmem:[#allocation0 + $0x80] sm:$0xff] %vm4620_vm2, %v6455_v15  }
 0x18a   :  { %v6450_v59 = vunpack.i.h.bf16 %v6448_v58  ;;  %v6449_v60 = vunpack.i.l.bf16 %v6448_v58 }
 0x18c   :  { %4576 = vst.msk [vmem:[#allocation0 + $0x58] sm:$0xff] %vm4436_vm1, %v6449_v60   ;;  %4599 = vst.msk [vmem:[#allocation0 + $0xb8] sm:$0xff] %vm4436_vm1, %v6450_v59  }
 0x18d   :  { %v6458_v7 = vpop.permute.xlu1 %6457 }
 0x18e   :  { %v6460_v61 = vunpack.i.h.bf16 %v6458_v7  ;;  %v6459_v50 = vunpack.i.l.bf16 %v6458_v7 }
 0x190   :  { %4668 = vst.msk [vmem:[#allocation0 + $0x8] sm:$0xff] %vm4620_vm2, %v6459_v50   ;;  %4691 = vst.msk [vmem:[#allocation0 + $0x68] sm:$0xff] %vm4620_vm2, %v6460_v61  }
 0x195   :  { %v6463_v8 = vpop.permute.xlu0 %6462 }
 0x196   :  { %v6465_v12 = vunpack.i.h.bf16 %v6463_v8  ;;  %v6464_v10 = vunpack.i.l.bf16 %v6463_v8 }
 0x198   :  { %4714 = vst.msk [vmem:[#allocation0 + $0x50] sm:$0xff] %vm4620_vm2, %v6464_v10   ;;  %4737 = vst.msk [vmem:[#allocation0 + $0xb0] sm:$0xff] %vm4620_vm2, %v6465_v12  }
 0x199   :  { %v6473_v39 = vpop.permute.xlu0 %6472 }
 0x19a   :  { %v6475_v40 = vunpack.i.h.bf16 %v6473_v39  ;;  %v6474_v22 = vunpack.i.l.bf16 %v6473_v39 }
 0x19c   :  { %4805 = vst.msk [vmem:[#allocation0] sm:$0xff] %vm4804_vm4, %v6474_v22   ;;  %4828 = vst.msk [vmem:[#allocation0 + $0x60] sm:$0xff] %vm4804_vm4, %v6475_v40  }
 0x19d   :  { %v6468_v14 = vpop.permute.xlu1 %6467 }
 0x19e   :  { %v6470_v13 = vunpack.i.h.bf16 %v6468_v14  ;;  %v6469_v34 = vunpack.i.l.bf16 %v6468_v14 }
 0x1a0   :  { %4760 = vst.msk [vmem:[#allocation0 + $0x38] sm:$0xff] %vm4620_vm2, %v6469_v34   ;;  %4783 = vst.msk [vmem:[#allocation0 + $0x98] sm:$0xff] %vm4620_vm2, %v6470_v13  }
 0x1a2   :  { %v6478_v21 = vpop.permute.xlu1 %6477 }
 0x1a3   :  { %v6480_v41 = vunpack.i.h.bf16 %v6478_v21  ;;  %v6479_v46 = vunpack.i.l.bf16 %v6478_v21  ;;  %v5340_v48 = vld [vmem:[#allocation0] sm:$0xff] }
 0x1a4   :  { %v5433_v7 = vld [vmem:[#allocation0 + $0x60] sm:$0xff] }
 0x1a5   :  { %4851 = vst.msk [vmem:[#allocation0 + $0x48] sm:$0xff] %vm4804_vm4, %v6479_v46   ;;  %4874 = vst.msk [vmem:[#allocation0 + $0xa8] sm:$0xff] %vm4804_vm4, %v6480_v41   ;;  %v6483_v51 = vpop.permute.xlu0 %6482 }
 0x1a6   :  { %v6485_v24 = vunpack.i.h.bf16 %v6483_v51  ;;  %v6484_v25 = vunpack.i.l.bf16 %v6483_v51 }
 0x1a8   :  { %4897 = vst.msk [vmem:[#allocation0 + $0x30] sm:$0xff] %vm4804_vm4, %v6484_v25   ;;  %4920 = vst.msk [vmem:[#allocation0 + $0x90] sm:$0xff] %vm4804_vm4, %v6485_v24  }
 0x1a9   :  { %v6493_v9 = vpop.permute.xlu0 %6492 }
 0x1aa   :  { %v6495_v33 = vunpack.i.h.bf16 %v6493_v9  ;;  %v6494_v26 = vunpack.i.l.bf16 %v6493_v9 }
 0x1ac   :  { %4989 = vst.msk [vmem:[#allocation0 + $0x40] sm:$0xff] %vm4987_vm5, %v6494_v26   ;;  %5012 = vst.msk [vmem:[#allocation0 + $0xa0] sm:$0xff] %vm4987_vm5, %v6495_v33   ;;  %v5409_v32 = vld [vmem:[#allocation0 + $0x48] sm:$0xff] }
 0x1ad   :  { %v6488_v62 = vpop.permute.xlu1 %6487  ;;  %v5505_v29 = vld [vmem:[#allocation0 + $0xa8] sm:$0xff] }
 0x1ae   :  { %v6490_v47 = vunpack.i.h.bf16 %v6488_v62  ;;  %v6489_v36 = vunpack.i.l.bf16 %v6488_v62 }
 0x1af   :  { %v5385_v22 = vld [vmem:[#allocation0 + $0x30] sm:$0xff] }
 0x1b0   :  { %4943 = vst.msk [vmem:[#allocation0 + $0x18] sm:$0xff] %vm4804_vm4, %v6489_v36   ;;  %4966 = vst.msk [vmem:[#allocation0 + $0x78] sm:$0xff] %vm4804_vm4, %v6490_v47   ;;  %v5481_v21 = vld [vmem:[#allocation0 + $0x90] sm:$0xff] }
 0x1b1   :  { %v6498_v54 = vpop.permute.xlu1 %6497 }
 0x1b2   :  { %v6500_v55 = vunpack.i.h.bf16 %v6498_v54  ;;  %v6499_v27 = vunpack.i.l.bf16 %v6498_v54 }
 0x1b3   :  { %v5401_v18 = vld [vmem:[#allocation0 + $0x40] sm:$0xff] }
 0x1b4   :  { %5035 = vst.msk [vmem:[#allocation0 + $0x28] sm:$0xff] %vm4987_vm5, %v6499_v27   ;;  %5058 = vst.msk [vmem:[#allocation0 + $0x88] sm:$0xff] %vm4987_vm5, %v6500_v55   ;;  %v5497_v4 = vld [vmem:[#allocation0 + $0xa0] sm:$0xff]  ;;  %v6105_v49 = vpack.c.bf16 %v5409_v32, %v5401_v18 }
 0x1b5   :  { %v6135_v52 = vpack.c.bf16 %v5505_v29, %v5497_v4 }
 0x1b6   :  { %6208 = vst [vmem:[%s7874_s1 + $0x20] sm:$0xff] %v6105_v49  }
 0x1b7   :  { %6214 = vst [vmem:[%s7874_s1 + $0x50] sm:$0xff] %v6135_v52   ;;  %v5361_v5 = vld [vmem:[#allocation0 + $0x18] sm:$0xff] }
 0x1b8   :  { %v6503_v63 = vpop.permute.xlu0 %6502  ;;  %v5457_v35 = vld [vmem:[#allocation0 + $0x78] sm:$0xff] }
 0x1b9   :  { %v6505_v3 = vunpack.i.h.bf16 %v6503_v63  ;;  %v6504_v28 = vunpack.i.l.bf16 %v6503_v63 }
 0x1bb   :  { %5081 = vst.msk [vmem:[#allocation0 + $0x10] sm:$0xff] %vm4987_vm5, %v6504_v28   ;;  %5104 = vst.msk [vmem:[#allocation0 + $0x70] sm:$0xff] %vm4987_vm5, %v6505_v3   ;;  %v5377_v57 = vld [vmem:[#allocation0 + $0x28] sm:$0xff] }
 0x1bc   :  { %v6513_v23 = vpop.permute.xlu0 %6512  ;;  %v5473_v6 = vld [vmem:[#allocation0 + $0x88] sm:$0xff] }
 0x1bd   :  { %v6515_v37 = vunpack.i.h.bf16 %v6513_v23  ;;  %v6514_v43 = vunpack.i.l.bf16 %v6513_v23 }
 0x1bf   :  { %5173 = vst.msk [vmem:[#allocation0 + $0x20] sm:$0xff] %vm5171_vm6, %v6514_v43   ;;  %5196 = vst.msk [vmem:[#allocation0 + $0x80] sm:$0xff] %vm5171_vm6, %v6515_v37  }
 0x1c0   :  { %v6508_v45 = vpop.permute.xlu1 %6507 }
 0x1c1   :  { %v6510_v30 = vunpack.i.h.bf16 %v6508_v45  ;;  %v6509_v44 = vunpack.i.l.bf16 %v6508_v45 }
 0x1c2   :  { %v5353_v17 = vld [vmem:[#allocation0 + $0x10] sm:$0xff] }
 0x1c3   :  { %5127 = vst.msk [vmem:[#allocation0 + $0x58] sm:$0xff] %vm4987_vm5, %v6509_v44   ;;  %5150 = vst.msk [vmem:[#allocation0 + $0xb8] sm:$0xff] %vm4987_vm5, %v6510_v30   ;;  %v5449_v16 = vld [vmem:[#allocation0 + $0x70] sm:$0xff]  ;;  %v6090_v1 = vpack.c.bf16 %v5361_v5, %v5353_v17 }
 0x1c4   :  { %v6120_v0 = vpack.c.bf16 %v5457_v35, %v5449_v16 }
 0x1c5   :  { %6205 = vst [vmem:[%s7874_s1 + $0x8] sm:$0xff] %v6090_v1   ;;  %v6518_v19 = vpop.permute.xlu1 %6517 }
 0x1c6   :  { %6211 = vst [vmem:[%s7874_s1 + $0x38] sm:$0xff] %v6120_v0   ;;  %v6520_v2 = vunpack.i.h.bf16 %v6518_v19  ;;  %v6519_v53 = vunpack.i.l.bf16 %v6518_v19  ;;  %v5369_v11 = vld [vmem:[#allocation0 + $0x20] sm:$0xff] }
 0x1c7   :  { %v5465_v31 = vld [vmem:[#allocation0 + $0x80] sm:$0xff]  ;;  %v6095_v59 = vpack.c.bf16 %v5377_v57, %v5369_v11 }
 0x1c8   :  { %5219 = vst.msk [vmem:[#allocation0 + $0x8] sm:$0xff] %vm5171_vm6, %v6519_v53   ;;  %5242 = vst.msk [vmem:[#allocation0 + $0x68] sm:$0xff] %vm5171_vm6, %v6520_v2   ;;  %v6125_v58 = vpack.c.bf16 %v5473_v6, %v5465_v31 }
 0x1c9   :  { %6206 = vst [vmem:[%s7874_s1 + $0x10] sm:$0xff] %v6095_v59  }
 0x1ca   :  { %v6523_v56 = vpop.permute.xlu0 %6522  ;;  %6212 = vst [vmem:[%s7874_s1 + $0x40] sm:$0xff] %v6125_v58   ;;  %v5425_v10 = vld [vmem:[#allocation0 + $0x58] sm:$0xff] }
 0x1cb   :  { %v6525_v42 = vunpack.i.h.bf16 %v6523_v56  ;;  %v6524_v20 = vunpack.i.l.bf16 %v6523_v56  ;;  %v5521_v14 = vld [vmem:[#allocation0 + $0xb8] sm:$0xff] }
 0x1cd   :  { %5265 = vst.msk [vmem:[#allocation0 + $0x50] sm:$0xff] %vm5171_vm6, %v6524_v20   ;;  %5288 = vst.msk [vmem:[#allocation0 + $0xb0] sm:$0xff] %vm5171_vm6, %v6525_v42  }
 0x1cf   :  { %v5346_v61 = vld [vmem:[#allocation0 + $0x8] sm:$0xff] }
 0x1d0   :  { %v5441_v50 = vld [vmem:[#allocation0 + $0x68] sm:$0xff]  ;;  %v6085_v8 = vpack.c.bf16 %v5346_v61, %v5340_v48 }
 0x1d1   :  { %v6115_v12 = vpack.c.bf16 %v5441_v50, %v5433_v7 }
 0x1d2   :  { %v6528_v60 = vpop.permute.xlu1 %6527  ;;  %6086 = vst [vmem:[%s7874_s1] sm:$0xff] %v6085_v8  }
 0x1d3   :  { %v6530_v15 = vunpack.i.h.bf16 %v6528_v60  ;;  %v6529_v38 = vunpack.i.l.bf16 %v6528_v60  ;;  %6210 = vst [vmem:[%s7874_s1 + $0x30] sm:$0xff] %v6115_v12  }
 0x1d4   :  { %v5417_v13 = vld [vmem:[#allocation0 + $0x50] sm:$0xff] }
 0x1d5   :  { %5311 = vst.msk [vmem:[#allocation0 + $0x38] sm:$0xff] %vm5171_vm6, %v6529_v38   ;;  %5334 = vst.msk [vmem:[#allocation0 + $0x98] sm:$0xff] %vm5171_vm6, %v6530_v15   ;;  %v5513_v34 = vld [vmem:[#allocation0 + $0xb0] sm:$0xff]  ;;  %v6110_v39 = vpack.c.bf16 %v5425_v10, %v5417_v13 }
 0x1d6   :  { %v6140_v40 = vpack.c.bf16 %v5521_v14, %v5513_v34 }
 0x1d7   :  { %6209 = vst [vmem:[%s7874_s1 + $0x28] sm:$0xff] %v6110_v39  }
 0x1d8   :  { %6215 = vst [vmem:[%s7874_s1 + $0x58] sm:$0xff] %v6140_v40  }
 0x1dc   :  { %v5393_v41 = vld [vmem:[#allocation0 + $0x38] sm:$0xff] }
 0x1dd   :  { %v5489_v46 = vld [vmem:[#allocation0 + $0x98] sm:$0xff]  ;;  %v6100_v51 = vpack.c.bf16 %v5393_v41, %v5385_v22 }
 0x1de   :  { %v6130_v24 = vpack.c.bf16 %v5489_v46, %v5481_v21 }
 0x1df   :  { %6207 = vst [vmem:[%s7874_s1 + $0x18] sm:$0xff] %v6100_v51  }
 0x1e0   :  { %6213 = vst [vmem:[%s7874_s1 + $0x48] sm:$0xff] %v6130_v24  }

// kernel: tile.113
= control target key start
LH: loop header
LB: loop body
LE: loop exit
PB: predicated region body
PF: predicated region fallthrough
CT: control target
= control target key end

     0   :  { %s28_s0 = inlined_call_operand.vmem [shape: f32[8], index: 0, kind: input, shape index: {}]   ;;  %s29_s1 = inlined_call_operand.vmem [shape: f32[16,8], index: 1, kind: output, shape index: {}]  }
   0x1   :  { %v4_v0 = vld [vmem:[%s28_s0] ss:$0 sm:$0xff] }
   0x2   :  { %5 = vst [vmem:[%s29_s1] sm:$0xff] %v4_v0  ;;  %8 = vst [vmem:[%s29_s1 + $0x8] sm:$0xff] %v4_v0 }

// kernel: tile.126
= control target key start
LH: loop header
LB: loop body
LE: loop exit
PB: predicated region body
PF: predicated region fallthrough
CT: control target
= control target key end

     0   :  { %s133_s10 = smov 120   ;;  %s134_s11 = smov 104   ;;  %vm3_vm0 = vcmask 64512   ;;  %vm9_vm1 = vcmask 1048512   ;;  %vm15_vm2 = vcmask 982912   ;;  %vm21_vm3 = vcmask 917312   ;;  %s209_s0 = inlined_call_operand.vmem [shape: f32[16,8], index: 0, kind: input, shape index: {}]   ;;  %s210_s1 = inlined_call_operand.vmem [shape: f32[1,128], index: 1, kind: output, shape index: {}]  }
   0x1   :  { %v103_v0 = vld [vmem:[%s209_s0 + $0xf] sm:$0x1]   ;;  %v105_v1 = vld [vmem:[%s209_s0 + $0xd] sm:$0x1]   ;;  %v104_v2 = vld [vmem:[%s209_s0 + $0xe] sm:$0x1]  }
   0x2   :  { %7 = vrot.lane.b32.xlu0 %v103_v0, %s133_s10  ;;  %19 = vrot.lane.b32.xlu1 %v105_v1, %s134_s11  ;;  %v106_v3 = vld [vmem:[%s209_s0 + $0xc] sm:$0x1]   ;;  %s135_s16 = smov 112   ;;  %s136_s17 = smov 96   ;;  %v107_v4 = vld [vmem:[%s209_s0 + $0xb] sm:$0x1]  }
   0x3   :  { %v108_v5 = vld [vmem:[%s209_s0 + $0xa] sm:$0x1]   ;;  %v2_v6 = vld [vmem:[%s209_s0] sm:$0x1]   ;;  %s137_s24 = smov 88   ;;  %s138_s25 = smov 80  }
   0x4   :  { %4 = vst.msk [vmem:[#allocation0] sm:$0x1] %vm3_vm0, %v2_v6   ;;  %v109_v7 = vld [vmem:[%s209_s0 + $0x9] sm:$0x1]   ;;  %v110_v8 = vld [vmem:[%s209_s0 + $0x8] sm:$0x1]  }
   0x5   :  { %s139_s30 = smov 72   ;;  %s140_s2 = smov 64   ;;  %v111_v9 = vld [vmem:[%s209_s0 + $0x7] sm:$0x1]   ;;  %v112_v10 = vld [vmem:[%s209_s0 + $0x6] sm:$0x1]  }
   0x6   :  { %13 = vrot.lane.b32.xlu0 %v104_v2, %s135_s16  ;;  %25 = vrot.lane.b32.xlu1 %v106_v3, %s136_s17  ;;  %s141_s7 = smov 56   ;;  %s142_s8 = smov 48   ;;  %v113_v11 = vld [vmem:[%s209_s0 + $0x5] sm:$0x1]   ;;  %v114_v12 = vld [vmem:[%s209_s0 + $0x4] sm:$0x1]  }
   0x7   :  { %s143_s13 = smov 40   ;;  %s144_s14 = smov 32   ;;  %v115_v13 = vld [vmem:[%s209_s0 + $0x3] sm:$0x1]   ;;  %v116_v14 = vld [vmem:[%s209_s0 + $0x2] sm:$0x1]  }
   0x8   :  { %s145_s19 = smov 24   ;;  %s146_s20 = smov 16   ;;  %v117_v15 = vld [vmem:[%s209_s0 + $0x1] sm:$0x1]   ;;  %vm27_vm4 = vcmask 851712   ;;  %vm33_vm5 = vcmask 786112  }
   0x9   :  { %s147_s0 = smov 8   ;;  %vm39_vm6 = vcmask 720512   ;;  %vm45_vm7 = vcmask 654912   ;;  %vm51_vm8 = vcmask 589312   ;;  %vm57_vm9 = vcmask 523712  }
   0xa   :  { %31 = vrot.lane.b32.xlu0 %v107_v4, %s137_s24  ;;  %37 = vrot.lane.b32.xlu1 %v108_v5, %s138_s25  ;;  %vm63_vm10 = vcmask 458112   ;;  %vm69_vm11 = vcmask 392512   ;;  %vm75_vm12 = vcmask 326912   ;;  %vm81_vm13 = vcmask 261312  }
   0xb   :  { %vm87_vm14 = vcmask 195712   ;;  %vm93_vm15 = vcmask 130112  }
   0xe   :  { %43 = vrot.lane.b32.xlu0 %v109_v7, %s139_s30  ;;  %49 = vrot.lane.b32.xlu1 %v110_v8, %s140_s2 }
  0x12   :  { %55 = vrot.lane.b32.xlu0 %v111_v9, %s141_s7  ;;  %61 = vrot.lane.b32.xlu1 %v112_v10, %s142_s8 }
  0x16   :  { %67 = vrot.lane.b32.xlu0 %v113_v11, %s143_s13  ;;  %73 = vrot.lane.b32.xlu1 %v114_v12, %s144_s14 }
  0x1a   :  { %79 = vrot.lane.b32.xlu0 %v115_v13, %s145_s19  ;;  %85 = vrot.lane.b32.xlu1 %v116_v14, %s146_s20 }
  0x1e   :  { %91 = vrot.lane.b32.xlu0 %v117_v15, %s147_s0 }
  0x74   :  { %v8_v16 = vpop.permute.xlu0 %7   ;;  %v20_v17 = vpop.permute.xlu1 %19  }
  0x75   :  { %10 = vst.msk [vmem:[#allocation0] sm:$0x1] %vm9_vm1, %v8_v16  }
  0x78   :  { %v14_v18 = vpop.permute.xlu0 %13   ;;  %v26_v19 = vpop.permute.xlu1 %25  }
  0x79   :  { %16 = vst.msk [vmem:[#allocation0] sm:$0x1] %vm15_vm2, %v14_v18  }
  0x7a   :  { %22 = vst.msk [vmem:[#allocation0] sm:$0x1] %vm21_vm3, %v20_v17  }
  0x7b   :  { %28 = vst.msk [vmem:[#allocation0] sm:$0x1] %vm27_vm4, %v26_v19  }
  0x7c   :  { %v32_v20 = vpop.permute.xlu0 %31   ;;  %v38_v21 = vpop.permute.xlu1 %37  }
  0x7d   :  { %34 = vst.msk [vmem:[#allocation0] sm:$0x1] %vm33_vm5, %v32_v20  }
  0x7e   :  { %40 = vst.msk [vmem:[#allocation0] sm:$0x1] %vm39_vm6, %v38_v21  }
  0x80   :  { %v44_v22 = vpop.permute.xlu0 %43   ;;  %v50_v23 = vpop.permute.xlu1 %49  }
  0x81   :  { %46 = vst.msk [vmem:[#allocation0] sm:$0x1] %vm45_vm7, %v44_v22  }
  0x82   :  { %52 = vst.msk [vmem:[#allocation0] sm:$0x1] %vm51_vm8, %v50_v23  }
  0x84   :  { %v56_v24 = vpop.permute.xlu0 %55   ;;  %v62_v25 = vpop.permute.xlu1 %61  }
  0x85   :  { %58 = vst.msk [vmem:[#allocation0] sm:$0x1] %vm57_vm9, %v56_v24  }
  0x86   :  { %64 = vst.msk [vmem:[#allocation0] sm:$0x1] %vm63_vm10, %v62_v25  }
  0x88   :  { %v68_v26 = vpop.permute.xlu0 %67   ;;  %v74_v27 = vpop.permute.xlu1 %73  }
  0x89   :  { %70 = vst.msk [vmem:[#allocation0] sm:$0x1] %vm69_vm11, %v68_v26  }
  0x8a   :  { %76 = vst.msk [vmem:[#allocation0] sm:$0x1] %vm75_vm12, %v74_v27  }
  0x8c   :  { %v80_v28 = vpop.permute.xlu0 %79   ;;  %v86_v29 = vpop.permute.xlu1 %85  }
  0x8d   :  { %82 = vst.msk [vmem:[#allocation0] sm:$0x1] %vm81_vm13, %v80_v28  }
  0x8e   :  { %88 = vst.msk [vmem:[#allocation0] sm:$0x1] %vm87_vm14, %v86_v29  }
  0x90   :  { %v92_v30 = vpop.permute.xlu0 %91  }
  0x91   :  { %94 = vst.msk [vmem:[#allocation0] sm:$0x1] %vm93_vm15, %v92_v30  }
  0x98   :  { %v99_v31 = vld [vmem:[#allocation0] sm:$0x1] }
  0x99   :  { %102 = vst [vmem:[%s210_s1] sm:$0x1] %v99_v31 }

// kernel: uplayer_forward.1
= control target key start
LH: loop header
LB: loop body
LE: loop exit
PB: predicated region body
PF: predicated region fallthrough
CT: control target
= control target key end

     0   :  { %v2242_v0 = vmov 0.0   ;;  %vm2243_vm0 = vmmov 0   ;;  %vm75_vm1 = vcmask 523264   ;;  %vm214_vm2 = vsmask.f32 7424  ;;  %s2246_s11 = smov 32   ;;  %s2933_s3 = inlined_call_operand.vmem [shape: bf16[3,64,128], index: 3, kind: input, shape index: {}]   ;;  %s2934_s2 = inlined_call_operand.vmem [shape: bf16[3,64,128], index: 2, kind: input, shape index: {}]   ;;  %s2935_s1 = inlined_call_operand.vmem [shape: bf16[2,18,64], index: 1, kind: input, shape index: {}]   ;;  %s2936_s0 = inlined_call_operand.vmem [shape: bf16[2,18,64], index: 0, kind: input, shape index: {}]   ;;  %s2937_s4 = inlined_call_operand.vmem [shape: bf16[3,128,128], index: 4, kind: input, shape index: {}]   ;;  %s2938_s5 = inlined_call_operand.vmem [shape: f32[4,128], index: 5, kind: input, shape index: {}]   ;;  %s2939_s6 = inlined_call_operand.vmem [shape: f32[2,16,128], index: 6, kind: output, shape index: {}]  }
   0x1   :  { %1904 = vmatprep.subr.bf16.mxu0 %v2242_v0  ;;  %1916 = vmatprep.subr.bf16.mxu1 %v2242_v0  ;;  %v2288_v1 = vld [vmem:[%s2933_s3 + $0x18] sm:$0xff]   ;;  %v2303_v3 = vld [vmem:[%s2933_s3 + $0x10] sm:$0xff]   ;;  %v2317_v5 = vld [vmem:[%s2933_s3 + $0x8] sm:$0xff]   ;;  %vm396_vm3 = vcmask 1046528   ;;  %s2247_s12 = smov 64   ;;  %vm954_vm4 = vcmask 1043459  }
   0x2   :  { %v2293_v2 = vld [vmem:[%s2934_s2 + $0x18] sm:$0xff]   ;;  %1912 = vmatprep.mubr.msk.bf16.mxu0 %vm2243_vm0, %v2242_v0  ;;  %1924 = vmatprep.mubr.msk.bf16.mxu1 %vm2243_vm0, %v2242_v0  ;;  %v2310_v4 = vld [vmem:[%s2934_s2 + $0x10] sm:$0xff]   ;;  %v2324_v6 = vld [vmem:[%s2934_s2 + $0x8] sm:$0xff]   ;;  %vm955_vm5 = vsmask.f32 7950  ;;  %vm960_vm7 = vcmask 1040384  }
   0x3   :  { %1905 = vmatpush3.bf16.msra.mxu0 %v2288_v1  ;;  %1917 = vmatpush3.bf16.msra.mxu1 %v2293_v2  ;;  %v2331_v7 = vld [vmem:[%s2933_s3] sm:$0xff]   ;;  %v2355_v11 = vld [vmem:[%s2933_s3 + $0x38] sm:$0xff]   ;;  %v2370_v13 = vld [vmem:[%s2933_s3 + $0x30] sm:$0xff]   ;;  %vm961_vm8 = vsmask.f32 256 }
   0x4   :  { %1906 = vmatprep.subr.bf16.mxu0 %v2242_v0  ;;  %1918 = vmatprep.subr.bf16.mxu1 %v2242_v0  ;;  %v2338_v8 = vld [vmem:[%s2934_s2] sm:$0xff]   ;;  %v2362_v12 = vld [vmem:[%s2934_s2 + $0x38] sm:$0xff]   ;;  %v2379_v15 = vld [vmem:[%s2934_s2 + $0x30] sm:$0xff]   ;;  %vm1125_vm10 = vsmask.f32 4352 }
   0x5   :  { %v2344_v9 = vld [vmem:[%s2935_s1] sm:$0xff]   ;;  %v2384_v16 = vld [vmem:[%s2935_s1 + $0x8] ss:$0 sps:$4 sm:$0x11]   ;;  %v2436_v34 = vld [vmem:[%s2933_s3 + $0x58] sm:$0xff]  }
   0x6   :  { %v2349_v10 = vld [vmem:[%s2936_s0] sm:$0xff]   ;;  %v217_v14 = vshll.u32 %v2344_v9, 16  ;;  %v2391_v17 = vld [vmem:[%s2936_s0 + $0x8] ss:$0 sps:$4 sm:$0x11]   ;;  %v215_v19 = vshrl.u32 %v2344_v9, 16  ;;  %vm956_vm6 = vmand %vm954_vm4, %vm955_vm5 }
   0x7   :  { %1907 = vmatpush3.bf16.msra.mxu0 %v2303_v3  ;;  %1919 = vmatpush3.bf16.msra.mxu1 %v2310_v4  ;;  %v299_v18 = vshll.u32 %v2349_v10, 16  ;;  %v297_v20 = vshrl.u32 %v2349_v10, 16  ;;  %v2402_v21 = vld [vmem:[%s2933_s3 + $0x28] sm:$0xff]   ;;  %v222_v24 = vshll.u32 %v2384_v16, 16  ;;  %v304_v26 = vshll.u32 %v2391_v17, 16  ;;  %v2421_v27 = vld [vmem:[%s2933_s3 + $0x20] sm:$0xff]   ;;  %vm962_vm9 = vmand %vm960_vm7, %vm961_vm8 }
   0x8   :  { %1908 = vmatprep.subr.bf16.mxu0 %v2242_v0  ;;  %1920 = vmatprep.subr.bf16.mxu1 %v2242_v0  ;;  %v219_v22 = vrot.slane %v217_v14, 1  ;;  %v2410_v23 = vld [vmem:[%s2934_s2 + $0x28] sm:$0xff]   ;;  %v2428_v30 = vld [vmem:[%s2934_s2 + $0x20] sm:$0xff]   ;;  %v2444_v36 = vld [vmem:[%s2934_s2 + $0x58] sm:$0xff]   ;;  %v397_v42 = vrot.slane %v2344_v9, 1  ;;  %v398_v43 = vrot.slane %v2384_v16, 1 }
   0x9   :  { %v301_v25 = vrot.slane %v299_v18, 1  ;;  %v224_v29 = vrot.slane %v222_v24, 1  ;;  %v306_v32 = vrot.slane %v304_v26, 1  ;;  %v2453_v37 = vld [vmem:[%s2933_s3 + $0x50] sm:$0xff]   ;;  %v2471_v39 = vld [vmem:[%s2933_s3 + $0x48] sm:$0xff]   ;;  %v2485_v41 = vld [vmem:[%s2933_s3 + $0x40] sm:$0xff]  }
   0xa   :  { %v220_v28 = vor.u32 %v219_v22, %v215_v19  ;;  %v2460_v38 = vld [vmem:[%s2934_s2 + $0x50] sm:$0xff]   ;;  %v2478_v40 = vld [vmem:[%s2934_s2 + $0x48] sm:$0xff]   ;;  %v2494_v44 = vld [vmem:[%s2934_s2 + $0x40] sm:$0xff]   ;;  %v468_v45 = vrot.slane %v2349_v10, 1  ;;  %v469_v46 = vrot.slane %v2391_v17, 1  ;;  %v399_v47 = vsel %vm396_vm3, %v397_v42, %v398_v43 }
   0xb   :  { %1909 = vmatpush3.bf16.msra.mxu0 %v2317_v5  ;;  %1921 = vmatpush3.bf16.msra.mxu1 %v2324_v6  ;;  %v302_v31 = vor.u32 %v301_v25, %v297_v20  ;;  %v2526_v49 = vld [vmem:[%s2935_s1 + $0xc] sm:$0xff]   ;;  %v2204_v51 = vld [vmem:[%s2935_s1 + $0x14] ss:$0 sps:$4 sm:$0x11]   ;;  %s2245_s1 = smov 16  }
   0xc   :  { %1910 = vmatprep.subr.bf16.mxu0 %v2242_v0  ;;  %1922 = vmatprep.subr.bf16.mxu1 %v2242_v0  ;;  %v225_v33 = vsel %vm214_vm2, %v220_v28, %v224_v29  ;;  %v470_v48 = vsel %vm396_vm3, %v468_v45, %v469_v46  ;;  %v2532_v50 = vld [vmem:[%s2936_s0 + $0xc] sm:$0xff]   ;;  %v652_v52 = vshll.u32 %v2526_v49, 16  ;;  %v2205_v53 = vld [vmem:[%s2936_s0 + $0x14] ss:$0 sps:$4 sm:$0x11]   ;;  %v650_v55 = vshrl.u32 %v2526_v49, 16 }
   0xd   :  { %v307_v35 = vsel %vm214_vm2, %v302_v31, %v306_v32  ;;  %v710_v54 = vshll.u32 %v2532_v50, 16  ;;  %v657_v57 = vshll.u32 %v2204_v51, 16  ;;  %v708_v58 = vshrl.u32 %v2532_v50, 16  ;;  %s2244_s0 = smov 8  }
   0xe   :  { %v654_v56 = vrot.slane %v652_v52, 1  ;;  %v715_v60 = vshll.u32 %v2205_v53, 16 }
   0xf   :  { %1911 = vmatpush3.bf16.msra.mxu0 %v2331_v7  ;;  %1923 = vmatpush3.bf16.msra.mxu1 %v2338_v8  ;;  %v712_v59 = vrot.slane %v710_v54, 1  ;;  %v659_v62 = vrot.slane %v657_v57, 1 }
  0x10   :  { %1928 = vmatprep.subr.bf16.mxu0 %v2242_v0  ;;  %1940 = vmatprep.subr.bf16.mxu1 %v2242_v0  ;;  %v655_v61 = vor.u32 %v654_v56, %v650_v55 }
  0x11   :  { %v713_v63 = vor.u32 %v712_v59, %v708_v58 }
  0x12   :  { %1913 = vmatmul.mubr.msk.bf16.vlgmr.msra.gmra.mxu0 %vm75_vm1, %v2344_v9  ;;  %1925 = vmatmul.mubr.msk.bf16.vlgmr.msra.gmra.mxu1 %vm75_vm1, %v2349_v10 }
  0x13   :  { %1929 = vmatpush3.bf16.msra.mxu0 %v2355_v11  ;;  %1941 = vmatpush3.bf16.msra.mxu1 %v2362_v12 }
  0x14   :  { %1930 = vmatprep.subr.bf16.mxu0 %v2242_v0  ;;  %1942 = vmatprep.subr.bf16.mxu1 %v2242_v0 }
  0x15   :  { %1936 = vmatprep.mubr.msk.bf16.mxu0 %vm2243_vm0, %v2242_v0  ;;  %1948 = vmatprep.mubr.msk.bf16.mxu1 %vm2243_vm0, %v2242_v0 }
  0x17   :  { %1931 = vmatpush3.bf16.msra.mxu0 %v2370_v13  ;;  %1943 = vmatpush3.bf16.msra.mxu1 %v2379_v15 }
  0x18   :  { %1932 = vmatprep.subr.bf16.mxu0 %v2242_v0  ;;  %1944 = vmatprep.subr.bf16.mxu1 %v2242_v0 }
  0x1b   :  { %1933 = vmatpush3.bf16.msra.mxu0 %v2402_v21  ;;  %1945 = vmatpush3.bf16.msra.mxu1 %v2410_v23 }
  0x1c   :  { %1934 = vmatprep.subr.bf16.mxu0 %v2242_v0  ;;  %1946 = vmatprep.subr.bf16.mxu1 %v2242_v0 }
  0x1f   :  { %1935 = vmatpush3.bf16.msra.mxu0 %v2421_v27  ;;  %1947 = vmatpush3.bf16.msra.mxu1 %v2428_v30 }
  0x20   :  { %1952 = vmatprep.subr.bf16.mxu0 %v2242_v0  ;;  %1964 = vmatprep.subr.bf16.mxu1 %v2242_v0 }
  0x22   :  { %1937 = vmatmul.mubr.msk.bf16.vlgmr.msra.gmra.mxu0 %vm75_vm1, %v225_v33  ;;  %1949 = vmatmul.mubr.msk.bf16.vlgmr.msra.gmra.mxu1 %vm75_vm1, %v307_v35 }
  0x23   :  { %1953 = vmatpush3.bf16.msra.mxu0 %v2436_v34  ;;  %1965 = vmatpush3.bf16.msra.mxu1 %v2444_v36 }
  0x24   :  { %1954 = vmatprep.subr.bf16.mxu0 %v2242_v0  ;;  %1966 = vmatprep.subr.bf16.mxu1 %v2242_v0 }
  0x25   :  { %1960 = vmatprep.mubr.msk.bf16.mxu0 %vm2243_vm0, %v2242_v0  ;;  %1972 = vmatprep.mubr.msk.bf16.mxu1 %vm2243_vm0, %v2242_v0 }
  0x27   :  { %1955 = vmatpush3.bf16.msra.mxu0 %v2453_v37  ;;  %1967 = vmatpush3.bf16.msra.mxu1 %v2460_v38 }
  0x28   :  { %1956 = vmatprep.subr.bf16.mxu0 %v2242_v0  ;;  %1968 = vmatprep.subr.bf16.mxu1 %v2242_v0 }
  0x2b   :  { %1957 = vmatpush3.bf16.msra.mxu0 %v2471_v39  ;;  %1969 = vmatpush3.bf16.msra.mxu1 %v2478_v40 }
  0x2c   :  { %1958 = vmatprep.subr.bf16.mxu0 %v2242_v0  ;;  %1970 = vmatprep.subr.bf16.mxu1 %v2242_v0 }
  0x2f   :  { %1959 = vmatpush3.bf16.msra.mxu0 %v2485_v41  ;;  %1971 = vmatpush3.bf16.msra.mxu1 %v2494_v44 }
  0x30   :  { %1976 = vmatprep.subr.bf16.mxu0 %v2242_v0  ;;  %1988 = vmatprep.subr.bf16.mxu1 %v2242_v0 }
  0x32   :  { %1961 = vmatmul.mubr.msk.bf16.vlgmr.msra.gmra.mxu0 %vm75_vm1, %v399_v47  ;;  %1973 = vmatmul.mubr.msk.bf16.vlgmr.msra.gmra.mxu1 %vm75_vm1, %v470_v48 }
  0x33   :  { %1977 = vmatpush3.bf16.msra.mxu0 %v2288_v1  ;;  %1989 = vmatpush3.bf16.msra.mxu1 %v2293_v2  ;;  %v717_v1 = vrot.slane %v715_v60, 1  ;;  %v660_v2 = vsel %vm214_vm2, %v655_v61, %v659_v62 }
  0x34   :  { %1978 = vmatprep.subr.bf16.mxu0 %v2242_v0  ;;  %1990 = vmatprep.subr.bf16.mxu1 %v2242_v0 }
  0x35   :  { %1984 = vmatprep.mubr.msk.bf16.mxu0 %vm2243_vm0, %v2242_v0  ;;  %1996 = vmatprep.mubr.msk.bf16.mxu1 %vm2243_vm0, %v2242_v0 }
  0x37   :  { %1979 = vmatpush3.bf16.msra.mxu0 %v2303_v3  ;;  %1991 = vmatpush3.bf16.msra.mxu1 %v2310_v4  ;;  %v718_v3 = vsel %vm214_vm2, %v713_v63, %v717_v1  ;;  %v765_v4 = vrot.slane %v2526_v49, 1 }
  0x38   :  { %1980 = vmatprep.subr.bf16.mxu0 %v2242_v0  ;;  %1992 = vmatprep.subr.bf16.mxu1 %v2242_v0 }
  0x3b   :  { %1981 = vmatpush3.bf16.msra.mxu0 %v2317_v5  ;;  %1993 = vmatpush3.bf16.msra.mxu1 %v2324_v6  ;;  %v766_v5 = vrot.slane %v2204_v51, 1  ;;  %v812_v6 = vrot.slane %v2532_v50, 1 }
  0x3c   :  { %1982 = vmatprep.subr.bf16.mxu0 %v2242_v0  ;;  %1994 = vmatprep.subr.bf16.mxu1 %v2242_v0 }
  0x3f   :  { %1983 = vmatpush3.bf16.msra.mxu0 %v2331_v7  ;;  %1995 = vmatpush3.bf16.msra.mxu1 %v2338_v8  ;;  %v813_v7 = vrot.slane %v2205_v53, 1  ;;  %v767_v8 = vsel %vm396_vm3, %v765_v4, %v766_v5 }
  0x40   :  { %2000 = vmatprep.subr.bf16.mxu0 %v2242_v0  ;;  %2012 = vmatprep.subr.bf16.mxu1 %v2242_v0 }
  0x41   :  { %v814_v9 = vsel %vm396_vm3, %v812_v6, %v813_v7 }
  0x42   :  { %1985 = vmatmul.mubr.msk.bf16.vlgmr.msra.gmra.mxu0 %vm75_vm1, %v2526_v49  ;;  %1997 = vmatmul.mubr.msk.bf16.vlgmr.msra.gmra.mxu1 %vm75_vm1, %v2532_v50 }
  0x43   :  { %2001 = vmatpush3.bf16.msra.mxu0 %v2355_v11  ;;  %2013 = vmatpush3.bf16.msra.mxu1 %v2362_v12 }
  0x44   :  { %2002 = vmatprep.subr.bf16.mxu0 %v2242_v0  ;;  %2014 = vmatprep.subr.bf16.mxu1 %v2242_v0 }
  0x45   :  { %2008 = vmatprep.mubr.msk.bf16.mxu0 %vm2243_vm0, %v2242_v0  ;;  %2020 = vmatprep.mubr.msk.bf16.mxu1 %vm2243_vm0, %v2242_v0 }
  0x47   :  { %2003 = vmatpush3.bf16.msra.mxu0 %v2370_v13  ;;  %2015 = vmatpush3.bf16.msra.mxu1 %v2379_v15 }
  0x48   :  { %2004 = vmatprep.subr.bf16.mxu0 %v2242_v0  ;;  %2016 = vmatprep.subr.bf16.mxu1 %v2242_v0 }
  0x4b   :  { %2005 = vmatpush3.bf16.msra.mxu0 %v2402_v21  ;;  %2017 = vmatpush3.bf16.msra.mxu1 %v2410_v23 }
  0x4c   :  { %2006 = vmatprep.subr.bf16.mxu0 %v2242_v0  ;;  %2018 = vmatprep.subr.bf16.mxu1 %v2242_v0 }
  0x4f   :  { %2007 = vmatpush3.bf16.msra.mxu0 %v2421_v27  ;;  %2019 = vmatpush3.bf16.msra.mxu1 %v2428_v30 }
  0x50   :  { %2024 = vmatprep.subr.bf16.mxu0 %v2242_v0  ;;  %2036 = vmatprep.subr.bf16.mxu1 %v2242_v0 }
  0x52   :  { %2009 = vmatmul.mubr.msk.bf16.vlgmr.msra.gmra.mxu0 %vm75_vm1, %v660_v2  ;;  %2021 = vmatmul.mubr.msk.bf16.vlgmr.msra.gmra.mxu1 %vm75_vm1, %v718_v3 }
  0x53   :  { %2025 = vmatpush3.bf16.msra.mxu0 %v2436_v34  ;;  %2037 = vmatpush3.bf16.msra.mxu1 %v2444_v36 }
  0x54   :  { %2026 = vmatprep.subr.bf16.mxu0 %v2242_v0  ;;  %2038 = vmatprep.subr.bf16.mxu1 %v2242_v0 }
  0x55   :  { %2032 = vmatprep.mubr.msk.bf16.mxu0 %vm2243_vm0, %v2242_v0  ;;  %2044 = vmatprep.mubr.msk.bf16.mxu1 %vm2243_vm0, %v2242_v0 }
  0x57   :  { %2027 = vmatpush3.bf16.msra.mxu0 %v2453_v37  ;;  %2039 = vmatpush3.bf16.msra.mxu1 %v2460_v38 }
  0x58   :  { %2028 = vmatprep.subr.bf16.mxu0 %v2242_v0  ;;  %2040 = vmatprep.subr.bf16.mxu1 %v2242_v0 }
  0x5b   :  { %2029 = vmatpush3.bf16.msra.mxu0 %v2471_v39  ;;  %2041 = vmatpush3.bf16.msra.mxu1 %v2478_v40 }
  0x5c   :  { %2030 = vmatprep.subr.bf16.mxu0 %v2242_v0  ;;  %2042 = vmatprep.subr.bf16.mxu1 %v2242_v0 }
  0x5f   :  { %2031 = vmatpush3.bf16.msra.mxu0 %v2485_v41  ;;  %2043 = vmatpush3.bf16.msra.mxu1 %v2494_v44 }
  0x60   :  { %2048 = vmatprep.subr.bf16.mxu0 %v2242_v0  ;;  %2068 = vmatprep.subr.bf16.mxu1 %v2242_v0 }
  0x62   :  { %2033 = vmatmul.mubr.msk.bf16.vlgmr.msra.gmra.mxu0 %vm75_vm1, %v767_v8  ;;  %2045 = vmatmul.mubr.msk.bf16.vlgmr.msra.gmra.mxu1 %vm75_vm1, %v814_v9 }
  0x63   :  { %2064 = vmatprep.mubr.msk.bf16.mxu0 %vm2243_vm0, %v2242_v0  ;;  %2084 = vmatprep.mubr.msk.bf16.mxu1 %vm2243_vm0, %v2242_v0 }
  0xd2   :  { %v113_v10 = vpop.f32.mrf.mxu0  ;;  %v186_v11 = vpop.f32.mrf.mxu1 }
  0xd3   :  { %v187_v12 = vadd.f32 %v186_v11, %v113_v10 }
  0xd4   :  { %v1914_v13 = vpop.f32.mrf.mxu0  ;;  %v1926_v14 = vpop.f32.mrf.mxu1 }
  0xd6   :  { %v116_v15 = vpop.f32.mrf.mxu0  ;;  %v189_v16 = vpop.f32.mrf.mxu1 }
  0xd7   :  { %v190_v17 = vadd.f32 %v189_v16, %v116_v15 }
  0xd8   :  { %v1915_v18 = vpop.f32.mrf.mxu0  ;;  %v1927_v19 = vpop.f32.mrf.mxu1 }
  0xe2   :  { %v287_v20 = vpop.f32.mrf.mxu0  ;;  %v369_v21 = vpop.f32.mrf.mxu1 }
  0xe3   :  { %v370_v22 = vadd.f32 %v369_v21, %v287_v20 }
  0xe4   :  { %v1938_v23 = vpop.f32.mrf.mxu0  ;;  %v1950_v24 = vpop.f32.mrf.mxu1 }
  0xe5   :  { %v376_v25 = vadd.f32 %v370_v22, %v187_v12 }
  0xe6   :  { %v290_v26 = vpop.f32.mrf.mxu0  ;;  %v372_v27 = vpop.f32.mrf.mxu1 }
  0xe7   :  { %v373_v49 = vadd.f32 %v372_v27, %v290_v26 }
  0xe8   :  { %v1939_v28 = vpop.f32.mrf.mxu0  ;;  %v1951_v29 = vpop.f32.mrf.mxu1 }
  0xe9   :  { %v377_v55 = vadd.f32 %v373_v49, %v190_v17 }
  0xf2   :  { %v461_v30 = vpop.f32.mrf.mxu0  ;;  %v532_v31 = vpop.f32.mrf.mxu1 }
  0xf3   :  { %v533_v56 = vadd.f32 %v532_v31, %v461_v30 }
  0xf4   :  { %v1962_v32 = vpop.f32.mrf.mxu0  ;;  %v1974_v33 = vpop.f32.mrf.mxu1 }
  0xf5   :  { %v2607_v59 = vadd.f32 %v533_v56, %v376_v25 }
  0xf6   :  { %v464_v34 = vpop.f32.mrf.mxu0  ;;  %v535_v35 = vpop.f32.mrf.mxu1 }
  0xf7   :  { %v536_v52 = vadd.f32 %v535_v35, %v464_v34  ;;  %v870_v62 = vmul.f32 %v2607_v59, %v2607_v59 }
  0xf8   :  { %v1963_v36 = vpop.f32.mrf.mxu0  ;;  %v1975_v37 = vpop.f32.mrf.mxu1 }
  0xf9   :  { %v2605_v58 = vadd.f32 %v536_v52, %v377_v55 }
  0xfb   :  { %v863_v60 = vadd.f32 %v2605_v58, %v2607_v59  ;;  %v871_v61 = vmul.f32 %v2605_v58, %v2605_v58 }
  0xfd   :  { %v864_v2 = vrot.slane %v863_v60, 4  ;;  %v872_v4 = vadd.f32 %v871_v61, %v870_v62 }
  0xff   :  { %v865_v14 = vadd.f32 %v864_v2, %v863_v60  ;;  %v873_v15 = vrot.slane %v872_v4, 4  ;;  %v2656_v2 = vld [vmem:[%s2937_s4 + $0x38] sm:$0xff]  }
 0x100   :  { %2069 = vmatpush3.bf16.msra.mxu1 %v2656_v2 }
 0x101   :  { %v866_v22 = vrot.slane %v865_v14, 2  ;;  %v874_v26 = vadd.f32 %v873_v15, %v872_v4  ;;  %2070 = vmatprep.subr.bf16.mxu1 %v2242_v0  ;;  %v2670_v4 = vld [vmem:[%s2937_s4 + $0x30] sm:$0xff]  }
 0x102   :  { %v591_v38 = vpop.f32.mrf.mxu0  ;;  %v640_v39 = vpop.f32.mrf.mxu1 }
 0x103   :  { %v641_v5 = vadd.f32 %v640_v39, %v591_v38  ;;  %v867_v30 = vadd.f32 %v866_v22, %v865_v14  ;;  %v875_v32 = vrot.slane %v874_v26, 2  ;;  %v986_v22 = vld [vmem:[#allocation2 + $0x24] sm:$0x1] }
 0x104   :  { %v1986_v40 = vpop.f32.mrf.mxu0  ;;  %v1998_v41 = vpop.f32.mrf.mxu1  ;;  %2071 = vmatpush3.bf16.msra.mxu1 %v2670_v4 }
 0x105   :  { %v868_v35 = vrot.slane %v867_v30, 1  ;;  %v876_v37 = vadd.f32 %v875_v32, %v874_v26  ;;  %2072 = vmatprep.subr.bf16.mxu1 %v2242_v0 }
 0x106   :  { %v594_v42 = vpop.f32.mrf.mxu0  ;;  %v643_v43 = vpop.f32.mrf.mxu1 }
 0x107   :  { %v644_v10 = vadd.f32 %v643_v43, %v594_v42  ;;  %v869_v41 = vadd.f32 %v868_v35, %v867_v30  ;;  %v877_v43 = vrot.slane %v876_v37, 1  ;;  %v930_v35 = vlaneseq }
 0x108   :  { %v1987_v44 = vpop.f32.mrf.mxu0  ;;  %v1999_v45 = vpop.f32.mrf.mxu1 }
 0x112   :  { %v698_v46 = vpop.f32.mrf.mxu0  ;;  %v756_v47 = vpop.f32.mrf.mxu1 }
 0x113   :  { %v757_v63 = vadd.f32 %v756_v47, %v698_v46  ;;  %v878_v47 = vadd.f32 %v877_v43, %v876_v37  ;;  %v861_v37 = vld [vmem:[%s2938_s5] sm:$0x1] }
 0x114   :  { %v2010_v48 = vpop.f32.mrf.mxu0  ;;  %v2022_v50 = vpop.f32.mrf.mxu1 }
 0x115   :  { %v763_v11 = vadd.f32 %v757_v63, %v641_v5  ;;  %v2642_v63 = vld [vmem:[%s2937_s4 + $0x78] sm:$0xff]   ;;  %v2675_v5 = vld [vmem:[%s2937_s4 + $0x60] sm:$0xff]  }
 0x116   :  { %v701_v51 = vpop.f32.mrf.mxu0  ;;  %v759_v53 = vpop.f32.mrf.mxu1  ;;  %2049 = vmatpush3.bf16.msra.mxu0 %v2642_v63 }
 0x117   :  { %v760_v6 = vadd.f32 %v759_v53, %v701_v51  ;;  %2050 = vmatprep.subr.bf16.mxu0 %v2242_v0 }
 0x118   :  { %v2011_v54 = vpop.f32.mrf.mxu0  ;;  %v2023_v57 = vpop.f32.mrf.mxu1 }
 0x119   :  { %v764_v16 = vadd.f32 %v760_v6, %v644_v10  ;;  %v2684_v6 = vld [vmem:[%s2937_s4 + $0x28] sm:$0xff]   ;;  %v957_v10 = vld [vmem:[#allocation2 + $0x4] sm:$0x8] }
 0x11a   :  { %2073 = vmatpush3.bf16.msra.mxu1 %v2684_v6  ;;  %v958_v14 = vsel %vm956_vm6, 0, %v957_v10 }
 0x11b   :  { %2074 = vmatprep.subr.bf16.mxu1 %v2242_v0  ;;  %959 = vst [vmem:[#allocation2 + $0x4] sm:$0x8] %v958_v14 }
 0x122   :  { %v805_v1 = vpop.f32.mrf.mxu0  ;;  %v852_v3 = vpop.f32.mrf.mxu1 }
 0x123   :  { %v853_v7 = vadd.f32 %v852_v3, %v805_v1  ;;  %v2649_v1 = vld [vmem:[%s2937_s4 + $0x70] sm:$0xff]   ;;  %v2661_v3 = vld [vmem:[%s2937_s4 + $0x68] sm:$0xff]  }
 0x124   :  { %v2034_v8 = vpop.f32.mrf.mxu0  ;;  %v2046_v9 = vpop.f32.mrf.mxu1  ;;  %2051 = vmatpush3.bf16.msra.mxu0 %v2649_v1 }
 0x125   :  { %v2615_v17 = vadd.f32 %v853_v7, %v763_v11  ;;  %2052 = vmatprep.subr.bf16.mxu0 %v2242_v0  ;;  %v2689_v7 = vld [vmem:[%s2937_s4 + $0x58] sm:$0xff]   ;;  %v2698_v8 = vld [vmem:[%s2937_s4 + $0x20] sm:$0xff]   ;;  %v2703_v9 = vld [vmem:[%s2937_s4 + $0x50] sm:$0xff]  }
 0x126   :  { %v808_v12 = vpop.f32.mrf.mxu0  ;;  %v855_v13 = vpop.f32.mrf.mxu1  ;;  %2075 = vmatpush3.bf16.msra.mxu1 %v2698_v8  ;;  %v983_v11 = vld [vmem:[#allocation2 + $0x18] sm:$0x8] }
 0x127   :  { %v856_v18 = vadd.f32 %v855_v13, %v808_v12  ;;  %v887_v23 = vmul.f32 %v2615_v17, %v2615_v17  ;;  %2076 = vmatprep.subr.bf16.mxu1 %v2242_v0  ;;  %v2712_v12 = vld [vmem:[%s2937_s4 + $0x18] sm:$0xff]   ;;  %v2717_v13 = vld [vmem:[%s2937_s4 + $0x48] sm:$0xff]   ;;  %v984_v15 = vsel %vm956_vm6, 0, %v983_v11 }
 0x128   :  { %v2035_v19 = vpop.f32.mrf.mxu0  ;;  %v2047_v20 = vpop.f32.mrf.mxu1  ;;  %2053 = vmatpush3.bf16.msra.mxu0 %v2661_v3  ;;  %985 = vst [vmem:[#allocation2 + $0x18] sm:$0x8] %v984_v15 }
 0x129   :  { %v2617_v21 = vadd.f32 %v856_v18, %v764_v16  ;;  %2054 = vmatprep.subr.bf16.mxu0 %v2242_v0  ;;  %v2723_v16 = vld [vmem:[%s2937_s4 + $0x10] sm:$0xff]   ;;  %v2730_v19 = vld [vmem:[%s2937_s4 + $0x40] sm:$0xff]  }
 0x12a   :  { %2077 = vmatpush3.bf16.msra.mxu1 %v2712_v12  ;;  %v963_v18 = vld [vmem:[#allocation2 + $0x10] sm:$0x1] }
 0x12b   :  { %v879_v24 = vadd.f32 %v2617_v21, %v2615_v17  ;;  %v888_v25 = vmul.f32 %v2617_v21, %v2617_v21  ;;  %2078 = vmatprep.subr.bf16.mxu1 %v2242_v0  ;;  %v964_v20 = vsel %vm962_vm9, 0, %v963_v18 }
 0x12c   :  { %2055 = vmatpush3.bf16.msra.mxu0 %v2675_v5  ;;  %965 = vst [vmem:[#allocation2 + $0x10] sm:$0x1] %v964_v20 }
 0x12d   :  { %v880_v27 = vrot.slane %v879_v24, 4  ;;  %v889_v28 = vadd.f32 %v888_v25, %v887_v23  ;;  %2056 = vmatprep.subr.bf16.mxu0 %v2242_v0  ;;  %v2737_v23 = vld [vmem:[%s2937_s4 + $0x8] sm:$0xff]   ;;  %v2747_v25 = vld [vmem:[%s2937_s4] sm:$0xff]  }
 0x12e   :  { %2079 = vmatpush3.bf16.msra.mxu1 %v2723_v16 }
 0x12f   :  { %v890_v29 = vrot.slane %v889_v28, 4  ;;  %v881_v31 = vadd.f32 %v880_v27, %v879_v24  ;;  %v987_v24 = vsel %vm962_vm9, 0, %v986_v22  ;;  %2080 = vmatprep.subr.bf16.mxu1 %v2242_v0 }
 0x130   :  { %2057 = vmatpush3.bf16.msra.mxu0 %v2689_v7  ;;  %988 = vst [vmem:[#allocation2 + $0x24] sm:$0x1] %v987_v24  ;;  %v2776_v24 = vld [vmem:[%s2937_s4 + $0xb0] sm:$0xff]  }
 0x131   :  { %v882_v33 = vrot.slane %v881_v31, 2  ;;  %v891_v34 = vadd.f32 %v890_v29, %v889_v28  ;;  %2058 = vmatprep.subr.bf16.mxu0 %v2242_v0 }
 0x132   :  { %2081 = vmatpush3.bf16.msra.mxu1 %v2737_v23 }
 0x133   :  { %v883_v36 = vadd.f32 %v882_v33, %v881_v31  ;;  %v892_v38 = vrot.slane %v891_v34, 2  ;;  %2082 = vmatprep.subr.bf16.mxu1 %v2242_v0 }
 0x134   :  { %2059 = vmatpush3.bf16.msra.mxu0 %v2703_v9 }
 0x135   :  { %v884_v39 = vrot.slane %v883_v36, 1  ;;  %v893_v40 = vadd.f32 %v892_v38, %v891_v34  ;;  %2060 = vmatprep.subr.bf16.mxu0 %v2242_v0 }
 0x136   :  { %2083 = vmatpush3.bf16.msra.mxu1 %v2747_v25 }
 0x137   :  { %v885_v42 = vadd.f32 %v884_v39, %v883_v36  ;;  %v894_v44 = vrot.slane %v893_v40, 1  ;;  %2108 = vmatprep.subr.bf16.mxu1 %v2242_v0  ;;  %v931_v36 = vshrl.u32 %v930_v35, 7  ;;  %v2233_v35 = vld [vmem:[#allocation2 + $0x10] ss:$0 sps:$4 sm:$0x11]  }
 0x138   :  { %2061 = vmatpush3.bf16.msra.mxu0 %v2717_v13 }
 0x139   :  { %v886_v45 = vadd.f32 %v885_v42, %v869_v41  ;;  %v895_v46 = vadd.f32 %v894_v44, %v893_v40  ;;  %2062 = vmatprep.subr.bf16.mxu0 %v2242_v0  ;;  %v2756_v38 = vsub.s32 0, %v931_v36  ;;  %v862_v41 = vld [vmem:[%s2938_s5 + $0x1] sm:$0x1] }
 0x13b   :  { %897 = vrot.lane.b32.xlu0 %v886_v45, %s2244_s0  ;;  %v896_v48 = vadd.f32 %v895_v46, %v878_v47 }
 0x13c   :  { %2063 = vmatpush3.bf16.msra.mxu0 %v2730_v19 }
 0x13d   :  { %2088 = vmatprep.subr.bf16.mxu0 %v2242_v0 }
 0x13f   :  { %909 = vrot.lane.b32.xlu0 %v896_v48, %s2244_s0 }
 0x1ad   :  { %v898_v49 = vpop.permute.xlu0 %897 }
 0x1ae   :  { %v899_v50 = vadd.f32 %v898_v49, %v886_v45 }
 0x1b0   :  { %900 = vrot.lane.b32.xlu1 %v899_v50, %s2245_s1 }
 0x1b1   :  { %v910_v51 = vpop.permute.xlu0 %909 }
 0x1b2   :  { %v911_v52 = vadd.f32 %v910_v51, %v896_v48 }
 0x1b4   :  { %912 = vrot.lane.b32.xlu1 %v911_v52, %s2245_s1 }
 0x222   :  { %v901_v53 = vpop.permute.xlu1 %900 }
 0x223   :  { %v902_v54 = vadd.f32 %v901_v53, %v899_v50 }
 0x225   :  { %903 = vrot.lane.b32.xlu0 %v902_v54, %s2246_s11 }
 0x226   :  { %v913_v55 = vpop.permute.xlu1 %912 }
 0x227   :  { %v914_v56 = vadd.f32 %v913_v55, %v911_v52 }
 0x229   :  { %915 = vrot.lane.b32.xlu1 %v914_v56, %s2246_s11 }
 0x297   :  { %v904_v57 = vpop.permute.xlu0 %903 }
 0x298   :  { %v2631_v60 = vadd.f32 %v904_v57, %v902_v54 }
 0x29a   :  { %906 = vrot.lane.b32.xlu0 %v2631_v60, %s2247_s12 }
 0x29b   :  { %v916_v61 = vpop.permute.xlu1 %915 }
 0x29c   :  { %v2635_v62 = vadd.f32 %v916_v61, %v914_v56 }
 0x29e   :  { %918 = vrot.lane.b32.xlu1 %v2635_v62, %s2247_s12 }
 0x30c   :  { %v907_v26 = vpop.permute.xlu0 %906 }
 0x30d   :  { %v908_v27 = vadd.f32 %v907_v26, %v2631_v60 }
 0x30f   :  { %v921_v28 = vmul.f32 0.001953125, %v908_v27 }
 0x310   :  { %v919_v29 = vpop.permute.xlu1 %918 }
 0x311   :  { %v920_v30 = vadd.f32 %v919_v29, %v2635_v62  ;;  %v923_v31 = vmul.f32 %v921_v28, %v921_v28 }
 0x313   :  { %v922_v32 = vmul.f32 0.001953125, %v920_v30 }
 0x315   :  { %v924_v33 = vsub.f32 %v922_v32, %v923_v31  ;;  %v2785_v32 = vld [vmem:[%s2937_s4 + $0xa8] sm:$0xff]  }
 0x317   :  { %v925_v34 = vadd.f32 1e-05, %v924_v33 }
 0x319   :  { %2238 = vrsqrt.f32 %v925_v34  ;;  %v2797_v34 = vld [vmem:[%s2937_s4 + $0xa0] sm:$0xff]  }
 0x326   :  { %v2239_v39 = vpop.eup %2238 }
 0x327   :  { %v927_v40 = vmul.f32 %v2239_v39, %v861_v37  ;;  %v1261_v39 = vshll.u32 %v2233_v35, 16 }
 0x329   :  { %v928_v42 = vmul.f32 %v927_v40, %v921_v28  ;;  %v933_v43 = vrot.slane %v927_v40, %v2756_v38 }
 0x32b   :  { %v929_v44 = vsub.f32 %v862_v41, %v928_v42  ;;  %v934_v45 = vmul.f32 %v933_v43, %v2607_v59  ;;  %v935_v46 = vmul.f32 %v933_v43, %v2605_v58  ;;  %v966_v48 = vmul.f32 %v933_v43, %v2615_v17  ;;  %v989_v58 = vld [vmem:[#allocation2 + $0x4] sm:$0x8]  ;;  %v2770_v17 = vld [vmem:[%s2937_s4 + $0xb8] sm:$0xff]  }
 0x32c   :  { %v967_v49 = vmul.f32 %v933_v43, %v2617_v21  ;;  %v1263_v42 = vrot.slane %v1261_v39, 1 }
 0x32d   :  { %v939_v47 = vrot.slane %v929_v44, %v2756_v38 }
 0x32f   :  { %v940_v50 = vadd.f32 %v939_v47, %v934_v45  ;;  %v941_v51 = vadd.f32 %v939_v47, %v935_v46  ;;  %v968_v52 = vadd.f32 %v966_v48, %v939_v47  ;;  %v969_v53 = vadd.f32 %v967_v49, %v939_v47  ;;  %v2237_v49 = vld [vmem:[#allocation2 + $0x24] ss:$0 sps:$4 sm:$0x11]  }
 0x331   :  { %v942_v54 = vmax.f32 %v940_v50, 0.0  ;;  %v943_v55 = vmax.f32 %v941_v51, 0.0  ;;  %v970_v56 = vmax.f32 %v968_v52, 0.0  ;;  %v971_v57 = vmax.f32 %v969_v53, 0.0 }
 0x332   :  { %v1482_v53 = vshll.u32 %v2237_v49, 16 }
 0x333   :  { %v1787_v60 = vpack.c.bf16 %v943_v55, %v942_v54  ;;  %v1782_v61 = vpack.c.bf16 %v970_v56, %v970_v56  ;;  %v1783_v62 = vpack.c.bf16 %v971_v57, %v971_v57 }
 0x334   :  { %v1484_v56 = vrot.slane %v1482_v53, 1 }
 0x335   :  { %1789 = vst [vmem:[#allocation2 + $0x8] sm:$0xff] %v1787_v60   ;;  %981 = vst [vmem:[#allocation2 + $0x1c] sm:$0xf] %v1782_v61 }
 0x336   :  { %982 = vst [vmem:[#allocation2 + $0x20] sm:$0xf] %v1783_v62 }
 0x33c   :  { %v990_v59 = vld [vmem:[#allocation2 + $0x8] sm:$0xf]  ;;  %v991_v10 = vld [vmem:[#allocation2 + $0xc] sm:$0xf]  ;;  %v1358_v43 = vld [vmem:[#allocation2 + $0x1c] sm:$0xf] }
 0x33d   :  { %v1730_v21 = vcombine.low %v990_v59, %v991_v10  ;;  %v1739_v11 = vcombine.low %v989_v58, %v990_v59  ;;  %v1740_v14 = vcombine.low %v991_v10, %v991_v10  ;;  %v1359_v44 = vld [vmem:[#allocation2 + $0x20] sm:$0xf] }
 0x33f   :  { %2065 = vmatmul.mubr.bf16.vlgmr.msra.gmra.mxu0 %v1730_v21  ;;  %v1127_v15 = vshrl.u32 %v1739_v11, 16  ;;  %v1130_v18 = vshll.u32 %v1739_v11, 16  ;;  %v1135_v20 = vshrl.u32 %v1740_v14, 16  ;;  %v1138_v22 = vshll.u32 %v1740_v14, 16 }
 0x340   :  { %2089 = vmatpush3.bf16.msra.mxu0 %v2770_v17  ;;  %2104 = vmatprep.mubr.msk.bf16.mxu0 %vm2243_vm0, %v2242_v0  ;;  %v1256_v36 = vshll.u32 %v1730_v21, 16  ;;  %v1254_v40 = vshrl.u32 %v1730_v21, 16 }
 0x341   :  { %2090 = vmatprep.subr.bf16.mxu0 %v2242_v0  ;;  %v1129_v26 = vrot.slane %v1127_v15, 3  ;;  %v1132_v27 = vrot.slane %v1130_v18, 4  ;;  %v1137_v28 = vrot.slane %v1135_v20, 3  ;;  %v1140_v29 = vrot.slane %v1138_v22, 4 }
 0x342   :  { %v1258_v37 = vrot.slane %v1256_v36, 1 }
 0x343   :  { %v1133_v30 = vor.u32 %v1132_v27, %v1129_v26  ;;  %v1141_v31 = vor.u32 %v1140_v29, %v1137_v28 }
 0x344   :  { %2091 = vmatpush3.bf16.msra.mxu0 %v2776_v24  ;;  %v1259_v41 = vor.u32 %v1258_v37, %v1254_v40 }
 0x345   :  { %v1142_v33 = vsel %vm1125_vm10, %v1133_v30, %v1141_v31  ;;  %2092 = vmatprep.subr.bf16.mxu0 %v2242_v0 }
 0x346   :  { %2085 = vmatmul.mubr.bf16.vlgmr.msra.gmra.mxu1 %v1142_v33 }
 0x347   :  { %2109 = vmatpush3.bf16.msra.mxu1 %v2642_v63  ;;  %2124 = vmatprep.mubr.msk.bf16.mxu1 %vm2243_vm0, %v2242_v0  ;;  %v2806_v63 = vld [vmem:[%s2937_s4 + $0x98] sm:$0xff]  }
 0x348   :  { %2093 = vmatpush3.bf16.msra.mxu0 %v2785_v32  ;;  %2110 = vmatprep.subr.bf16.mxu1 %v2242_v0 }
 0x349   :  { %2094 = vmatprep.subr.bf16.mxu0 %v2242_v0 }
 0x34b   :  { %2111 = vmatpush3.bf16.msra.mxu1 %v2649_v1  ;;  %v2815_v1 = vld [vmem:[%s2937_s4 + $0x90] sm:$0xff]  }
 0x34c   :  { %2095 = vmatpush3.bf16.msra.mxu0 %v2797_v34  ;;  %2112 = vmatprep.subr.bf16.mxu1 %v2242_v0 }
 0x34d   :  { %2096 = vmatprep.subr.bf16.mxu0 %v2242_v0 }
 0x34f   :  { %2113 = vmatpush3.bf16.msra.mxu1 %v2661_v3  ;;  %v2824_v3 = vld [vmem:[%s2937_s4 + $0x88] sm:$0xff]  }
 0x350   :  { %2097 = vmatpush3.bf16.msra.mxu0 %v2806_v63  ;;  %2114 = vmatprep.subr.bf16.mxu1 %v2242_v0 }
 0x351   :  { %2098 = vmatprep.subr.bf16.mxu0 %v2242_v0 }
 0x353   :  { %2115 = vmatpush3.bf16.msra.mxu1 %v2675_v5  ;;  %v2833_v5 = vld [vmem:[%s2937_s4 + $0x80] sm:$0xff]  }
 0x354   :  { %2099 = vmatpush3.bf16.msra.mxu0 %v2815_v1  ;;  %2116 = vmatprep.subr.bf16.mxu1 %v2242_v0 }
 0x355   :  { %2100 = vmatprep.subr.bf16.mxu0 %v2242_v0 }
 0x357   :  { %2117 = vmatpush3.bf16.msra.mxu1 %v2689_v7  ;;  %v1264_v7 = vsel %vm214_vm2, %v1259_v41, %v1263_v42 }
 0x358   :  { %2101 = vmatpush3.bf16.msra.mxu0 %v2824_v3  ;;  %2118 = vmatprep.subr.bf16.mxu1 %v2242_v0 }
 0x359   :  { %2102 = vmatprep.subr.bf16.mxu0 %v2242_v0 }
 0x35b   :  { %2119 = vmatpush3.bf16.msra.mxu1 %v2703_v9  ;;  %v1774_v9 = vcombine.low %v1358_v43, %v1359_v44 }
 0x35c   :  { %2103 = vmatpush3.bf16.msra.mxu0 %v2833_v5  ;;  %2120 = vmatprep.subr.bf16.mxu1 %v2242_v0 }
 0x35d   :  { %2128 = vmatprep.subr.bf16.mxu0 %v2242_v0  ;;  %v1477_v50 = vshll.u32 %v1774_v9, 16 }
 0x35f   :  { %2105 = vmatmul.mubr.bf16.vlgmr.msra.gmra.mxu0 %v1264_v7  ;;  %2121 = vmatpush3.bf16.msra.mxu1 %v2717_v13  ;;  %v1776_v13 = vcombine.low %v1359_v44, %v1359_v44  ;;  %v1479_v52 = vrot.slane %v1477_v50, 1 }
 0x360   :  { %2129 = vmatpush3.bf16.msra.mxu0 %v2656_v2  ;;  %2122 = vmatprep.subr.bf16.mxu1 %v2242_v0  ;;  %v1357_v2 = vld [vmem:[#allocation2 + $0x18] sm:$0x8] }
 0x361   :  { %2130 = vmatprep.subr.bf16.mxu0 %v2242_v0  ;;  %2144 = vmatprep.mubr.msk.bf16.mxu0 %vm2243_vm0, %v2242_v0  ;;  %v1421_v45 = vshrl.u32 %v1776_v13, 16  ;;  %v1424_v46 = vshll.u32 %v1776_v13, 16 }
 0x363   :  { %2123 = vmatpush3.bf16.msra.mxu1 %v2730_v19  ;;  %v1423_v48 = vrot.slane %v1421_v45, 3 }
 0x364   :  { %2131 = vmatpush3.bf16.msra.mxu0 %v2670_v4  ;;  %2148 = vmatprep.subr.bf16.mxu1 %v2242_v0  ;;  %v1775_v4 = vcombine.low %v1357_v2, %v1358_v43 }
 0x365   :  { %2132 = vmatprep.subr.bf16.mxu0 %v2242_v0 }
 0x366   :  { %2125 = vmatmul.mubr.bf16.vlgmr.msra.gmra.mxu1 %v1774_v9  ;;  %v1416_v19 = vshll.u32 %v1775_v4, 16 }
 0x367   :  { %2149 = vmatpush3.bf16.msra.mxu1 %v2770_v17  ;;  %2164 = vmatprep.mubr.msk.bf16.mxu1 %vm2243_vm0, %v2242_v0 }
 0x368   :  { %2133 = vmatpush3.bf16.msra.mxu0 %v2684_v6  ;;  %2150 = vmatprep.subr.bf16.mxu1 %v2242_v0  ;;  %v1413_v6 = vshrl.u32 %v1775_v4, 16  ;;  %v1418_v47 = vrot.slane %v1416_v19, 4 }
 0x369   :  { %2134 = vmatprep.subr.bf16.mxu0 %v2242_v0 }
 0x36b   :  { %2151 = vmatpush3.bf16.msra.mxu1 %v2776_v24 }
 0x36c   :  { %2135 = vmatpush3.bf16.msra.mxu0 %v2698_v8  ;;  %2152 = vmatprep.subr.bf16.mxu1 %v2242_v0  ;;  %v1415_v8 = vrot.slane %v1413_v6, 3 }
 0x36d   :  { %2136 = vmatprep.subr.bf16.mxu0 %v2242_v0 }
 0x36e   :  { %v1419_v51 = vor.u32 %v1418_v47, %v1415_v8 }
 0x36f   :  { %2153 = vmatpush3.bf16.msra.mxu1 %v2785_v32 }
 0x370   :  { %2137 = vmatpush3.bf16.msra.mxu0 %v2712_v12  ;;  %2154 = vmatprep.subr.bf16.mxu1 %v2242_v0  ;;  %v1426_v12 = vrot.slane %v1424_v46, 4 }
 0x371   :  { %2138 = vmatprep.subr.bf16.mxu0 %v2242_v0 }
 0x373   :  { %2155 = vmatpush3.bf16.msra.mxu1 %v2797_v34 }
 0x374   :  { %2139 = vmatpush3.bf16.msra.mxu0 %v2723_v16  ;;  %2156 = vmatprep.subr.bf16.mxu1 %v2242_v0  ;;  %v1427_v16 = vor.u32 %v1426_v12, %v1423_v48 }
 0x375   :  { %2140 = vmatprep.subr.bf16.mxu0 %v2242_v0 }
 0x376   :  { %v1428_v54 = vsel %vm1125_vm10, %v1419_v51, %v1427_v16 }
 0x377   :  { %2157 = vmatpush3.bf16.msra.mxu1 %v2806_v63 }
 0x378   :  { %2141 = vmatpush3.bf16.msra.mxu0 %v2737_v23  ;;  %2158 = vmatprep.subr.bf16.mxu1 %v2242_v0  ;;  %v1475_v23 = vshrl.u32 %v1774_v9, 16 }
 0x379   :  { %2142 = vmatprep.subr.bf16.mxu0 %v2242_v0 }
 0x37a   :  { %v1480_v55 = vor.u32 %v1479_v52, %v1475_v23 }
 0x37b   :  { %2159 = vmatpush3.bf16.msra.mxu1 %v2815_v1 }
 0x37c   :  { %2143 = vmatpush3.bf16.msra.mxu0 %v2747_v25  ;;  %2160 = vmatprep.subr.bf16.mxu1 %v2242_v0  ;;  %v1485_v57 = vsel %vm214_vm2, %v1480_v55, %v1484_v56 }
 0x37f   :  { %2145 = vmatmul.mubr.bf16.vlgmr.msra.gmra.mxu0 %v1428_v54  ;;  %2161 = vmatpush3.bf16.msra.mxu1 %v2824_v3 }
 0x380   :  { %2162 = vmatprep.subr.bf16.mxu1 %v2242_v0 }
 0x383   :  { %2163 = vmatpush3.bf16.msra.mxu1 %v2833_v5 }
 0x386   :  { %2165 = vmatmul.mubr.bf16.vlgmr.msra.gmra.mxu1 %v1485_v57 }
 0x3ff   :  { %v1114_v25 = vpop.f32.mrf.mxu0 }
 0x401   :  { %v2066_v60 = vpop.f32.mrf.mxu0 }
 0x403   :  { %v1117_v61 = vpop.f32.mrf.mxu0 }
 0x405   :  { %v2067_v62 = vpop.f32.mrf.mxu0 }
 0x406   :  { %v1226_v58 = vpop.f32.mrf.mxu1 }
 0x407   :  { %v1227_v59 = vadd.f32 %v1226_v58, %v1114_v25 }
 0x408   :  { %v2086_v10 = vpop.f32.mrf.mxu1 }
 0x40a   :  { %v1229_v17 = vpop.f32.mrf.mxu1 }
 0x40b   :  { %v1230_v26 = vadd.f32 %v1229_v17, %v1117_v61 }
 0x40c   :  { %v2087_v21 = vpop.f32.mrf.mxu1 }
 0x41f   :  { %v1348_v11 = vpop.f32.mrf.mxu0 }
 0x420   :  { %v2883_v28 = vadd.f32 %v1348_v11, %v1227_v59 }
 0x421   :  { %v2106_v14 = vpop.f32.mrf.mxu0 }
 0x422   :  { %v1539_v31 = vmul.f32 %v2883_v28, %v2883_v28 }
 0x423   :  { %v1351_v15 = vpop.f32.mrf.mxu0 }
 0x424   :  { %v2881_v27 = vadd.f32 %v1351_v15, %v1230_v26 }
 0x425   :  { %v2107_v0 = vpop.f32.mrf.mxu0 }
 0x426   :  { %v1401_v18 = vpop.f32.mrf.mxu1  ;;  %v1540_v29 = vmul.f32 %v2881_v27, %v2881_v27  ;;  %v1532_v32 = vadd.f32 %v2881_v27, %v2883_v28 }
 0x428   :  { %v2126_v20 = vpop.f32.mrf.mxu1  ;;  %v1541_v34 = vadd.f32 %v1540_v29, %v1539_v31  ;;  %v1533_v1 = vrot.slane %v1532_v32, 4 }
 0x42a   :  { %v1404_v22 = vpop.f32.mrf.mxu1  ;;  %v1542_v3 = vrot.slane %v1541_v34, 4  ;;  %v1534_v5 = vadd.f32 %v1533_v1, %v1532_v32 }
 0x42c   :  { %v2127_v24 = vpop.f32.mrf.mxu1  ;;  %v1543_v7 = vadd.f32 %v1542_v3, %v1541_v34  ;;  %v1535_v9 = vrot.slane %v1534_v5, 2 }
 0x42e   :  { %v1544_v45 = vrot.slane %v1543_v7, 2  ;;  %v1536_v47 = vadd.f32 %v1535_v9, %v1534_v5 }
 0x430   :  { %v1545_v49 = vadd.f32 %v1544_v45, %v1543_v7  ;;  %v1537_v50 = vrot.slane %v1536_v47, 1 }
 0x432   :  { %v1546_v53 = vrot.slane %v1545_v49, 1  ;;  %v1538_v23 = vadd.f32 %v1537_v50, %v1536_v47 }
 0x434   :  { %v1547_v25 = vadd.f32 %v1546_v53, %v1545_v49 }
 0x43f   :  { %v1464_v30 = vpop.f32.mrf.mxu0 }
 0x440   :  { %v1465_v37 = vadd.f32 %v1464_v30, %v1401_v18 }
 0x441   :  { %v2146_v33 = vpop.f32.mrf.mxu0 }
 0x443   :  { %v1467_v63 = vpop.f32.mrf.mxu0 }
 0x444   :  { %v1468_v40 = vadd.f32 %v1467_v63, %v1404_v22  ;;  %v1530_v63 = vld [vmem:[%s2938_s5 + $0x2] sm:$0x1] }
 0x445   :  { %v2147_v35 = vpop.f32.mrf.mxu0 }
 0x446   :  { %v1521_v36 = vpop.f32.mrf.mxu1 }
 0x447   :  { %v2891_v41 = vadd.f32 %v1521_v36, %v1465_v37  ;;  %v1531_v36 = vld [vmem:[%s2938_s5 + $0x3] sm:$0x1] }
 0x448   :  { %v2166_v39 = vpop.f32.mrf.mxu1 }
 0x449   :  { %v1556_v2 = vmul.f32 %v2891_v41, %v2891_v41 }
 0x44a   :  { %v1524_v42 = vpop.f32.mrf.mxu1 }
 0x44b   :  { %v2893_v43 = vadd.f32 %v1524_v42, %v1468_v40 }
 0x44c   :  { %v2167_v44 = vpop.f32.mrf.mxu1 }
 0x44d   :  { %v1548_v4 = vadd.f32 %v2893_v43, %v2891_v41  ;;  %v1557_v13 = vmul.f32 %v2893_v43, %v2893_v43 }
 0x44f   :  { %v1549_v6 = vrot.slane %v1548_v4, 4  ;;  %v1558_v19 = vadd.f32 %v1557_v13, %v1556_v2 }
 0x451   :  { %v1550_v46 = vadd.f32 %v1549_v6, %v1548_v4  ;;  %v1559_v8 = vrot.slane %v1558_v19, 4 }
 0x453   :  { %v1551_v48 = vrot.slane %v1550_v46, 2  ;;  %v1560_v12 = vadd.f32 %v1559_v8, %v1558_v19 }
 0x455   :  { %v1552_v51 = vadd.f32 %v1551_v48, %v1550_v46  ;;  %v1561_v16 = vrot.slane %v1560_v12, 2 }
 0x457   :  { %v1553_v52 = vrot.slane %v1552_v51, 1  ;;  %v1562_v54 = vadd.f32 %v1561_v16, %v1560_v12 }
 0x459   :  { %v1554_v55 = vadd.f32 %v1553_v52, %v1552_v51  ;;  %v1563_v56 = vrot.slane %v1562_v54, 1 }
 0x45b   :  { %v1555_v57 = vadd.f32 %v1554_v55, %v1538_v23  ;;  %v1564_v60 = vadd.f32 %v1563_v56, %v1562_v54 }
 0x45d   :  { %1566 = vrot.lane.b32.xlu0 %v1555_v57, %s2244_s0  ;;  %v1565_v61 = vadd.f32 %v1564_v60, %v1547_v25 }
 0x45f   :  { %1578 = vrot.lane.b32.xlu1 %v1565_v61, %s2244_s0 }
 0x4cf   :  { %v1567_v62 = vpop.permute.xlu0 %1566 }
 0x4d0   :  { %v1568_v58 = vadd.f32 %v1567_v62, %v1555_v57 }
 0x4d1   :  { %v1579_v59 = vpop.permute.xlu1 %1578 }
 0x4d2   :  { %v1580_v10 = vadd.f32 %v1579_v59, %v1565_v61  ;;  %1569 = vrot.lane.b32.xlu0 %v1568_v58, %s2245_s1 }
 0x4d4   :  { %1581 = vrot.lane.b32.xlu1 %v1580_v10, %s2245_s1 }
 0x544   :  { %v1570_v17 = vpop.permute.xlu0 %1569 }
 0x545   :  { %v1571_v21 = vadd.f32 %v1570_v17, %v1568_v58 }
 0x546   :  { %v1582_v11 = vpop.permute.xlu1 %1581 }
 0x547   :  { %v1583_v14 = vadd.f32 %v1582_v11, %v1580_v10  ;;  %1572 = vrot.lane.b32.xlu0 %v1571_v21, %s2246_s11 }
 0x549   :  { %1584 = vrot.lane.b32.xlu1 %v1583_v14, %s2246_s11 }
 0x5b9   :  { %v1573_v15 = vpop.permute.xlu0 %1572 }
 0x5ba   :  { %v1574_v0 = vadd.f32 %v1573_v15, %v1571_v21 }
 0x5bb   :  { %v1585_v18 = vpop.permute.xlu1 %1584 }
 0x5bc   :  { %v1586_v20 = vadd.f32 %v1585_v18, %v1583_v14  ;;  %1575 = vrot.lane.b32.xlu0 %v1574_v0, %s2247_s12 }
 0x5be   :  { %1587 = vrot.lane.b32.xlu1 %v1586_v20, %s2247_s12 }
 0x62e   :  { %v1576_v22 = vpop.permute.xlu0 %1575 }
 0x62f   :  { %v1577_v24 = vadd.f32 %v1576_v22, %v1574_v0 }
 0x630   :  { %v1588_v26 = vpop.permute.xlu1 %1587 }
 0x631   :  { %v1590_v29 = vmul.f32 0.001953125, %v1577_v24  ;;  %v1589_v30 = vadd.f32 %v1588_v26, %v1586_v20 }
 0x633   :  { %v1592_v31 = vmul.f32 %v1590_v29, %v1590_v29  ;;  %v1591_v32 = vmul.f32 0.001953125, %v1589_v30 }
 0x635   :  { %v1593_v33 = vsub.f32 %v1591_v32, %v1592_v31 }
 0x637   :  { %v1594_v34 = vadd.f32 1e-05, %v1593_v33 }
 0x639   :  { %2240 = vrsqrt.f32 %v1594_v34 }
 0x646   :  { %v2241_v1 = vpop.eup %2240 }
 0x647   :  { %v1596_v35 = vmul.f32 %v2241_v1, %v1530_v63 }
 0x649   :  { %v1597_v3 = vmul.f32 %v1596_v35, %v1590_v29  ;;  %v1602_v37 = vrot.slane %v1596_v35, %v2756_v38 }
 0x64b   :  { %v1598_v39 = vsub.f32 %v1531_v36, %v1597_v3  ;;  %v1603_v5 = vmul.f32 %v1602_v37, %v2883_v28  ;;  %v1604_v40 = vmul.f32 %v1602_v37, %v2881_v27  ;;  %v1615_v7 = vmul.f32 %v1602_v37, %v2891_v41 }
 0x64c   :  { %v1616_v44 = vmul.f32 %v1602_v37, %v2893_v43 }
 0x64d   :  { %v1608_v42 = vrot.slane %v1598_v39, %v2756_v38 }
 0x64f   :  { %v1609_v9 = vadd.f32 %v1608_v42, %v1603_v5  ;;  %v1610_v2 = vadd.f32 %v1608_v42, %v1604_v40  ;;  %v1617_v4 = vadd.f32 %v1615_v7, %v1608_v42  ;;  %v1618_v13 = vadd.f32 %v1616_v44, %v1608_v42 }
 0x651   :  { %v1611_v6 = vmax.f32 %v1609_v9, 0.0  ;;  %v1612_v19 = vmax.f32 %v1610_v2, 0.0  ;;  %v1619_v45 = vmax.f32 %v1617_v4, 0.0  ;;  %v1620_v46 = vmax.f32 %v1618_v13, 0.0 }
 0x653   :  { %1613 = vst [vmem:[%s2939_s6] sm:$0xff] %v1611_v6  ;;  %1614 = vst [vmem:[%s2939_s6 + $0x8] sm:$0xff] %v1612_v19 }
 0x654   :  { %1778 = vst [vmem:[%s2939_s6 + $0x10] sm:$0xff] %v1619_v45  ;;  %1779 = vst [vmem:[%s2939_s6 + $0x18] sm:$0xff] %v1620_v46 }

</bundles_post_ra>
